<compile_context>
chip_gen: v7x
topology: tpu7x:2x2x1
jax: 0.10.0
libtpu: 0.0.40
codegen_flags: <defaults>
</compile_context>

<pallas_src>
import numpy as np

import jax
import jax.numpy as jnp
from jax.experimental import pallas as pl
from jax.experimental.pallas import tpu as pltpu


def _round_up(v, m):
    return ((v + m - 1) // m) * m


# ---------------------------------------------------------------------------
# Weight preprocessing (plain JAX on the tiny parameter tensors, traced once).
# ---------------------------------------------------------------------------
def _prepare_weights(params):
    f32 = jnp.float32
    w1 = params["conv1_w"].astype(f32)[:, 0]          # (16, 5, 5)   (co, ki, kj)
    b1 = params["conv1_b"].astype(f32)                # (16,)
    w2 = params["conv2_w"].astype(f32)                # (32, 16, 5, 5)
    b2 = params["conv2_b"].astype(f32)                # (32,)

    # conv1 banded matrices A1[r, w, lane]:
    #   lane = v*256 + pw*16 + co, with v = a*2 + p encoding the 2x2 pooling
    #   window position (oh = 2*ph + a, ow = 2*pw + p).  Lanes 192..255 of each
    #   256-wide block are zero padding.
    r = np.arange(6).reshape(6, 1, 1)
    w = np.arange(28).reshape(1, 28, 1)
    lane = np.arange(1024).reshape(1, 1, 1024)
    v, rem = lane // 256, lane % 256
    a, p = v // 2, v % 2
    pw, co = rem // 16, rem % 16
    ki = r - a
    kj = w - 2 * pw - p
    valid = (rem < 192) & (ki >= 0) & (ki < 5) & (kj >= 0) & (kj < 5)
    shp = (6, 28, 1024)
    gather = w1[np.broadcast_to(co, shp),
                np.broadcast_to(np.clip(ki, 0, 4), shp),
                np.broadcast_to(np.clip(kj, 0, 4), shp)]
    A1 = jnp.where(valid, gather, 0.0).astype(f32)                      # (6, 28, 1024)
    b1t = jnp.concatenate([jnp.tile(b1, 12), jnp.zeros((64,), f32)]).reshape(1, 256)

    # conv2 banded matrices W2[par, ki, row, col]:
    #   row = pw*16 + ci (rows >= 192 are zero), col = pw2*32 + c2,
    #   ow2 = 2*pw2 + par (par = pooling parity along the conv2 width).
    ki2 = np.arange(5).reshape(5, 1, 1)
    row = np.arange(256).reshape(1, 256, 1)
    col = np.arange(64).reshape(1, 1, 64)
    pwi, ci = row // 16, row % 16
    pw2, c2 = col // 32, col % 32
    shp2 = (5, 256, 64)
    mats = []
    for par in (0, 1):
        kj2 = pwi - (4 * pw2 + 2 * par)
        valid2 = (row < 192) & (kj2 >= 0) & (kj2 < 5)
        gather2 = w2[np.broadcast_to(c2, shp2),
                     np.broadcast_to(ci, shp2),
                     np.broadcast_to(ki2, shp2),
                     np.broadcast_to(np.clip(kj2, 0, 4), shp2)]
        mats.append(jnp.where(valid2, gather2, 0.0))
    W2 = jnp.stack(mats, axis=0).astype(f32)                            # (2, 5, 256, 64)
    b2t = jnp.tile(b2, 2).reshape(1, 64)

    # fc1: split into the ph2=0 / ph2=1 halves of the flattened features and
    # permuted from torch's flatten order (c2*4 + ph2*2 + pw2) to the kernel's
    # lane order (pw2*32 + c2).
    L = np.arange(64)
    pw2l, c2l = L // 32, L % 32
    wt1 = params["fc1_w"].astype(f32)                                   # (128, 128) (out, in)
    Wf1a = wt1[:, c2l * 4 + 0 + pw2l].T                                 # (64, 128)  ph2 = 0
    Wf1b = wt1[:, c2l * 4 + 2 + pw2l].T                                 # (64, 128)  ph2 = 1
    bf1 = params["fc1_b"].astype(f32).reshape(1, 128)

    Wf2 = params["fc2_w"].astype(f32).T                                 # (128, 64)
    bf2 = params["fc2_b"].astype(f32).reshape(1, 64)
    Wf3 = params["fc3_w"].astype(f32).T                                 # (64, 32)
    bf3 = params["fc3_b"].astype(f32).reshape(1, 32)
    # fc4 output padded 10 -> 128 lanes so the only HBM store is lane-dense.
    Wf4 = jnp.zeros((32, 128), f32).at[:, :10].set(params["fc4_w"].astype(f32).T)
    bf4 = jnp.zeros((1, 128), f32).at[0, :10].set(params["fc4_b"].astype(f32))

    return (A1, W2, b1t, b2t, Wf1a, Wf1b, bf1, Wf2, bf2, Wf3, bf3, Wf4, bf4)


# ---------------------------------------------------------------------------
# The fused Pallas kernel: one batch tile per grid step, everything in VMEM.
# ---------------------------------------------------------------------------
def _digit_classifier_kernel(x_ref, a1_ref, w2_ref, b1_ref, b2_ref,
                             wf1a_ref, wf1b_ref, bf1_ref, wf2_ref, bf2_ref,
                             wf3_ref, bf3_ref, wf4_ref, bf4_ref, out_ref):
    f32 = jnp.float32

    # ---- conv1 (5x5, s=1) + ReLU + 2x2 maxpool, fused --------------------
    # h1[ph]: (TB, 256) with lanes pw*16 + co (lanes 192..255 stay zero).
    h1 = []
    for ph in range(12):
        acc = jnp.dot(x_ref[2 * ph], a1_ref[0], preferred_element_type=f32)
        for r in range(1, 6):
            acc = acc + jnp.dot(x_ref[2 * ph + r], a1_ref[r],
                                preferred_element_type=f32)
        # max over the 4 pooling-window positions (256-lane aligned slices).
        pooled = jnp.maximum(jnp.maximum(acc[:, 0:256], acc[:, 256:512]),
                             jnp.maximum(acc[:, 512:768], acc[:, 768:1024]))
        h1.append(jnp.maximum(pooled + b1_ref[...], 0.0))

    # ---- conv2 (5x5, s=2) + ReLU + 2x2 maxpool, fused ---------------------
    # m[oh2]: (TB, 64) with lanes pw2*32 + c2 (already max-pooled along width).
    m = []
    for oh2 in range(4):
        ze = jnp.dot(h1[2 * oh2], w2_ref[0, 0], preferred_element_type=f32)
        zo = jnp.dot(h1[2 * oh2], w2_ref[1, 0], preferred_element_type=f32)
        for ki in range(1, 5):
            hrow = h1[2 * oh2 + ki]
            ze = ze + jnp.dot(hrow, w2_ref[0, ki], preferred_element_type=f32)
            zo = zo + jnp.dot(hrow, w2_ref[1, ki], preferred_element_type=f32)
        m.append(jnp.maximum(ze, zo))
    h2a = jnp.maximum(jnp.maximum(m[0], m[1]) + b2_ref[...], 0.0)   # ph2 = 0
    h2b = jnp.maximum(jnp.maximum(m[2], m[3]) + b2_ref[...], 0.0)   # ph2 = 1

    # ---- fc1 .. fc4 --------------------------------------------------------
    # fc1 consumes the two flattened halves directly (no lane concat needed);
    # fc4 is zero-padded to 128 output lanes for a dense store.
    h = jnp.dot(h2a, wf1a_ref[...], preferred_element_type=f32)
    h = h + jnp.dot(h2b, wf1b_ref[...], preferred_element_type=f32)
    h = jnp.maximum(h + bf1_ref[...], 0.0)
    h = jnp.maximum(
        jnp.dot(h, wf2_ref[...], preferred_element_type=f32) + bf2_ref[...], 0.0)
    h = jnp.maximum(
        jnp.dot(h, wf3_ref[...], preferred_element_type=f32) + bf3_ref[...], 0.0)
    out = jnp.dot(h, wf4_ref[...], preferred_element_type=f32) + bf4_ref[...]
    out_ref[...] = out.astype(out_ref.dtype)


# ---------------------------------------------------------------------------
# Forward wrapper.
# ---------------------------------------------------------------------------
def digit_classifier_forward(params, x, *, batch_tile=128):
    """x: (N, 1, 28, 28) float32 NCHW (like the PyTorch module). Returns (N, 10)."""
    if x.ndim != 4 or x.shape[1] != 1 or x.shape[2] != 28 or x.shape[3] != 28:
        raise ValueError(f"expected (N, 1, 28, 28) input, got {x.shape}")
    n = x.shape[0]
    batch_tile = _round_up(batch_tile, 8)
    tb = min(batch_tile, _round_up(n, 8))
    n_pad = _round_up(n, tb)

    # Single layout change at the model input: NCHW -> (H, N, W), so the kernel
    # can read whole image rows with the batch on sublanes.
    xs = jnp.transpose(x[:, 0, :, :].astype(jnp.float32), (1, 0, 2))   # (28, N, 28)
    if n_pad != n:
        xs = jnp.pad(xs, ((0, 0), (0, n_pad - n), (0, 0)))

    weights = _prepare_weights(params)

    def _resident(arr):
        nd = arr.ndim
        return pl.BlockSpec(arr.shape, lambda i, _nd=nd: (0,) * _nd)

    grid = (n_pad // tb,)
    out_pad = pl.pallas_call(
        _digit_classifier_kernel,
        out_shape=jax.ShapeDtypeStruct((n_pad, 128), jnp.float32),
        grid_spec=pltpu.PrefetchScalarGridSpec(
            num_scalar_prefetch=0,
            grid=grid,
            in_specs=[pl.BlockSpec((28, tb, 28), lambda i: (0, i, 0))]
                     + [_resident(wgt) for wgt in weights],
            out_specs=pl.BlockSpec((tb, 128), lambda i: (i, 0)),
        ),
        compiler_params=pltpu.CompilerParams(
            dimension_semantics=("parallel",),
        ),
    )(xs, *weights)
    return out_pad[:n, :10]


# ---------------------------------------------------------------------------
# Pure-JAX/XLA reference (exact PyTorch forward semantics) for self-checking.
# ---------------------------------------------------------------------------
def reference_forward(params, x):
    hp = jax.lax.Precision.HIGHEST
    y = jax.lax.conv_general_dilated(
        x.astype(jnp.float32), params["conv1_w"], (1, 1), "VALID",
        dimension_numbers=("NCHW", "OIHW", "NCHW"), precision=hp)
    y = jnp.maximum(y + params["conv1_b"][None, :, None, None], 0.0)
    y = jax.lax.reduce_window(y, -jnp.inf, jax.lax.max,
                              (1, 1, 2, 2), (1, 1, 2, 2), "VALID")
    y = jax.lax.conv_general_dilated(
        y, params["conv2_w"], (2, 2), "VALID",
        dimension_numbers=("NCHW", "OIHW", "NCHW"), precision=hp)
    y = jnp.maximum(y + params["conv2_b"][None, :, None, None], 0.0)
    y = jax.lax.reduce_window(y, -jnp.inf, jax.lax.max,
                              (1, 1, 2, 2), (1, 1, 2, 2), "VALID")
    y = y.reshape(y.shape[0], -1)
    y = jnp.maximum(jnp.dot(y, params["fc1_w"].T, precision=hp) + params["fc1_b"], 0.0)
    y = jnp.maximum(jnp.dot(y, params["fc2_w"].T, precision=hp) + params["fc2_b"], 0.0)
    y = jnp.maximum(jnp.dot(y, params["fc3_w"].T, precision=hp) + params["fc3_b"], 0.0)
    return jnp.dot(y, params["fc4_w"].T, precision=hp) + params["fc4_b"]


# ---------------------------------------------------------------------------
# Parameters (stored in PyTorch layout: conv (Cout,Cin,K,K), fc (out,in)).
# ---------------------------------------------------------------------------
def init_params(key):
    def uniform(k, shape, fan_in):
        bound = 1.0 / float(np.sqrt(fan_in))
        return jax.random.uniform(k, shape, jnp.float32, -bound, bound)

    ks = jax.random.split(key, 12)
    return {
        "conv1_w": uniform(ks[0], (16, 1, 5, 5), 25),
        "conv1_b": uniform(ks[1], (16,), 25),
        "conv2_w": uniform(ks[2], (32, 16, 5, 5), 16 * 25),
        "conv2_b": uniform(ks[3], (32,), 16 * 25),
        "fc1_w": uniform(ks[4], (128, 128), 128),
        "fc1_b": uniform(ks[5], (128,), 128),
        "fc2_w": uniform(ks[6], (64, 128), 128),
        "fc2_b": uniform(ks[7], (64,), 128),
        "fc3_w": uniform(ks[8], (32, 64), 64),
        "fc3_b": uniform(ks[9], (32,), 64),
        "fc4_w": uniform(ks[10], (10, 32), 32),
        "fc4_b": uniform(ks[11], (10,), 32),
    }


if __name__ == "__main__":
    key = jax.random.PRNGKey(0)
    kp, kx = jax.random.split(key)
    params = init_params(kp)
    # Smallest input consistent with the module (fc1 expects 32*2*2 features): 28x28.
    x = jax.random.normal(kx, (2, 1, 28, 28), dtype=jnp.float32)

    fwd = jax.jit(digit_classifier_forward)
    out = jax.block_until_ready(fwd(params, x))
    assert out.shape == (2, 10) and out.dtype == jnp.float32

    ref = jax.block_until_ready(jax.jit(reference_forward)(params, x))
    err = float(jnp.max(jnp.abs(out - ref)))
    assert err < 1e-2, f"mismatch vs reference: max abs err = {err}"

    print("KERNEL_OK")
</pallas_src>

<mosaic_0001>
module attributes {stable_mosaic.version = 11 : i64} {
  func.func @_digit_classifier_kernel(%arg0: i32, %arg1: memref<28x8x28xf32, #tpu.memory_space<vmem>>, %arg2: memref<6x28x1024xf32, #tpu.memory_space<vmem>>, %arg3: memref<2x5x256x64xf32, #tpu.memory_space<vmem>>, %arg4: memref<1x256xf32, #tpu.memory_space<vmem>>, %arg5: memref<1x64xf32, #tpu.memory_space<vmem>>, %arg6: memref<64x128xf32, #tpu.memory_space<vmem>>, %arg7: memref<64x128xf32, #tpu.memory_space<vmem>>, %arg8: memref<1x128xf32, #tpu.memory_space<vmem>>, %arg9: memref<128x64xf32, #tpu.memory_space<vmem>>, %arg10: memref<1x64xf32, #tpu.memory_space<vmem>>, %arg11: memref<64x32xf32, #tpu.memory_space<vmem>>, %arg12: memref<1x32xf32, #tpu.memory_space<vmem>>, %arg13: memref<32x128xf32, #tpu.memory_space<vmem>>, %arg14: memref<1x128xf32, #tpu.memory_space<vmem>>, %arg15: memref<8x128xf32, #tpu.memory_space<vmem>>) attributes {dimension_semantics = [#tpu.dimension_semantics<parallel>], iteration_bounds = array<i64: 1>, scalar_prefetch = 0 : i64, scratch_operands = 0 : i64, tpu.core_type = #tpu.core_type<tc>, window_params = [{transform_indices = @transform_0, window_bounds = array<i64: 28, 8, 28>}, {pipeline_mode = #tpu.pipeline_mode<synchronous>, transform_indices = @transform_1, window_bounds = array<i64: 6, 28, 1024>}, {pipeline_mode = #tpu.pipeline_mode<synchronous>, transform_indices = @transform_2, window_bounds = array<i64: 2, 5, 256, 64>}, {pipeline_mode = #tpu.pipeline_mode<synchronous>, transform_indices = @transform_3, window_bounds = array<i64: 1, 256>}, {pipeline_mode = #tpu.pipeline_mode<synchronous>, transform_indices = @transform_4, window_bounds = array<i64: 1, 64>}, {pipeline_mode = #tpu.pipeline_mode<synchronous>, transform_indices = @transform_5, window_bounds = array<i64: 64, 128>}, {pipeline_mode = #tpu.pipeline_mode<synchronous>, transform_indices = @transform_6, window_bounds = array<i64: 64, 128>}, {pipeline_mode = #tpu.pipeline_mode<synchronous>, transform_indices = @transform_7, window_bounds = array<i64: 1, 128>}, {pipeline_mode = #tpu.pipeline_mode<synchronous>, transform_indices = @transform_8, window_bounds = array<i64: 128, 64>}, {pipeline_mode = #tpu.pipeline_mode<synchronous>, transform_indices = @transform_9, window_bounds = array<i64: 1, 64>}, {pipeline_mode = #tpu.pipeline_mode<synchronous>, transform_indices = @transform_10, window_bounds = array<i64: 64, 32>}, {pipeline_mode = #tpu.pipeline_mode<synchronous>, transform_indices = @transform_11, window_bounds = array<i64: 1, 32>}, {pipeline_mode = #tpu.pipeline_mode<synchronous>, transform_indices = @transform_12, window_bounds = array<i64: 32, 128>}, {pipeline_mode = #tpu.pipeline_mode<synchronous>, transform_indices = @transform_13, window_bounds = array<i64: 1, 128>}, {transform_indices = @transform_14, window_bounds = array<i64: 8, 128>}]} {
    %c0 = arith.constant 0 : index
    %c0_0 = arith.constant 0 : index
    %c0_1 = arith.constant 0 : index
    %0 = vector.load %arg1[%c0, %c0_0, %c0_1] : memref<28x8x28xf32, #tpu.memory_space<vmem>>, vector<1x8x28xf32>
    %1 = vector.shape_cast %0 : vector<1x8x28xf32> to vector<8x28xf32>
    %c0_2 = arith.constant 0 : index
    %c0_3 = arith.constant 0 : index
    %c0_4 = arith.constant 0 : index
    %2 = vector.load %arg2[%c0_2, %c0_3, %c0_4] : memref<6x28x1024xf32, #tpu.memory_space<vmem>>, vector<1x28x1024xf32>
    %3 = vector.shape_cast %2 : vector<1x28x1024xf32> to vector<28x1024xf32>
    %cst = arith.constant dense<0.000000e+00> : vector<8x1024xf32>
    %4 = tpu.matmul %1, %3, %cst {dimension_numbers = #tpu.dot_dimension_numbers<[1], [0], [0], [1], [0, 0, 1, 1], [], []>} : vector<8x28xf32>, vector<28x1024xf32>, vector<8x1024xf32> -> vector<8x1024xf32>
    %c1 = arith.constant 1 : index
    %c0_5 = arith.constant 0 : index
    %c0_6 = arith.constant 0 : index
    %5 = vector.load %arg1[%c1, %c0_5, %c0_6] : memref<28x8x28xf32, #tpu.memory_space<vmem>>, vector<1x8x28xf32>
    %6 = vector.shape_cast %5 : vector<1x8x28xf32> to vector<8x28xf32>
    %c1_7 = arith.constant 1 : index
    %c0_8 = arith.constant 0 : index
    %c0_9 = arith.constant 0 : index
    %7 = vector.load %arg2[%c1_7, %c0_8, %c0_9] : memref<6x28x1024xf32, #tpu.memory_space<vmem>>, vector<1x28x1024xf32>
    %8 = vector.shape_cast %7 : vector<1x28x1024xf32> to vector<28x1024xf32>
    %cst_10 = arith.constant dense<0.000000e+00> : vector<8x1024xf32>
    %9 = tpu.matmul %6, %8, %cst_10 {dimension_numbers = #tpu.dot_dimension_numbers<[1], [0], [0], [1], [0, 0, 1, 1], [], []>} : vector<8x28xf32>, vector<28x1024xf32>, vector<8x1024xf32> -> vector<8x1024xf32>
    %10 = arith.addf %4, %9 : vector<8x1024xf32>
    %c2 = arith.constant 2 : index
    %c0_11 = arith.constant 0 : index
    %c0_12 = arith.constant 0 : index
    %11 = vector.load %arg1[%c2, %c0_11, %c0_12] : memref<28x8x28xf32, #tpu.memory_space<vmem>>, vector<1x8x28xf32>
    %12 = vector.shape_cast %11 : vector<1x8x28xf32> to vector<8x28xf32>
    %c2_13 = arith.constant 2 : index
    %c0_14 = arith.constant 0 : index
    %c0_15 = arith.constant 0 : index
    %13 = vector.load %arg2[%c2_13, %c0_14, %c0_15] : memref<6x28x1024xf32, #tpu.memory_space<vmem>>, vector<1x28x1024xf32>
    %14 = vector.shape_cast %13 : vector<1x28x1024xf32> to vector<28x1024xf32>
    %cst_16 = arith.constant dense<0.000000e+00> : vector<8x1024xf32>
    %15 = tpu.matmul %12, %14, %cst_16 {dimension_numbers = #tpu.dot_dimension_numbers<[1], [0], [0], [1], [0, 0, 1, 1], [], []>} : vector<8x28xf32>, vector<28x1024xf32>, vector<8x1024xf32> -> vector<8x1024xf32>
    %16 = arith.addf %10, %15 : vector<8x1024xf32>
    %c3 = arith.constant 3 : index
    %c0_17 = arith.constant 0 : index
    %c0_18 = arith.constant 0 : index
    %17 = vector.load %arg1[%c3, %c0_17, %c0_18] : memref<28x8x28xf32, #tpu.memory_space<vmem>>, vector<1x8x28xf32>
    %18 = vector.shape_cast %17 : vector<1x8x28xf32> to vector<8x28xf32>
    %c3_19 = arith.constant 3 : index
    %c0_20 = arith.constant 0 : index
    %c0_21 = arith.constant 0 : index
    %19 = vector.load %arg2[%c3_19, %c0_20, %c0_21] : memref<6x28x1024xf32, #tpu.memory_space<vmem>>, vector<1x28x1024xf32>
    %20 = vector.shape_cast %19 : vector<1x28x1024xf32> to vector<28x1024xf32>
    %cst_22 = arith.constant dense<0.000000e+00> : vector<8x1024xf32>
    %21 = tpu.matmul %18, %20, %cst_22 {dimension_numbers = #tpu.dot_dimension_numbers<[1], [0], [0], [1], [0, 0, 1, 1], [], []>} : vector<8x28xf32>, vector<28x1024xf32>, vector<8x1024xf32> -> vector<8x1024xf32>
    %22 = arith.addf %16, %21 : vector<8x1024xf32>
    %c4 = arith.constant 4 : index
    %c0_23 = arith.constant 0 : index
    %c0_24 = arith.constant 0 : index
    %23 = vector.load %arg1[%c4, %c0_23, %c0_24] : memref<28x8x28xf32, #tpu.memory_space<vmem>>, vector<1x8x28xf32>
    %24 = vector.shape_cast %23 : vector<1x8x28xf32> to vector<8x28xf32>
    %c4_25 = arith.constant 4 : index
    %c0_26 = arith.constant 0 : index
    %c0_27 = arith.constant 0 : index
    %25 = vector.load %arg2[%c4_25, %c0_26, %c0_27] : memref<6x28x1024xf32, #tpu.memory_space<vmem>>, vector<1x28x1024xf32>
    %26 = vector.shape_cast %25 : vector<1x28x1024xf32> to vector<28x1024xf32>
    %cst_28 = arith.constant dense<0.000000e+00> : vector<8x1024xf32>
    %27 = tpu.matmul %24, %26, %cst_28 {dimension_numbers = #tpu.dot_dimension_numbers<[1], [0], [0], [1], [0, 0, 1, 1], [], []>} : vector<8x28xf32>, vector<28x1024xf32>, vector<8x1024xf32> -> vector<8x1024xf32>
    %28 = arith.addf %22, %27 : vector<8x1024xf32>
    %c5 = arith.constant 5 : index
    %c0_29 = arith.constant 0 : index
    %c0_30 = arith.constant 0 : index
    %29 = vector.load %arg1[%c5, %c0_29, %c0_30] : memref<28x8x28xf32, #tpu.memory_space<vmem>>, vector<1x8x28xf32>
    %30 = vector.shape_cast %29 : vector<1x8x28xf32> to vector<8x28xf32>
    %c5_31 = arith.constant 5 : index
    %c0_32 = arith.constant 0 : index
    %c0_33 = arith.constant 0 : index
    %31 = vector.load %arg2[%c5_31, %c0_32, %c0_33] : memref<6x28x1024xf32, #tpu.memory_space<vmem>>, vector<1x28x1024xf32>
    %32 = vector.shape_cast %31 : vector<1x28x1024xf32> to vector<28x1024xf32>
    %cst_34 = arith.constant dense<0.000000e+00> : vector<8x1024xf32>
    %33 = tpu.matmul %30, %32, %cst_34 {dimension_numbers = #tpu.dot_dimension_numbers<[1], [0], [0], [1], [0, 0, 1, 1], [], []>} : vector<8x28xf32>, vector<28x1024xf32>, vector<8x1024xf32> -> vector<8x1024xf32>
    %34 = arith.addf %28, %33 : vector<8x1024xf32>
    %35 = vector.extract_strided_slice %34 {offsets = [0, 0], sizes = [8, 256], strides = [1, 1]} : vector<8x1024xf32> to vector<8x256xf32>
    %36 = vector.extract_strided_slice %34 {offsets = [0, 256], sizes = [8, 256], strides = [1, 1]} : vector<8x1024xf32> to vector<8x256xf32>
    %37 = arith.maximumf %35, %36 : vector<8x256xf32>
    %38 = vector.extract_strided_slice %34 {offsets = [0, 512], sizes = [8, 256], strides = [1, 1]} : vector<8x1024xf32> to vector<8x256xf32>
    %39 = vector.extract_strided_slice %34 {offsets = [0, 768], sizes = [8, 256], strides = [1, 1]} : vector<8x1024xf32> to vector<8x256xf32>
    %40 = arith.maximumf %38, %39 : vector<8x256xf32>
    %41 = arith.maximumf %37, %40 : vector<8x256xf32>
    %c0_35 = arith.constant 0 : index
    %c0_36 = arith.constant 0 : index
    %42 = vector.load %arg4[%c0_35, %c0_36] : memref<1x256xf32, #tpu.memory_space<vmem>>, vector<1x256xf32>
    %43 = vector.broadcast %42 : vector<1x256xf32> to vector<8x256xf32>
    %44 = arith.addf %41, %43 : vector<8x256xf32>
    %cst_37 = arith.constant 0.000000e+00 : f32
    %45 = vector.broadcast %cst_37 : f32 to vector<8x256xf32>
    %46 = arith.maximumf %44, %45 : vector<8x256xf32>
    %c2_38 = arith.constant 2 : index
    %c0_39 = arith.constant 0 : index
    %c0_40 = arith.constant 0 : index
    %47 = vector.load %arg1[%c2_38, %c0_39, %c0_40] : memref<28x8x28xf32, #tpu.memory_space<vmem>>, vector<1x8x28xf32>
    %48 = vector.shape_cast %47 : vector<1x8x28xf32> to vector<8x28xf32>
    %c0_41 = arith.constant 0 : index
    %c0_42 = arith.constant 0 : index
    %c0_43 = arith.constant 0 : index
    %49 = vector.load %arg2[%c0_41, %c0_42, %c0_43] : memref<6x28x1024xf32, #tpu.memory_space<vmem>>, vector<1x28x1024xf32>
    %50 = vector.shape_cast %49 : vector<1x28x1024xf32> to vector<28x1024xf32>
    %cst_44 = arith.constant dense<0.000000e+00> : vector<8x1024xf32>
    %51 = tpu.matmul %48, %50, %cst_44 {dimension_numbers = #tpu.dot_dimension_numbers<[1], [0], [0], [1], [0, 0, 1, 1], [], []>} : vector<8x28xf32>, vector<28x1024xf32>, vector<8x1024xf32> -> vector<8x1024xf32>
    %c3_45 = arith.constant 3 : index
    %c0_46 = arith.constant 0 : index
    %c0_47 = arith.constant 0 : index
    %52 = vector.load %arg1[%c3_45, %c0_46, %c0_47] : memref<28x8x28xf32, #tpu.memory_space<vmem>>, vector<1x8x28xf32>
    %53 = vector.shape_cast %52 : vector<1x8x28xf32> to vector<8x28xf32>
    %c1_48 = arith.constant 1 : index
    %c0_49 = arith.constant 0 : index
    %c0_50 = arith.constant 0 : index
    %54 = vector.load %arg2[%c1_48, %c0_49, %c0_50] : memref<6x28x1024xf32, #tpu.memory_space<vmem>>, vector<1x28x1024xf32>
    %55 = vector.shape_cast %54 : vector<1x28x1024xf32> to vector<28x1024xf32>
    %cst_51 = arith.constant dense<0.000000e+00> : vector<8x1024xf32>
    %56 = tpu.matmul %53, %55, %cst_51 {dimension_numbers = #tpu.dot_dimension_numbers<[1], [0], [0], [1], [0, 0, 1, 1], [], []>} : vector<8x28xf32>, vector<28x1024xf32>, vector<8x1024xf32> -> vector<8x1024xf32>
    %57 = arith.addf %51, %56 : vector<8x1024xf32>
    %c4_52 = arith.constant 4 : index
    %c0_53 = arith.constant 0 : index
    %c0_54 = arith.constant 0 : index
    %58 = vector.load %arg1[%c4_52, %c0_53, %c0_54] : memref<28x8x28xf32, #tpu.memory_space<vmem>>, vector<1x8x28xf32>
    %59 = vector.shape_cast %58 : vector<1x8x28xf32> to vector<8x28xf32>
    %c2_55 = arith.constant 2 : index
    %c0_56 = arith.constant 0 : index
    %c0_57 = arith.constant 0 : index
    %60 = vector.load %arg2[%c2_55, %c0_56, %c0_57] : memref<6x28x1024xf32, #tpu.memory_space<vmem>>, vector<1x28x1024xf32>
    %61 = vector.shape_cast %60 : vector<1x28x1024xf32> to vector<28x1024xf32>
    %cst_58 = arith.constant dense<0.000000e+00> : vector<8x1024xf32>
    %62 = tpu.matmul %59, %61, %cst_58 {dimension_numbers = #tpu.dot_dimension_numbers<[1], [0], [0], [1], [0, 0, 1, 1], [], []>} : vector<8x28xf32>, vector<28x1024xf32>, vector<8x1024xf32> -> vector<8x1024xf32>
    %63 = arith.addf %57, %62 : vector<8x1024xf32>
    %c5_59 = arith.constant 5 : index
    %c0_60 = arith.constant 0 : index
    %c0_61 = arith.constant 0 : index
    %64 = vector.load %arg1[%c5_59, %c0_60, %c0_61] : memref<28x8x28xf32, #tpu.memory_space<vmem>>, vector<1x8x28xf32>
    %65 = vector.shape_cast %64 : vector<1x8x28xf32> to vector<8x28xf32>
    %c3_62 = arith.constant 3 : index
    %c0_63 = arith.constant 0 : index
    %c0_64 = arith.constant 0 : index
    %66 = vector.load %arg2[%c3_62, %c0_63, %c0_64] : memref<6x28x1024xf32, #tpu.memory_space<vmem>>, vector<1x28x1024xf32>
    %67 = vector.shape_cast %66 : vector<1x28x1024xf32> to vector<28x1024xf32>
    %cst_65 = arith.constant dense<0.000000e+00> : vector<8x1024xf32>
    %68 = tpu.matmul %65, %67, %cst_65 {dimension_numbers = #tpu.dot_dimension_numbers<[1], [0], [0], [1], [0, 0, 1, 1], [], []>} : vector<8x28xf32>, vector<28x1024xf32>, vector<8x1024xf32> -> vector<8x1024xf32>
    %69 = arith.addf %63, %68 : vector<8x1024xf32>
    %c6 = arith.constant 6 : index
    %c0_66 = arith.constant 0 : index
    %c0_67 = arith.constant 0 : index
    %70 = vector.load %arg1[%c6, %c0_66, %c0_67] : memref<28x8x28xf32, #tpu.memory_space<vmem>>, vector<1x8x28xf32>
    %71 = vector.shape_cast %70 : vector<1x8x28xf32> to vector<8x28xf32>
    %c4_68 = arith.constant 4 : index
    %c0_69 = arith.constant 0 : index
    %c0_70 = arith.constant 0 : index
    %72 = vector.load %arg2[%c4_68, %c0_69, %c0_70] : memref<6x28x1024xf32, #tpu.memory_space<vmem>>, vector<1x28x1024xf32>
    %73 = vector.shape_cast %72 : vector<1x28x1024xf32> to vector<28x1024xf32>
    %cst_71 = arith.constant dense<0.000000e+00> : vector<8x1024xf32>
    %74 = tpu.matmul %71, %73, %cst_71 {dimension_numbers = #tpu.dot_dimension_numbers<[1], [0], [0], [1], [0, 0, 1, 1], [], []>} : vector<8x28xf32>, vector<28x1024xf32>, vector<8x1024xf32> -> vector<8x1024xf32>
    %75 = arith.addf %69, %74 : vector<8x1024xf32>
    %c7 = arith.constant 7 : index
    %c0_72 = arith.constant 0 : index
    %c0_73 = arith.constant 0 : index
    %76 = vector.load %arg1[%c7, %c0_72, %c0_73] : memref<28x8x28xf32, #tpu.memory_space<vmem>>, vector<1x8x28xf32>
    %77 = vector.shape_cast %76 : vector<1x8x28xf32> to vector<8x28xf32>
    %c5_74 = arith.constant 5 : index
    %c0_75 = arith.constant 0 : index
    %c0_76 = arith.constant 0 : index
    %78 = vector.load %arg2[%c5_74, %c0_75, %c0_76] : memref<6x28x1024xf32, #tpu.memory_space<vmem>>, vector<1x28x1024xf32>
    %79 = vector.shape_cast %78 : vector<1x28x1024xf32> to vector<28x1024xf32>
    %cst_77 = arith.constant dense<0.000000e+00> : vector<8x1024xf32>
    %80 = tpu.matmul %77, %79, %cst_77 {dimension_numbers = #tpu.dot_dimension_numbers<[1], [0], [0], [1], [0, 0, 1, 1], [], []>} : vector<8x28xf32>, vector<28x1024xf32>, vector<8x1024xf32> -> vector<8x1024xf32>
    %81 = arith.addf %75, %80 : vector<8x1024xf32>
    %82 = vector.extract_strided_slice %81 {offsets = [0, 0], sizes = [8, 256], strides = [1, 1]} : vector<8x1024xf32> to vector<8x256xf32>
    %83 = vector.extract_strided_slice %81 {offsets = [0, 256], sizes = [8, 256], strides = [1, 1]} : vector<8x1024xf32> to vector<8x256xf32>
    %84 = arith.maximumf %82, %83 : vector<8x256xf32>
    %85 = vector.extract_strided_slice %81 {offsets = [0, 512], sizes = [8, 256], strides = [1, 1]} : vector<8x1024xf32> to vector<8x256xf32>
    %86 = vector.extract_strided_slice %81 {offsets = [0, 768], sizes = [8, 256], strides = [1, 1]} : vector<8x1024xf32> to vector<8x256xf32>
    %87 = arith.maximumf %85, %86 : vector<8x256xf32>
    %88 = arith.maximumf %84, %87 : vector<8x256xf32>
    %c0_78 = arith.constant 0 : index
    %c0_79 = arith.constant 0 : index
    %89 = vector.load %arg4[%c0_78, %c0_79] : memref<1x256xf32, #tpu.memory_space<vmem>>, vector<1x256xf32>
    %90 = vector.broadcast %89 : vector<1x256xf32> to vector<8x256xf32>
    %91 = arith.addf %88, %90 : vector<8x256xf32>
    %cst_80 = arith.constant 0.000000e+00 : f32
    %92 = vector.broadcast %cst_80 : f32 to vector<8x256xf32>
    %93 = arith.maximumf %91, %92 : vector<8x256xf32>
    %c4_81 = arith.constant 4 : index
    %c0_82 = arith.constant 0 : index
    %c0_83 = arith.constant 0 : index
    %94 = vector.load %arg1[%c4_81, %c0_82, %c0_83] : memref<28x8x28xf32, #tpu.memory_space<vmem>>, vector<1x8x28xf32>
    %95 = vector.shape_cast %94 : vector<1x8x28xf32> to vector<8x28xf32>
    %c0_84 = arith.constant 0 : index
    %c0_85 = arith.constant 0 : index
    %c0_86 = arith.constant 0 : index
    %96 = vector.load %arg2[%c0_84, %c0_85, %c0_86] : memref<6x28x1024xf32, #tpu.memory_space<vmem>>, vector<1x28x1024xf32>
    %97 = vector.shape_cast %96 : vector<1x28x1024xf32> to vector<28x1024xf32>
    %cst_87 = arith.constant dense<0.000000e+00> : vector<8x1024xf32>
    %98 = tpu.matmul %95, %97, %cst_87 {dimension_numbers = #tpu.dot_dimension_numbers<[1], [0], [0], [1], [0, 0, 1, 1], [], []>} : vector<8x28xf32>, vector<28x1024xf32>, vector<8x1024xf32> -> vector<8x1024xf32>
    %c5_88 = arith.constant 5 : index
    %c0_89 = arith.constant 0 : index
    %c0_90 = arith.constant 0 : index
    %99 = vector.load %arg1[%c5_88, %c0_89, %c0_90] : memref<28x8x28xf32, #tpu.memory_space<vmem>>, vector<1x8x28xf32>
    %100 = vector.shape_cast %99 : vector<1x8x28xf32> to vector<8x28xf32>
    %c1_91 = arith.constant 1 : index
    %c0_92 = arith.constant 0 : index
    %c0_93 = arith.constant 0 : index
    %101 = vector.load %arg2[%c1_91, %c0_92, %c0_93] : memref<6x28x1024xf32, #tpu.memory_space<vmem>>, vector<1x28x1024xf32>
    %102 = vector.shape_cast %101 : vector<1x28x1024xf32> to vector<28x1024xf32>
    %cst_94 = arith.constant dense<0.000000e+00> : vector<8x1024xf32>
    %103 = tpu.matmul %100, %102, %cst_94 {dimension_numbers = #tpu.dot_dimension_numbers<[1], [0], [0], [1], [0, 0, 1, 1], [], []>} : vector<8x28xf32>, vector<28x1024xf32>, vector<8x1024xf32> -> vector<8x1024xf32>
    %104 = arith.addf %98, %103 : vector<8x1024xf32>
    %c6_95 = arith.constant 6 : index
    %c0_96 = arith.constant 0 : index
    %c0_97 = arith.constant 0 : index
    %105 = vector.load %arg1[%c6_95, %c0_96, %c0_97] : memref<28x8x28xf32, #tpu.memory_space<vmem>>, vector<1x8x28xf32>
    %106 = vector.shape_cast %105 : vector<1x8x28xf32> to vector<8x28xf32>
    %c2_98 = arith.constant 2 : index
    %c0_99 = arith.constant 0 : index
    %c0_100 = arith.constant 0 : index
    %107 = vector.load %arg2[%c2_98, %c0_99, %c0_100] : memref<6x28x1024xf32, #tpu.memory_space<vmem>>, vector<1x28x1024xf32>
    %108 = vector.shape_cast %107 : vector<1x28x1024xf32> to vector<28x1024xf32>
    %cst_101 = arith.constant dense<0.000000e+00> : vector<8x1024xf32>
    %109 = tpu.matmul %106, %108, %cst_101 {dimension_numbers = #tpu.dot_dimension_numbers<[1], [0], [0], [1], [0, 0, 1, 1], [], []>} : vector<8x28xf32>, vector<28x1024xf32>, vector<8x1024xf32> -> vector<8x1024xf32>
    %110 = arith.addf %104, %109 : vector<8x1024xf32>
    %c7_102 = arith.constant 7 : index
    %c0_103 = arith.constant 0 : index
    %c0_104 = arith.constant 0 : index
    %111 = vector.load %arg1[%c7_102, %c0_103, %c0_104] : memref<28x8x28xf32, #tpu.memory_space<vmem>>, vector<1x8x28xf32>
    %112 = vector.shape_cast %111 : vector<1x8x28xf32> to vector<8x28xf32>
    %c3_105 = arith.constant 3 : index
    %c0_106 = arith.constant 0 : index
    %c0_107 = arith.constant 0 : index
    %113 = vector.load %arg2[%c3_105, %c0_106, %c0_107] : memref<6x28x1024xf32, #tpu.memory_space<vmem>>, vector<1x28x1024xf32>
    %114 = vector.shape_cast %113 : vector<1x28x1024xf32> to vector<28x1024xf32>
    %cst_108 = arith.constant dense<0.000000e+00> : vector<8x1024xf32>
    %115 = tpu.matmul %112, %114, %cst_108 {dimension_numbers = #tpu.dot_dimension_numbers<[1], [0], [0], [1], [0, 0, 1, 1], [], []>} : vector<8x28xf32>, vector<28x1024xf32>, vector<8x1024xf32> -> vector<8x1024xf32>
    %116 = arith.addf %110, %115 : vector<8x1024xf32>
    %c8 = arith.constant 8 : index
    %c0_109 = arith.constant 0 : index
    %c0_110 = arith.constant 0 : index
    %117 = vector.load %arg1[%c8, %c0_109, %c0_110] : memref<28x8x28xf32, #tpu.memory_space<vmem>>, vector<1x8x28xf32>
    %118 = vector.shape_cast %117 : vector<1x8x28xf32> to vector<8x28xf32>
    %c4_111 = arith.constant 4 : index
    %c0_112 = arith.constant 0 : index
    %c0_113 = arith.constant 0 : index
    %119 = vector.load %arg2[%c4_111, %c0_112, %c0_113] : memref<6x28x1024xf32, #tpu.memory_space<vmem>>, vector<1x28x1024xf32>
    %120 = vector.shape_cast %119 : vector<1x28x1024xf32> to vector<28x1024xf32>
    %cst_114 = arith.constant dense<0.000000e+00> : vector<8x1024xf32>
    %121 = tpu.matmul %118, %120, %cst_114 {dimension_numbers = #tpu.dot_dimension_numbers<[1], [0], [0], [1], [0, 0, 1, 1], [], []>} : vector<8x28xf32>, vector<28x1024xf32>, vector<8x1024xf32> -> vector<8x1024xf32>
    %122 = arith.addf %116, %121 : vector<8x1024xf32>
    %c9 = arith.constant 9 : index
    %c0_115 = arith.constant 0 : index
    %c0_116 = arith.constant 0 : index
    %123 = vector.load %arg1[%c9, %c0_115, %c0_116] : memref<28x8x28xf32, #tpu.memory_space<vmem>>, vector<1x8x28xf32>
    %124 = vector.shape_cast %123 : vector<1x8x28xf32> to vector<8x28xf32>
    %c5_117 = arith.constant 5 : index
    %c0_118 = arith.constant 0 : index
    %c0_119 = arith.constant 0 : index
    %125 = vector.load %arg2[%c5_117, %c0_118, %c0_119] : memref<6x28x1024xf32, #tpu.memory_space<vmem>>, vector<1x28x1024xf32>
    %126 = vector.shape_cast %125 : vector<1x28x1024xf32> to vector<28x1024xf32>
    %cst_120 = arith.constant dense<0.000000e+00> : vector<8x1024xf32>
    %127 = tpu.matmul %124, %126, %cst_120 {dimension_numbers = #tpu.dot_dimension_numbers<[1], [0], [0], [1], [0, 0, 1, 1], [], []>} : vector<8x28xf32>, vector<28x1024xf32>, vector<8x1024xf32> -> vector<8x1024xf32>
    %128 = arith.addf %122, %127 : vector<8x1024xf32>
    %129 = vector.extract_strided_slice %128 {offsets = [0, 0], sizes = [8, 256], strides = [1, 1]} : vector<8x1024xf32> to vector<8x256xf32>
    %130 = vector.extract_strided_slice %128 {offsets = [0, 256], sizes = [8, 256], strides = [1, 1]} : vector<8x1024xf32> to vector<8x256xf32>
    %131 = arith.maximumf %129, %130 : vector<8x256xf32>
    %132 = vector.extract_strided_slice %128 {offsets = [0, 512], sizes = [8, 256], strides = [1, 1]} : vector<8x1024xf32> to vector<8x256xf32>
    %133 = vector.extract_strided_slice %128 {offsets = [0, 768], sizes = [8, 256], strides = [1, 1]} : vector<8x1024xf32> to vector<8x256xf32>
    %134 = arith.maximumf %132, %133 : vector<8x256xf32>
    %135 = arith.maximumf %131, %134 : vector<8x256xf32>
    %c0_121 = arith.constant 0 : index
    %c0_122 = arith.constant 0 : index
    %136 = vector.load %arg4[%c0_121, %c0_122] : memref<1x256xf32, #tpu.memory_space<vmem>>, vector<1x256xf32>
    %137 = vector.broadcast %136 : vector<1x256xf32> to vector<8x256xf32>
    %138 = arith.addf %135, %137 : vector<8x256xf32>
    %cst_123 = arith.constant 0.000000e+00 : f32
    %139 = vector.broadcast %cst_123 : f32 to vector<8x256xf32>
    %140 = arith.maximumf %138, %139 : vector<8x256xf32>
    %c6_124 = arith.constant 6 : index
    %c0_125 = arith.constant 0 : index
    %c0_126 = arith.constant 0 : index
    %141 = vector.load %arg1[%c6_124, %c0_125, %c0_126] : memref<28x8x28xf32, #tpu.memory_space<vmem>>, vector<1x8x28xf32>
    %142 = vector.shape_cast %141 : vector<1x8x28xf32> to vector<8x28xf32>
    %c0_127 = arith.constant 0 : index
    %c0_128 = arith.constant 0 : index
    %c0_129 = arith.constant 0 : index
    %143 = vector.load %arg2[%c0_127, %c0_128, %c0_129] : memref<6x28x1024xf32, #tpu.memory_space<vmem>>, vector<1x28x1024xf32>
    %144 = vector.shape_cast %143 : vector<1x28x1024xf32> to vector<28x1024xf32>
    %cst_130 = arith.constant dense<0.000000e+00> : vector<8x1024xf32>
    %145 = tpu.matmul %142, %144, %cst_130 {dimension_numbers = #tpu.dot_dimension_numbers<[1], [0], [0], [1], [0, 0, 1, 1], [], []>} : vector<8x28xf32>, vector<28x1024xf32>, vector<8x1024xf32> -> vector<8x1024xf32>
    %c7_131 = arith.constant 7 : index
    %c0_132 = arith.constant 0 : index
    %c0_133 = arith.constant 0 : index
    %146 = vector.load %arg1[%c7_131, %c0_132, %c0_133] : memref<28x8x28xf32, #tpu.memory_space<vmem>>, vector<1x8x28xf32>
    %147 = vector.shape_cast %146 : vector<1x8x28xf32> to vector<8x28xf32>
    %c1_134 = arith.constant 1 : index
    %c0_135 = arith.constant 0 : index
    %c0_136 = arith.constant 0 : index
    %148 = vector.load %arg2[%c1_134, %c0_135, %c0_136] : memref<6x28x1024xf32, #tpu.memory_space<vmem>>, vector<1x28x1024xf32>
    %149 = vector.shape_cast %148 : vector<1x28x1024xf32> to vector<28x1024xf32>
    %cst_137 = arith.constant dense<0.000000e+00> : vector<8x1024xf32>
    %150 = tpu.matmul %147, %149, %cst_137 {dimension_numbers = #tpu.dot_dimension_numbers<[1], [0], [0], [1], [0, 0, 1, 1], [], []>} : vector<8x28xf32>, vector<28x1024xf32>, vector<8x1024xf32> -> vector<8x1024xf32>
    %151 = arith.addf %145, %150 : vector<8x1024xf32>
    %c8_138 = arith.constant 8 : index
    %c0_139 = arith.constant 0 : index
    %c0_140 = arith.constant 0 : index
    %152 = vector.load %arg1[%c8_138, %c0_139, %c0_140] : memref<28x8x28xf32, #tpu.memory_space<vmem>>, vector<1x8x28xf32>
    %153 = vector.shape_cast %152 : vector<1x8x28xf32> to vector<8x28xf32>
    %c2_141 = arith.constant 2 : index
    %c0_142 = arith.constant 0 : index
    %c0_143 = arith.constant 0 : index
    %154 = vector.load %arg2[%c2_141, %c0_142, %c0_143] : memref<6x28x1024xf32, #tpu.memory_space<vmem>>, vector<1x28x1024xf32>
    %155 = vector.shape_cast %154 : vector<1x28x1024xf32> to vector<28x1024xf32>
    %cst_144 = arith.constant dense<0.000000e+00> : vector<8x1024xf32>
    %156 = tpu.matmul %153, %155, %cst_144 {dimension_numbers = #tpu.dot_dimension_numbers<[1], [0], [0], [1], [0, 0, 1, 1], [], []>} : vector<8x28xf32>, vector<28x1024xf32>, vector<8x1024xf32> -> vector<8x1024xf32>
    %157 = arith.addf %151, %156 : vector<8x1024xf32>
    %c9_145 = arith.constant 9 : index
    %c0_146 = arith.constant 0 : index
    %c0_147 = arith.constant 0 : index
    %158 = vector.load %arg1[%c9_145, %c0_146, %c0_147] : memref<28x8x28xf32, #tpu.memory_space<vmem>>, vector<1x8x28xf32>
    %159 = vector.shape_cast %158 : vector<1x8x28xf32> to vector<8x28xf32>
    %c3_148 = arith.constant 3 : index
    %c0_149 = arith.constant 0 : index
    %c0_150 = arith.constant 0 : index
    %160 = vector.load %arg2[%c3_148, %c0_149, %c0_150] : memref<6x28x1024xf32, #tpu.memory_space<vmem>>, vector<1x28x1024xf32>
    %161 = vector.shape_cast %160 : vector<1x28x1024xf32> to vector<28x1024xf32>
    %cst_151 = arith.constant dense<0.000000e+00> : vector<8x1024xf32>
    %162 = tpu.matmul %159, %161, %cst_151 {dimension_numbers = #tpu.dot_dimension_numbers<[1], [0], [0], [1], [0, 0, 1, 1], [], []>} : vector<8x28xf32>, vector<28x1024xf32>, vector<8x1024xf32> -> vector<8x1024xf32>
    %163 = arith.addf %157, %162 : vector<8x1024xf32>
    %c10 = arith.constant 10 : index
    %c0_152 = arith.constant 0 : index
    %c0_153 = arith.constant 0 : index
    %164 = vector.load %arg1[%c10, %c0_152, %c0_153] : memref<28x8x28xf32, #tpu.memory_space<vmem>>, vector<1x8x28xf32>
    %165 = vector.shape_cast %164 : vector<1x8x28xf32> to vector<8x28xf32>
    %c4_154 = arith.constant 4 : index
    %c0_155 = arith.constant 0 : index
    %c0_156 = arith.constant 0 : index
    %166 = vector.load %arg2[%c4_154, %c0_155, %c0_156] : memref<6x28x1024xf32, #tpu.memory_space<vmem>>, vector<1x28x1024xf32>
    %167 = vector.shape_cast %166 : vector<1x28x1024xf32> to vector<28x1024xf32>
    %cst_157 = arith.constant dense<0.000000e+00> : vector<8x1024xf32>
    %168 = tpu.matmul %165, %167, %cst_157 {dimension_numbers = #tpu.dot_dimension_numbers<[1], [0], [0], [1], [0, 0, 1, 1], [], []>} : vector<8x28xf32>, vector<28x1024xf32>, vector<8x1024xf32> -> vector<8x1024xf32>
    %169 = arith.addf %163, %168 : vector<8x1024xf32>
    %c11 = arith.constant 11 : index
    %c0_158 = arith.constant 0 : index
    %c0_159 = arith.constant 0 : index
    %170 = vector.load %arg1[%c11, %c0_158, %c0_159] : memref<28x8x28xf32, #tpu.memory_space<vmem>>, vector<1x8x28xf32>
    %171 = vector.shape_cast %170 : vector<1x8x28xf32> to vector<8x28xf32>
    %c5_160 = arith.constant 5 : index
    %c0_161 = arith.constant 0 : index
    %c0_162 = arith.constant 0 : index
    %172 = vector.load %arg2[%c5_160, %c0_161, %c0_162] : memref<6x28x1024xf32, #tpu.memory_space<vmem>>, vector<1x28x1024xf32>
    %173 = vector.shape_cast %172 : vector<1x28x1024xf32> to vector<28x1024xf32>
    %cst_163 = arith.constant dense<0.000000e+00> : vector<8x1024xf32>
    %174 = tpu.matmul %171, %173, %cst_163 {dimension_numbers = #tpu.dot_dimension_numbers<[1], [0], [0], [1], [0, 0, 1, 1], [], []>} : vector<8x28xf32>, vector<28x1024xf32>, vector<8x1024xf32> -> vector<8x1024xf32>
    %175 = arith.addf %169, %174 : vector<8x1024xf32>
    %176 = vector.extract_strided_slice %175 {offsets = [0, 0], sizes = [8, 256], strides = [1, 1]} : vector<8x1024xf32> to vector<8x256xf32>
    %177 = vector.extract_strided_slice %175 {offsets = [0, 256], sizes = [8, 256], strides = [1, 1]} : vector<8x1024xf32> to vector<8x256xf32>
    %178 = arith.maximumf %176, %177 : vector<8x256xf32>
    %179 = vector.extract_strided_slice %175 {offsets = [0, 512], sizes = [8, 256], strides = [1, 1]} : vector<8x1024xf32> to vector<8x256xf32>
    %180 = vector.extract_strided_slice %175 {offsets = [0, 768], sizes = [8, 256], strides = [1, 1]} : vector<8x1024xf32> to vector<8x256xf32>
    %181 = arith.maximumf %179, %180 : vector<8x256xf32>
    %182 = arith.maximumf %178, %181 : vector<8x256xf32>
    %c0_164 = arith.constant 0 : index
    %c0_165 = arith.constant 0 : index
    %183 = vector.load %arg4[%c0_164, %c0_165] : memref<1x256xf32, #tpu.memory_space<vmem>>, vector<1x256xf32>
    %184 = vector.broadcast %183 : vector<1x256xf32> to vector<8x256xf32>
    %185 = arith.addf %182, %184 : vector<8x256xf32>
    %cst_166 = arith.constant 0.000000e+00 : f32
    %186 = vector.broadcast %cst_166 : f32 to vector<8x256xf32>
    %187 = arith.maximumf %185, %186 : vector<8x256xf32>
    %c8_167 = arith.constant 8 : index
    %c0_168 = arith.constant 0 : index
    %c0_169 = arith.constant 0 : index
    %188 = vector.load %arg1[%c8_167, %c0_168, %c0_169] : memref<28x8x28xf32, #tpu.memory_space<vmem>>, vector<1x8x28xf32>
    %189 = vector.shape_cast %188 : vector<1x8x28xf32> to vector<8x28xf32>
    %c0_170 = arith.constant 0 : index
    %c0_171 = arith.constant 0 : index
    %c0_172 = arith.constant 0 : index
    %190 = vector.load %arg2[%c0_170, %c0_171, %c0_172] : memref<6x28x1024xf32, #tpu.memory_space<vmem>>, vector<1x28x1024xf32>
    %191 = vector.shape_cast %190 : vector<1x28x1024xf32> to vector<28x1024xf32>
    %cst_173 = arith.constant dense<0.000000e+00> : vector<8x1024xf32>
    %192 = tpu.matmul %189, %191, %cst_173 {dimension_numbers = #tpu.dot_dimension_numbers<[1], [0], [0], [1], [0, 0, 1, 1], [], []>} : vector<8x28xf32>, vector<28x1024xf32>, vector<8x1024xf32> -> vector<8x1024xf32>
    %c9_174 = arith.constant 9 : index
    %c0_175 = arith.constant 0 : index
    %c0_176 = arith.constant 0 : index
    %193 = vector.load %arg1[%c9_174, %c0_175, %c0_176] : memref<28x8x28xf32, #tpu.memory_space<vmem>>, vector<1x8x28xf32>
    %194 = vector.shape_cast %193 : vector<1x8x28xf32> to vector<8x28xf32>
    %c1_177 = arith.constant 1 : index
    %c0_178 = arith.constant 0 : index
    %c0_179 = arith.constant 0 : index
    %195 = vector.load %arg2[%c1_177, %c0_178, %c0_179] : memref<6x28x1024xf32, #tpu.memory_space<vmem>>, vector<1x28x1024xf32>
    %196 = vector.shape_cast %195 : vector<1x28x1024xf32> to vector<28x1024xf32>
    %cst_180 = arith.constant dense<0.000000e+00> : vector<8x1024xf32>
    %197 = tpu.matmul %194, %196, %cst_180 {dimension_numbers = #tpu.dot_dimension_numbers<[1], [0], [0], [1], [0, 0, 1, 1], [], []>} : vector<8x28xf32>, vector<28x1024xf32>, vector<8x1024xf32> -> vector<8x1024xf32>
    %198 = arith.addf %192, %197 : vector<8x1024xf32>
    %c10_181 = arith.constant 10 : index
    %c0_182 = arith.constant 0 : index
    %c0_183 = arith.constant 0 : index
    %199 = vector.load %arg1[%c10_181, %c0_182, %c0_183] : memref<28x8x28xf32, #tpu.memory_space<vmem>>, vector<1x8x28xf32>
    %200 = vector.shape_cast %199 : vector<1x8x28xf32> to vector<8x28xf32>
    %c2_184 = arith.constant 2 : index
    %c0_185 = arith.constant 0 : index
    %c0_186 = arith.constant 0 : index
    %201 = vector.load %arg2[%c2_184, %c0_185, %c0_186] : memref<6x28x1024xf32, #tpu.memory_space<vmem>>, vector<1x28x1024xf32>
    %202 = vector.shape_cast %201 : vector<1x28x1024xf32> to vector<28x1024xf32>
    %cst_187 = arith.constant dense<0.000000e+00> : vector<8x1024xf32>
    %203 = tpu.matmul %200, %202, %cst_187 {dimension_numbers = #tpu.dot_dimension_numbers<[1], [0], [0], [1], [0, 0, 1, 1], [], []>} : vector<8x28xf32>, vector<28x1024xf32>, vector<8x1024xf32> -> vector<8x1024xf32>
    %204 = arith.addf %198, %203 : vector<8x1024xf32>
    %c11_188 = arith.constant 11 : index
    %c0_189 = arith.constant 0 : index
    %c0_190 = arith.constant 0 : index
    %205 = vector.load %arg1[%c11_188, %c0_189, %c0_190] : memref<28x8x28xf32, #tpu.memory_space<vmem>>, vector<1x8x28xf32>
    %206 = vector.shape_cast %205 : vector<1x8x28xf32> to vector<8x28xf32>
    %c3_191 = arith.constant 3 : index
    %c0_192 = arith.constant 0 : index
    %c0_193 = arith.constant 0 : index
    %207 = vector.load %arg2[%c3_191, %c0_192, %c0_193] : memref<6x28x1024xf32, #tpu.memory_space<vmem>>, vector<1x28x1024xf32>
    %208 = vector.shape_cast %207 : vector<1x28x1024xf32> to vector<28x1024xf32>
    %cst_194 = arith.constant dense<0.000000e+00> : vector<8x1024xf32>
    %209 = tpu.matmul %206, %208, %cst_194 {dimension_numbers = #tpu.dot_dimension_numbers<[1], [0], [0], [1], [0, 0, 1, 1], [], []>} : vector<8x28xf32>, vector<28x1024xf32>, vector<8x1024xf32> -> vector<8x1024xf32>
    %210 = arith.addf %204, %209 : vector<8x1024xf32>
    %c12 = arith.constant 12 : index
    %c0_195 = arith.constant 0 : index
    %c0_196 = arith.constant 0 : index
    %211 = vector.load %arg1[%c12, %c0_195, %c0_196] : memref<28x8x28xf32, #tpu.memory_space<vmem>>, vector<1x8x28xf32>
    %212 = vector.shape_cast %211 : vector<1x8x28xf32> to vector<8x28xf32>
    %c4_197 = arith.constant 4 : index
    %c0_198 = arith.constant 0 : index
    %c0_199 = arith.constant 0 : index
    %213 = vector.load %arg2[%c4_197, %c0_198, %c0_199] : memref<6x28x1024xf32, #tpu.memory_space<vmem>>, vector<1x28x1024xf32>
    %214 = vector.shape_cast %213 : vector<1x28x1024xf32> to vector<28x1024xf32>
    %cst_200 = arith.constant dense<0.000000e+00> : vector<8x1024xf32>
    %215 = tpu.matmul %212, %214, %cst_200 {dimension_numbers = #tpu.dot_dimension_numbers<[1], [0], [0], [1], [0, 0, 1, 1], [], []>} : vector<8x28xf32>, vector<28x1024xf32>, vector<8x1024xf32> -> vector<8x1024xf32>
    %216 = arith.addf %210, %215 : vector<8x1024xf32>
    %c13 = arith.constant 13 : index
    %c0_201 = arith.constant 0 : index
    %c0_202 = arith.constant 0 : index
    %217 = vector.load %arg1[%c13, %c0_201, %c0_202] : memref<28x8x28xf32, #tpu.memory_space<vmem>>, vector<1x8x28xf32>
    %218 = vector.shape_cast %217 : vector<1x8x28xf32> to vector<8x28xf32>
    %c5_203 = arith.constant 5 : index
    %c0_204 = arith.constant 0 : index
    %c0_205 = arith.constant 0 : index
    %219 = vector.load %arg2[%c5_203, %c0_204, %c0_205] : memref<6x28x1024xf32, #tpu.memory_space<vmem>>, vector<1x28x1024xf32>
    %220 = vector.shape_cast %219 : vector<1x28x1024xf32> to vector<28x1024xf32>
    %cst_206 = arith.constant dense<0.000000e+00> : vector<8x1024xf32>
    %221 = tpu.matmul %218, %220, %cst_206 {dimension_numbers = #tpu.dot_dimension_numbers<[1], [0], [0], [1], [0, 0, 1, 1], [], []>} : vector<8x28xf32>, vector<28x1024xf32>, vector<8x1024xf32> -> vector<8x1024xf32>
    %222 = arith.addf %216, %221 : vector<8x1024xf32>
    %223 = vector.extract_strided_slice %222 {offsets = [0, 0], sizes = [8, 256], strides = [1, 1]} : vector<8x1024xf32> to vector<8x256xf32>
    %224 = vector.extract_strided_slice %222 {offsets = [0, 256], sizes = [8, 256], strides = [1, 1]} : vector<8x1024xf32> to vector<8x256xf32>
    %225 = arith.maximumf %223, %224 : vector<8x256xf32>
    %226 = vector.extract_strided_slice %222 {offsets = [0, 512], sizes = [8, 256], strides = [1, 1]} : vector<8x1024xf32> to vector<8x256xf32>
    %227 = vector.extract_strided_slice %222 {offsets = [0, 768], sizes = [8, 256], strides = [1, 1]} : vector<8x1024xf32> to vector<8x256xf32>
    %228 = arith.maximumf %226, %227 : vector<8x256xf32>
    %229 = arith.maximumf %225, %228 : vector<8x256xf32>
    %c0_207 = arith.constant 0 : index
    %c0_208 = arith.constant 0 : index
    %230 = vector.load %arg4[%c0_207, %c0_208] : memref<1x256xf32, #tpu.memory_space<vmem>>, vector<1x256xf32>
    %231 = vector.broadcast %230 : vector<1x256xf32> to vector<8x256xf32>
    %232 = arith.addf %229, %231 : vector<8x256xf32>
    %cst_209 = arith.constant 0.000000e+00 : f32
    %233 = vector.broadcast %cst_209 : f32 to vector<8x256xf32>
    %234 = arith.maximumf %232, %233 : vector<8x256xf32>
    %c10_210 = arith.constant 10 : index
    %c0_211 = arith.constant 0 : index
    %c0_212 = arith.constant 0 : index
    %235 = vector.load %arg1[%c10_210, %c0_211, %c0_212] : memref<28x8x28xf32, #tpu.memory_space<vmem>>, vector<1x8x28xf32>
    %236 = vector.shape_cast %235 : vector<1x8x28xf32> to vector<8x28xf32>
    %c0_213 = arith.constant 0 : index
    %c0_214 = arith.constant 0 : index
    %c0_215 = arith.constant 0 : index
    %237 = vector.load %arg2[%c0_213, %c0_214, %c0_215] : memref<6x28x1024xf32, #tpu.memory_space<vmem>>, vector<1x28x1024xf32>
    %238 = vector.shape_cast %237 : vector<1x28x1024xf32> to vector<28x1024xf32>
    %cst_216 = arith.constant dense<0.000000e+00> : vector<8x1024xf32>
    %239 = tpu.matmul %236, %238, %cst_216 {dimension_numbers = #tpu.dot_dimension_numbers<[1], [0], [0], [1], [0, 0, 1, 1], [], []>} : vector<8x28xf32>, vector<28x1024xf32>, vector<8x1024xf32> -> vector<8x1024xf32>
    %c11_217 = arith.constant 11 : index
    %c0_218 = arith.constant 0 : index
    %c0_219 = arith.constant 0 : index
    %240 = vector.load %arg1[%c11_217, %c0_218, %c0_219] : memref<28x8x28xf32, #tpu.memory_space<vmem>>, vector<1x8x28xf32>
    %241 = vector.shape_cast %240 : vector<1x8x28xf32> to vector<8x28xf32>
    %c1_220 = arith.constant 1 : index
    %c0_221 = arith.constant 0 : index
    %c0_222 = arith.constant 0 : index
    %242 = vector.load %arg2[%c1_220, %c0_221, %c0_222] : memref<6x28x1024xf32, #tpu.memory_space<vmem>>, vector<1x28x1024xf32>
    %243 = vector.shape_cast %242 : vector<1x28x1024xf32> to vector<28x1024xf32>
    %cst_223 = arith.constant dense<0.000000e+00> : vector<8x1024xf32>
    %244 = tpu.matmul %241, %243, %cst_223 {dimension_numbers = #tpu.dot_dimension_numbers<[1], [0], [0], [1], [0, 0, 1, 1], [], []>} : vector<8x28xf32>, vector<28x1024xf32>, vector<8x1024xf32> -> vector<8x1024xf32>
    %245 = arith.addf %239, %244 : vector<8x1024xf32>
    %c12_224 = arith.constant 12 : index
    %c0_225 = arith.constant 0 : index
    %c0_226 = arith.constant 0 : index
    %246 = vector.load %arg1[%c12_224, %c0_225, %c0_226] : memref<28x8x28xf32, #tpu.memory_space<vmem>>, vector<1x8x28xf32>
    %247 = vector.shape_cast %246 : vector<1x8x28xf32> to vector<8x28xf32>
    %c2_227 = arith.constant 2 : index
    %c0_228 = arith.constant 0 : index
    %c0_229 = arith.constant 0 : index
    %248 = vector.load %arg2[%c2_227, %c0_228, %c0_229] : memref<6x28x1024xf32, #tpu.memory_space<vmem>>, vector<1x28x1024xf32>
    %249 = vector.shape_cast %248 : vector<1x28x1024xf32> to vector<28x1024xf32>
    %cst_230 = arith.constant dense<0.000000e+00> : vector<8x1024xf32>
    %250 = tpu.matmul %247, %249, %cst_230 {dimension_numbers = #tpu.dot_dimension_numbers<[1], [0], [0], [1], [0, 0, 1, 1], [], []>} : vector<8x28xf32>, vector<28x1024xf32>, vector<8x1024xf32> -> vector<8x1024xf32>
    %251 = arith.addf %245, %250 : vector<8x1024xf32>
    %c13_231 = arith.constant 13 : index
    %c0_232 = arith.constant 0 : index
    %c0_233 = arith.constant 0 : index
    %252 = vector.load %arg1[%c13_231, %c0_232, %c0_233] : memref<28x8x28xf32, #tpu.memory_space<vmem>>, vector<1x8x28xf32>
    %253 = vector.shape_cast %252 : vector<1x8x28xf32> to vector<8x28xf32>
    %c3_234 = arith.constant 3 : index
    %c0_235 = arith.constant 0 : index
    %c0_236 = arith.constant 0 : index
    %254 = vector.load %arg2[%c3_234, %c0_235, %c0_236] : memref<6x28x1024xf32, #tpu.memory_space<vmem>>, vector<1x28x1024xf32>
    %255 = vector.shape_cast %254 : vector<1x28x1024xf32> to vector<28x1024xf32>
    %cst_237 = arith.constant dense<0.000000e+00> : vector<8x1024xf32>
    %256 = tpu.matmul %253, %255, %cst_237 {dimension_numbers = #tpu.dot_dimension_numbers<[1], [0], [0], [1], [0, 0, 1, 1], [], []>} : vector<8x28xf32>, vector<28x1024xf32>, vector<8x1024xf32> -> vector<8x1024xf32>
    %257 = arith.addf %251, %256 : vector<8x1024xf32>
    %c14 = arith.constant 14 : index
    %c0_238 = arith.constant 0 : index
    %c0_239 = arith.constant 0 : index
    %258 = vector.load %arg1[%c14, %c0_238, %c0_239] : memref<28x8x28xf32, #tpu.memory_space<vmem>>, vector<1x8x28xf32>
    %259 = vector.shape_cast %258 : vector<1x8x28xf32> to vector<8x28xf32>
    %c4_240 = arith.constant 4 : index
    %c0_241 = arith.constant 0 : index
    %c0_242 = arith.constant 0 : index
    %260 = vector.load %arg2[%c4_240, %c0_241, %c0_242] : memref<6x28x1024xf32, #tpu.memory_space<vmem>>, vector<1x28x1024xf32>
    %261 = vector.shape_cast %260 : vector<1x28x1024xf32> to vector<28x1024xf32>
    %cst_243 = arith.constant dense<0.000000e+00> : vector<8x1024xf32>
    %262 = tpu.matmul %259, %261, %cst_243 {dimension_numbers = #tpu.dot_dimension_numbers<[1], [0], [0], [1], [0, 0, 1, 1], [], []>} : vector<8x28xf32>, vector<28x1024xf32>, vector<8x1024xf32> -> vector<8x1024xf32>
    %263 = arith.addf %257, %262 : vector<8x1024xf32>
    %c15 = arith.constant 15 : index
    %c0_244 = arith.constant 0 : index
    %c0_245 = arith.constant 0 : index
    %264 = vector.load %arg1[%c15, %c0_244, %c0_245] : memref<28x8x28xf32, #tpu.memory_space<vmem>>, vector<1x8x28xf32>
    %265 = vector.shape_cast %264 : vector<1x8x28xf32> to vector<8x28xf32>
    %c5_246 = arith.constant 5 : index
    %c0_247 = arith.constant 0 : index
    %c0_248 = arith.constant 0 : index
    %266 = vector.load %arg2[%c5_246, %c0_247, %c0_248] : memref<6x28x1024xf32, #tpu.memory_space<vmem>>, vector<1x28x1024xf32>
    %267 = vector.shape_cast %266 : vector<1x28x1024xf32> to vector<28x1024xf32>
    %cst_249 = arith.constant dense<0.000000e+00> : vector<8x1024xf32>
    %268 = tpu.matmul %265, %267, %cst_249 {dimension_numbers = #tpu.dot_dimension_numbers<[1], [0], [0], [1], [0, 0, 1, 1], [], []>} : vector<8x28xf32>, vector<28x1024xf32>, vector<8x1024xf32> -> vector<8x1024xf32>
    %269 = arith.addf %263, %268 : vector<8x1024xf32>
    %270 = vector.extract_strided_slice %269 {offsets = [0, 0], sizes = [8, 256], strides = [1, 1]} : vector<8x1024xf32> to vector<8x256xf32>
    %271 = vector.extract_strided_slice %269 {offsets = [0, 256], sizes = [8, 256], strides = [1, 1]} : vector<8x1024xf32> to vector<8x256xf32>
    %272 = arith.maximumf %270, %271 : vector<8x256xf32>
    %273 = vector.extract_strided_slice %269 {offsets = [0, 512], sizes = [8, 256], strides = [1, 1]} : vector<8x1024xf32> to vector<8x256xf32>
    %274 = vector.extract_strided_slice %269 {offsets = [0, 768], sizes = [8, 256], strides = [1, 1]} : vector<8x1024xf32> to vector<8x256xf32>
    %275 = arith.maximumf %273, %274 : vector<8x256xf32>
    %276 = arith.maximumf %272, %275 : vector<8x256xf32>
    %c0_250 = arith.constant 0 : index
    %c0_251 = arith.constant 0 : index
    %277 = vector.load %arg4[%c0_250, %c0_251] : memref<1x256xf32, #tpu.memory_space<vmem>>, vector<1x256xf32>
    %278 = vector.broadcast %277 : vector<1x256xf32> to vector<8x256xf32>
    %279 = arith.addf %276, %278 : vector<8x256xf32>
    %cst_252 = arith.constant 0.000000e+00 : f32
    %280 = vector.broadcast %cst_252 : f32 to vector<8x256xf32>
    %281 = arith.maximumf %279, %280 : vector<8x256xf32>
    %c12_253 = arith.constant 12 : index
    %c0_254 = arith.constant 0 : index
    %c0_255 = arith.constant 0 : index
    %282 = vector.load %arg1[%c12_253, %c0_254, %c0_255] : memref<28x8x28xf32, #tpu.memory_space<vmem>>, vector<1x8x28xf32>
    %283 = vector.shape_cast %282 : vector<1x8x28xf32> to vector<8x28xf32>
    %c0_256 = arith.constant 0 : index
    %c0_257 = arith.constant 0 : index
    %c0_258 = arith.constant 0 : index
    %284 = vector.load %arg2[%c0_256, %c0_257, %c0_258] : memref<6x28x1024xf32, #tpu.memory_space<vmem>>, vector<1x28x1024xf32>
    %285 = vector.shape_cast %284 : vector<1x28x1024xf32> to vector<28x1024xf32>
    %cst_259 = arith.constant dense<0.000000e+00> : vector<8x1024xf32>
    %286 = tpu.matmul %283, %285, %cst_259 {dimension_numbers = #tpu.dot_dimension_numbers<[1], [0], [0], [1], [0, 0, 1, 1], [], []>} : vector<8x28xf32>, vector<28x1024xf32>, vector<8x1024xf32> -> vector<8x1024xf32>
    %c13_260 = arith.constant 13 : index
    %c0_261 = arith.constant 0 : index
    %c0_262 = arith.constant 0 : index
    %287 = vector.load %arg1[%c13_260, %c0_261, %c0_262] : memref<28x8x28xf32, #tpu.memory_space<vmem>>, vector<1x8x28xf32>
    %288 = vector.shape_cast %287 : vector<1x8x28xf32> to vector<8x28xf32>
    %c1_263 = arith.constant 1 : index
    %c0_264 = arith.constant 0 : index
    %c0_265 = arith.constant 0 : index
    %289 = vector.load %arg2[%c1_263, %c0_264, %c0_265] : memref<6x28x1024xf32, #tpu.memory_space<vmem>>, vector<1x28x1024xf32>
    %290 = vector.shape_cast %289 : vector<1x28x1024xf32> to vector<28x1024xf32>
    %cst_266 = arith.constant dense<0.000000e+00> : vector<8x1024xf32>
    %291 = tpu.matmul %288, %290, %cst_266 {dimension_numbers = #tpu.dot_dimension_numbers<[1], [0], [0], [1], [0, 0, 1, 1], [], []>} : vector<8x28xf32>, vector<28x1024xf32>, vector<8x1024xf32> -> vector<8x1024xf32>
    %292 = arith.addf %286, %291 : vector<8x1024xf32>
    %c14_267 = arith.constant 14 : index
    %c0_268 = arith.constant 0 : index
    %c0_269 = arith.constant 0 : index
    %293 = vector.load %arg1[%c14_267, %c0_268, %c0_269] : memref<28x8x28xf32, #tpu.memory_space<vmem>>, vector<1x8x28xf32>
    %294 = vector.shape_cast %293 : vector<1x8x28xf32> to vector<8x28xf32>
    %c2_270 = arith.constant 2 : index
    %c0_271 = arith.constant 0 : index
    %c0_272 = arith.constant 0 : index
    %295 = vector.load %arg2[%c2_270, %c0_271, %c0_272] : memref<6x28x1024xf32, #tpu.memory_space<vmem>>, vector<1x28x1024xf32>
    %296 = vector.shape_cast %295 : vector<1x28x1024xf32> to vector<28x1024xf32>
    %cst_273 = arith.constant dense<0.000000e+00> : vector<8x1024xf32>
    %297 = tpu.matmul %294, %296, %cst_273 {dimension_numbers = #tpu.dot_dimension_numbers<[1], [0], [0], [1], [0, 0, 1, 1], [], []>} : vector<8x28xf32>, vector<28x1024xf32>, vector<8x1024xf32> -> vector<8x1024xf32>
    %298 = arith.addf %292, %297 : vector<8x1024xf32>
    %c15_274 = arith.constant 15 : index
    %c0_275 = arith.constant 0 : index
    %c0_276 = arith.constant 0 : index
    %299 = vector.load %arg1[%c15_274, %c0_275, %c0_276] : memref<28x8x28xf32, #tpu.memory_space<vmem>>, vector<1x8x28xf32>
    %300 = vector.shape_cast %299 : vector<1x8x28xf32> to vector<8x28xf32>
    %c3_277 = arith.constant 3 : index
    %c0_278 = arith.constant 0 : index
    %c0_279 = arith.constant 0 : index
    %301 = vector.load %arg2[%c3_277, %c0_278, %c0_279] : memref<6x28x1024xf32, #tpu.memory_space<vmem>>, vector<1x28x1024xf32>
    %302 = vector.shape_cast %301 : vector<1x28x1024xf32> to vector<28x1024xf32>
    %cst_280 = arith.constant dense<0.000000e+00> : vector<8x1024xf32>
    %303 = tpu.matmul %300, %302, %cst_280 {dimension_numbers = #tpu.dot_dimension_numbers<[1], [0], [0], [1], [0, 0, 1, 1], [], []>} : vector<8x28xf32>, vector<28x1024xf32>, vector<8x1024xf32> -> vector<8x1024xf32>
    %304 = arith.addf %298, %303 : vector<8x1024xf32>
    %c16 = arith.constant 16 : index
    %c0_281 = arith.constant 0 : index
    %c0_282 = arith.constant 0 : index
    %305 = vector.load %arg1[%c16, %c0_281, %c0_282] : memref<28x8x28xf32, #tpu.memory_space<vmem>>, vector<1x8x28xf32>
    %306 = vector.shape_cast %305 : vector<1x8x28xf32> to vector<8x28xf32>
    %c4_283 = arith.constant 4 : index
    %c0_284 = arith.constant 0 : index
    %c0_285 = arith.constant 0 : index
    %307 = vector.load %arg2[%c4_283, %c0_284, %c0_285] : memref<6x28x1024xf32, #tpu.memory_space<vmem>>, vector<1x28x1024xf32>
    %308 = vector.shape_cast %307 : vector<1x28x1024xf32> to vector<28x1024xf32>
    %cst_286 = arith.constant dense<0.000000e+00> : vector<8x1024xf32>
    %309 = tpu.matmul %306, %308, %cst_286 {dimension_numbers = #tpu.dot_dimension_numbers<[1], [0], [0], [1], [0, 0, 1, 1], [], []>} : vector<8x28xf32>, vector<28x1024xf32>, vector<8x1024xf32> -> vector<8x1024xf32>
    %310 = arith.addf %304, %309 : vector<8x1024xf32>
    %c17 = arith.constant 17 : index
    %c0_287 = arith.constant 0 : index
    %c0_288 = arith.constant 0 : index
    %311 = vector.load %arg1[%c17, %c0_287, %c0_288] : memref<28x8x28xf32, #tpu.memory_space<vmem>>, vector<1x8x28xf32>
    %312 = vector.shape_cast %311 : vector<1x8x28xf32> to vector<8x28xf32>
    %c5_289 = arith.constant 5 : index
    %c0_290 = arith.constant 0 : index
    %c0_291 = arith.constant 0 : index
    %313 = vector.load %arg2[%c5_289, %c0_290, %c0_291] : memref<6x28x1024xf32, #tpu.memory_space<vmem>>, vector<1x28x1024xf32>
    %314 = vector.shape_cast %313 : vector<1x28x1024xf32> to vector<28x1024xf32>
    %cst_292 = arith.constant dense<0.000000e+00> : vector<8x1024xf32>
    %315 = tpu.matmul %312, %314, %cst_292 {dimension_numbers = #tpu.dot_dimension_numbers<[1], [0], [0], [1], [0, 0, 1, 1], [], []>} : vector<8x28xf32>, vector<28x1024xf32>, vector<8x1024xf32> -> vector<8x1024xf32>
    %316 = arith.addf %310, %315 : vector<8x1024xf32>
    %317 = vector.extract_strided_slice %316 {offsets = [0, 0], sizes = [8, 256], strides = [1, 1]} : vector<8x1024xf32> to vector<8x256xf32>
    %318 = vector.extract_strided_slice %316 {offsets = [0, 256], sizes = [8, 256], strides = [1, 1]} : vector<8x1024xf32> to vector<8x256xf32>
    %319 = arith.maximumf %317, %318 : vector<8x256xf32>
    %320 = vector.extract_strided_slice %316 {offsets = [0, 512], sizes = [8, 256], strides = [1, 1]} : vector<8x1024xf32> to vector<8x256xf32>
    %321 = vector.extract_strided_slice %316 {offsets = [0, 768], sizes = [8, 256], strides = [1, 1]} : vector<8x1024xf32> to vector<8x256xf32>
    %322 = arith.maximumf %320, %321 : vector<8x256xf32>
    %323 = arith.maximumf %319, %322 : vector<8x256xf32>
    %c0_293 = arith.constant 0 : index
    %c0_294 = arith.constant 0 : index
    %324 = vector.load %arg4[%c0_293, %c0_294] : memref<1x256xf32, #tpu.memory_space<vmem>>, vector<1x256xf32>
    %325 = vector.broadcast %324 : vector<1x256xf32> to vector<8x256xf32>
    %326 = arith.addf %323, %325 : vector<8x256xf32>
    %cst_295 = arith.constant 0.000000e+00 : f32
    %327 = vector.broadcast %cst_295 : f32 to vector<8x256xf32>
    %328 = arith.maximumf %326, %327 : vector<8x256xf32>
    %c14_296 = arith.constant 14 : index
    %c0_297 = arith.constant 0 : index
    %c0_298 = arith.constant 0 : index
    %329 = vector.load %arg1[%c14_296, %c0_297, %c0_298] : memref<28x8x28xf32, #tpu.memory_space<vmem>>, vector<1x8x28xf32>
    %330 = vector.shape_cast %329 : vector<1x8x28xf32> to vector<8x28xf32>
    %c0_299 = arith.constant 0 : index
    %c0_300 = arith.constant 0 : index
    %c0_301 = arith.constant 0 : index
    %331 = vector.load %arg2[%c0_299, %c0_300, %c0_301] : memref<6x28x1024xf32, #tpu.memory_space<vmem>>, vector<1x28x1024xf32>
    %332 = vector.shape_cast %331 : vector<1x28x1024xf32> to vector<28x1024xf32>
    %cst_302 = arith.constant dense<0.000000e+00> : vector<8x1024xf32>
    %333 = tpu.matmul %330, %332, %cst_302 {dimension_numbers = #tpu.dot_dimension_numbers<[1], [0], [0], [1], [0, 0, 1, 1], [], []>} : vector<8x28xf32>, vector<28x1024xf32>, vector<8x1024xf32> -> vector<8x1024xf32>
    %c15_303 = arith.constant 15 : index
    %c0_304 = arith.constant 0 : index
    %c0_305 = arith.constant 0 : index
    %334 = vector.load %arg1[%c15_303, %c0_304, %c0_305] : memref<28x8x28xf32, #tpu.memory_space<vmem>>, vector<1x8x28xf32>
    %335 = vector.shape_cast %334 : vector<1x8x28xf32> to vector<8x28xf32>
    %c1_306 = arith.constant 1 : index
    %c0_307 = arith.constant 0 : index
    %c0_308 = arith.constant 0 : index
    %336 = vector.load %arg2[%c1_306, %c0_307, %c0_308] : memref<6x28x1024xf32, #tpu.memory_space<vmem>>, vector<1x28x1024xf32>
    %337 = vector.shape_cast %336 : vector<1x28x1024xf32> to vector<28x1024xf32>
    %cst_309 = arith.constant dense<0.000000e+00> : vector<8x1024xf32>
    %338 = tpu.matmul %335, %337, %cst_309 {dimension_numbers = #tpu.dot_dimension_numbers<[1], [0], [0], [1], [0, 0, 1, 1], [], []>} : vector<8x28xf32>, vector<28x1024xf32>, vector<8x1024xf32> -> vector<8x1024xf32>
    %339 = arith.addf %333, %338 : vector<8x1024xf32>
    %c16_310 = arith.constant 16 : index
    %c0_311 = arith.constant 0 : index
    %c0_312 = arith.constant 0 : index
    %340 = vector.load %arg1[%c16_310, %c0_311, %c0_312] : memref<28x8x28xf32, #tpu.memory_space<vmem>>, vector<1x8x28xf32>
    %341 = vector.shape_cast %340 : vector<1x8x28xf32> to vector<8x28xf32>
    %c2_313 = arith.constant 2 : index
    %c0_314 = arith.constant 0 : index
    %c0_315 = arith.constant 0 : index
    %342 = vector.load %arg2[%c2_313, %c0_314, %c0_315] : memref<6x28x1024xf32, #tpu.memory_space<vmem>>, vector<1x28x1024xf32>
    %343 = vector.shape_cast %342 : vector<1x28x1024xf32> to vector<28x1024xf32>
    %cst_316 = arith.constant dense<0.000000e+00> : vector<8x1024xf32>
    %344 = tpu.matmul %341, %343, %cst_316 {dimension_numbers = #tpu.dot_dimension_numbers<[1], [0], [0], [1], [0, 0, 1, 1], [], []>} : vector<8x28xf32>, vector<28x1024xf32>, vector<8x1024xf32> -> vector<8x1024xf32>
    %345 = arith.addf %339, %344 : vector<8x1024xf32>
    %c17_317 = arith.constant 17 : index
    %c0_318 = arith.constant 0 : index
    %c0_319 = arith.constant 0 : index
    %346 = vector.load %arg1[%c17_317, %c0_318, %c0_319] : memref<28x8x28xf32, #tpu.memory_space<vmem>>, vector<1x8x28xf32>
    %347 = vector.shape_cast %346 : vector<1x8x28xf32> to vector<8x28xf32>
    %c3_320 = arith.constant 3 : index
    %c0_321 = arith.constant 0 : index
    %c0_322 = arith.constant 0 : index
    %348 = vector.load %arg2[%c3_320, %c0_321, %c0_322] : memref<6x28x1024xf32, #tpu.memory_space<vmem>>, vector<1x28x1024xf32>
    %349 = vector.shape_cast %348 : vector<1x28x1024xf32> to vector<28x1024xf32>
    %cst_323 = arith.constant dense<0.000000e+00> : vector<8x1024xf32>
    %350 = tpu.matmul %347, %349, %cst_323 {dimension_numbers = #tpu.dot_dimension_numbers<[1], [0], [0], [1], [0, 0, 1, 1], [], []>} : vector<8x28xf32>, vector<28x1024xf32>, vector<8x1024xf32> -> vector<8x1024xf32>
    %351 = arith.addf %345, %350 : vector<8x1024xf32>
    %c18 = arith.constant 18 : index
    %c0_324 = arith.constant 0 : index
    %c0_325 = arith.constant 0 : index
    %352 = vector.load %arg1[%c18, %c0_324, %c0_325] : memref<28x8x28xf32, #tpu.memory_space<vmem>>, vector<1x8x28xf32>
    %353 = vector.shape_cast %352 : vector<1x8x28xf32> to vector<8x28xf32>
    %c4_326 = arith.constant 4 : index
    %c0_327 = arith.constant 0 : index
    %c0_328 = arith.constant 0 : index
    %354 = vector.load %arg2[%c4_326, %c0_327, %c0_328] : memref<6x28x1024xf32, #tpu.memory_space<vmem>>, vector<1x28x1024xf32>
    %355 = vector.shape_cast %354 : vector<1x28x1024xf32> to vector<28x1024xf32>
    %cst_329 = arith.constant dense<0.000000e+00> : vector<8x1024xf32>
    %356 = tpu.matmul %353, %355, %cst_329 {dimension_numbers = #tpu.dot_dimension_numbers<[1], [0], [0], [1], [0, 0, 1, 1], [], []>} : vector<8x28xf32>, vector<28x1024xf32>, vector<8x1024xf32> -> vector<8x1024xf32>
    %357 = arith.addf %351, %356 : vector<8x1024xf32>
    %c19 = arith.constant 19 : index
    %c0_330 = arith.constant 0 : index
    %c0_331 = arith.constant 0 : index
    %358 = vector.load %arg1[%c19, %c0_330, %c0_331] : memref<28x8x28xf32, #tpu.memory_space<vmem>>, vector<1x8x28xf32>
    %359 = vector.shape_cast %358 : vector<1x8x28xf32> to vector<8x28xf32>
    %c5_332 = arith.constant 5 : index
    %c0_333 = arith.constant 0 : index
    %c0_334 = arith.constant 0 : index
    %360 = vector.load %arg2[%c5_332, %c0_333, %c0_334] : memref<6x28x1024xf32, #tpu.memory_space<vmem>>, vector<1x28x1024xf32>
    %361 = vector.shape_cast %360 : vector<1x28x1024xf32> to vector<28x1024xf32>
    %cst_335 = arith.constant dense<0.000000e+00> : vector<8x1024xf32>
    %362 = tpu.matmul %359, %361, %cst_335 {dimension_numbers = #tpu.dot_dimension_numbers<[1], [0], [0], [1], [0, 0, 1, 1], [], []>} : vector<8x28xf32>, vector<28x1024xf32>, vector<8x1024xf32> -> vector<8x1024xf32>
    %363 = arith.addf %357, %362 : vector<8x1024xf32>
    %364 = vector.extract_strided_slice %363 {offsets = [0, 0], sizes = [8, 256], strides = [1, 1]} : vector<8x1024xf32> to vector<8x256xf32>
    %365 = vector.extract_strided_slice %363 {offsets = [0, 256], sizes = [8, 256], strides = [1, 1]} : vector<8x1024xf32> to vector<8x256xf32>
    %366 = arith.maximumf %364, %365 : vector<8x256xf32>
    %367 = vector.extract_strided_slice %363 {offsets = [0, 512], sizes = [8, 256], strides = [1, 1]} : vector<8x1024xf32> to vector<8x256xf32>
    %368 = vector.extract_strided_slice %363 {offsets = [0, 768], sizes = [8, 256], strides = [1, 1]} : vector<8x1024xf32> to vector<8x256xf32>
    %369 = arith.maximumf %367, %368 : vector<8x256xf32>
    %370 = arith.maximumf %366, %369 : vector<8x256xf32>
    %c0_336 = arith.constant 0 : index
    %c0_337 = arith.constant 0 : index
    %371 = vector.load %arg4[%c0_336, %c0_337] : memref<1x256xf32, #tpu.memory_space<vmem>>, vector<1x256xf32>
    %372 = vector.broadcast %371 : vector<1x256xf32> to vector<8x256xf32>
    %373 = arith.addf %370, %372 : vector<8x256xf32>
    %cst_338 = arith.constant 0.000000e+00 : f32
    %374 = vector.broadcast %cst_338 : f32 to vector<8x256xf32>
    %375 = arith.maximumf %373, %374 : vector<8x256xf32>
    %c16_339 = arith.constant 16 : index
    %c0_340 = arith.constant 0 : index
    %c0_341 = arith.constant 0 : index
    %376 = vector.load %arg1[%c16_339, %c0_340, %c0_341] : memref<28x8x28xf32, #tpu.memory_space<vmem>>, vector<1x8x28xf32>
    %377 = vector.shape_cast %376 : vector<1x8x28xf32> to vector<8x28xf32>
    %c0_342 = arith.constant 0 : index
    %c0_343 = arith.constant 0 : index
    %c0_344 = arith.constant 0 : index
    %378 = vector.load %arg2[%c0_342, %c0_343, %c0_344] : memref<6x28x1024xf32, #tpu.memory_space<vmem>>, vector<1x28x1024xf32>
    %379 = vector.shape_cast %378 : vector<1x28x1024xf32> to vector<28x1024xf32>
    %cst_345 = arith.constant dense<0.000000e+00> : vector<8x1024xf32>
    %380 = tpu.matmul %377, %379, %cst_345 {dimension_numbers = #tpu.dot_dimension_numbers<[1], [0], [0], [1], [0, 0, 1, 1], [], []>} : vector<8x28xf32>, vector<28x1024xf32>, vector<8x1024xf32> -> vector<8x1024xf32>
    %c17_346 = arith.constant 17 : index
    %c0_347 = arith.constant 0 : index
    %c0_348 = arith.constant 0 : index
    %381 = vector.load %arg1[%c17_346, %c0_347, %c0_348] : memref<28x8x28xf32, #tpu.memory_space<vmem>>, vector<1x8x28xf32>
    %382 = vector.shape_cast %381 : vector<1x8x28xf32> to vector<8x28xf32>
    %c1_349 = arith.constant 1 : index
    %c0_350 = arith.constant 0 : index
    %c0_351 = arith.constant 0 : index
    %383 = vector.load %arg2[%c1_349, %c0_350, %c0_351] : memref<6x28x1024xf32, #tpu.memory_space<vmem>>, vector<1x28x1024xf32>
    %384 = vector.shape_cast %383 : vector<1x28x1024xf32> to vector<28x1024xf32>
    %cst_352 = arith.constant dense<0.000000e+00> : vector<8x1024xf32>
    %385 = tpu.matmul %382, %384, %cst_352 {dimension_numbers = #tpu.dot_dimension_numbers<[1], [0], [0], [1], [0, 0, 1, 1], [], []>} : vector<8x28xf32>, vector<28x1024xf32>, vector<8x1024xf32> -> vector<8x1024xf32>
    %386 = arith.addf %380, %385 : vector<8x1024xf32>
    %c18_353 = arith.constant 18 : index
    %c0_354 = arith.constant 0 : index
    %c0_355 = arith.constant 0 : index
    %387 = vector.load %arg1[%c18_353, %c0_354, %c0_355] : memref<28x8x28xf32, #tpu.memory_space<vmem>>, vector<1x8x28xf32>
    %388 = vector.shape_cast %387 : vector<1x8x28xf32> to vector<8x28xf32>
    %c2_356 = arith.constant 2 : index
    %c0_357 = arith.constant 0 : index
    %c0_358 = arith.constant 0 : index
    %389 = vector.load %arg2[%c2_356, %c0_357, %c0_358] : memref<6x28x1024xf32, #tpu.memory_space<vmem>>, vector<1x28x1024xf32>
    %390 = vector.shape_cast %389 : vector<1x28x1024xf32> to vector<28x1024xf32>
    %cst_359 = arith.constant dense<0.000000e+00> : vector<8x1024xf32>
    %391 = tpu.matmul %388, %390, %cst_359 {dimension_numbers = #tpu.dot_dimension_numbers<[1], [0], [0], [1], [0, 0, 1, 1], [], []>} : vector<8x28xf32>, vector<28x1024xf32>, vector<8x1024xf32> -> vector<8x1024xf32>
    %392 = arith.addf %386, %391 : vector<8x1024xf32>
    %c19_360 = arith.constant 19 : index
    %c0_361 = arith.constant 0 : index
    %c0_362 = arith.constant 0 : index
    %393 = vector.load %arg1[%c19_360, %c0_361, %c0_362] : memref<28x8x28xf32, #tpu.memory_space<vmem>>, vector<1x8x28xf32>
    %394 = vector.shape_cast %393 : vector<1x8x28xf32> to vector<8x28xf32>
    %c3_363 = arith.constant 3 : index
    %c0_364 = arith.constant 0 : index
    %c0_365 = arith.constant 0 : index
    %395 = vector.load %arg2[%c3_363, %c0_364, %c0_365] : memref<6x28x1024xf32, #tpu.memory_space<vmem>>, vector<1x28x1024xf32>
    %396 = vector.shape_cast %395 : vector<1x28x1024xf32> to vector<28x1024xf32>
    %cst_366 = arith.constant dense<0.000000e+00> : vector<8x1024xf32>
    %397 = tpu.matmul %394, %396, %cst_366 {dimension_numbers = #tpu.dot_dimension_numbers<[1], [0], [0], [1], [0, 0, 1, 1], [], []>} : vector<8x28xf32>, vector<28x1024xf32>, vector<8x1024xf32> -> vector<8x1024xf32>
    %398 = arith.addf %392, %397 : vector<8x1024xf32>
    %c20 = arith.constant 20 : index
    %c0_367 = arith.constant 0 : index
    %c0_368 = arith.constant 0 : index
    %399 = vector.load %arg1[%c20, %c0_367, %c0_368] : memref<28x8x28xf32, #tpu.memory_space<vmem>>, vector<1x8x28xf32>
    %400 = vector.shape_cast %399 : vector<1x8x28xf32> to vector<8x28xf32>
    %c4_369 = arith.constant 4 : index
    %c0_370 = arith.constant 0 : index
    %c0_371 = arith.constant 0 : index
    %401 = vector.load %arg2[%c4_369, %c0_370, %c0_371] : memref<6x28x1024xf32, #tpu.memory_space<vmem>>, vector<1x28x1024xf32>
    %402 = vector.shape_cast %401 : vector<1x28x1024xf32> to vector<28x1024xf32>
    %cst_372 = arith.constant dense<0.000000e+00> : vector<8x1024xf32>
    %403 = tpu.matmul %400, %402, %cst_372 {dimension_numbers = #tpu.dot_dimension_numbers<[1], [0], [0], [1], [0, 0, 1, 1], [], []>} : vector<8x28xf32>, vector<28x1024xf32>, vector<8x1024xf32> -> vector<8x1024xf32>
    %404 = arith.addf %398, %403 : vector<8x1024xf32>
    %c21 = arith.constant 21 : index
    %c0_373 = arith.constant 0 : index
    %c0_374 = arith.constant 0 : index
    %405 = vector.load %arg1[%c21, %c0_373, %c0_374] : memref<28x8x28xf32, #tpu.memory_space<vmem>>, vector<1x8x28xf32>
    %406 = vector.shape_cast %405 : vector<1x8x28xf32> to vector<8x28xf32>
    %c5_375 = arith.constant 5 : index
    %c0_376 = arith.constant 0 : index
    %c0_377 = arith.constant 0 : index
    %407 = vector.load %arg2[%c5_375, %c0_376, %c0_377] : memref<6x28x1024xf32, #tpu.memory_space<vmem>>, vector<1x28x1024xf32>
    %408 = vector.shape_cast %407 : vector<1x28x1024xf32> to vector<28x1024xf32>
    %cst_378 = arith.constant dense<0.000000e+00> : vector<8x1024xf32>
    %409 = tpu.matmul %406, %408, %cst_378 {dimension_numbers = #tpu.dot_dimension_numbers<[1], [0], [0], [1], [0, 0, 1, 1], [], []>} : vector<8x28xf32>, vector<28x1024xf32>, vector<8x1024xf32> -> vector<8x1024xf32>
    %410 = arith.addf %404, %409 : vector<8x1024xf32>
    %411 = vector.extract_strided_slice %410 {offsets = [0, 0], sizes = [8, 256], strides = [1, 1]} : vector<8x1024xf32> to vector<8x256xf32>
    %412 = vector.extract_strided_slice %410 {offsets = [0, 256], sizes = [8, 256], strides = [1, 1]} : vector<8x1024xf32> to vector<8x256xf32>
    %413 = arith.maximumf %411, %412 : vector<8x256xf32>
    %414 = vector.extract_strided_slice %410 {offsets = [0, 512], sizes = [8, 256], strides = [1, 1]} : vector<8x1024xf32> to vector<8x256xf32>
    %415 = vector.extract_strided_slice %410 {offsets = [0, 768], sizes = [8, 256], strides = [1, 1]} : vector<8x1024xf32> to vector<8x256xf32>
    %416 = arith.maximumf %414, %415 : vector<8x256xf32>
    %417 = arith.maximumf %413, %416 : vector<8x256xf32>
    %c0_379 = arith.constant 0 : index
    %c0_380 = arith.constant 0 : index
    %418 = vector.load %arg4[%c0_379, %c0_380] : memref<1x256xf32, #tpu.memory_space<vmem>>, vector<1x256xf32>
    %419 = vector.broadcast %418 : vector<1x256xf32> to vector<8x256xf32>
    %420 = arith.addf %417, %419 : vector<8x256xf32>
    %cst_381 = arith.constant 0.000000e+00 : f32
    %421 = vector.broadcast %cst_381 : f32 to vector<8x256xf32>
    %422 = arith.maximumf %420, %421 : vector<8x256xf32>
    %c18_382 = arith.constant 18 : index
    %c0_383 = arith.constant 0 : index
    %c0_384 = arith.constant 0 : index
    %423 = vector.load %arg1[%c18_382, %c0_383, %c0_384] : memref<28x8x28xf32, #tpu.memory_space<vmem>>, vector<1x8x28xf32>
    %424 = vector.shape_cast %423 : vector<1x8x28xf32> to vector<8x28xf32>
    %c0_385 = arith.constant 0 : index
    %c0_386 = arith.constant 0 : index
    %c0_387 = arith.constant 0 : index
    %425 = vector.load %arg2[%c0_385, %c0_386, %c0_387] : memref<6x28x1024xf32, #tpu.memory_space<vmem>>, vector<1x28x1024xf32>
    %426 = vector.shape_cast %425 : vector<1x28x1024xf32> to vector<28x1024xf32>
    %cst_388 = arith.constant dense<0.000000e+00> : vector<8x1024xf32>
    %427 = tpu.matmul %424, %426, %cst_388 {dimension_numbers = #tpu.dot_dimension_numbers<[1], [0], [0], [1], [0, 0, 1, 1], [], []>} : vector<8x28xf32>, vector<28x1024xf32>, vector<8x1024xf32> -> vector<8x1024xf32>
    %c19_389 = arith.constant 19 : index
    %c0_390 = arith.constant 0 : index
    %c0_391 = arith.constant 0 : index
    %428 = vector.load %arg1[%c19_389, %c0_390, %c0_391] : memref<28x8x28xf32, #tpu.memory_space<vmem>>, vector<1x8x28xf32>
    %429 = vector.shape_cast %428 : vector<1x8x28xf32> to vector<8x28xf32>
    %c1_392 = arith.constant 1 : index
    %c0_393 = arith.constant 0 : index
    %c0_394 = arith.constant 0 : index
    %430 = vector.load %arg2[%c1_392, %c0_393, %c0_394] : memref<6x28x1024xf32, #tpu.memory_space<vmem>>, vector<1x28x1024xf32>
    %431 = vector.shape_cast %430 : vector<1x28x1024xf32> to vector<28x1024xf32>
    %cst_395 = arith.constant dense<0.000000e+00> : vector<8x1024xf32>
    %432 = tpu.matmul %429, %431, %cst_395 {dimension_numbers = #tpu.dot_dimension_numbers<[1], [0], [0], [1], [0, 0, 1, 1], [], []>} : vector<8x28xf32>, vector<28x1024xf32>, vector<8x1024xf32> -> vector<8x1024xf32>
    %433 = arith.addf %427, %432 : vector<8x1024xf32>
    %c20_396 = arith.constant 20 : index
    %c0_397 = arith.constant 0 : index
    %c0_398 = arith.constant 0 : index
    %434 = vector.load %arg1[%c20_396, %c0_397, %c0_398] : memref<28x8x28xf32, #tpu.memory_space<vmem>>, vector<1x8x28xf32>
    %435 = vector.shape_cast %434 : vector<1x8x28xf32> to vector<8x28xf32>
    %c2_399 = arith.constant 2 : index
    %c0_400 = arith.constant 0 : index
    %c0_401 = arith.constant 0 : index
    %436 = vector.load %arg2[%c2_399, %c0_400, %c0_401] : memref<6x28x1024xf32, #tpu.memory_space<vmem>>, vector<1x28x1024xf32>
    %437 = vector.shape_cast %436 : vector<1x28x1024xf32> to vector<28x1024xf32>
    %cst_402 = arith.constant dense<0.000000e+00> : vector<8x1024xf32>
    %438 = tpu.matmul %435, %437, %cst_402 {dimension_numbers = #tpu.dot_dimension_numbers<[1], [0], [0], [1], [0, 0, 1, 1], [], []>} : vector<8x28xf32>, vector<28x1024xf32>, vector<8x1024xf32> -> vector<8x1024xf32>
    %439 = arith.addf %433, %438 : vector<8x1024xf32>
    %c21_403 = arith.constant 21 : index
    %c0_404 = arith.constant 0 : index
    %c0_405 = arith.constant 0 : index
    %440 = vector.load %arg1[%c21_403, %c0_404, %c0_405] : memref<28x8x28xf32, #tpu.memory_space<vmem>>, vector<1x8x28xf32>
    %441 = vector.shape_cast %440 : vector<1x8x28xf32> to vector<8x28xf32>
    %c3_406 = arith.constant 3 : index
    %c0_407 = arith.constant 0 : index
    %c0_408 = arith.constant 0 : index
    %442 = vector.load %arg2[%c3_406, %c0_407, %c0_408] : memref<6x28x1024xf32, #tpu.memory_space<vmem>>, vector<1x28x1024xf32>
    %443 = vector.shape_cast %442 : vector<1x28x1024xf32> to vector<28x1024xf32>
    %cst_409 = arith.constant dense<0.000000e+00> : vector<8x1024xf32>
    %444 = tpu.matmul %441, %443, %cst_409 {dimension_numbers = #tpu.dot_dimension_numbers<[1], [0], [0], [1], [0, 0, 1, 1], [], []>} : vector<8x28xf32>, vector<28x1024xf32>, vector<8x1024xf32> -> vector<8x1024xf32>
    %445 = arith.addf %439, %444 : vector<8x1024xf32>
    %c22 = arith.constant 22 : index
    %c0_410 = arith.constant 0 : index
    %c0_411 = arith.constant 0 : index
    %446 = vector.load %arg1[%c22, %c0_410, %c0_411] : memref<28x8x28xf32, #tpu.memory_space<vmem>>, vector<1x8x28xf32>
    %447 = vector.shape_cast %446 : vector<1x8x28xf32> to vector<8x28xf32>
    %c4_412 = arith.constant 4 : index
    %c0_413 = arith.constant 0 : index
    %c0_414 = arith.constant 0 : index
    %448 = vector.load %arg2[%c4_412, %c0_413, %c0_414] : memref<6x28x1024xf32, #tpu.memory_space<vmem>>, vector<1x28x1024xf32>
    %449 = vector.shape_cast %448 : vector<1x28x1024xf32> to vector<28x1024xf32>
    %cst_415 = arith.constant dense<0.000000e+00> : vector<8x1024xf32>
    %450 = tpu.matmul %447, %449, %cst_415 {dimension_numbers = #tpu.dot_dimension_numbers<[1], [0], [0], [1], [0, 0, 1, 1], [], []>} : vector<8x28xf32>, vector<28x1024xf32>, vector<8x1024xf32> -> vector<8x1024xf32>
    %451 = arith.addf %445, %450 : vector<8x1024xf32>
    %c23 = arith.constant 23 : index
    %c0_416 = arith.constant 0 : index
    %c0_417 = arith.constant 0 : index
    %452 = vector.load %arg1[%c23, %c0_416, %c0_417] : memref<28x8x28xf32, #tpu.memory_space<vmem>>, vector<1x8x28xf32>
    %453 = vector.shape_cast %452 : vector<1x8x28xf32> to vector<8x28xf32>
    %c5_418 = arith.constant 5 : index
    %c0_419 = arith.constant 0 : index
    %c0_420 = arith.constant 0 : index
    %454 = vector.load %arg2[%c5_418, %c0_419, %c0_420] : memref<6x28x1024xf32, #tpu.memory_space<vmem>>, vector<1x28x1024xf32>
    %455 = vector.shape_cast %454 : vector<1x28x1024xf32> to vector<28x1024xf32>
    %cst_421 = arith.constant dense<0.000000e+00> : vector<8x1024xf32>
    %456 = tpu.matmul %453, %455, %cst_421 {dimension_numbers = #tpu.dot_dimension_numbers<[1], [0], [0], [1], [0, 0, 1, 1], [], []>} : vector<8x28xf32>, vector<28x1024xf32>, vector<8x1024xf32> -> vector<8x1024xf32>
    %457 = arith.addf %451, %456 : vector<8x1024xf32>
    %458 = vector.extract_strided_slice %457 {offsets = [0, 0], sizes = [8, 256], strides = [1, 1]} : vector<8x1024xf32> to vector<8x256xf32>
    %459 = vector.extract_strided_slice %457 {offsets = [0, 256], sizes = [8, 256], strides = [1, 1]} : vector<8x1024xf32> to vector<8x256xf32>
    %460 = arith.maximumf %458, %459 : vector<8x256xf32>
    %461 = vector.extract_strided_slice %457 {offsets = [0, 512], sizes = [8, 256], strides = [1, 1]} : vector<8x1024xf32> to vector<8x256xf32>
    %462 = vector.extract_strided_slice %457 {offsets = [0, 768], sizes = [8, 256], strides = [1, 1]} : vector<8x1024xf32> to vector<8x256xf32>
    %463 = arith.maximumf %461, %462 : vector<8x256xf32>
    %464 = arith.maximumf %460, %463 : vector<8x256xf32>
    %c0_422 = arith.constant 0 : index
    %c0_423 = arith.constant 0 : index
    %465 = vector.load %arg4[%c0_422, %c0_423] : memref<1x256xf32, #tpu.memory_space<vmem>>, vector<1x256xf32>
    %466 = vector.broadcast %465 : vector<1x256xf32> to vector<8x256xf32>
    %467 = arith.addf %464, %466 : vector<8x256xf32>
    %cst_424 = arith.constant 0.000000e+00 : f32
    %468 = vector.broadcast %cst_424 : f32 to vector<8x256xf32>
    %469 = arith.maximumf %467, %468 : vector<8x256xf32>
    %c20_425 = arith.constant 20 : index
    %c0_426 = arith.constant 0 : index
    %c0_427 = arith.constant 0 : index
    %470 = vector.load %arg1[%c20_425, %c0_426, %c0_427] : memref<28x8x28xf32, #tpu.memory_space<vmem>>, vector<1x8x28xf32>
    %471 = vector.shape_cast %470 : vector<1x8x28xf32> to vector<8x28xf32>
    %c0_428 = arith.constant 0 : index
    %c0_429 = arith.constant 0 : index
    %c0_430 = arith.constant 0 : index
    %472 = vector.load %arg2[%c0_428, %c0_429, %c0_430] : memref<6x28x1024xf32, #tpu.memory_space<vmem>>, vector<1x28x1024xf32>
    %473 = vector.shape_cast %472 : vector<1x28x1024xf32> to vector<28x1024xf32>
    %cst_431 = arith.constant dense<0.000000e+00> : vector<8x1024xf32>
    %474 = tpu.matmul %471, %473, %cst_431 {dimension_numbers = #tpu.dot_dimension_numbers<[1], [0], [0], [1], [0, 0, 1, 1], [], []>} : vector<8x28xf32>, vector<28x1024xf32>, vector<8x1024xf32> -> vector<8x1024xf32>
    %c21_432 = arith.constant 21 : index
    %c0_433 = arith.constant 0 : index
    %c0_434 = arith.constant 0 : index
    %475 = vector.load %arg1[%c21_432, %c0_433, %c0_434] : memref<28x8x28xf32, #tpu.memory_space<vmem>>, vector<1x8x28xf32>
    %476 = vector.shape_cast %475 : vector<1x8x28xf32> to vector<8x28xf32>
    %c1_435 = arith.constant 1 : index
    %c0_436 = arith.constant 0 : index
    %c0_437 = arith.constant 0 : index
    %477 = vector.load %arg2[%c1_435, %c0_436, %c0_437] : memref<6x28x1024xf32, #tpu.memory_space<vmem>>, vector<1x28x1024xf32>
    %478 = vector.shape_cast %477 : vector<1x28x1024xf32> to vector<28x1024xf32>
    %cst_438 = arith.constant dense<0.000000e+00> : vector<8x1024xf32>
    %479 = tpu.matmul %476, %478, %cst_438 {dimension_numbers = #tpu.dot_dimension_numbers<[1], [0], [0], [1], [0, 0, 1, 1], [], []>} : vector<8x28xf32>, vector<28x1024xf32>, vector<8x1024xf32> -> vector<8x1024xf32>
    %480 = arith.addf %474, %479 : vector<8x1024xf32>
    %c22_439 = arith.constant 22 : index
    %c0_440 = arith.constant 0 : index
    %c0_441 = arith.constant 0 : index
    %481 = vector.load %arg1[%c22_439, %c0_440, %c0_441] : memref<28x8x28xf32, #tpu.memory_space<vmem>>, vector<1x8x28xf32>
    %482 = vector.shape_cast %481 : vector<1x8x28xf32> to vector<8x28xf32>
    %c2_442 = arith.constant 2 : index
    %c0_443 = arith.constant 0 : index
    %c0_444 = arith.constant 0 : index
    %483 = vector.load %arg2[%c2_442, %c0_443, %c0_444] : memref<6x28x1024xf32, #tpu.memory_space<vmem>>, vector<1x28x1024xf32>
    %484 = vector.shape_cast %483 : vector<1x28x1024xf32> to vector<28x1024xf32>
    %cst_445 = arith.constant dense<0.000000e+00> : vector<8x1024xf32>
    %485 = tpu.matmul %482, %484, %cst_445 {dimension_numbers = #tpu.dot_dimension_numbers<[1], [0], [0], [1], [0, 0, 1, 1], [], []>} : vector<8x28xf32>, vector<28x1024xf32>, vector<8x1024xf32> -> vector<8x1024xf32>
    %486 = arith.addf %480, %485 : vector<8x1024xf32>
    %c23_446 = arith.constant 23 : index
    %c0_447 = arith.constant 0 : index
    %c0_448 = arith.constant 0 : index
    %487 = vector.load %arg1[%c23_446, %c0_447, %c0_448] : memref<28x8x28xf32, #tpu.memory_space<vmem>>, vector<1x8x28xf32>
    %488 = vector.shape_cast %487 : vector<1x8x28xf32> to vector<8x28xf32>
    %c3_449 = arith.constant 3 : index
    %c0_450 = arith.constant 0 : index
    %c0_451 = arith.constant 0 : index
    %489 = vector.load %arg2[%c3_449, %c0_450, %c0_451] : memref<6x28x1024xf32, #tpu.memory_space<vmem>>, vector<1x28x1024xf32>
    %490 = vector.shape_cast %489 : vector<1x28x1024xf32> to vector<28x1024xf32>
    %cst_452 = arith.constant dense<0.000000e+00> : vector<8x1024xf32>
    %491 = tpu.matmul %488, %490, %cst_452 {dimension_numbers = #tpu.dot_dimension_numbers<[1], [0], [0], [1], [0, 0, 1, 1], [], []>} : vector<8x28xf32>, vector<28x1024xf32>, vector<8x1024xf32> -> vector<8x1024xf32>
    %492 = arith.addf %486, %491 : vector<8x1024xf32>
    %c24 = arith.constant 24 : index
    %c0_453 = arith.constant 0 : index
    %c0_454 = arith.constant 0 : index
    %493 = vector.load %arg1[%c24, %c0_453, %c0_454] : memref<28x8x28xf32, #tpu.memory_space<vmem>>, vector<1x8x28xf32>
    %494 = vector.shape_cast %493 : vector<1x8x28xf32> to vector<8x28xf32>
    %c4_455 = arith.constant 4 : index
    %c0_456 = arith.constant 0 : index
    %c0_457 = arith.constant 0 : index
    %495 = vector.load %arg2[%c4_455, %c0_456, %c0_457] : memref<6x28x1024xf32, #tpu.memory_space<vmem>>, vector<1x28x1024xf32>
    %496 = vector.shape_cast %495 : vector<1x28x1024xf32> to vector<28x1024xf32>
    %cst_458 = arith.constant dense<0.000000e+00> : vector<8x1024xf32>
    %497 = tpu.matmul %494, %496, %cst_458 {dimension_numbers = #tpu.dot_dimension_numbers<[1], [0], [0], [1], [0, 0, 1, 1], [], []>} : vector<8x28xf32>, vector<28x1024xf32>, vector<8x1024xf32> -> vector<8x1024xf32>
    %498 = arith.addf %492, %497 : vector<8x1024xf32>
    %c25 = arith.constant 25 : index
    %c0_459 = arith.constant 0 : index
    %c0_460 = arith.constant 0 : index
    %499 = vector.load %arg1[%c25, %c0_459, %c0_460] : memref<28x8x28xf32, #tpu.memory_space<vmem>>, vector<1x8x28xf32>
    %500 = vector.shape_cast %499 : vector<1x8x28xf32> to vector<8x28xf32>
    %c5_461 = arith.constant 5 : index
    %c0_462 = arith.constant 0 : index
    %c0_463 = arith.constant 0 : index
    %501 = vector.load %arg2[%c5_461, %c0_462, %c0_463] : memref<6x28x1024xf32, #tpu.memory_space<vmem>>, vector<1x28x1024xf32>
    %502 = vector.shape_cast %501 : vector<1x28x1024xf32> to vector<28x1024xf32>
    %cst_464 = arith.constant dense<0.000000e+00> : vector<8x1024xf32>
    %503 = tpu.matmul %500, %502, %cst_464 {dimension_numbers = #tpu.dot_dimension_numbers<[1], [0], [0], [1], [0, 0, 1, 1], [], []>} : vector<8x28xf32>, vector<28x1024xf32>, vector<8x1024xf32> -> vector<8x1024xf32>
    %504 = arith.addf %498, %503 : vector<8x1024xf32>
    %505 = vector.extract_strided_slice %504 {offsets = [0, 0], sizes = [8, 256], strides = [1, 1]} : vector<8x1024xf32> to vector<8x256xf32>
    %506 = vector.extract_strided_slice %504 {offsets = [0, 256], sizes = [8, 256], strides = [1, 1]} : vector<8x1024xf32> to vector<8x256xf32>
    %507 = arith.maximumf %505, %506 : vector<8x256xf32>
    %508 = vector.extract_strided_slice %504 {offsets = [0, 512], sizes = [8, 256], strides = [1, 1]} : vector<8x1024xf32> to vector<8x256xf32>
    %509 = vector.extract_strided_slice %504 {offsets = [0, 768], sizes = [8, 256], strides = [1, 1]} : vector<8x1024xf32> to vector<8x256xf32>
    %510 = arith.maximumf %508, %509 : vector<8x256xf32>
    %511 = arith.maximumf %507, %510 : vector<8x256xf32>
    %c0_465 = arith.constant 0 : index
    %c0_466 = arith.constant 0 : index
    %512 = vector.load %arg4[%c0_465, %c0_466] : memref<1x256xf32, #tpu.memory_space<vmem>>, vector<1x256xf32>
    %513 = vector.broadcast %512 : vector<1x256xf32> to vector<8x256xf32>
    %514 = arith.addf %511, %513 : vector<8x256xf32>
    %cst_467 = arith.constant 0.000000e+00 : f32
    %515 = vector.broadcast %cst_467 : f32 to vector<8x256xf32>
    %516 = arith.maximumf %514, %515 : vector<8x256xf32>
    %c0_468 = arith.constant 0 : index
    %c0_469 = arith.constant 0 : index
    %c0_470 = arith.constant 0 : index
    %c0_471 = arith.constant 0 : index
    %517 = vector.load %arg3[%c0_468, %c0_469, %c0_470, %c0_471] : memref<2x5x256x64xf32, #tpu.memory_space<vmem>>, vector<1x1x256x64xf32>
    %518 = vector.shape_cast %517 : vector<1x1x256x64xf32> to vector<256x64xf32>
    %cst_472 = arith.constant dense<0.000000e+00> : vector<8x64xf32>
    %519 = tpu.matmul %46, %518, %cst_472 {dimension_numbers = #tpu.dot_dimension_numbers<[1], [0], [0], [1], [0, 0, 1, 1], [], []>} : vector<8x256xf32>, vector<256x64xf32>, vector<8x64xf32> -> vector<8x64xf32>
    %c1_473 = arith.constant 1 : index
    %c0_474 = arith.constant 0 : index
    %c0_475 = arith.constant 0 : index
    %c0_476 = arith.constant 0 : index
    %520 = vector.load %arg3[%c1_473, %c0_474, %c0_475, %c0_476] : memref<2x5x256x64xf32, #tpu.memory_space<vmem>>, vector<1x1x256x64xf32>
    %521 = vector.shape_cast %520 : vector<1x1x256x64xf32> to vector<256x64xf32>
    %cst_477 = arith.constant dense<0.000000e+00> : vector<8x64xf32>
    %522 = tpu.matmul %46, %521, %cst_477 {dimension_numbers = #tpu.dot_dimension_numbers<[1], [0], [0], [1], [0, 0, 1, 1], [], []>} : vector<8x256xf32>, vector<256x64xf32>, vector<8x64xf32> -> vector<8x64xf32>
    %c0_478 = arith.constant 0 : index
    %c1_479 = arith.constant 1 : index
    %c0_480 = arith.constant 0 : index
    %c0_481 = arith.constant 0 : index
    %523 = vector.load %arg3[%c0_478, %c1_479, %c0_480, %c0_481] : memref<2x5x256x64xf32, #tpu.memory_space<vmem>>, vector<1x1x256x64xf32>
    %524 = vector.shape_cast %523 : vector<1x1x256x64xf32> to vector<256x64xf32>
    %cst_482 = arith.constant dense<0.000000e+00> : vector<8x64xf32>
    %525 = tpu.matmul %93, %524, %cst_482 {dimension_numbers = #tpu.dot_dimension_numbers<[1], [0], [0], [1], [0, 0, 1, 1], [], []>} : vector<8x256xf32>, vector<256x64xf32>, vector<8x64xf32> -> vector<8x64xf32>
    %526 = arith.addf %519, %525 : vector<8x64xf32>
    %c1_483 = arith.constant 1 : index
    %c1_484 = arith.constant 1 : index
    %c0_485 = arith.constant 0 : index
    %c0_486 = arith.constant 0 : index
    %527 = vector.load %arg3[%c1_483, %c1_484, %c0_485, %c0_486] : memref<2x5x256x64xf32, #tpu.memory_space<vmem>>, vector<1x1x256x64xf32>
    %528 = vector.shape_cast %527 : vector<1x1x256x64xf32> to vector<256x64xf32>
    %cst_487 = arith.constant dense<0.000000e+00> : vector<8x64xf32>
    %529 = tpu.matmul %93, %528, %cst_487 {dimension_numbers = #tpu.dot_dimension_numbers<[1], [0], [0], [1], [0, 0, 1, 1], [], []>} : vector<8x256xf32>, vector<256x64xf32>, vector<8x64xf32> -> vector<8x64xf32>
    %530 = arith.addf %522, %529 : vector<8x64xf32>
    %c0_488 = arith.constant 0 : index
    %c2_489 = arith.constant 2 : index
    %c0_490 = arith.constant 0 : index
    %c0_491 = arith.constant 0 : index
    %531 = vector.load %arg3[%c0_488, %c2_489, %c0_490, %c0_491] : memref<2x5x256x64xf32, #tpu.memory_space<vmem>>, vector<1x1x256x64xf32>
    %532 = vector.shape_cast %531 : vector<1x1x256x64xf32> to vector<256x64xf32>
    %cst_492 = arith.constant dense<0.000000e+00> : vector<8x64xf32>
    %533 = tpu.matmul %140, %532, %cst_492 {dimension_numbers = #tpu.dot_dimension_numbers<[1], [0], [0], [1], [0, 0, 1, 1], [], []>} : vector<8x256xf32>, vector<256x64xf32>, vector<8x64xf32> -> vector<8x64xf32>
    %534 = arith.addf %526, %533 : vector<8x64xf32>
    %c1_493 = arith.constant 1 : index
    %c2_494 = arith.constant 2 : index
    %c0_495 = arith.constant 0 : index
    %c0_496 = arith.constant 0 : index
    %535 = vector.load %arg3[%c1_493, %c2_494, %c0_495, %c0_496] : memref<2x5x256x64xf32, #tpu.memory_space<vmem>>, vector<1x1x256x64xf32>
    %536 = vector.shape_cast %535 : vector<1x1x256x64xf32> to vector<256x64xf32>
    %cst_497 = arith.constant dense<0.000000e+00> : vector<8x64xf32>
    %537 = tpu.matmul %140, %536, %cst_497 {dimension_numbers = #tpu.dot_dimension_numbers<[1], [0], [0], [1], [0, 0, 1, 1], [], []>} : vector<8x256xf32>, vector<256x64xf32>, vector<8x64xf32> -> vector<8x64xf32>
    %538 = arith.addf %530, %537 : vector<8x64xf32>
    %c0_498 = arith.constant 0 : index
    %c3_499 = arith.constant 3 : index
    %c0_500 = arith.constant 0 : index
    %c0_501 = arith.constant 0 : index
    %539 = vector.load %arg3[%c0_498, %c3_499, %c0_500, %c0_501] : memref<2x5x256x64xf32, #tpu.memory_space<vmem>>, vector<1x1x256x64xf32>
    %540 = vector.shape_cast %539 : vector<1x1x256x64xf32> to vector<256x64xf32>
    %cst_502 = arith.constant dense<0.000000e+00> : vector<8x64xf32>
    %541 = tpu.matmul %187, %540, %cst_502 {dimension_numbers = #tpu.dot_dimension_numbers<[1], [0], [0], [1], [0, 0, 1, 1], [], []>} : vector<8x256xf32>, vector<256x64xf32>, vector<8x64xf32> -> vector<8x64xf32>
    %542 = arith.addf %534, %541 : vector<8x64xf32>
    %c1_503 = arith.constant 1 : index
    %c3_504 = arith.constant 3 : index
    %c0_505 = arith.constant 0 : index
    %c0_506 = arith.constant 0 : index
    %543 = vector.load %arg3[%c1_503, %c3_504, %c0_505, %c0_506] : memref<2x5x256x64xf32, #tpu.memory_space<vmem>>, vector<1x1x256x64xf32>
    %544 = vector.shape_cast %543 : vector<1x1x256x64xf32> to vector<256x64xf32>
    %cst_507 = arith.constant dense<0.000000e+00> : vector<8x64xf32>
    %545 = tpu.matmul %187, %544, %cst_507 {dimension_numbers = #tpu.dot_dimension_numbers<[1], [0], [0], [1], [0, 0, 1, 1], [], []>} : vector<8x256xf32>, vector<256x64xf32>, vector<8x64xf32> -> vector<8x64xf32>
    %546 = arith.addf %538, %545 : vector<8x64xf32>
    %c0_508 = arith.constant 0 : index
    %c4_509 = arith.constant 4 : index
    %c0_510 = arith.constant 0 : index
    %c0_511 = arith.constant 0 : index
    %547 = vector.load %arg3[%c0_508, %c4_509, %c0_510, %c0_511] : memref<2x5x256x64xf32, #tpu.memory_space<vmem>>, vector<1x1x256x64xf32>
    %548 = vector.shape_cast %547 : vector<1x1x256x64xf32> to vector<256x64xf32>
    %cst_512 = arith.constant dense<0.000000e+00> : vector<8x64xf32>
    %549 = tpu.matmul %234, %548, %cst_512 {dimension_numbers = #tpu.dot_dimension_numbers<[1], [0], [0], [1], [0, 0, 1, 1], [], []>} : vector<8x256xf32>, vector<256x64xf32>, vector<8x64xf32> -> vector<8x64xf32>
    %550 = arith.addf %542, %549 : vector<8x64xf32>
    %c1_513 = arith.constant 1 : index
    %c4_514 = arith.constant 4 : index
    %c0_515 = arith.constant 0 : index
    %c0_516 = arith.constant 0 : index
    %551 = vector.load %arg3[%c1_513, %c4_514, %c0_515, %c0_516] : memref<2x5x256x64xf32, #tpu.memory_space<vmem>>, vector<1x1x256x64xf32>
    %552 = vector.shape_cast %551 : vector<1x1x256x64xf32> to vector<256x64xf32>
    %cst_517 = arith.constant dense<0.000000e+00> : vector<8x64xf32>
    %553 = tpu.matmul %234, %552, %cst_517 {dimension_numbers = #tpu.dot_dimension_numbers<[1], [0], [0], [1], [0, 0, 1, 1], [], []>} : vector<8x256xf32>, vector<256x64xf32>, vector<8x64xf32> -> vector<8x64xf32>
    %554 = arith.addf %546, %553 : vector<8x64xf32>
    %555 = arith.maximumf %550, %554 : vector<8x64xf32>
    %c0_518 = arith.constant 0 : index
    %c0_519 = arith.constant 0 : index
    %c0_520 = arith.constant 0 : index
    %c0_521 = arith.constant 0 : index
    %556 = vector.load %arg3[%c0_518, %c0_519, %c0_520, %c0_521] : memref<2x5x256x64xf32, #tpu.memory_space<vmem>>, vector<1x1x256x64xf32>
    %557 = vector.shape_cast %556 : vector<1x1x256x64xf32> to vector<256x64xf32>
    %cst_522 = arith.constant dense<0.000000e+00> : vector<8x64xf32>
    %558 = tpu.matmul %140, %557, %cst_522 {dimension_numbers = #tpu.dot_dimension_numbers<[1], [0], [0], [1], [0, 0, 1, 1], [], []>} : vector<8x256xf32>, vector<256x64xf32>, vector<8x64xf32> -> vector<8x64xf32>
    %c1_523 = arith.constant 1 : index
    %c0_524 = arith.constant 0 : index
    %c0_525 = arith.constant 0 : index
    %c0_526 = arith.constant 0 : index
    %559 = vector.load %arg3[%c1_523, %c0_524, %c0_525, %c0_526] : memref<2x5x256x64xf32, #tpu.memory_space<vmem>>, vector<1x1x256x64xf32>
    %560 = vector.shape_cast %559 : vector<1x1x256x64xf32> to vector<256x64xf32>
    %cst_527 = arith.constant dense<0.000000e+00> : vector<8x64xf32>
    %561 = tpu.matmul %140, %560, %cst_527 {dimension_numbers = #tpu.dot_dimension_numbers<[1], [0], [0], [1], [0, 0, 1, 1], [], []>} : vector<8x256xf32>, vector<256x64xf32>, vector<8x64xf32> -> vector<8x64xf32>
    %c0_528 = arith.constant 0 : index
    %c1_529 = arith.constant 1 : index
    %c0_530 = arith.constant 0 : index
    %c0_531 = arith.constant 0 : index
    %562 = vector.load %arg3[%c0_528, %c1_529, %c0_530, %c0_531] : memref<2x5x256x64xf32, #tpu.memory_space<vmem>>, vector<1x1x256x64xf32>
    %563 = vector.shape_cast %562 : vector<1x1x256x64xf32> to vector<256x64xf32>
    %cst_532 = arith.constant dense<0.000000e+00> : vector<8x64xf32>
    %564 = tpu.matmul %187, %563, %cst_532 {dimension_numbers = #tpu.dot_dimension_numbers<[1], [0], [0], [1], [0, 0, 1, 1], [], []>} : vector<8x256xf32>, vector<256x64xf32>, vector<8x64xf32> -> vector<8x64xf32>
    %565 = arith.addf %558, %564 : vector<8x64xf32>
    %c1_533 = arith.constant 1 : index
    %c1_534 = arith.constant 1 : index
    %c0_535 = arith.constant 0 : index
    %c0_536 = arith.constant 0 : index
    %566 = vector.load %arg3[%c1_533, %c1_534, %c0_535, %c0_536] : memref<2x5x256x64xf32, #tpu.memory_space<vmem>>, vector<1x1x256x64xf32>
    %567 = vector.shape_cast %566 : vector<1x1x256x64xf32> to vector<256x64xf32>
    %cst_537 = arith.constant dense<0.000000e+00> : vector<8x64xf32>
    %568 = tpu.matmul %187, %567, %cst_537 {dimension_numbers = #tpu.dot_dimension_numbers<[1], [0], [0], [1], [0, 0, 1, 1], [], []>} : vector<8x256xf32>, vector<256x64xf32>, vector<8x64xf32> -> vector<8x64xf32>
    %569 = arith.addf %561, %568 : vector<8x64xf32>
    %c0_538 = arith.constant 0 : index
    %c2_539 = arith.constant 2 : index
    %c0_540 = arith.constant 0 : index
    %c0_541 = arith.constant 0 : index
    %570 = vector.load %arg3[%c0_538, %c2_539, %c0_540, %c0_541] : memref<2x5x256x64xf32, #tpu.memory_space<vmem>>, vector<1x1x256x64xf32>
    %571 = vector.shape_cast %570 : vector<1x1x256x64xf32> to vector<256x64xf32>
    %cst_542 = arith.constant dense<0.000000e+00> : vector<8x64xf32>
    %572 = tpu.matmul %234, %571, %cst_542 {dimension_numbers = #tpu.dot_dimension_numbers<[1], [0], [0], [1], [0, 0, 1, 1], [], []>} : vector<8x256xf32>, vector<256x64xf32>, vector<8x64xf32> -> vector<8x64xf32>
    %573 = arith.addf %565, %572 : vector<8x64xf32>
    %c1_543 = arith.constant 1 : index
    %c2_544 = arith.constant 2 : index
    %c0_545 = arith.constant 0 : index
    %c0_546 = arith.constant 0 : index
    %574 = vector.load %arg3[%c1_543, %c2_544, %c0_545, %c0_546] : memref<2x5x256x64xf32, #tpu.memory_space<vmem>>, vector<1x1x256x64xf32>
    %575 = vector.shape_cast %574 : vector<1x1x256x64xf32> to vector<256x64xf32>
    %cst_547 = arith.constant dense<0.000000e+00> : vector<8x64xf32>
    %576 = tpu.matmul %234, %575, %cst_547 {dimension_numbers = #tpu.dot_dimension_numbers<[1], [0], [0], [1], [0, 0, 1, 1], [], []>} : vector<8x256xf32>, vector<256x64xf32>, vector<8x64xf32> -> vector<8x64xf32>
    %577 = arith.addf %569, %576 : vector<8x64xf32>
    %c0_548 = arith.constant 0 : index
    %c3_549 = arith.constant 3 : index
    %c0_550 = arith.constant 0 : index
    %c0_551 = arith.constant 0 : index
    %578 = vector.load %arg3[%c0_548, %c3_549, %c0_550, %c0_551] : memref<2x5x256x64xf32, #tpu.memory_space<vmem>>, vector<1x1x256x64xf32>
    %579 = vector.shape_cast %578 : vector<1x1x256x64xf32> to vector<256x64xf32>
    %cst_552 = arith.constant dense<0.000000e+00> : vector<8x64xf32>
    %580 = tpu.matmul %281, %579, %cst_552 {dimension_numbers = #tpu.dot_dimension_numbers<[1], [0], [0], [1], [0, 0, 1, 1], [], []>} : vector<8x256xf32>, vector<256x64xf32>, vector<8x64xf32> -> vector<8x64xf32>
    %581 = arith.addf %573, %580 : vector<8x64xf32>
    %c1_553 = arith.constant 1 : index
    %c3_554 = arith.constant 3 : index
    %c0_555 = arith.constant 0 : index
    %c0_556 = arith.constant 0 : index
    %582 = vector.load %arg3[%c1_553, %c3_554, %c0_555, %c0_556] : memref<2x5x256x64xf32, #tpu.memory_space<vmem>>, vector<1x1x256x64xf32>
    %583 = vector.shape_cast %582 : vector<1x1x256x64xf32> to vector<256x64xf32>
    %cst_557 = arith.constant dense<0.000000e+00> : vector<8x64xf32>
    %584 = tpu.matmul %281, %583, %cst_557 {dimension_numbers = #tpu.dot_dimension_numbers<[1], [0], [0], [1], [0, 0, 1, 1], [], []>} : vector<8x256xf32>, vector<256x64xf32>, vector<8x64xf32> -> vector<8x64xf32>
    %585 = arith.addf %577, %584 : vector<8x64xf32>
    %c0_558 = arith.constant 0 : index
    %c4_559 = arith.constant 4 : index
    %c0_560 = arith.constant 0 : index
    %c0_561 = arith.constant 0 : index
    %586 = vector.load %arg3[%c0_558, %c4_559, %c0_560, %c0_561] : memref<2x5x256x64xf32, #tpu.memory_space<vmem>>, vector<1x1x256x64xf32>
    %587 = vector.shape_cast %586 : vector<1x1x256x64xf32> to vector<256x64xf32>
    %cst_562 = arith.constant dense<0.000000e+00> : vector<8x64xf32>
    %588 = tpu.matmul %328, %587, %cst_562 {dimension_numbers = #tpu.dot_dimension_numbers<[1], [0], [0], [1], [0, 0, 1, 1], [], []>} : vector<8x256xf32>, vector<256x64xf32>, vector<8x64xf32> -> vector<8x64xf32>
    %589 = arith.addf %581, %588 : vector<8x64xf32>
    %c1_563 = arith.constant 1 : index
    %c4_564 = arith.constant 4 : index
    %c0_565 = arith.constant 0 : index
    %c0_566 = arith.constant 0 : index
    %590 = vector.load %arg3[%c1_563, %c4_564, %c0_565, %c0_566] : memref<2x5x256x64xf32, #tpu.memory_space<vmem>>, vector<1x1x256x64xf32>
    %591 = vector.shape_cast %590 : vector<1x1x256x64xf32> to vector<256x64xf32>
    %cst_567 = arith.constant dense<0.000000e+00> : vector<8x64xf32>
    %592 = tpu.matmul %328, %591, %cst_567 {dimension_numbers = #tpu.dot_dimension_numbers<[1], [0], [0], [1], [0, 0, 1, 1], [], []>} : vector<8x256xf32>, vector<256x64xf32>, vector<8x64xf32> -> vector<8x64xf32>
    %593 = arith.addf %585, %592 : vector<8x64xf32>
    %594 = arith.maximumf %589, %593 : vector<8x64xf32>
    %c0_568 = arith.constant 0 : index
    %c0_569 = arith.constant 0 : index
    %c0_570 = arith.constant 0 : index
    %c0_571 = arith.constant 0 : index
    %595 = vector.load %arg3[%c0_568, %c0_569, %c0_570, %c0_571] : memref<2x5x256x64xf32, #tpu.memory_space<vmem>>, vector<1x1x256x64xf32>
    %596 = vector.shape_cast %595 : vector<1x1x256x64xf32> to vector<256x64xf32>
    %cst_572 = arith.constant dense<0.000000e+00> : vector<8x64xf32>
    %597 = tpu.matmul %234, %596, %cst_572 {dimension_numbers = #tpu.dot_dimension_numbers<[1], [0], [0], [1], [0, 0, 1, 1], [], []>} : vector<8x256xf32>, vector<256x64xf32>, vector<8x64xf32> -> vector<8x64xf32>
    %c1_573 = arith.constant 1 : index
    %c0_574 = arith.constant 0 : index
    %c0_575 = arith.constant 0 : index
    %c0_576 = arith.constant 0 : index
    %598 = vector.load %arg3[%c1_573, %c0_574, %c0_575, %c0_576] : memref<2x5x256x64xf32, #tpu.memory_space<vmem>>, vector<1x1x256x64xf32>
    %599 = vector.shape_cast %598 : vector<1x1x256x64xf32> to vector<256x64xf32>
    %cst_577 = arith.constant dense<0.000000e+00> : vector<8x64xf32>
    %600 = tpu.matmul %234, %599, %cst_577 {dimension_numbers = #tpu.dot_dimension_numbers<[1], [0], [0], [1], [0, 0, 1, 1], [], []>} : vector<8x256xf32>, vector<256x64xf32>, vector<8x64xf32> -> vector<8x64xf32>
    %c0_578 = arith.constant 0 : index
    %c1_579 = arith.constant 1 : index
    %c0_580 = arith.constant 0 : index
    %c0_581 = arith.constant 0 : index
    %601 = vector.load %arg3[%c0_578, %c1_579, %c0_580, %c0_581] : memref<2x5x256x64xf32, #tpu.memory_space<vmem>>, vector<1x1x256x64xf32>
    %602 = vector.shape_cast %601 : vector<1x1x256x64xf32> to vector<256x64xf32>
    %cst_582 = arith.constant dense<0.000000e+00> : vector<8x64xf32>
    %603 = tpu.matmul %281, %602, %cst_582 {dimension_numbers = #tpu.dot_dimension_numbers<[1], [0], [0], [1], [0, 0, 1, 1], [], []>} : vector<8x256xf32>, vector<256x64xf32>, vector<8x64xf32> -> vector<8x64xf32>
    %604 = arith.addf %597, %603 : vector<8x64xf32>
    %c1_583 = arith.constant 1 : index
    %c1_584 = arith.constant 1 : index
    %c0_585 = arith.constant 0 : index
    %c0_586 = arith.constant 0 : index
    %605 = vector.load %arg3[%c1_583, %c1_584, %c0_585, %c0_586] : memref<2x5x256x64xf32, #tpu.memory_space<vmem>>, vector<1x1x256x64xf32>
    %606 = vector.shape_cast %605 : vector<1x1x256x64xf32> to vector<256x64xf32>
    %cst_587 = arith.constant dense<0.000000e+00> : vector<8x64xf32>
    %607 = tpu.matmul %281, %606, %cst_587 {dimension_numbers = #tpu.dot_dimension_numbers<[1], [0], [0], [1], [0, 0, 1, 1], [], []>} : vector<8x256xf32>, vector<256x64xf32>, vector<8x64xf32> -> vector<8x64xf32>
    %608 = arith.addf %600, %607 : vector<8x64xf32>
    %c0_588 = arith.constant 0 : index
    %c2_589 = arith.constant 2 : index
    %c0_590 = arith.constant 0 : index
    %c0_591 = arith.constant 0 : index
    %609 = vector.load %arg3[%c0_588, %c2_589, %c0_590, %c0_591] : memref<2x5x256x64xf32, #tpu.memory_space<vmem>>, vector<1x1x256x64xf32>
    %610 = vector.shape_cast %609 : vector<1x1x256x64xf32> to vector<256x64xf32>
    %cst_592 = arith.constant dense<0.000000e+00> : vector<8x64xf32>
    %611 = tpu.matmul %328, %610, %cst_592 {dimension_numbers = #tpu.dot_dimension_numbers<[1], [0], [0], [1], [0, 0, 1, 1], [], []>} : vector<8x256xf32>, vector<256x64xf32>, vector<8x64xf32> -> vector<8x64xf32>
    %612 = arith.addf %604, %611 : vector<8x64xf32>
    %c1_593 = arith.constant 1 : index
    %c2_594 = arith.constant 2 : index
    %c0_595 = arith.constant 0 : index
    %c0_596 = arith.constant 0 : index
    %613 = vector.load %arg3[%c1_593, %c2_594, %c0_595, %c0_596] : memref<2x5x256x64xf32, #tpu.memory_space<vmem>>, vector<1x1x256x64xf32>
    %614 = vector.shape_cast %613 : vector<1x1x256x64xf32> to vector<256x64xf32>
    %cst_597 = arith.constant dense<0.000000e+00> : vector<8x64xf32>
    %615 = tpu.matmul %328, %614, %cst_597 {dimension_numbers = #tpu.dot_dimension_numbers<[1], [0], [0], [1], [0, 0, 1, 1], [], []>} : vector<8x256xf32>, vector<256x64xf32>, vector<8x64xf32> -> vector<8x64xf32>
    %616 = arith.addf %608, %615 : vector<8x64xf32>
    %c0_598 = arith.constant 0 : index
    %c3_599 = arith.constant 3 : index
    %c0_600 = arith.constant 0 : index
    %c0_601 = arith.constant 0 : index
    %617 = vector.load %arg3[%c0_598, %c3_599, %c0_600, %c0_601] : memref<2x5x256x64xf32, #tpu.memory_space<vmem>>, vector<1x1x256x64xf32>
    %618 = vector.shape_cast %617 : vector<1x1x256x64xf32> to vector<256x64xf32>
    %cst_602 = arith.constant dense<0.000000e+00> : vector<8x64xf32>
    %619 = tpu.matmul %375, %618, %cst_602 {dimension_numbers = #tpu.dot_dimension_numbers<[1], [0], [0], [1], [0, 0, 1, 1], [], []>} : vector<8x256xf32>, vector<256x64xf32>, vector<8x64xf32> -> vector<8x64xf32>
    %620 = arith.addf %612, %619 : vector<8x64xf32>
    %c1_603 = arith.constant 1 : index
    %c3_604 = arith.constant 3 : index
    %c0_605 = arith.constant 0 : index
    %c0_606 = arith.constant 0 : index
    %621 = vector.load %arg3[%c1_603, %c3_604, %c0_605, %c0_606] : memref<2x5x256x64xf32, #tpu.memory_space<vmem>>, vector<1x1x256x64xf32>
    %622 = vector.shape_cast %621 : vector<1x1x256x64xf32> to vector<256x64xf32>
    %cst_607 = arith.constant dense<0.000000e+00> : vector<8x64xf32>
    %623 = tpu.matmul %375, %622, %cst_607 {dimension_numbers = #tpu.dot_dimension_numbers<[1], [0], [0], [1], [0, 0, 1, 1], [], []>} : vector<8x256xf32>, vector<256x64xf32>, vector<8x64xf32> -> vector<8x64xf32>
    %624 = arith.addf %616, %623 : vector<8x64xf32>
    %c0_608 = arith.constant 0 : index
    %c4_609 = arith.constant 4 : index
    %c0_610 = arith.constant 0 : index
    %c0_611 = arith.constant 0 : index
    %625 = vector.load %arg3[%c0_608, %c4_609, %c0_610, %c0_611] : memref<2x5x256x64xf32, #tpu.memory_space<vmem>>, vector<1x1x256x64xf32>
    %626 = vector.shape_cast %625 : vector<1x1x256x64xf32> to vector<256x64xf32>
    %cst_612 = arith.constant dense<0.000000e+00> : vector<8x64xf32>
    %627 = tpu.matmul %422, %626, %cst_612 {dimension_numbers = #tpu.dot_dimension_numbers<[1], [0], [0], [1], [0, 0, 1, 1], [], []>} : vector<8x256xf32>, vector<256x64xf32>, vector<8x64xf32> -> vector<8x64xf32>
    %628 = arith.addf %620, %627 : vector<8x64xf32>
    %c1_613 = arith.constant 1 : index
    %c4_614 = arith.constant 4 : index
    %c0_615 = arith.constant 0 : index
    %c0_616 = arith.constant 0 : index
    %629 = vector.load %arg3[%c1_613, %c4_614, %c0_615, %c0_616] : memref<2x5x256x64xf32, #tpu.memory_space<vmem>>, vector<1x1x256x64xf32>
    %630 = vector.shape_cast %629 : vector<1x1x256x64xf32> to vector<256x64xf32>
    %cst_617 = arith.constant dense<0.000000e+00> : vector<8x64xf32>
    %631 = tpu.matmul %422, %630, %cst_617 {dimension_numbers = #tpu.dot_dimension_numbers<[1], [0], [0], [1], [0, 0, 1, 1], [], []>} : vector<8x256xf32>, vector<256x64xf32>, vector<8x64xf32> -> vector<8x64xf32>
    %632 = arith.addf %624, %631 : vector<8x64xf32>
    %633 = arith.maximumf %628, %632 : vector<8x64xf32>
    %c0_618 = arith.constant 0 : index
    %c0_619 = arith.constant 0 : index
    %c0_620 = arith.constant 0 : index
    %c0_621 = arith.constant 0 : index
    %634 = vector.load %arg3[%c0_618, %c0_619, %c0_620, %c0_621] : memref<2x5x256x64xf32, #tpu.memory_space<vmem>>, vector<1x1x256x64xf32>
    %635 = vector.shape_cast %634 : vector<1x1x256x64xf32> to vector<256x64xf32>
    %cst_622 = arith.constant dense<0.000000e+00> : vector<8x64xf32>
    %636 = tpu.matmul %328, %635, %cst_622 {dimension_numbers = #tpu.dot_dimension_numbers<[1], [0], [0], [1], [0, 0, 1, 1], [], []>} : vector<8x256xf32>, vector<256x64xf32>, vector<8x64xf32> -> vector<8x64xf32>
    %c1_623 = arith.constant 1 : index
    %c0_624 = arith.constant 0 : index
    %c0_625 = arith.constant 0 : index
    %c0_626 = arith.constant 0 : index
    %637 = vector.load %arg3[%c1_623, %c0_624, %c0_625, %c0_626] : memref<2x5x256x64xf32, #tpu.memory_space<vmem>>, vector<1x1x256x64xf32>
    %638 = vector.shape_cast %637 : vector<1x1x256x64xf32> to vector<256x64xf32>
    %cst_627 = arith.constant dense<0.000000e+00> : vector<8x64xf32>
    %639 = tpu.matmul %328, %638, %cst_627 {dimension_numbers = #tpu.dot_dimension_numbers<[1], [0], [0], [1], [0, 0, 1, 1], [], []>} : vector<8x256xf32>, vector<256x64xf32>, vector<8x64xf32> -> vector<8x64xf32>
    %c0_628 = arith.constant 0 : index
    %c1_629 = arith.constant 1 : index
    %c0_630 = arith.constant 0 : index
    %c0_631 = arith.constant 0 : index
    %640 = vector.load %arg3[%c0_628, %c1_629, %c0_630, %c0_631] : memref<2x5x256x64xf32, #tpu.memory_space<vmem>>, vector<1x1x256x64xf32>
    %641 = vector.shape_cast %640 : vector<1x1x256x64xf32> to vector<256x64xf32>
    %cst_632 = arith.constant dense<0.000000e+00> : vector<8x64xf32>
    %642 = tpu.matmul %375, %641, %cst_632 {dimension_numbers = #tpu.dot_dimension_numbers<[1], [0], [0], [1], [0, 0, 1, 1], [], []>} : vector<8x256xf32>, vector<256x64xf32>, vector<8x64xf32> -> vector<8x64xf32>
    %643 = arith.addf %636, %642 : vector<8x64xf32>
    %c1_633 = arith.constant 1 : index
    %c1_634 = arith.constant 1 : index
    %c0_635 = arith.constant 0 : index
    %c0_636 = arith.constant 0 : index
    %644 = vector.load %arg3[%c1_633, %c1_634, %c0_635, %c0_636] : memref<2x5x256x64xf32, #tpu.memory_space<vmem>>, vector<1x1x256x64xf32>
    %645 = vector.shape_cast %644 : vector<1x1x256x64xf32> to vector<256x64xf32>
    %cst_637 = arith.constant dense<0.000000e+00> : vector<8x64xf32>
    %646 = tpu.matmul %375, %645, %cst_637 {dimension_numbers = #tpu.dot_dimension_numbers<[1], [0], [0], [1], [0, 0, 1, 1], [], []>} : vector<8x256xf32>, vector<256x64xf32>, vector<8x64xf32> -> vector<8x64xf32>
    %647 = arith.addf %639, %646 : vector<8x64xf32>
    %c0_638 = arith.constant 0 : index
    %c2_639 = arith.constant 2 : index
    %c0_640 = arith.constant 0 : index
    %c0_641 = arith.constant 0 : index
    %648 = vector.load %arg3[%c0_638, %c2_639, %c0_640, %c0_641] : memref<2x5x256x64xf32, #tpu.memory_space<vmem>>, vector<1x1x256x64xf32>
    %649 = vector.shape_cast %648 : vector<1x1x256x64xf32> to vector<256x64xf32>
    %cst_642 = arith.constant dense<0.000000e+00> : vector<8x64xf32>
    %650 = tpu.matmul %422, %649, %cst_642 {dimension_numbers = #tpu.dot_dimension_numbers<[1], [0], [0], [1], [0, 0, 1, 1], [], []>} : vector<8x256xf32>, vector<256x64xf32>, vector<8x64xf32> -> vector<8x64xf32>
    %651 = arith.addf %643, %650 : vector<8x64xf32>
    %c1_643 = arith.constant 1 : index
    %c2_644 = arith.constant 2 : index
    %c0_645 = arith.constant 0 : index
    %c0_646 = arith.constant 0 : index
    %652 = vector.load %arg3[%c1_643, %c2_644, %c0_645, %c0_646] : memref<2x5x256x64xf32, #tpu.memory_space<vmem>>, vector<1x1x256x64xf32>
    %653 = vector.shape_cast %652 : vector<1x1x256x64xf32> to vector<256x64xf32>
    %cst_647 = arith.constant dense<0.000000e+00> : vector<8x64xf32>
    %654 = tpu.matmul %422, %653, %cst_647 {dimension_numbers = #tpu.dot_dimension_numbers<[1], [0], [0], [1], [0, 0, 1, 1], [], []>} : vector<8x256xf32>, vector<256x64xf32>, vector<8x64xf32> -> vector<8x64xf32>
    %655 = arith.addf %647, %654 : vector<8x64xf32>
    %c0_648 = arith.constant 0 : index
    %c3_649 = arith.constant 3 : index
    %c0_650 = arith.constant 0 : index
    %c0_651 = arith.constant 0 : index
    %656 = vector.load %arg3[%c0_648, %c3_649, %c0_650, %c0_651] : memref<2x5x256x64xf32, #tpu.memory_space<vmem>>, vector<1x1x256x64xf32>
    %657 = vector.shape_cast %656 : vector<1x1x256x64xf32> to vector<256x64xf32>
    %cst_652 = arith.constant dense<0.000000e+00> : vector<8x64xf32>
    %658 = tpu.matmul %469, %657, %cst_652 {dimension_numbers = #tpu.dot_dimension_numbers<[1], [0], [0], [1], [0, 0, 1, 1], [], []>} : vector<8x256xf32>, vector<256x64xf32>, vector<8x64xf32> -> vector<8x64xf32>
    %659 = arith.addf %651, %658 : vector<8x64xf32>
    %c1_653 = arith.constant 1 : index
    %c3_654 = arith.constant 3 : index
    %c0_655 = arith.constant 0 : index
    %c0_656 = arith.constant 0 : index
    %660 = vector.load %arg3[%c1_653, %c3_654, %c0_655, %c0_656] : memref<2x5x256x64xf32, #tpu.memory_space<vmem>>, vector<1x1x256x64xf32>
    %661 = vector.shape_cast %660 : vector<1x1x256x64xf32> to vector<256x64xf32>
    %cst_657 = arith.constant dense<0.000000e+00> : vector<8x64xf32>
    %662 = tpu.matmul %469, %661, %cst_657 {dimension_numbers = #tpu.dot_dimension_numbers<[1], [0], [0], [1], [0, 0, 1, 1], [], []>} : vector<8x256xf32>, vector<256x64xf32>, vector<8x64xf32> -> vector<8x64xf32>
    %663 = arith.addf %655, %662 : vector<8x64xf32>
    %c0_658 = arith.constant 0 : index
    %c4_659 = arith.constant 4 : index
    %c0_660 = arith.constant 0 : index
    %c0_661 = arith.constant 0 : index
    %664 = vector.load %arg3[%c0_658, %c4_659, %c0_660, %c0_661] : memref<2x5x256x64xf32, #tpu.memory_space<vmem>>, vector<1x1x256x64xf32>
    %665 = vector.shape_cast %664 : vector<1x1x256x64xf32> to vector<256x64xf32>
    %cst_662 = arith.constant dense<0.000000e+00> : vector<8x64xf32>
    %666 = tpu.matmul %516, %665, %cst_662 {dimension_numbers = #tpu.dot_dimension_numbers<[1], [0], [0], [1], [0, 0, 1, 1], [], []>} : vector<8x256xf32>, vector<256x64xf32>, vector<8x64xf32> -> vector<8x64xf32>
    %667 = arith.addf %659, %666 : vector<8x64xf32>
    %c1_663 = arith.constant 1 : index
    %c4_664 = arith.constant 4 : index
    %c0_665 = arith.constant 0 : index
    %c0_666 = arith.constant 0 : index
    %668 = vector.load %arg3[%c1_663, %c4_664, %c0_665, %c0_666] : memref<2x5x256x64xf32, #tpu.memory_space<vmem>>, vector<1x1x256x64xf32>
    %669 = vector.shape_cast %668 : vector<1x1x256x64xf32> to vector<256x64xf32>
    %cst_667 = arith.constant dense<0.000000e+00> : vector<8x64xf32>
    %670 = tpu.matmul %516, %669, %cst_667 {dimension_numbers = #tpu.dot_dimension_numbers<[1], [0], [0], [1], [0, 0, 1, 1], [], []>} : vector<8x256xf32>, vector<256x64xf32>, vector<8x64xf32> -> vector<8x64xf32>
    %671 = arith.addf %663, %670 : vector<8x64xf32>
    %672 = arith.maximumf %667, %671 : vector<8x64xf32>
    %673 = arith.maximumf %555, %594 : vector<8x64xf32>
    %c0_668 = arith.constant 0 : index
    %c0_669 = arith.constant 0 : index
    %674 = vector.load %arg5[%c0_668, %c0_669] : memref<1x64xf32, #tpu.memory_space<vmem>>, vector<1x64xf32>
    %675 = vector.broadcast %674 : vector<1x64xf32> to vector<8x64xf32>
    %676 = arith.addf %673, %675 : vector<8x64xf32>
    %cst_670 = arith.constant 0.000000e+00 : f32
    %677 = vector.broadcast %cst_670 : f32 to vector<8x64xf32>
    %678 = arith.maximumf %676, %677 : vector<8x64xf32>
    %679 = arith.maximumf %633, %672 : vector<8x64xf32>
    %c0_671 = arith.constant 0 : index
    %c0_672 = arith.constant 0 : index
    %680 = vector.load %arg5[%c0_671, %c0_672] : memref<1x64xf32, #tpu.memory_space<vmem>>, vector<1x64xf32>
    %681 = vector.broadcast %680 : vector<1x64xf32> to vector<8x64xf32>
    %682 = arith.addf %679, %681 : vector<8x64xf32>
    %cst_673 = arith.constant 0.000000e+00 : f32
    %683 = vector.broadcast %cst_673 : f32 to vector<8x64xf32>
    %684 = arith.maximumf %682, %683 : vector<8x64xf32>
    %c0_674 = arith.constant 0 : index
    %c0_675 = arith.constant 0 : index
    %685 = vector.load %arg6[%c0_674, %c0_675] : memref<64x128xf32, #tpu.memory_space<vmem>>, vector<64x128xf32>
    %cst_676 = arith.constant dense<0.000000e+00> : vector<8x128xf32>
    %686 = tpu.matmul %678, %685, %cst_676 {dimension_numbers = #tpu.dot_dimension_numbers<[1], [0], [0], [1], [0, 0, 1, 1], [], []>} : vector<8x64xf32>, vector<64x128xf32>, vector<8x128xf32> -> vector<8x128xf32>
    %c0_677 = arith.constant 0 : index
    %c0_678 = arith.constant 0 : index
    %687 = vector.load %arg7[%c0_677, %c0_678] : memref<64x128xf32, #tpu.memory_space<vmem>>, vector<64x128xf32>
    %cst_679 = arith.constant dense<0.000000e+00> : vector<8x128xf32>
    %688 = tpu.matmul %684, %687, %cst_679 {dimension_numbers = #tpu.dot_dimension_numbers<[1], [0], [0], [1], [0, 0, 1, 1], [], []>} : vector<8x64xf32>, vector<64x128xf32>, vector<8x128xf32> -> vector<8x128xf32>
    %689 = arith.addf %686, %688 : vector<8x128xf32>
    %c0_680 = arith.constant 0 : index
    %c0_681 = arith.constant 0 : index
    %690 = vector.load %arg8[%c0_680, %c0_681] : memref<1x128xf32, #tpu.memory_space<vmem>>, vector<1x128xf32>
    %691 = vector.broadcast %690 : vector<1x128xf32> to vector<8x128xf32>
    %692 = arith.addf %689, %691 : vector<8x128xf32>
    %cst_682 = arith.constant 0.000000e+00 : f32
    %693 = vector.broadcast %cst_682 : f32 to vector<8x128xf32>
    %694 = arith.maximumf %692, %693 : vector<8x128xf32>
    %c0_683 = arith.constant 0 : index
    %c0_684 = arith.constant 0 : index
    %695 = vector.load %arg9[%c0_683, %c0_684] : memref<128x64xf32, #tpu.memory_space<vmem>>, vector<128x64xf32>
    %cst_685 = arith.constant dense<0.000000e+00> : vector<8x64xf32>
    %696 = tpu.matmul %694, %695, %cst_685 {dimension_numbers = #tpu.dot_dimension_numbers<[1], [0], [0], [1], [0, 0, 1, 1], [], []>} : vector<8x128xf32>, vector<128x64xf32>, vector<8x64xf32> -> vector<8x64xf32>
    %c0_686 = arith.constant 0 : index
    %c0_687 = arith.constant 0 : index
    %697 = vector.load %arg10[%c0_686, %c0_687] : memref<1x64xf32, #tpu.memory_space<vmem>>, vector<1x64xf32>
    %698 = vector.broadcast %697 : vector<1x64xf32> to vector<8x64xf32>
    %699 = arith.addf %696, %698 : vector<8x64xf32>
    %cst_688 = arith.constant 0.000000e+00 : f32
    %700 = vector.broadcast %cst_688 : f32 to vector<8x64xf32>
    %701 = arith.maximumf %699, %700 : vector<8x64xf32>
    %c0_689 = arith.constant 0 : index
    %c0_690 = arith.constant 0 : index
    %702 = vector.load %arg11[%c0_689, %c0_690] : memref<64x32xf32, #tpu.memory_space<vmem>>, vector<64x32xf32>
    %cst_691 = arith.constant dense<0.000000e+00> : vector<8x32xf32>
    %703 = tpu.matmul %701, %702, %cst_691 {dimension_numbers = #tpu.dot_dimension_numbers<[1], [0], [0], [1], [0, 0, 1, 1], [], []>} : vector<8x64xf32>, vector<64x32xf32>, vector<8x32xf32> -> vector<8x32xf32>
    %c0_692 = arith.constant 0 : index
    %c0_693 = arith.constant 0 : index
    %704 = vector.load %arg12[%c0_692, %c0_693] : memref<1x32xf32, #tpu.memory_space<vmem>>, vector<1x32xf32>
    %705 = vector.broadcast %704 : vector<1x32xf32> to vector<8x32xf32>
    %706 = arith.addf %703, %705 : vector<8x32xf32>
    %cst_694 = arith.constant 0.000000e+00 : f32
    %707 = vector.broadcast %cst_694 : f32 to vector<8x32xf32>
    %708 = arith.maximumf %706, %707 : vector<8x32xf32>
    %c0_695 = arith.constant 0 : index
    %c0_696 = arith.constant 0 : index
    %709 = vector.load %arg13[%c0_695, %c0_696] : memref<32x128xf32, #tpu.memory_space<vmem>>, vector<32x128xf32>
    %cst_697 = arith.constant dense<0.000000e+00> : vector<8x128xf32>
    %710 = tpu.matmul %708, %709, %cst_697 {dimension_numbers = #tpu.dot_dimension_numbers<[1], [0], [0], [1], [0, 0, 1, 1], [], []>} : vector<8x32xf32>, vector<32x128xf32>, vector<8x128xf32> -> vector<8x128xf32>
    %c0_698 = arith.constant 0 : index
    %c0_699 = arith.constant 0 : index
    %711 = vector.load %arg14[%c0_698, %c0_699] : memref<1x128xf32, #tpu.memory_space<vmem>>, vector<1x128xf32>
    %712 = vector.broadcast %711 : vector<1x128xf32> to vector<8x128xf32>
    %713 = arith.addf %710, %712 : vector<8x128xf32>
    %c0_700 = arith.constant 0 : index
    %c0_701 = arith.constant 0 : index
    %714 = vector.load %arg15[%c0_700, %c0_701] : memref<8x128xf32, #tpu.memory_space<vmem>>, vector<8x128xf32>
    tpu.vector_store %arg15[%c0_700, %c0_701], %713 {strides = array<i32>} : memref<8x128xf32, #tpu.memory_space<vmem>>, vector<8x128xf32>,
    return
  }
  func.func @transform_0(%arg0: i32) -> (i32, i32, i32) {
    %c0_i32 = arith.constant 0 : i32
    %c0_i32_0 = arith.constant 0 : i32
    %c0_i32_1 = arith.constant 0 : i32
    return %c0_i32, %arg0, %c0_i32_0 : i32, i32, i32
  }
  func.func @transform_1(%arg0: i32) -> (i32, i32, i32) {
    %c0_i32 = arith.constant 0 : i32
    %c0_i32_0 = arith.constant 0 : i32
    %c0_i32_1 = arith.constant 0 : i32
    %c0_i32_2 = arith.constant 0 : i32
    return %c0_i32, %c0_i32_0, %c0_i32_1 : i32, i32, i32
  }
  func.func @transform_2(%arg0: i32) -> (i32, i32, i32, i32) {
    %c0_i32 = arith.constant 0 : i32
    %c0_i32_0 = arith.constant 0 : i32
    %c0_i32_1 = arith.constant 0 : i32
    %c0_i32_2 = arith.constant 0 : i32
    %c0_i32_3 = arith.constant 0 : i32
    return %c0_i32, %c0_i32_0, %c0_i32_1, %c0_i32_2 : i32, i32, i32, i32
  }
  func.func @transform_3(%arg0: i32) -> (i32, i32) {
    %c0_i32 = arith.constant 0 : i32
    %c0_i32_0 = arith.constant 0 : i32
    %c0_i32_1 = arith.constant 0 : i32
    return %c0_i32, %c0_i32_0 : i32, i32
  }
  func.func @transform_4(%arg0: i32) -> (i32, i32) {
    %c0_i32 = arith.constant 0 : i32
    %c0_i32_0 = arith.constant 0 : i32
    %c0_i32_1 = arith.constant 0 : i32
    return %c0_i32, %c0_i32_0 : i32, i32
  }
  func.func @transform_5(%arg0: i32) -> (i32, i32) {
    %c0_i32 = arith.constant 0 : i32
    %c0_i32_0 = arith.constant 0 : i32
    %c0_i32_1 = arith.constant 0 : i32
    return %c0_i32, %c0_i32_0 : i32, i32
  }
  func.func @transform_6(%arg0: i32) -> (i32, i32) {
    %c0_i32 = arith.constant 0 : i32
    %c0_i32_0 = arith.constant 0 : i32
    %c0_i32_1 = arith.constant 0 : i32
    return %c0_i32, %c0_i32_0 : i32, i32
  }
  func.func @transform_7(%arg0: i32) -> (i32, i32) {
    %c0_i32 = arith.constant 0 : i32
    %c0_i32_0 = arith.constant 0 : i32
    %c0_i32_1 = arith.constant 0 : i32
    return %c0_i32, %c0_i32_0 : i32, i32
  }
  func.func @transform_8(%arg0: i32) -> (i32, i32) {
    %c0_i32 = arith.constant 0 : i32
    %c0_i32_0 = arith.constant 0 : i32
    %c0_i32_1 = arith.constant 0 : i32
    return %c0_i32, %c0_i32_0 : i32, i32
  }
  func.func @transform_9(%arg0: i32) -> (i32, i32) {
    %c0_i32 = arith.constant 0 : i32
    %c0_i32_0 = arith.constant 0 : i32
    %c0_i32_1 = arith.constant 0 : i32
    return %c0_i32, %c0_i32_0 : i32, i32
  }
  func.func @transform_10(%arg0: i32) -> (i32, i32) {
    %c0_i32 = arith.constant 0 : i32
    %c0_i32_0 = arith.constant 0 : i32
    %c0_i32_1 = arith.constant 0 : i32
    return %c0_i32, %c0_i32_0 : i32, i32
  }
  func.func @transform_11(%arg0: i32) -> (i32, i32) {
    %c0_i32 = arith.constant 0 : i32
    %c0_i32_0 = arith.constant 0 : i32
    %c0_i32_1 = arith.constant 0 : i32
    return %c0_i32, %c0_i32_0 : i32, i32
  }
  func.func @transform_12(%arg0: i32) -> (i32, i32) {
    %c0_i32 = arith.constant 0 : i32
    %c0_i32_0 = arith.constant 0 : i32
    %c0_i32_1 = arith.constant 0 : i32
    return %c0_i32, %c0_i32_0 : i32, i32
  }
  func.func @transform_13(%arg0: i32) -> (i32, i32) {
    %c0_i32 = arith.constant 0 : i32
    %c0_i32_0 = arith.constant 0 : i32
    %c0_i32_1 = arith.constant 0 : i32
    return %c0_i32, %c0_i32_0 : i32, i32
  }
  func.func @transform_14(%arg0: i32) -> (i32, i32) {
    %c0_i32 = arith.constant 0 : i32
    %c0_i32_0 = arith.constant 0 : i32
    return %arg0, %c0_i32 : i32, i32
  }
}

</mosaic_0001>

<bundles_post_ra>
// kernel: tile.13
= control target key start
LH: loop header
LB: loop body
LE: loop exit
PB: predicated region body
PF: predicated region fallthrough
CT: control target
= control target key end

     0   :  { %s28_s0 = inlined_call_operand.vmem [shape: f32[16], index: 0, kind: input, shape index: {}]   ;;  %s29_s1 = inlined_call_operand.vmem [shape: f32[12,16], index: 1, kind: output, shape index: {}]  }
   0x1   :  { %v4_v0 = vld [vmem:[%s28_s0] ss:$0 sm:$0xff] }
   0x2   :  { %5 = vst [vmem:[%s29_s1] sm:$0xff] %v4_v0  ;;  %8 = vst [vmem:[%s29_s1 + $0x8] sm:$0xff] %v4_v0 }

// kernel: tile.14
= control target key start
LH: loop header
LB: loop body
LE: loop exit
PB: predicated region body
PF: predicated region fallthrough
CT: control target
= control target key end

     0   :  { %s71_s10 = smov 112   ;;  %s72_s11 = smov 80   ;;  %vm4_vm0 = vcmask 130048   ;;  %vm10_vm1 = vcmask 1048448   ;;  %vm16_vm2 = vcmask 917248   ;;  %vm22_vm3 = vcmask 786048   ;;  %s115_s0 = inlined_call_operand.vmem [shape: f32[12,16], index: 0, kind: input, shape index: {}]   ;;  %s116_s1 = inlined_call_operand.vmem [shape: f32[192], index: 1, kind: output, shape index: {}]  }
   0x1   :  { %v57_v0 = vld [vmem:[%s115_s0 + $0x7] sm:$0x1]   ;;  %v59_v1 = vld [vmem:[%s115_s0 + $0x5] sm:$0x1]   ;;  %v58_v2 = vld [vmem:[%s115_s0 + $0x6] sm:$0x1]  }
   0x2   :  { %8 = vrot.lane.b32.xlu0 %v57_v0, %s71_s10  ;;  %20 = vrot.lane.b32.xlu1 %v59_v1, %s72_s11  ;;  %v60_v3 = vld [vmem:[%s115_s0 + $0x4] sm:$0x1]   ;;  %s31_s16 = smov 3  ;;  %s38_s17 = smov 3  ;;  %vm28_vm4 = vcmask 654848   ;;  %vm35_vm5 = vcmask 523648  }
   0x3   :  { %s73_s18 = smov 96   ;;  %s74_s19 = smov 64   ;;  %v61_v4 = vld [vmem:[%s115_s0 + $0x3] ss:$8 sm:%s31_s16]   ;;  %v62_v5 = vld [vmem:[%s115_s0 + $0x2] ss:$8 sm:%s38_s17]  }
   0x4   :  { %s2_s22 = smov 3  ;;  %s45_s27 = smov 3  ;;  %vm42_vm6 = vcmask 392448   ;;  %vm49_vm7 = vcmask 261248  }
   0x5   :  { %v3_v6 = vld [vmem:[%s115_s0] ss:$8 sm:%s2_s22]   ;;  %s75_s28 = smov 48   ;;  %s76_s29 = smov 32   ;;  %v63_v7 = vld [vmem:[%s115_s0 + $0x1] ss:$8 sm:%s45_s27]  }
   0x6   :  { %14 = vrot.lane.b32.xlu0 %v58_v2, %s73_s18  ;;  %26 = vrot.lane.b32.xlu1 %v60_v3, %s74_s19  ;;  %5 = vst.msk [vmem:[#allocation0] sm:$0x3] %vm4_vm0, %v3_v6   ;;  %s77_s0 = smov 16  }
   0xa   :  { %33 = vrot.lane.b32.xlu0 %v61_v4, %s75_s28  ;;  %40 = vrot.lane.b32.xlu1 %v62_v5, %s76_s29 }
   0xe   :  { %47 = vrot.lane.b32.xlu0 %v63_v7, %s77_s0 }
  0x74   :  { %v9_v8 = vpop.permute.xlu0 %8   ;;  %v21_v9 = vpop.permute.xlu1 %20  }
  0x75   :  { %11 = vst.msk [vmem:[#allocation0] sm:$0x1] %vm10_vm1, %v9_v8  }
  0x78   :  { %v15_v10 = vpop.permute.xlu0 %14   ;;  %v27_v11 = vpop.permute.xlu1 %26  }
  0x79   :  { %17 = vst.msk [vmem:[#allocation0] sm:$0x1] %vm16_vm2, %v15_v10  }
  0x7a   :  { %23 = vst.msk [vmem:[#allocation0] sm:$0x1] %vm22_vm3, %v21_v9  }
  0x7b   :  { %29 = vst.msk [vmem:[#allocation0] sm:$0x1] %vm28_vm4, %v27_v11  }
  0x7c   :  { %v34_v12 = vpop.permute.xlu0 %33   ;;  %v41_v13 = vpop.permute.xlu1 %40  }
  0x7d   :  { %36 = vst.msk [vmem:[#allocation0] sm:$0x3] %vm35_vm5, %v34_v12  }
  0x7e   :  { %43 = vst.msk [vmem:[#allocation0] sm:$0x3] %vm42_vm6, %v41_v13  }
  0x80   :  { %v48_v14 = vpop.permute.xlu0 %47  }
  0x81   :  { %50 = vst.msk [vmem:[#allocation0] sm:$0x3] %vm49_vm7, %v48_v14  }
  0x88   :  { %v54_v15 = vld [vmem:[#allocation0] sm:$0x3] }
  0x89   :  { %56 = vst [vmem:[%s116_s1] sm:$0x3] %v54_v15 }

// kernel: tile.18
= control target key start
LH: loop header
LB: loop body
LE: loop exit
PB: predicated region body
PF: predicated region fallthrough
CT: control target
= control target key end

     0   :  { %s22_s0 = inlined_call_operand.vmem [shape: f32[32], index: 0, kind: input, shape index: {}]   ;;  %s23_s1 = inlined_call_operand.vmem [shape: f32[2,32], index: 1, kind: output, shape index: {}]  }
   0x1   :  { %v4_v0 = vld [vmem:[%s22_s0] ss:$0 sm:$0xff] }
   0x2   :  { %5 = vst [vmem:[%s23_s1] sm:$0x3] %v4_v0 }

// kernel: tile.19
= control target key start
LH: loop header
LB: loop body
LE: loop exit
PB: predicated region body
PF: predicated region fallthrough
CT: control target
= control target key end

     0   :  { %vm7_vm0 = vcmask 261120   ;;  %vm13_vm1 = vcmask 523520   ;;  %s39_s0 = inlined_call_operand.vmem [shape: f32[2,32], index: 0, kind: input, shape index: {}]   ;;  %s40_s1 = inlined_call_operand.vmem [shape: f32[1,64], index: 1, kind: output, shape index: {}]  }
   0x1   :  { %v4_v0 = vld [vmem:[%s39_s0] sm:$0x3]  ;;  %s22_s0 = smov 32  }
   0x2   :  { %5 = vst [vmem:[#allocation1] sm:$0x3] %v4_v0 }
   0x9   :  { %v10_v1 = vld [vmem:[#allocation1 + $0x1] sm:$0x1]   ;;  %v6_v2 = vld [vmem:[#allocation1] sm:$0x1]  }
   0xa   :  { %11 = vrot.lane.b32.xlu0 %v10_v1, %s22_s0  ;;  %8 = vst.msk [vmem:[#allocation0] sm:$0x1] %vm7_vm0, %v6_v2  }
  0x7c   :  { %v12_v3 = vpop.permute.xlu0 %11  }
  0x7d   :  { %14 = vst.msk [vmem:[#allocation0] sm:$0x1] %vm13_vm1, %v12_v3  }
  0x84   :  { %v18_v4 = vld [vmem:[#allocation0] sm:$0x1] }
  0x85   :  { %20 = vst [vmem:[%s40_s1] sm:$0x1] %v18_v4 }

// kernel: digit_classifier_forward.1
= control target key start
LH: loop header
LB: loop body
LE: loop exit
PB: predicated region body
PF: predicated region fallthrough
CT: control target
= control target key end

     0   :  { %vm119_vm0 = vcmask 1043456   ;;  %v36853_v3 = vmov 0.0   ;;  %vm30609_vm1 = vmmov 1   ;;  %vm115_vm3 = vcmask 228352   ;;  %s36838_s1 = inlined_call_operand.vmem [shape: f32[6,28,1024], index: 1, kind: input, shape index: {}]   ;;  %s36839_s0 = inlined_call_operand.vmem [shape: f32[28,8,28], index: 0, kind: input, shape index: {}]   ;;  %s36840_s3 = inlined_call_operand.vmem [shape: f32[1,256], index: 3, kind: input, shape index: {}]   ;;  %s36841_s2 = inlined_call_operand.vmem [shape: f32[2,5,256,64], index: 2, kind: input, shape index: {}]   ;;  %s36842_s5 = inlined_call_operand.vmem [shape: f32[64,128], index: 5, kind: input, shape index: {}]   ;;  %s36843_s4 = inlined_call_operand.vmem [shape: f32[1,64], index: 4, kind: input, shape index: {}]   ;;  %s36844_s6 = inlined_call_operand.vmem [shape: f32[64,128], index: 6, kind: input, shape index: {}]   ;;  %s36845_s8 = inlined_call_operand.vmem [shape: f32[128,64], index: 8, kind: input, shape index: {}]   ;;  %s36846_s10 = inlined_call_operand.vmem [shape: f32[64,32], index: 10, kind: input, shape index: {}]   ;;  %s36847_s7 = inlined_call_operand.vmem [shape: f32[1,128], index: 7, kind: input, shape index: {}]   ;;  %s36848_s9 = inlined_call_operand.vmem [shape: f32[1,64], index: 9, kind: input, shape index: {}]   ;;  %s36849_s12 = inlined_call_operand.vmem [shape: f32[32,128], index: 12, kind: input, shape index: {}]   ;;  %s36850_s11 = inlined_call_operand.vmem [shape: f32[1,32], index: 11, kind: input, shape index: {}]   ;;  %s36851_s13 = inlined_call_operand.vmem [shape: f32[1,128], index: 13, kind: input, shape index: {}]   ;;  %s36852_s14 = inlined_call_operand.vmem [shape: f32[8,128], index: 14, kind: output, shape index: {}]  }
   0x1   :  { %v23354_v0 = vld [vmem:[%s36838_s1 + $0x108] sm:$0xff]  ;;  %v23356_v2 = vld [vmem:[%s36838_s1 + $0x118] sm:$0xff]  ;;  %208 = vmatprep.mubr.f32.mxu0 %v36853_v3  ;;  %279 = vmatprep.mubr.f32.mxu1 %v36853_v3  ;;  %v23353_v6 = vld [vmem:[%s36838_s1 + $0x100] sm:$0xff]  ;;  %vm30611_vm4 = vmmov 0   ;;  %vm22923_vm5 = vcmask 523264   ;;  %vm23273_vm6 = vcmask 261120  }
   0x2   :  { %v23362_v1 = vld [vmem:[%s36838_s1 + $0x148] sm:$0xff]  ;;  %v23364_v5 = vld [vmem:[%s36838_s1 + $0x158] sm:$0xff]  ;;  %v23361_v7 = vld [vmem:[%s36838_s1 + $0x140] sm:$0xff] }
   0x3   :  { %v30698_v4 = vpack.c.bf16 %v23362_v1, %v23354_v0  ;;  %v30709_v8 = vpack.c.bf16 %v23364_v5, %v23356_v2  ;;  %v30711_v9 = vpack.c.bf16 %v23361_v7, %v23353_v6  ;;  %v23355_v10 = vld [vmem:[%s36838_s1 + $0x110] sm:$0xff]  ;;  %v23370_v12 = vld [vmem:[%s36838_s1 + $0x188] sm:$0xff]  ;;  %vm30729_vm2 = vmpackc.low %vm119_vm0, %vm30609_vm1 }
   0x4   :  { %v23363_v11 = vld [vmem:[%s36838_s1 + $0x150] sm:$0xff]  ;;  %v23378_v14 = vld [vmem:[%s36838_s1 + $0x1c8] sm:$0xf]  ;;  %v23372_v16 = vld [vmem:[%s36838_s1 + $0x198] sm:$0xff] }
   0x5   :  { %37289 = vst [vmem:[#allocation2_spill] sm:$0xff] %v30698_v4  ;;  %37290 = vst [vmem:[#allocation3_spill] sm:$0xff] %v30709_v8  ;;  %26179 = vmatprep.subr.bf16.mxu0 %v30698_v4  ;;  %v30723_v13 = vpack.c.bf16 %v23363_v11, %v23355_v10  ;;  %26189 = vmatprep.subr.bf16.mxu1 %v30709_v8  ;;  %v30738_v17 = vpack.c.bf16 %v23378_v14, %v23370_v12  ;;  %v23380_v18 = vld [vmem:[%s36838_s1 + $0x1d8] sm:$0xf]  ;;  %v23369_v19 = vld [vmem:[%s36838_s1 + $0x180] sm:$0xff] }
   0x6   :  { %37291 = vst [vmem:[#allocation4_spill] sm:$0xff] %v30711_v9  ;;  %26181 = vmatpush1.bf16.msra.mxu0 %v30711_v9  ;;  %v23377_v20 = vld [vmem:[%s36838_s1 + $0x1c0] sm:$0xf]  ;;  %v30750_v21 = vpack.c.bf16 %v23380_v18, %v23372_v16  ;;  %v23371_v23 = vld [vmem:[%s36838_s1 + $0x190] sm:$0xff]  ;;  %v23358_v25 = vld [vmem:[%s36838_s1 + $0x128] sm:$0xff] }
   0x7   :  { %37292 = vst [vmem:[#allocation5_spill] sm:$0xff] %v30723_v13  ;;  %37295 = vst [vmem:[#allocation6_spill] sm:$0xff] %v30738_v17  ;;  %26191 = vmatpush1.bf16.msra.mxu1 %v30723_v13  ;;  %v30752_v22 = vpack.c.bf16 %v23377_v20, %v23369_v19  ;;  %v23379_v24 = vld [vmem:[%s36838_s1 + $0x1d0] sm:$0xf]  ;;  %26184 = vmatprep.subr.msk.bf16.mxu0 %vm30729_vm2, %v30738_v17  ;;  %v23366_v27 = vld [vmem:[%s36838_s1 + $0x168] sm:$0xff] }
   0x8   :  { %37296 = vst [vmem:[#allocation7_spill] sm:$0xff] %v30750_v21  ;;  %v30766_v26 = vpack.c.bf16 %v23379_v24, %v23371_v23  ;;  %v23360_v28 = vld [vmem:[%s36838_s1 + $0x138] sm:$0xff]  ;;  %26194 = vmatprep.subr.msk.bf16.mxu1 %vm30729_vm2, %v30750_v21  ;;  %v30780_v30 = vpack.c.bf16 %v23366_v27, %v23358_v25  ;;  %v30787_v32 = vld [vmem:[%s36839_s0 + $0x8] sm:$0xff]  ;;  %v23357_v33 = vld [vmem:[%s36838_s1 + $0x120] sm:$0xff] }
   0x9   :  { %37297 = vst [vmem:[#allocation8_spill] sm:$0xff] %v30752_v22  ;;  %v23368_v29 = vld [vmem:[%s36838_s1 + $0x178] sm:$0xff]  ;;  %v23365_v34 = vld [vmem:[%s36838_s1 + $0x160] sm:$0xff]  ;;  %v23359_v36 = vld [vmem:[%s36838_s1 + $0x130] sm:$0xff] }
   0xa   :  { %37298 = vst [vmem:[#allocation9_spill] sm:$0xff] %v30766_v26  ;;  %37299 = vst [vmem:[#allocation10_spill] sm:$0xff] %v30780_v30  ;;  %v30782_v31 = vpack.c.bf16 %v23368_v29, %v23360_v28  ;;  %26187 = vmatpush1.bf16.msk.msra.mxu0 %vm30729_vm2, %v30752_v22  ;;  %v30798_v35 = vpack.c.bf16 %v23365_v34, %v23357_v33  ;;  %v23367_v37 = vld [vmem:[%s36838_s1 + $0x170] sm:$0xff]  ;;  %v23374_v38 = vld [vmem:[%s36838_s1 + $0x1a8] sm:$0xff] }
   0xb   :  { %26197 = vmatpush1.bf16.msk.msra.mxu1 %vm30729_vm2, %v30766_v26  ;;  %26199 = vmatprep.subr.bf16.mxu0 %v30780_v30  ;;  %v30813_v39 = vpack.c.bf16 %v23367_v37, %v23359_v36  ;;  %v23382_v40 = vld [vmem:[%s36838_s1 + $0x1e8] sm:$0xf]  ;;  %v23376_v41 = vld [vmem:[%s36838_s1 + $0x1b8] sm:$0xff]  ;;  %v23373_v45 = vld [vmem:[%s36838_s1 + $0x1a0] sm:$0xff] }
   0xc   :  { %37300 = vst [vmem:[#allocation11_spill] sm:$0xff] %v30782_v31  ;;  %37301 = vst [vmem:[#allocation12_spill] sm:$0xff] %v30798_v35  ;;  %v23384_v42 = vld [vmem:[%s36838_s1 + $0x1f8] sm:$0xf]  ;;  %26209 = vmatprep.subr.bf16.mxu1 %v30782_v31  ;;  %v30825_v43 = vpack.c.bf16 %v23382_v40, %v23374_v38  ;;  %v23381_v46 = vld [vmem:[%s36838_s1 + $0x1e0] sm:$0xf] }
   0xd   :  { %37302 = vst [vmem:[#allocation13_spill] sm:$0xff] %v30813_v39  ;;  %v30827_v44 = vpack.c.bf16 %v23384_v42, %v23376_v41  ;;  %v23375_v47 = vld [vmem:[%s36838_s1 + $0x1b0] sm:$0xff]  ;;  %23387 = vmatmul.mubr.msk.f32.vlgmr.msra.gmra.mrb[0].mxu0 %vm115_vm3, %v30787_v32  ;;  %v49_v49 = vld [vmem:[%s36838_s1 + $0x8] sm:$0xff]  ;;  %v30852_v51 = vpack.c.bf16 %v23381_v46, %v23373_v45  ;;  %v51_v52 = vld [vmem:[%s36838_s1 + $0x18] sm:$0xff] }
   0xe   :  { %37303 = vst [vmem:[#allocation14_spill] sm:$0xff] %v30825_v43  ;;  %v23383_v48 = vld [vmem:[%s36838_s1 + $0x1f0] sm:$0xf]  ;;  %v57_v50 = vld [vmem:[%s36838_s1 + $0x48] sm:$0xff]  ;;  %23390 = vmatmul.mubr.msk.f32.vlgmr.msra.gmra.mrb[0].mxu1 %vm115_vm3, %v30787_v32  ;;  %26201 = vmatpush1.bf16.msra.mxu0 %v30798_v35  ;;  %v59_v53 = vld [vmem:[%s36838_s1 + $0x58] sm:$0xff] }
   0xf   :  { %37304 = vst [vmem:[#allocation15_spill] sm:$0xff] %v30827_v44  ;;  %26211 = vmatpush1.bf16.msra.mxu1 %v30813_v39  ;;  %26204 = vmatprep.subr.msk.bf16.mxu0 %vm30729_vm2, %v30825_v43  ;;  %v30864_v54 = vpack.c.bf16 %v23383_v48, %v23375_v47  ;;  %v30866_v55 = vpack.c.bf16 %v57_v50, %v49_v49  ;;  %v48_v56 = vld [vmem:[%s36838_s1] sm:$0xff]  ;;  %v50_v58 = vld [vmem:[%s36838_s1 + $0x10] sm:$0xff]  ;;  %v65_v61 = vld [vmem:[%s36838_s1 + $0x88] sm:$0xff] }
  0x10   :  { %v56_v57 = vld [vmem:[%s36838_s1 + $0x40] sm:$0xff]  ;;  %26214 = vmatprep.subr.msk.bf16.mxu1 %vm30729_vm2, %v30827_v44  ;;  %350 = vmatprep.mubr.f32.mxu0 %v36853_v3  ;;  %v30881_v59 = vpack.c.bf16 %v59_v53, %v51_v52  ;;  %v58_v60 = vld [vmem:[%s36838_s1 + $0x50] sm:$0xff]  ;;  %v73_v62 = vld [vmem:[%s36838_s1 + $0xc8] sm:$0xf] }
  0x11   :  { %37305 = vst [vmem:[#allocation16_spill] sm:$0xff] %v30864_v54  ;;  %37306 = vst [vmem:[#allocation17_spill] sm:$0xff] %v30866_v55  ;;  %421 = vmatprep.mubr.f32.mxu1 %v36853_v3  ;;  %v67_v63 = vld [vmem:[%s36838_s1 + $0x98] sm:$0xff]  ;;  %v30902_v1 = vpack.c.bf16 %v56_v57, %v48_v56  ;;  %v30908_v2 = vpack.c.bf16 %v58_v60, %v50_v58  ;;  %v30910_v5 = vpack.c.bf16 %v73_v62, %v65_v61  ;;  %v64_v6 = vld [vmem:[%s36838_s1 + $0x80] sm:$0xff] }
  0x12   :  { %37307 = vst [vmem:[#allocation18_spill] sm:$0xff] %v30881_v59  ;;  %v75_v0 = vld [vmem:[%s36838_s1 + $0xd8] sm:$0xf]  ;;  %26207 = vmatpush1.bf16.msk.msra.mxu0 %vm30729_vm2, %v30852_v51  ;;  %v72_v7 = vld [vmem:[%s36838_s1 + $0xc0] sm:$0xf]  ;;  %v66_v10 = vld [vmem:[%s36838_s1 + $0x90] sm:$0xff] }
  0x13   :  { %26217 = vmatpush1.bf16.msk.msra.mxu1 %vm30729_vm2, %v30864_v54  ;;  %26219 = vmatprep.subr.bf16.mxu0 %v30866_v55  ;;  %37308 = vst [vmem:[#allocation19_spill] sm:$0xff] %v30908_v2  ;;  %37309 = vst [vmem:[#allocation20_spill] sm:$0xff] %v30910_v5  ;;  %v30922_v11 = vpack.c.bf16 %v75_v0, %v67_v63  ;;  %v74_v12 = vld [vmem:[%s36838_s1 + $0xd0] sm:$0xf]  ;;  %v53_v14 = vld [vmem:[%s36838_s1 + $0x28] sm:$0xff]  ;;  %v30944_v20 = vpack.c.bf16 %v72_v7, %v64_v6 }
  0x14   :  { %26229 = vmatprep.subr.bf16.mxu1 %v30881_v59  ;;  %v61_v16 = vld [vmem:[%s36838_s1 + $0x68] sm:$0xff]  ;;  %v55_v18 = vld [vmem:[%s36838_s1 + $0x38] sm:$0xff]  ;;  %v30950_v23 = vpack.c.bf16 %v74_v12, %v66_v10  ;;  %v52_v25 = vld [vmem:[%s36838_s1 + $0x20] sm:$0xff] }
  0x15   :  { %37310 = vst [vmem:[#allocation21_spill] sm:$0xff] %v30922_v11  ;;  %23393 = vmatmul.mubr.msk.f32.vlgmr.msra.gmra.mrb[2].mxu0 %vm115_vm3, %v30787_v32  ;;  %v63_v19 = vld [vmem:[%s36838_s1 + $0x78] sm:$0xff]  ;;  %v30952_v24 = vpack.c.bf16 %v61_v16, %v53_v14  ;;  %v60_v27 = vld [vmem:[%s36838_s1 + $0x60] sm:$0xff]  ;;  %v54_v28 = vld [vmem:[%s36838_s1 + $0x30] sm:$0xff] }
  0x16   :  { %23396 = vmatmul.mubr.msk.f32.vlgmr.msra.gmra.mrb[2].mxu1 %vm115_vm3, %v30787_v32  ;;  %26221 = vmatpush1.bf16.msra.mxu0 %v30902_v1  ;;  %v30967_v29 = vpack.c.bf16 %v63_v19, %v55_v18  ;;  %v62_v32 = vld [vmem:[%s36838_s1 + $0x70] sm:$0xff]  ;;  %v69_v33 = vld [vmem:[%s36838_s1 + $0xa8] sm:$0xff]  ;;  %v71_v36 = vld [vmem:[%s36838_s1 + $0xb8] sm:$0xff]  ;;  %v30991_v40 = vpack.c.bf16 %v60_v27, %v52_v25 }
  0x17   :  { %26231 = vmatpush1.bf16.msra.mxu1 %v30908_v2  ;;  %26224 = vmatprep.subr.msk.bf16.mxu0 %vm30729_vm2, %v30910_v5  ;;  %v77_v34 = vld [vmem:[%s36838_s1 + $0xe8] sm:$0xf]  ;;  %v79_v37 = vld [vmem:[%s36838_s1 + $0xf8] sm:$0xf]  ;;  %v47_v38 = vld [vmem:[%s36839_s0] sm:$0xff]  ;;  %v30997_v41 = vpack.c.bf16 %v62_v32, %v54_v28 }
  0x18   :  { %26234 = vmatprep.subr.msk.bf16.mxu1 %vm30729_vm2, %v30922_v11  ;;  %519 = vmatprep.mubr.f32.mxu0 %v36853_v3  ;;  %v30999_v42 = vpack.c.bf16 %v77_v34, %v69_v33  ;;  %v68_v45 = vld [vmem:[%s36838_s1 + $0xa0] sm:$0xff]  ;;  %v70_v47 = vld [vmem:[%s36838_s1 + $0xb0] sm:$0xff]  ;;  %v31011_v48 = vpack.c.bf16 %v79_v37, %v71_v36  ;;  %v23411_v50 = vld [vmem:[%s36838_s1 + $0x208] sm:$0xff] }
  0x19   :  { %590 = vmatprep.mubr.f32.mxu1 %v36853_v3  ;;  %v76_v46 = vld [vmem:[%s36838_s1 + $0xe0] sm:$0xf]  ;;  %v78_v49 = vld [vmem:[%s36838_s1 + $0xf0] sm:$0xf]  ;;  %v23419_v52 = vld [vmem:[%s36838_s1 + $0x248] sm:$0xff] }
  0x1a   :  { %26227 = vmatpush1.bf16.msk.msra.mxu0 %vm30729_vm2, %v30944_v20  ;;  %v23413_v53 = vld [vmem:[%s36838_s1 + $0x218] sm:$0xff]  ;;  %v31031_v57 = vpack.c.bf16 %v76_v46, %v68_v45  ;;  %v31037_v58 = vpack.c.bf16 %v78_v49, %v70_v47  ;;  %v31039_v60 = vpack.c.bf16 %v23419_v52, %v23411_v50  ;;  %v23410_v61 = vld [vmem:[%s36838_s1 + $0x200] sm:$0xff]  ;;  %v23412_v63 = vld [vmem:[%s36838_s1 + $0x210] sm:$0xff] }
  0x1b   :  { %26237 = vmatpush1.bf16.msk.msra.mxu1 %vm30729_vm2, %v30950_v23  ;;  %26239 = vmatprep.subr.bf16.mxu0 %v30952_v24  ;;  %v23421_v56 = vld [vmem:[%s36838_s1 + $0x258] sm:$0xff]  ;;  %v23418_v62 = vld [vmem:[%s36838_s1 + $0x240] sm:$0xff]  ;;  %v23420_v6 = vld [vmem:[%s36838_s1 + $0x250] sm:$0xff] }
  0x1c   :  { %26249 = vmatprep.subr.bf16.mxu1 %v30967_v29  ;;  %v31054_v0 = vpack.c.bf16 %v23421_v56, %v23413_v53  ;;  %v23427_v7 = vld [vmem:[%s36838_s1 + $0x288] sm:$0xff]  ;;  %v23429_v12 = vld [vmem:[%s36838_s1 + $0x298] sm:$0xff]  ;;  %v31075_v16 = vpack.c.bf16 %v23418_v62, %v23410_v61  ;;  %v31081_v18 = vpack.c.bf16 %v23420_v6, %v23412_v63  ;;  %v23426_v25 = vld [vmem:[%s36838_s1 + $0x280] sm:$0xff] }
  0x1d   :  { %23399 = vmatmul.mubr.msk.f32.vlgmr.msra.gmra.mrb[0].mxu0 %vm115_vm3, %v47_v38  ;;  %v23435_v10 = vld [vmem:[%s36838_s1 + $0x2c8] sm:$0xf]  ;;  %v23437_v14 = vld [vmem:[%s36838_s1 + $0x2d8] sm:$0xf]  ;;  %v23434_v27 = vld [vmem:[%s36838_s1 + $0x2c0] sm:$0xf] }
  0x1e   :  { %23402 = vmatmul.mubr.msk.f32.vlgmr.msra.gmra.mrb[0].mxu1 %vm115_vm3, %v47_v38  ;;  %26241 = vmatpush1.bf16.msra.mxu0 %v30991_v40  ;;  %v31083_v19 = vpack.c.bf16 %v23435_v10, %v23427_v7  ;;  %v23428_v28 = vld [vmem:[%s36838_s1 + $0x290] sm:$0xff]  ;;  %v31095_v32 = vpack.c.bf16 %v23437_v14, %v23429_v12  ;;  %v23415_v34 = vld [vmem:[%s36838_s1 + $0x228] sm:$0xff]  ;;  %v23417_v37 = vld [vmem:[%s36838_s1 + $0x238] sm:$0xff]  ;;  %v31115_v46 = vpack.c.bf16 %v23434_v27, %v23426_v25 }
  0x1f   :  { %26251 = vmatpush1.bf16.msra.mxu1 %v30997_v41  ;;  %26244 = vmatprep.subr.msk.bf16.mxu0 %vm30729_vm2, %v30999_v42  ;;  %v23436_v33 = vld [vmem:[%s36838_s1 + $0x2d0] sm:$0xf]  ;;  %v23423_v36 = vld [vmem:[%s36838_s1 + $0x268] sm:$0xff]  ;;  %v23425_v45 = vld [vmem:[%s36838_s1 + $0x278] sm:$0xff] }
  0x20   :  { %26254 = vmatprep.subr.msk.bf16.mxu1 %vm30729_vm2, %v31011_v48  ;;  %661 = vmatprep.mubr.f32.mxu0 %v36853_v3  ;;  %37311 = vst [vmem:[#allocation22_spill] sm:$0xff] %v31095_v32  ;;  %37312 = vst [vmem:[#allocation23_spill] sm:$0xff] %v31115_v46  ;;  %v31121_v47 = vpack.c.bf16 %v23436_v33, %v23428_v28  ;;  %v31123_v49 = vpack.c.bf16 %v23423_v36, %v23415_v34  ;;  %v23414_v50 = vld [vmem:[%s36838_s1 + $0x220] sm:$0xff]  ;;  %v23416_v52 = vld [vmem:[%s36838_s1 + $0x230] sm:$0xff] }
  0x21   :  { %732 = vmatprep.mubr.f32.mxu1 %v36853_v3  ;;  %v31138_v53 = vpack.c.bf16 %v23425_v45, %v23417_v37  ;;  %v23424_v56 = vld [vmem:[%s36838_s1 + $0x270] sm:$0xff]  ;;  %v23431_v61 = vld [vmem:[%s36838_s1 + $0x2a8] sm:$0xff]  ;;  %v23433_v63 = vld [vmem:[%s36838_s1 + $0x2b8] sm:$0xff] }
  0x22   :  { %26247 = vmatpush1.bf16.msk.msra.mxu0 %vm30729_vm2, %v31031_v57  ;;  %37313 = vst [vmem:[#allocation24_spill] sm:$0xff] %v31121_v47  ;;  %37314 = vst [vmem:[#allocation25_spill] sm:$0xff] %v31123_v49  ;;  %v23439_v62 = vld [vmem:[%s36838_s1 + $0x2e8] sm:$0xf]  ;;  %v23441_v6 = vld [vmem:[%s36838_s1 + $0x2f8] sm:$0xf]  ;;  %v31170_v12 = vpack.c.bf16 %v23424_v56, %v23416_v52 }
  0x23   :  { %26257 = vmatpush1.bf16.msk.msra.mxu1 %vm30729_vm2, %v31037_v58  ;;  %26259 = vmatprep.subr.bf16.mxu0 %v31039_v60  ;;  %37315 = vst [vmem:[#allocation26_spill] sm:$0xff] %v31138_v53  ;;  %v31162_v7 = vld [vmem:[%s36839_s0 + $0x10] sm:$0xff]  ;;  %v31172_v14 = vpack.c.bf16 %v23439_v62, %v23431_v61  ;;  %v23430_v25 = vld [vmem:[%s36838_s1 + $0x2a0] sm:$0xff]  ;;  %v31184_v33 = vpack.c.bf16 %v23441_v6, %v23433_v63  ;;  %v23456_v36 = vld [vmem:[%s36838_s1 + $0x308] sm:$0xff] }
  0x24   :  { %26269 = vmatprep.subr.bf16.mxu1 %v31054_v0  ;;  %37317 = vst [vmem:[#allocation28_spill] sm:$0xff] %v31170_v12  ;;  %v23438_v27 = vld [vmem:[%s36838_s1 + $0x2e0] sm:$0xf]  ;;  %v23432_v28 = vld [vmem:[%s36838_s1 + $0x2b0] sm:$0xff]  ;;  %v23464_v37 = vld [vmem:[%s36838_s1 + $0x348] sm:$0xff] }
  0x25   :  { %23405 = vmatmul.mubr.msk.f32.vlgmr.msra.gmra.mrb[2].mxu0 %vm115_vm3, %v47_v38  ;;  %37318 = vst [vmem:[#allocation29_spill] sm:$0xff] %v31172_v14  ;;  %37319 = vst [vmem:[#allocation30_spill] sm:$0xff] %v31184_v33  ;;  %v23440_v34 = vld [vmem:[%s36838_s1 + $0x2f0] sm:$0xf]  ;;  %v23458_v45 = vld [vmem:[%s36838_s1 + $0x318] sm:$0xff]  ;;  %v31214_v56 = vpack.c.bf16 %v23464_v37, %v23456_v36 }
  0x26   :  { %23408 = vmatmul.mubr.msk.f32.vlgmr.msra.gmra.mrb[2].mxu1 %vm115_vm3, %v47_v38  ;;  %26261 = vmatpush1.bf16.msra.mxu0 %v31075_v16  ;;  %v23422_v38 = vld [vmem:[%s36838_s1 + $0x260] sm:$0xff]  ;;  %v31212_v52 = vpack.c.bf16 %v23440_v34, %v23432_v28  ;;  %v23457_v63 = vld [vmem:[%s36838_s1 + $0x310] sm:$0xff]  ;;  %v23480_v28 = vld [vmem:[%s36838_s1 + $0x3c8] sm:$0xf] }
  0x27   :  { %26271 = vmatpush1.bf16.msra.mxu1 %v31081_v18  ;;  %26264 = vmatprep.subr.msk.bf16.mxu0 %vm30729_vm2, %v31083_v19  ;;  %v31164_v10 = vpack.c.bf16 %v23422_v38, %v23414_v50  ;;  %v23466_v50 = vld [vmem:[%s36838_s1 + $0x358] sm:$0xff]  ;;  %v31206_v38 = vpack.c.bf16 %v23438_v27, %v23430_v25  ;;  %37322 = vst [vmem:[#allocation33_spill] sm:$0xff] %v31214_v56  ;;  %v23455_v61 = vld [vmem:[%s36838_s1 + $0x300] sm:$0xff]  ;;  %v23465_v25 = vld [vmem:[%s36838_s1 + $0x350] sm:$0xff] }
  0x28   :  { %26274 = vmatprep.subr.msk.bf16.mxu1 %vm30729_vm2, %v31095_v32  ;;  %865 = vmatprep.mubr.f32.mxu0 %v36853_v3  ;;  %37321 = vst [vmem:[#allocation32_spill] sm:$0xff] %v31212_v52  ;;  %v23463_v62 = vld [vmem:[%s36838_s1 + $0x340] sm:$0xff]  ;;  %v31229_v6 = vpack.c.bf16 %v23466_v50, %v23458_v45  ;;  %v23472_v27 = vld [vmem:[%s36838_s1 + $0x388] sm:$0xff]  ;;  %v23474_v34 = vld [vmem:[%s36838_s1 + $0x398] sm:$0xff]  ;;  %v31256_v45 = vpack.c.bf16 %v23465_v25, %v23457_v63 }
  0x29   :  { %936 = vmatprep.mubr.f32.mxu1 %v36853_v3  ;;  %37316 = vst [vmem:[#allocation27_spill] sm:$0xff] %v31164_v10  ;;  %37320 = vst [vmem:[#allocation31_spill] sm:$0xff] %v31206_v38  ;;  %v23482_v36 = vld [vmem:[%s36838_s1 + $0x3d8] sm:$0xf]  ;;  %v31250_v37 = vpack.c.bf16 %v23463_v62, %v23455_v61  ;;  %v31258_v50 = vpack.c.bf16 %v23480_v28, %v23472_v27  ;;  %v23473_v61 = vld [vmem:[%s36838_s1 + $0x390] sm:$0xff] }
  0x2a   :  { %26267 = vmatpush1.bf16.msk.msra.mxu0 %vm30729_vm2, %v31115_v46  ;;  %37323 = vst [vmem:[#allocation34_spill] sm:$0xff] %v31229_v6  ;;  %37325 = vst [vmem:[#allocation36_spill] sm:$0xff] %v31256_v45  ;;  %v31270_v62 = vpack.c.bf16 %v23482_v36, %v23474_v34  ;;  %v23481_v63 = vld [vmem:[%s36838_s1 + $0x3d0] sm:$0xf]  ;;  %v23460_v25 = vld [vmem:[%s36838_s1 + $0x328] sm:$0xff] }
  0x2b   :  { %26277 = vmatpush1.bf16.msk.msra.mxu1 %vm30729_vm2, %v31121_v47  ;;  %26279 = vmatprep.subr.bf16.mxu0 %v31123_v49  ;;  %37324 = vst [vmem:[#allocation35_spill] sm:$0xff] %v31250_v37  ;;  %37326 = vst [vmem:[#allocation37_spill] sm:$0xff] %v31258_v50  ;;  %v23468_v27 = vld [vmem:[%s36838_s1 + $0x368] sm:$0xff]  ;;  %v23462_v28 = vld [vmem:[%s36838_s1 + $0x338] sm:$0xff] }
  0x2c   :  { %26289 = vmatprep.subr.bf16.mxu1 %v31138_v53  ;;  %37327 = vst [vmem:[#allocation38_spill] sm:$0xff] %v31270_v62  ;;  %v23470_v34 = vld [vmem:[%s36838_s1 + $0x378] sm:$0xff] }
  0x2d   :  { %23444 = vmatmul.mubr.msk.f32.vlgmr.msra.gmra.mrb[0].mxu0 %vm115_vm3, %v31162_v7 }
  0x2e   :  { %23447 = vmatmul.mubr.msk.f32.vlgmr.msra.gmra.mrb[0].mxu1 %vm115_vm3, %v31162_v7  ;;  %26281 = vmatpush1.bf16.msra.mxu0 %v31164_v10  ;;  %v23573_v10 = vld [vmem:[%s36838_s1 + $0x5e0] sm:$0xf] }
  0x2f   :  { %26291 = vmatpush1.bf16.msra.mxu1 %v31170_v12  ;;  %26284 = vmatprep.subr.msk.bf16.mxu0 %vm30729_vm2, %v31172_v14  ;;  %v23483_v14 = vld [vmem:[%s36838_s1 + $0x3e0] sm:$0xf] }
  0x30   :  { %26294 = vmatprep.subr.msk.bf16.mxu1 %vm30729_vm2, %v31184_v33  ;;  %1007 = vmatprep.mubr.f32.mxu0 %v36853_v3  ;;  %v23528_v12 = vld [vmem:[%s36838_s1 + $0x4e0] sm:$0xf] }
  0x31   :  { %1078 = vmatprep.mubr.f32.mxu1 %v36853_v3  ;;  %v23471_v3 = vld [vmem:[%s36838_s1 + $0x380] sm:$0xff] }
  0x32   :  { %26287 = vmatpush1.bf16.msk.msra.mxu0 %vm30729_vm2, %v31206_v38  ;;  %v23479_v38 = vld [vmem:[%s36838_s1 + $0x3c0] sm:$0xf] }
  0x33   :  { %26297 = vmatpush1.bf16.msk.msra.mxu1 %vm30729_vm2, %v31212_v52  ;;  %26299 = vmatprep.subr.bf16.mxu0 %v31214_v56  ;;  %v31292_v36 = vpack.c.bf16 %v23479_v38, %v23471_v3  ;;  %v31300_v56 = vpack.c.bf16 %v23468_v27, %v23460_v25  ;;  %v23459_v52 = vld [vmem:[%s36838_s1 + $0x320] sm:$0xff]  ;;  %v23461_v3 = vld [vmem:[%s36838_s1 + $0x330] sm:$0xff]  ;;  %v37331_v38 = vmov 0.0   ;;  %v23476_v25 = vld [vmem:[%s36838_s1 + $0x3a8] sm:$0xff] }
  0x34   :  { %26309 = vmatprep.subr.bf16.mxu1 %v31229_v6  ;;  %v31298_v6 = vpack.c.bf16 %v23481_v63, %v23473_v61  ;;  %v31315_v61 = vpack.c.bf16 %v23470_v34, %v23462_v28  ;;  %v23469_v63 = vld [vmem:[%s36838_s1 + $0x370] sm:$0xff]  ;;  %v23484_v27 = vld [vmem:[%s36838_s1 + $0x3e8] sm:$0xf]  ;;  %v23486_v28 = vld [vmem:[%s36838_s1 + $0x3f8] sm:$0xf] }
  0x35   :  { %23450 = vmatmul.mubr.msk.f32.vlgmr.msra.gmra.mrb[2].mxu0 %vm115_vm3, %v31162_v7  ;;  %37328 = vst [vmem:[#allocation39_spill] sm:$0xff] %v31292_v36  ;;  %37330 = vst [vmem:[#allocation41_spill] sm:$0xff] %v31300_v56  ;;  %v31339_v34 = vld [vmem:[%s36839_s0 + $0x18] sm:$0xff]  ;;  %v31349_v33 = vpack.c.bf16 %v23484_v27, %v23476_v25  ;;  %v23509_v25 = vld [vmem:[%s36838_s1 + $0x448] sm:$0xff] }
  0x36   :  { %23453 = vmatmul.mubr.msk.f32.vlgmr.msra.gmra.mrb[2].mxu1 %vm115_vm3, %v31162_v7  ;;  %26301 = vmatpush1.bf16.msra.mxu0 %v31250_v37  ;;  %37329 = vst [vmem:[#allocation40_spill] sm:$0xff] %v31298_v6  ;;  %v23467_v37 = vld [vmem:[%s36838_s1 + $0x360] sm:$0xff]  ;;  %37332 = vst [vmem:[#allocation42_spill] sm:$0xff] %v31315_v61  ;;  %v23511_v27 = vld [vmem:[%s36838_s1 + $0x458] sm:$0xff] }
  0x37   :  { %26311 = vmatpush1.bf16.msra.mxu1 %v31256_v45  ;;  %26304 = vmatprep.subr.msk.bf16.mxu0 %vm30729_vm2, %v31258_v50  ;;  %v31341_v50 = vpack.c.bf16 %v23467_v37, %v23459_v52  ;;  %v31347_v45 = vpack.c.bf16 %v23469_v63, %v23461_v3  ;;  %37335 = vst [vmem:[#allocation45_spill] sm:$0xff] %v31349_v33  ;;  %v23477_v52 = vld [vmem:[%s36838_s1 + $0x3b0] sm:$0xff]  ;;  %v23501_v63 = vld [vmem:[%s36838_s1 + $0x408] sm:$0xff] }
  0x38   :  { %26314 = vmatprep.subr.msk.bf16.mxu1 %vm30729_vm2, %v31270_v62  ;;  %1219 = vmatprep.mubr.f32.mxu0 %v37331_v38  ;;  %v23478_v62 = vld [vmem:[%s36838_s1 + $0x3b8] sm:$0xff]  ;;  %v23485_v3 = vld [vmem:[%s36838_s1 + $0x3f0] sm:$0xf] }
  0x39   :  { %1290 = vmatprep.mubr.f32.mxu1 %v37331_v38  ;;  %37333 = vst [vmem:[#allocation43_spill] sm:$0xff] %v31341_v50  ;;  %37334 = vst [vmem:[#allocation44_spill] sm:$0xff] %v31347_v45  ;;  %v31361_v37 = vpack.c.bf16 %v23486_v28, %v23478_v62  ;;  %v23503_v62 = vld [vmem:[%s36838_s1 + $0x418] sm:$0xff] }
  0x3a   :  { %26307 = vmatpush1.bf16.msk.msra.mxu0 %vm30729_vm2, %v31292_v36  ;;  %v23475_v36 = vld [vmem:[%s36838_s1 + $0x3a0] sm:$0xff] }
  0x3b   :  { %26317 = vmatpush1.bf16.msk.msra.mxu1 %vm30729_vm2, %v31298_v6  ;;  %26319 = vmatprep.subr.bf16.mxu0 %v31300_v56  ;;  %37336 = vst [vmem:[#allocation46_spill] sm:$0xff] %v31361_v37  ;;  %v31383_v28 = vpack.c.bf16 %v23483_v14, %v23475_v36  ;;  %v31391_v56 = vpack.c.bf16 %v23509_v25, %v23501_v63  ;;  %v23500_v6 = vld [vmem:[%s36838_s1 + $0x400] sm:$0xff]  ;;  %v23502_v14 = vld [vmem:[%s36838_s1 + $0x410] sm:$0xff]  ;;  %v23525_v63 = vld [vmem:[%s36838_s1 + $0x4c8] sm:$0xf] }
  0x3c   :  { %26329 = vmatprep.subr.bf16.mxu1 %v31315_v61  ;;  %v31389_v61 = vpack.c.bf16 %v23485_v3, %v23477_v52  ;;  %v31406_v36 = vpack.c.bf16 %v23511_v27, %v23503_v62  ;;  %v23510_v52 = vld [vmem:[%s36838_s1 + $0x450] sm:$0xff]  ;;  %v23517_v3 = vld [vmem:[%s36838_s1 + $0x488] sm:$0xff]  ;;  %v23519_v25 = vld [vmem:[%s36838_s1 + $0x498] sm:$0xff] }
  0x3d   :  { %23489 = vmatmul.mubr.msk.f32.vlgmr.msra.gmra.mrb[0].mxu0 %vm115_vm3, %v31339_v34  ;;  %37337 = vst [vmem:[#allocation47_spill] sm:$0xff] %v31383_v28  ;;  %37339 = vst [vmem:[#allocation49_spill] sm:$0xff] %v31391_v56  ;;  %v23527_v62 = vld [vmem:[%s36838_s1 + $0x4d8] sm:$0xf] }
  0x3e   :  { %23492 = vmatmul.mubr.msk.f32.vlgmr.msra.gmra.mrb[0].mxu1 %vm115_vm3, %v31339_v34  ;;  %26321 = vmatpush1.bf16.msra.mxu0 %v31341_v50  ;;  %37338 = vst [vmem:[#allocation48_spill] sm:$0xff] %v31389_v61  ;;  %v23508_v50 = vld [vmem:[%s36838_s1 + $0x440] sm:$0xff]  ;;  %37340 = vst [vmem:[#allocation50_spill] sm:$0xff] %v31406_v36 }
  0x3f   :  { %26331 = vmatpush1.bf16.msra.mxu1 %v31347_v45  ;;  %26324 = vmatprep.subr.msk.bf16.mxu0 %vm30729_vm2, %v31349_v33  ;;  %v31427_v27 = vpack.c.bf16 %v23508_v50, %v23500_v6  ;;  %v31435_v33 = vpack.c.bf16 %v23525_v63, %v23517_v3  ;;  %v23516_v45 = vld [vmem:[%s36838_s1 + $0x480] sm:$0xff]  ;;  %v23518_v6 = vld [vmem:[%s36838_s1 + $0x490] sm:$0xff]  ;;  %v31447_v50 = vpack.c.bf16 %v23527_v62, %v23519_v25  ;;  %v23513_v3 = vld [vmem:[%s36838_s1 + $0x468] sm:$0xff] }
  0x40   :  { %26334 = vmatprep.subr.msk.bf16.mxu1 %vm30729_vm2, %v31361_v37  ;;  %1361 = vmatprep.mubr.f32.mxu0 %v37331_v38  ;;  %v31433_v37 = vpack.c.bf16 %v23510_v52, %v23502_v14  ;;  %v23526_v14 = vld [vmem:[%s36838_s1 + $0x4d0] sm:$0xf]  ;;  %v23505_v52 = vld [vmem:[%s36838_s1 + $0x428] sm:$0xff]  ;;  %v23507_v63 = vld [vmem:[%s36838_s1 + $0x438] sm:$0xff] }
  0x41   :  { %1432 = vmatprep.mubr.f32.mxu1 %v37331_v38  ;;  %37341 = vst [vmem:[#allocation51_spill] sm:$0xff] %v31427_v27  ;;  %37343 = vst [vmem:[#allocation53_spill] sm:$0xff] %v31435_v33  ;;  %v23515_v25 = vld [vmem:[%s36838_s1 + $0x478] sm:$0xff] }
  0x42   :  { %26327 = vmatpush1.bf16.msk.msra.mxu0 %vm30729_vm2, %v31383_v28  ;;  %37342 = vst [vmem:[#allocation52_spill] sm:$0xff] %v31433_v37  ;;  %v23524_v28 = vld [vmem:[%s36838_s1 + $0x4c0] sm:$0xf]  ;;  %37344 = vst [vmem:[#allocation54_spill] sm:$0xff] %v31447_v50 }
  0x43   :  { %26337 = vmatpush1.bf16.msk.msra.mxu1 %vm30729_vm2, %v31389_v61  ;;  %26339 = vmatprep.subr.bf16.mxu0 %v31391_v56  ;;  %v31469_v62 = vpack.c.bf16 %v23524_v28, %v23516_v45  ;;  %v31477_v56 = vpack.c.bf16 %v23513_v3, %v23505_v52  ;;  %v23504_v61 = vld [vmem:[%s36838_s1 + $0x420] sm:$0xff]  ;;  %v23506_v45 = vld [vmem:[%s36838_s1 + $0x430] sm:$0xff]  ;;  %v31492_v28 = vpack.c.bf16 %v23515_v25, %v23507_v63  ;;  %v23529_v52 = vld [vmem:[%s36838_s1 + $0x4e8] sm:$0xf] }
  0x44   :  { %26349 = vmatprep.subr.bf16.mxu1 %v31406_v36  ;;  %v31475_v36 = vpack.c.bf16 %v23526_v14, %v23518_v6  ;;  %v23514_v6 = vld [vmem:[%s36838_s1 + $0x470] sm:$0xff]  ;;  %v23521_v14 = vld [vmem:[%s36838_s1 + $0x4a8] sm:$0xff]  ;;  %v23523_v3 = vld [vmem:[%s36838_s1 + $0x4b8] sm:$0xff] }
  0x45   :  { %23495 = vmatmul.mubr.msk.f32.vlgmr.msra.gmra.mrb[2].mxu0 %vm115_vm3, %v31339_v34  ;;  %37345 = vst [vmem:[#allocation55_spill] sm:$0xff] %v31469_v62  ;;  %37347 = vst [vmem:[#allocation57_spill] sm:$0xff] %v31477_v56  ;;  %v23531_v63 = vld [vmem:[%s36838_s1 + $0x4f8] sm:$0xf]  ;;  %v31516_v25 = vld [vmem:[%s36839_s0 + $0x20] sm:$0xff] }
  0x46   :  { %23498 = vmatmul.mubr.msk.f32.vlgmr.msra.gmra.mrb[2].mxu1 %vm115_vm3, %v31339_v34  ;;  %26341 = vmatpush1.bf16.msra.mxu0 %v31427_v27  ;;  %37346 = vst [vmem:[#allocation56_spill] sm:$0xff] %v31475_v36  ;;  %v23512_v27 = vld [vmem:[%s36838_s1 + $0x460] sm:$0xff]  ;;  %37348 = vst [vmem:[#allocation58_spill] sm:$0xff] %v31492_v28 }
  0x47   :  { %26351 = vmatpush1.bf16.msra.mxu1 %v31433_v37  ;;  %26344 = vmatprep.subr.msk.bf16.mxu0 %vm30729_vm2, %v31435_v33  ;;  %v31524_v33 = vpack.c.bf16 %v23514_v6, %v23506_v45  ;;  %v31526_v37 = vpack.c.bf16 %v23529_v52, %v23521_v14  ;;  %v23530_v45 = vld [vmem:[%s36838_s1 + $0x4f0] sm:$0xf]  ;;  %v23546_v6 = vld [vmem:[%s36838_s1 + $0x508] sm:$0xff]  ;;  %v23548_v52 = vld [vmem:[%s36838_s1 + $0x518] sm:$0xff] }
  0x48   :  { %26354 = vmatprep.subr.msk.bf16.mxu1 %vm30729_vm2, %v31447_v50  ;;  %1573 = vmatprep.mubr.f32.mxu0 %v37331_v38  ;;  %v31518_v50 = vpack.c.bf16 %v23512_v27, %v23504_v61  ;;  %v23522_v61 = vld [vmem:[%s36838_s1 + $0x4b0] sm:$0xff]  ;;  %v31538_v27 = vpack.c.bf16 %v23531_v63, %v23523_v3  ;;  %v23554_v14 = vld [vmem:[%s36838_s1 + $0x548] sm:$0xff]  ;;  %v23556_v3 = vld [vmem:[%s36838_s1 + $0x558] sm:$0xff] }
  0x49   :  { %1644 = vmatprep.mubr.f32.mxu1 %v37331_v38  ;;  %37350 = vst [vmem:[#allocation60_spill] sm:$0xff] %v31524_v33  ;;  %37351 = vst [vmem:[#allocation61_spill] sm:$0xff] %v31526_v37 }
  0x4a   :  { %26347 = vmatpush1.bf16.msk.msra.mxu0 %vm30729_vm2, %v31469_v62  ;;  %37349 = vst [vmem:[#allocation59_spill] sm:$0xff] %v31518_v50  ;;  %v23520_v62 = vld [vmem:[%s36838_s1 + $0x4a0] sm:$0xff]  ;;  %37352 = vst [vmem:[#allocation62_spill] sm:$0xff] %v31538_v27 }
  0x4b   :  { %26357 = vmatpush1.bf16.msk.msra.mxu1 %vm30729_vm2, %v31475_v36  ;;  %26359 = vmatprep.subr.bf16.mxu0 %v31477_v56  ;;  %v31560_v63 = vpack.c.bf16 %v23528_v12, %v23520_v62  ;;  %v31568_v56 = vpack.c.bf16 %v23554_v14, %v23546_v6  ;;  %v23545_v36 = vld [vmem:[%s36838_s1 + $0x500] sm:$0xff]  ;;  %v23547_v12 = vld [vmem:[%s36838_s1 + $0x510] sm:$0xff]  ;;  %v31583_v62 = vpack.c.bf16 %v23556_v3, %v23548_v52  ;;  %v23570_v6 = vld [vmem:[%s36838_s1 + $0x5c8] sm:$0xf] }
  0x4c   :  { %26369 = vmatprep.subr.bf16.mxu1 %v31492_v28  ;;  %v31566_v28 = vpack.c.bf16 %v23530_v45, %v23522_v61  ;;  %v23555_v61 = vld [vmem:[%s36838_s1 + $0x550] sm:$0xff]  ;;  %v23562_v45 = vld [vmem:[%s36838_s1 + $0x588] sm:$0xff]  ;;  %v23564_v14 = vld [vmem:[%s36838_s1 + $0x598] sm:$0xff] }
  0x4d   :  { %23534 = vmatmul.mubr.msk.f32.vlgmr.msra.gmra.mrb[0].mxu0 %vm115_vm3, %v31516_v25  ;;  %37353 = vst [vmem:[#allocation63_spill] sm:$0xff] %v31560_v63  ;;  %37355 = vst [vmem:[#allocation65_spill] sm:$0xff] %v31568_v56  ;;  %v23572_v52 = vld [vmem:[%s36838_s1 + $0x5d8] sm:$0xf] }
  0x4e   :  { %23537 = vmatmul.mubr.msk.f32.vlgmr.msra.gmra.mrb[0].mxu1 %vm115_vm3, %v31516_v25  ;;  %26361 = vmatpush1.bf16.msra.mxu0 %v31518_v50  ;;  %37354 = vst [vmem:[#allocation64_spill] sm:$0xff] %v31566_v28  ;;  %v23553_v50 = vld [vmem:[%s36838_s1 + $0x540] sm:$0xff]  ;;  %37356 = vst [vmem:[#allocation66_spill] sm:$0xff] %v31583_v62 }
  0x4f   :  { %26371 = vmatpush1.bf16.msra.mxu1 %v31524_v33  ;;  %26364 = vmatprep.subr.msk.bf16.mxu0 %vm30729_vm2, %v31526_v37  ;;  %v31604_v3 = vpack.c.bf16 %v23553_v50, %v23545_v36  ;;  %v31612_v37 = vpack.c.bf16 %v23570_v6, %v23562_v45  ;;  %v23561_v33 = vld [vmem:[%s36838_s1 + $0x580] sm:$0xff]  ;;  %v23563_v36 = vld [vmem:[%s36838_s1 + $0x590] sm:$0xff]  ;;  %v31624_v50 = vpack.c.bf16 %v23572_v52, %v23564_v14  ;;  %v23558_v45 = vld [vmem:[%s36838_s1 + $0x568] sm:$0xff] }
  0x50   :  { %26374 = vmatprep.subr.msk.bf16.mxu1 %vm30729_vm2, %v31538_v27  ;;  %1715 = vmatprep.mubr.f32.mxu0 %v37331_v38  ;;  %v31610_v27 = vpack.c.bf16 %v23555_v61, %v23547_v12  ;;  %v23571_v12 = vld [vmem:[%s36838_s1 + $0x5d0] sm:$0xf]  ;;  %v23550_v61 = vld [vmem:[%s36838_s1 + $0x528] sm:$0xff]  ;;  %v23552_v6 = vld [vmem:[%s36838_s1 + $0x538] sm:$0xff] }
  0x51   :  { %1786 = vmatprep.mubr.f32.mxu1 %v37331_v38  ;;  %37357 = vst [vmem:[#allocation67_spill] sm:$0xff] %v31604_v3  ;;  %37359 = vst [vmem:[#allocation69_spill] sm:$0xff] %v31612_v37  ;;  %v23560_v14 = vld [vmem:[%s36838_s1 + $0x578] sm:$0xff] }
  0x52   :  { %26367 = vmatpush1.bf16.msk.msra.mxu0 %vm30729_vm2, %v31560_v63  ;;  %37358 = vst [vmem:[#allocation68_spill] sm:$0xff] %v31610_v27  ;;  %v23569_v63 = vld [vmem:[%s36838_s1 + $0x5c0] sm:$0xf]  ;;  %37360 = vst [vmem:[#allocation70_spill] sm:$0xff] %v31624_v50 }
  0x53   :  { %26377 = vmatpush1.bf16.msk.msra.mxu1 %vm30729_vm2, %v31566_v28  ;;  %26379 = vmatprep.subr.bf16.mxu0 %v31568_v56  ;;  %v31646_v52 = vpack.c.bf16 %v23569_v63, %v23561_v33  ;;  %v31654_v56 = vpack.c.bf16 %v23558_v45, %v23550_v61  ;;  %v23549_v28 = vld [vmem:[%s36838_s1 + $0x520] sm:$0xff]  ;;  %v23551_v33 = vld [vmem:[%s36838_s1 + $0x530] sm:$0xff]  ;;  %v31669_v63 = vpack.c.bf16 %v23560_v14, %v23552_v6  ;;  %v23574_v61 = vld [vmem:[%s36838_s1 + $0x5e8] sm:$0xf] }
  0x54   :  { %26389 = vmatprep.subr.bf16.mxu1 %v31583_v62  ;;  %v31652_v62 = vpack.c.bf16 %v23571_v12, %v23563_v36  ;;  %v23559_v36 = vld [vmem:[%s36838_s1 + $0x570] sm:$0xff]  ;;  %v23566_v12 = vld [vmem:[%s36838_s1 + $0x5a8] sm:$0xff]  ;;  %v23568_v45 = vld [vmem:[%s36838_s1 + $0x5b8] sm:$0xff] }
  0x55   :  { %23540 = vmatmul.mubr.msk.f32.vlgmr.msra.gmra.mrb[2].mxu0 %vm115_vm3, %v31516_v25  ;;  %37361 = vst [vmem:[#allocation71_spill] sm:$0xff] %v31646_v52  ;;  %37363 = vst [vmem:[#allocation73_spill] sm:$0xff] %v31654_v56  ;;  %v23576_v6 = vld [vmem:[%s36838_s1 + $0x5f8] sm:$0xf]  ;;  %v31693_v14 = vld [vmem:[%s36839_s0 + $0x28] sm:$0xff] }
  0x56   :  { %23543 = vmatmul.mubr.msk.f32.vlgmr.msra.gmra.mrb[2].mxu1 %vm115_vm3, %v31516_v25  ;;  %26381 = vmatpush1.bf16.msra.mxu0 %v31604_v3  ;;  %37362 = vst [vmem:[#allocation72_spill] sm:$0xff] %v31652_v62  ;;  %v23557_v3 = vld [vmem:[%s36838_s1 + $0x560] sm:$0xff]  ;;  %37364 = vst [vmem:[#allocation74_spill] sm:$0xff] %v31669_v63 }
  0x57   :  { %26391 = vmatpush1.bf16.msra.mxu1 %v31610_v27  ;;  %26384 = vmatprep.subr.msk.bf16.mxu0 %vm30729_vm2, %v31612_v37  ;;  %v31701_v37 = vpack.c.bf16 %v23559_v36, %v23551_v33  ;;  %v31703_v27 = vpack.c.bf16 %v23574_v61, %v23566_v12  ;;  %v23575_v33 = vld [vmem:[%s36838_s1 + $0x5f0] sm:$0xf]  ;;  %v37375_v61 = vld [vmem:[#allocation31_spill] sm:$0xff] }
  0x58   :  { %26394 = vmatprep.subr.msk.bf16.mxu1 %vm30729_vm2, %v31624_v50  ;;  %1927 = vmatprep.mubr.f32.mxu0 %v37331_v38  ;;  %v31695_v50 = vpack.c.bf16 %v23557_v3, %v23549_v28  ;;  %v31712_v28 = vpack.c.bf16 %v23576_v6, %v23568_v45  ;;  %v23567_v3 = vld [vmem:[%s36838_s1 + $0x5b0] sm:$0xff]  ;;  %v37377_v6 = vld [vmem:[#allocation33_spill] sm:$0xff] }
  0x59   :  { %1998 = vmatprep.mubr.f32.mxu1 %v37331_v38  ;;  %37366 = vst [vmem:[#allocation76_spill] sm:$0xff] %v31701_v37  ;;  %37367 = vst [vmem:[#allocation77_spill] sm:$0xff] %v31703_v27  ;;  %v31731_v12 = vpack.c.bf16 %v23575_v33, %v23567_v3  ;;  %v37376_v45 = vld [vmem:[#allocation32_spill] sm:$0xff]  ;;  %v37378_v3 = vld [vmem:[#allocation34_spill] sm:$0xff] }
  0x5a   :  { %26387 = vmatpush1.bf16.msk.msra.mxu0 %vm30729_vm2, %v31646_v52  ;;  %37365 = vst [vmem:[#allocation75_spill] sm:$0xff] %v31695_v50  ;;  %v23565_v52 = vld [vmem:[%s36838_s1 + $0x5a0] sm:$0xff]  ;;  %37368 = vst [vmem:[#allocation78_spill] sm:$0xff] %v31712_v28  ;;  %v37379_v33 = vld [vmem:[#allocation35_spill] sm:$0xff] }
  0x5b   :  { %26397 = vmatpush1.bf16.msk.msra.mxu1 %vm30729_vm2, %v31652_v62  ;;  %26399 = vmatprep.subr.bf16.mxu0 %v31654_v56  ;;  %v31725_v36 = vpack.c.bf16 %v23573_v10, %v23565_v52  ;;  %37370 = vst [vmem:[#allocation80_spill] sm:$0xff] %v31731_v12  ;;  %v37372_v10 = vld [vmem:[#allocation28_spill] sm:$0xff]  ;;  %v37374_v52 = vld [vmem:[#allocation30_spill] sm:$0xff] }
  0x5c   :  { %26409 = vmatprep.subr.bf16.mxu1 %v31669_v63 }
  0x5d   :  { %23579 = vmatmul.mubr.msk.f32.vlgmr.msra.gmra.mrb[0].mxu0 %vm115_vm3, %v31693_v14  ;;  %37369 = vst [vmem:[#allocation79_spill] sm:$0xff] %v31725_v36 }
  0x5e   :  { %23582 = vmatmul.mubr.msk.f32.vlgmr.msra.gmra.mrb[0].mxu1 %vm115_vm3, %v31693_v14  ;;  %26401 = vmatpush1.bf16.msra.mxu0 %v31695_v50 }
  0x5f   :  { %26411 = vmatpush1.bf16.msra.mxu1 %v31701_v37  ;;  %26404 = vmatprep.subr.msk.bf16.mxu0 %vm30729_vm2, %v31703_v27 }
  0x60   :  { %26414 = vmatprep.subr.msk.bf16.mxu1 %vm30729_vm2, %v31712_v28  ;;  %2069 = vmatprep.mubr.f32.mxu0 %v37331_v38 }
  0x61   :  { %2140 = vmatprep.mubr.f32.mxu1 %v37331_v38 }
  0x62   :  { %26407 = vmatpush1.bf16.msk.msra.mxu0 %vm30729_vm2, %v31725_v36 }
  0x63   :  { %26417 = vmatpush1.bf16.msk.msra.mxu1 %vm30729_vm2, %v31731_v12  ;;  %26419 = vmatprep.subr.bf16.mxu0 %v30698_v4 }
  0x64   :  { %26429 = vmatprep.subr.bf16.mxu1 %v30709_v8 }
  0x65   :  { %23585 = vmatmul.mubr.msk.f32.vlgmr.msra.gmra.mrb[2].mxu0 %vm115_vm3, %v31693_v14 }
  0x66   :  { %23588 = vmatmul.mubr.msk.f32.vlgmr.msra.gmra.mrb[2].mxu1 %vm115_vm3, %v31693_v14  ;;  %26421 = vmatpush1.bf16.msra.mxu0 %v30711_v9 }
  0x67   :  { %26431 = vmatpush1.bf16.msra.mxu1 %v30723_v13  ;;  %26424 = vmatprep.subr.msk.bf16.mxu0 %vm30729_vm2, %v30738_v17 }
  0x68   :  { %26434 = vmatprep.subr.msk.bf16.mxu1 %vm30729_vm2, %v30750_v21  ;;  %2241 = vmatprep.mubr.f32.mxu0 %v37331_v38 }
  0x69   :  { %2312 = vmatprep.mubr.f32.mxu1 %v37331_v38 }
  0x6a   :  { %26427 = vmatpush1.bf16.msk.msra.mxu0 %vm30729_vm2, %v30752_v22 }
  0x6b   :  { %26437 = vmatpush1.bf16.msk.msra.mxu1 %vm30729_vm2, %v30766_v26  ;;  %26439 = vmatprep.subr.bf16.mxu0 %v30780_v30 }
  0x6c   :  { %26449 = vmatprep.subr.bf16.mxu1 %v30782_v31 }
  0x6d   :  { %23591 = vmatmul.mubr.msk.f32.vlgmr.msra.gmra.mrb[4].mxu0 %vm115_vm3, %v31339_v34 }
  0x6e   :  { %23594 = vmatmul.mubr.msk.f32.vlgmr.msra.gmra.mrb[4].mxu1 %vm115_vm3, %v31339_v34  ;;  %26441 = vmatpush1.bf16.msra.mxu0 %v30798_v35 }
  0x6f   :  { %26451 = vmatpush1.bf16.msra.mxu1 %v30813_v39  ;;  %26444 = vmatprep.subr.msk.bf16.mxu0 %vm30729_vm2, %v30825_v43 }
  0x70   :  { %26454 = vmatprep.subr.msk.bf16.mxu1 %vm30729_vm2, %v30827_v44  ;;  %2383 = vmatprep.mubr.f32.mxu0 %v37331_v38 }
  0x71   :  { %2454 = vmatprep.mubr.f32.mxu1 %v37331_v38 }
  0x72   :  { %26447 = vmatpush1.bf16.msk.msra.mxu0 %vm30729_vm2, %v30852_v51 }
  0x73   :  { %26457 = vmatpush1.bf16.msk.msra.mxu1 %vm30729_vm2, %v30864_v54  ;;  %26459 = vmatprep.subr.bf16.mxu0 %v30866_v55 }
  0x74   :  { %26469 = vmatprep.subr.bf16.mxu1 %v30881_v59 }
  0x75   :  { %23597 = vmatmul.mubr.msk.f32.vlgmr.msra.gmra.mrb[6].mxu0 %vm115_vm3, %v31339_v34 }
  0x76   :  { %23600 = vmatmul.mubr.msk.f32.vlgmr.msra.gmra.mrb[6].mxu1 %vm115_vm3, %v31339_v34  ;;  %26461 = vmatpush1.bf16.msra.mxu0 %v30902_v1  ;;  %v37373_v34 = vld [vmem:[#allocation29_spill] sm:$0xff] }
  0x77   :  { %26471 = vmatpush1.bf16.msra.mxu1 %v30908_v2  ;;  %26464 = vmatprep.subr.msk.bf16.mxu0 %vm30729_vm2, %v30910_v5 }
  0x78   :  { %26474 = vmatprep.subr.msk.bf16.mxu1 %vm30729_vm2, %v30922_v11  ;;  %2525 = vmatprep.mubr.f32.mxu0 %v37331_v38 }
  0x79   :  { %2596 = vmatprep.mubr.f32.mxu1 %v37331_v38 }
  0x7a   :  { %26467 = vmatpush1.bf16.msk.msra.mxu0 %vm30729_vm2, %v30944_v20 }
  0x7b   :  { %26477 = vmatpush1.bf16.msk.msra.mxu1 %vm30729_vm2, %v30950_v23  ;;  %26479 = vmatprep.subr.bf16.mxu0 %v30952_v24 }
  0x7c   :  { %26489 = vmatprep.subr.bf16.mxu1 %v30967_v29 }
  0x7d   :  { %23603 = vmatmul.mubr.msk.f32.vlgmr.msra.gmra.mrb[4].mxu0 %vm115_vm3, %v31162_v7 }
  0x7e   :  { %23606 = vmatmul.mubr.msk.f32.vlgmr.msra.gmra.mrb[4].mxu1 %vm115_vm3, %v31162_v7  ;;  %26481 = vmatpush1.bf16.msra.mxu0 %v30991_v40 }
  0x7f   :  { %26491 = vmatpush1.bf16.msra.mxu1 %v30997_v41  ;;  %26484 = vmatprep.subr.msk.bf16.mxu0 %vm30729_vm2, %v30999_v42 }
  0x80   :  { %26494 = vmatprep.subr.msk.bf16.mxu1 %vm30729_vm2, %v31011_v48  ;;  %2667 = vmatprep.mubr.f32.mxu0 %v37331_v38 }
  0x81   :  { %2738 = vmatprep.mubr.f32.mxu1 %v37331_v38 }
  0x82   :  { %26487 = vmatpush1.bf16.msk.msra.mxu0 %vm30729_vm2, %v31031_v57 }
  0x83   :  { %26497 = vmatpush1.bf16.msk.msra.mxu1 %vm30729_vm2, %v31037_v58  ;;  %26499 = vmatprep.subr.bf16.mxu0 %v31039_v60 }
  0x84   :  { %26509 = vmatprep.subr.bf16.mxu1 %v31054_v0 }
  0x85   :  { %23609 = vmatmul.mubr.msk.f32.vlgmr.msra.gmra.mrb[6].mxu0 %vm115_vm3, %v31162_v7 }
  0x86   :  { %23612 = vmatmul.mubr.msk.f32.vlgmr.msra.gmra.mrb[6].mxu1 %vm115_vm3, %v31162_v7  ;;  %26501 = vmatpush1.bf16.msra.mxu0 %v31075_v16  ;;  %v37371_v7 = vld [vmem:[#allocation27_spill] sm:$0xff] }
  0x87   :  { %26511 = vmatpush1.bf16.msra.mxu1 %v31081_v18  ;;  %26504 = vmatprep.subr.msk.bf16.mxu0 %vm30729_vm2, %v31083_v19 }
  0x88   :  { %26514 = vmatprep.subr.msk.bf16.mxu1 %vm30729_vm2, %v31095_v32  ;;  %2809 = vmatprep.mubr.f32.mxu0 %v37331_v38 }
  0x89   :  { %2880 = vmatprep.mubr.f32.mxu1 %v37331_v38 }
  0x8a   :  { %26507 = vmatpush1.bf16.msk.msra.mxu0 %vm30729_vm2, %v31115_v46 }
  0x8b   :  { %26517 = vmatpush1.bf16.msk.msra.mxu1 %vm30729_vm2, %v31121_v47  ;;  %26519 = vmatprep.subr.bf16.mxu0 %v31123_v49 }
  0x8c   :  { %26529 = vmatprep.subr.bf16.mxu1 %v31138_v53 }
  0x8d   :  { %23615 = vmatmul.mubr.msk.f32.vlgmr.msra.gmra.mrb[4].mxu0 %vm115_vm3, %v31516_v25 }
  0x8e   :  { %23618 = vmatmul.mubr.msk.f32.vlgmr.msra.gmra.mrb[4].mxu1 %vm115_vm3, %v31516_v25  ;;  %26521 = vmatpush1.bf16.msra.mxu0 %v37371_v7 }
  0x8f   :  { %26531 = vmatpush1.bf16.msra.mxu1 %v37372_v10  ;;  %26524 = vmatprep.subr.msk.bf16.mxu0 %vm30729_vm2, %v37373_v34  ;;  %v37381_v34 = vld [vmem:[#allocation37_spill] sm:$0xff]  ;;  %v37406_v10 = vld [vmem:[#allocation62_spill] sm:$0xff] }
  0x90   :  { %26534 = vmatprep.subr.msk.bf16.mxu1 %vm30729_vm2, %v37374_v52  ;;  %2951 = vmatprep.mubr.f32.mxu0 %v37331_v38  ;;  %v37380_v52 = vld [vmem:[#allocation36_spill] sm:$0xff] }
  0x91   :  { %3022 = vmatprep.mubr.f32.mxu1 %v37331_v38 }
  0x92   :  { %26527 = vmatpush1.bf16.msk.msra.mxu0 %vm30729_vm2, %v37375_v61  ;;  %v37382_v61 = vld [vmem:[#allocation38_spill] sm:$0xff] }
  0x93   :  { %26537 = vmatpush1.bf16.msk.msra.mxu1 %vm30729_vm2, %v37376_v45  ;;  %26539 = vmatprep.subr.bf16.mxu0 %v37377_v6  ;;  %v37384_v6 = vld [vmem:[#allocation40_spill] sm:$0xff]  ;;  %v37389_v45 = vld [vmem:[#allocation45_spill] sm:$0xff] }
  0x94   :  { %26549 = vmatprep.subr.bf16.mxu1 %v37378_v3  ;;  %v37383_v3 = vld [vmem:[#allocation39_spill] sm:$0xff] }
  0x95   :  { %23621 = vmatmul.mubr.msk.f32.vlgmr.msra.gmra.mrb[6].mxu0 %vm115_vm3, %v31516_v25 }
  0x96   :  { %23624 = vmatmul.mubr.msk.f32.vlgmr.msra.gmra.mrb[6].mxu1 %vm115_vm3, %v31516_v25  ;;  %26541 = vmatpush1.bf16.msra.mxu0 %v37379_v33  ;;  %v37386_v33 = vld [vmem:[#allocation42_spill] sm:$0xff] }
  0x97   :  { %26551 = vmatpush1.bf16.msra.mxu1 %v37380_v52  ;;  %26544 = vmatprep.subr.msk.bf16.mxu0 %vm30729_vm2, %v37381_v34  ;;  %v37385_v52 = vld [vmem:[#allocation41_spill] sm:$0xff]  ;;  %v37388_v34 = vld [vmem:[#allocation44_spill] sm:$0xff] }
  0x98   :  { %26554 = vmatprep.subr.msk.bf16.mxu1 %vm30729_vm2, %v37382_v61  ;;  %3101 = vmatprep.mubr.f32.mxu0 %v37331_v38  ;;  %v37387_v61 = vld [vmem:[#allocation43_spill] sm:$0xff] }
  0x99   :  { %3172 = vmatprep.mubr.f32.mxu1 %v37331_v38 }
  0x9a   :  { %26547 = vmatpush1.bf16.msk.msra.mxu0 %vm30729_vm2, %v37383_v3  ;;  %v37390_v3 = vld [vmem:[#allocation46_spill] sm:$0xff] }
  0x9b   :  { %26557 = vmatpush1.bf16.msk.msra.mxu1 %vm30729_vm2, %v37384_v6  ;;  %26559 = vmatprep.subr.bf16.mxu0 %v37385_v52  ;;  %v37392_v52 = vld [vmem:[#allocation48_spill] sm:$0xff]  ;;  %v37397_v6 = vld [vmem:[#allocation53_spill] sm:$0xff] }
  0x9c   :  { %26569 = vmatprep.subr.bf16.mxu1 %v37386_v33  ;;  %v37391_v33 = vld [vmem:[#allocation47_spill] sm:$0xff] }
  0x9d   :  { %23627 = vmatmul.mubr.msk.f32.vlgmr.msra.gmra.mrb[4].mxu0 %vm115_vm3, %v31693_v14 }
  0x9e   :  { %23630 = vmatmul.mubr.msk.f32.vlgmr.msra.gmra.mrb[4].mxu1 %vm115_vm3, %v31693_v14  ;;  %26561 = vmatpush1.bf16.msra.mxu0 %v37387_v61  ;;  %v37394_v61 = vld [vmem:[#allocation50_spill] sm:$0xff] }
  0x9f   :  { %26571 = vmatpush1.bf16.msra.mxu1 %v37388_v34  ;;  %26564 = vmatprep.subr.msk.bf16.mxu0 %vm30729_vm2, %v37389_v45  ;;  %v37393_v34 = vld [vmem:[#allocation49_spill] sm:$0xff]  ;;  %v37396_v45 = vld [vmem:[#allocation52_spill] sm:$0xff] }
  0xa0   :  { %26574 = vmatprep.subr.msk.bf16.mxu1 %vm30729_vm2, %v37390_v3  ;;  %3243 = vmatprep.mubr.f32.mxu0 %v37331_v38  ;;  %v37395_v3 = vld [vmem:[#allocation51_spill] sm:$0xff] }
  0xa1   :  { %3314 = vmatprep.mubr.f32.mxu1 %v37331_v38 }
  0xa2   :  { %26567 = vmatpush1.bf16.msk.msra.mxu0 %vm30729_vm2, %v37391_v33  ;;  %v37398_v33 = vld [vmem:[#allocation54_spill] sm:$0xff] }
  0xa3   :  { %26577 = vmatpush1.bf16.msk.msra.mxu1 %vm30729_vm2, %v37392_v52  ;;  %26579 = vmatprep.subr.bf16.mxu0 %v37393_v34  ;;  %v37404_v34 = vld [vmem:[#allocation60_spill] sm:$0xff]  ;;  %v37405_v52 = vld [vmem:[#allocation61_spill] sm:$0xff] }
  0xa4   :  { %26589 = vmatprep.subr.bf16.mxu1 %v37394_v61  ;;  %v37399_v61 = vld [vmem:[#allocation55_spill] sm:$0xff] }
  0xa5   :  { %23633 = vmatmul.mubr.msk.f32.vlgmr.msra.gmra.mrb[6].mxu0 %vm115_vm3, %v31693_v14 }
  0xa6   :  { %23636 = vmatmul.mubr.msk.f32.vlgmr.msra.gmra.mrb[6].mxu1 %vm115_vm3, %v31693_v14  ;;  %26581 = vmatpush1.bf16.msra.mxu0 %v37395_v3  ;;  %v37400_v3 = vld [vmem:[#allocation56_spill] sm:$0xff] }
  0xa7   :  { %26591 = vmatpush1.bf16.msra.mxu1 %v37396_v45  ;;  %26584 = vmatprep.subr.msk.bf16.mxu0 %vm30729_vm2, %v37397_v6  ;;  %v31942_v45 = vld [vmem:[%s36839_s0 + $0x30] sm:$0xff]  ;;  %v37401_v6 = vld [vmem:[#allocation57_spill] sm:$0xff] }
  0xa8   :  { %26594 = vmatprep.subr.msk.bf16.mxu1 %vm30729_vm2, %v37398_v33  ;;  %3398 = vmatprep.mubr.f32.mxu0 %v37331_v38  ;;  %v37402_v33 = vld [vmem:[#allocation58_spill] sm:$0xff] }
  0xa9   :  { %3469 = vmatprep.mubr.f32.mxu1 %v37331_v38 }
  0xaa   :  { %26587 = vmatpush1.bf16.msk.msra.mxu0 %vm30729_vm2, %v37399_v61  ;;  %v37403_v61 = vld [vmem:[#allocation59_spill] sm:$0xff] }
  0xab   :  { %26597 = vmatpush1.bf16.msk.msra.mxu1 %vm30729_vm2, %v37400_v3  ;;  %26599 = vmatprep.subr.bf16.mxu0 %v37401_v6  ;;  %v37408_v6 = vld [vmem:[#allocation64_spill] sm:$0xff]  ;;  %v37413_v3 = vld [vmem:[#allocation69_spill] sm:$0xff] }
  0xac   :  { %26609 = vmatprep.subr.bf16.mxu1 %v37402_v33  ;;  %v37407_v33 = vld [vmem:[#allocation63_spill] sm:$0xff] }
  0xad   :  { %23640 = vmatmul.mubr.msk.f32.vlgmr.msra.gmra.mrb[4].mxu0 %vm115_vm3, %v31942_v45 }
  0xae   :  { %23643 = vmatmul.mubr.msk.f32.vlgmr.msra.gmra.mrb[4].mxu1 %vm115_vm3, %v31942_v45  ;;  %26601 = vmatpush1.bf16.msra.mxu0 %v37403_v61  ;;  %v37410_v61 = vld [vmem:[#allocation66_spill] sm:$0xff] }
  0xaf   :  { %26611 = vmatpush1.bf16.msra.mxu1 %v37404_v34  ;;  %26604 = vmatprep.subr.msk.bf16.mxu0 %vm30729_vm2, %v37405_v52  ;;  %v37409_v34 = vld [vmem:[#allocation65_spill] sm:$0xff]  ;;  %v37412_v52 = vld [vmem:[#allocation68_spill] sm:$0xff] }
  0xb0   :  { %26614 = vmatprep.subr.msk.bf16.mxu1 %vm30729_vm2, %v37406_v10  ;;  %3540 = vmatprep.mubr.f32.mxu0 %v37331_v38  ;;  %v37411_v10 = vld [vmem:[#allocation67_spill] sm:$0xff] }
  0xb1   :  { %3611 = vmatprep.mubr.f32.mxu1 %v37331_v38 }
  0xb2   :  { %26607 = vmatpush1.bf16.msk.msra.mxu0 %vm30729_vm2, %v37407_v33  ;;  %v37414_v33 = vld [vmem:[#allocation70_spill] sm:$0xff] }
  0xb3   :  { %26617 = vmatpush1.bf16.msk.msra.mxu1 %vm30729_vm2, %v37408_v6  ;;  %26619 = vmatprep.subr.bf16.mxu0 %v37409_v34 }
  0xb4   :  { %26629 = vmatprep.subr.bf16.mxu1 %v37410_v61  ;;  %v37415_v61 = vld [vmem:[#allocation71_spill] sm:$0xff] }
  0xb5   :  { %23646 = vmatmul.mubr.msk.f32.vlgmr.msra.gmra.mrb[6].mxu0 %vm115_vm3, %v31942_v45 }
  0xb6   :  { %23649 = vmatmul.mubr.msk.f32.vlgmr.msra.gmra.mrb[6].mxu1 %vm115_vm3, %v31942_v45  ;;  %26621 = vmatpush1.bf16.msra.mxu0 %v37411_v10 }
  0xb7   :  { %26631 = vmatpush1.bf16.msra.mxu1 %v37412_v52  ;;  %26624 = vmatprep.subr.msk.bf16.mxu0 %vm30729_vm2, %v37413_v3  ;;  %v31991_v52 = vld [vmem:[%s36839_s0 + $0x38] sm:$0xff] }
  0xb8   :  { %26634 = vmatprep.subr.msk.bf16.mxu1 %vm30729_vm2, %v37414_v33  ;;  %3695 = vmatprep.mubr.f32.mxu0 %v37331_v38 }
  0xb9   :  { %3766 = vmatprep.mubr.f32.mxu1 %v37331_v38 }
  0xba   :  { %26627 = vmatpush1.bf16.msk.msra.mxu0 %vm30729_vm2, %v37415_v61 }
  0xbb   :  { %26637 = vmatpush1.bf16.msk.msra.mxu1 %vm30729_vm2, %v31652_v62  ;;  %26639 = vmatprep.subr.bf16.mxu0 %v31654_v56 }
  0xbc   :  { %26649 = vmatprep.subr.bf16.mxu1 %v31669_v63 }
  0xbd   :  { %23653 = vmatmul.mubr.msk.f32.vlgmr.msra.gmra.mrb[4].mxu0 %vm115_vm3, %v31991_v52 }
  0xbe   :  { %23656 = vmatmul.mubr.msk.f32.vlgmr.msra.gmra.mrb[4].mxu1 %vm115_vm3, %v31991_v52  ;;  %26641 = vmatpush1.bf16.msra.mxu0 %v31695_v50 }
  0xbf   :  { %26651 = vmatpush1.bf16.msra.mxu1 %v31701_v37  ;;  %26644 = vmatprep.subr.msk.bf16.mxu0 %vm30729_vm2, %v31703_v27 }
  0xc0   :  { %26654 = vmatprep.subr.msk.bf16.mxu1 %vm30729_vm2, %v31712_v28  ;;  %3837 = vmatprep.mubr.f32.mxu0 %v37331_v38 }
  0xc1   :  { %3908 = vmatprep.mubr.f32.mxu1 %v37331_v38 }
  0xc2   :  { %26647 = vmatpush1.bf16.msk.msra.mxu0 %vm30729_vm2, %v31725_v36 }
  0xc3   :  { %26657 = vmatpush1.bf16.msk.msra.mxu1 %vm30729_vm2, %v31731_v12  ;;  %26659 = vmatprep.subr.bf16.mxu0 %v30698_v4 }
  0xc4   :  { %26669 = vmatprep.subr.bf16.mxu1 %v30709_v8 }
  0xc5   :  { %23659 = vmatmul.mubr.msk.f32.vlgmr.msra.gmra.mrb[6].mxu0 %vm115_vm3, %v31991_v52 }
  0xc6   :  { %23662 = vmatmul.mubr.msk.f32.vlgmr.msra.gmra.mrb[6].mxu1 %vm115_vm3, %v31991_v52  ;;  %26661 = vmatpush1.bf16.msra.mxu0 %v30711_v9 }
  0xc7   :  { %26671 = vmatpush1.bf16.msra.mxu1 %v30723_v13  ;;  %26664 = vmatprep.subr.msk.bf16.mxu0 %vm30729_vm2, %v30738_v17 }
  0xc8   :  { %26674 = vmatprep.subr.msk.bf16.mxu1 %vm30729_vm2, %v30750_v21  ;;  %3997 = vmatprep.mubr.f32.mxu0 %v37331_v38 }
  0xc9   :  { %4068 = vmatprep.mubr.f32.mxu1 %v37331_v38 }
  0xca   :  { %26667 = vmatpush1.bf16.msk.msra.mxu0 %vm30729_vm2, %v30752_v22 }
  0xcb   :  { %26677 = vmatpush1.bf16.msk.msra.mxu1 %vm30729_vm2, %v30766_v26  ;;  %26679 = vmatprep.subr.bf16.mxu0 %v30780_v30 }
  0xcc   :  { %26689 = vmatprep.subr.bf16.mxu1 %v30782_v31 }
  0xcd   :  { %23665 = vmatmul.mubr.msk.f32.vlgmr.msra.gmra.mrb[8].mxu0 %vm115_vm3, %v31693_v14 }
  0xce   :  { %23668 = vmatmul.mubr.msk.f32.vlgmr.msra.gmra.mrb[8].mxu1 %vm115_vm3, %v31693_v14  ;;  %26681 = vmatpush1.bf16.msra.mxu0 %v30798_v35 }
  0xcf   :  { %26691 = vmatpush1.bf16.msra.mxu1 %v30813_v39  ;;  %26684 = vmatprep.subr.msk.bf16.mxu0 %vm30729_vm2, %v30825_v43 }
  0xd0   :  { %26694 = vmatprep.subr.msk.bf16.mxu1 %vm30729_vm2, %v30827_v44  ;;  %4139 = vmatprep.mubr.f32.mxu0 %v37331_v38 }
  0xd1   :  { %4210 = vmatprep.mubr.f32.mxu1 %v37331_v38 }
  0xd2   :  { %26687 = vmatpush1.bf16.msk.msra.mxu0 %vm30729_vm2, %v30852_v51 }
  0xd3   :  { %26697 = vmatpush1.bf16.msk.msra.mxu1 %vm30729_vm2, %v30864_v54  ;;  %26699 = vmatprep.subr.bf16.mxu0 %v30866_v55 }
  0xd4   :  { %26709 = vmatprep.subr.bf16.mxu1 %v30881_v59 }
  0xd5   :  { %23671 = vmatmul.mubr.msk.f32.vlgmr.msra.gmra.mrb[10].mxu0 %vm115_vm3, %v31693_v14 }
  0xd6   :  { %23674 = vmatmul.mubr.msk.f32.vlgmr.msra.gmra.mrb[10].mxu1 %vm115_vm3, %v31693_v14  ;;  %26701 = vmatpush1.bf16.msra.mxu0 %v30902_v1  ;;  %v37417_v14 = vld [vmem:[#allocation29_spill] sm:$0xff] }
  0xd7   :  { %26711 = vmatpush1.bf16.msra.mxu1 %v30908_v2  ;;  %26704 = vmatprep.subr.msk.bf16.mxu0 %vm30729_vm2, %v30910_v5 }
  0xd8   :  { %26714 = vmatprep.subr.msk.bf16.mxu1 %vm30729_vm2, %v30922_v11  ;;  %4281 = vmatprep.mubr.f32.mxu0 %v37331_v38 }
  0xd9   :  { %4352 = vmatprep.mubr.f32.mxu1 %v37331_v38 }
  0xda   :  { %26707 = vmatpush1.bf16.msk.msra.mxu0 %vm30729_vm2, %v30944_v20 }
  0xdb   :  { %26717 = vmatpush1.bf16.msk.msra.mxu1 %vm30729_vm2, %v30950_v23  ;;  %26719 = vmatprep.subr.bf16.mxu0 %v30952_v24 }
  0xdc   :  { %26729 = vmatprep.subr.bf16.mxu1 %v30967_v29 }
  0xdd   :  { %23677 = vmatmul.mubr.msk.f32.vlgmr.msra.gmra.mrb[8].mxu0 %vm115_vm3, %v31516_v25 }
  0xde   :  { %23680 = vmatmul.mubr.msk.f32.vlgmr.msra.gmra.mrb[8].mxu1 %vm115_vm3, %v31516_v25  ;;  %26721 = vmatpush1.bf16.msra.mxu0 %v30991_v40 }
  0xdf   :  { %26731 = vmatpush1.bf16.msra.mxu1 %v30997_v41  ;;  %26724 = vmatprep.subr.msk.bf16.mxu0 %vm30729_vm2, %v30999_v42 }
  0xe0   :  { %26734 = vmatprep.subr.msk.bf16.mxu1 %vm30729_vm2, %v31011_v48  ;;  %4423 = vmatprep.mubr.f32.mxu0 %v37331_v38 }
  0xe1   :  { %4494 = vmatprep.mubr.f32.mxu1 %v37331_v38 }
  0xe2   :  { %26727 = vmatpush1.bf16.msk.msra.mxu0 %vm30729_vm2, %v31031_v57 }
  0xe3   :  { %26737 = vmatpush1.bf16.msk.msra.mxu1 %vm30729_vm2, %v31037_v58  ;;  %26739 = vmatprep.subr.bf16.mxu0 %v31039_v60 }
  0xe4   :  { %26749 = vmatprep.subr.bf16.mxu1 %v31054_v0 }
  0xe5   :  { %23683 = vmatmul.mubr.msk.f32.vlgmr.msra.gmra.mrb[10].mxu0 %vm115_vm3, %v31516_v25 }
  0xe6   :  { %23686 = vmatmul.mubr.msk.f32.vlgmr.msra.gmra.mrb[10].mxu1 %vm115_vm3, %v31516_v25  ;;  %26741 = vmatpush1.bf16.msra.mxu0 %v31075_v16  ;;  %v37416_v25 = vld [vmem:[#allocation28_spill] sm:$0xff] }
  0xe7   :  { %26751 = vmatpush1.bf16.msra.mxu1 %v31081_v18  ;;  %26744 = vmatprep.subr.msk.bf16.mxu0 %vm30729_vm2, %v31083_v19 }
  0xe8   :  { %26754 = vmatprep.subr.msk.bf16.mxu1 %vm30729_vm2, %v31095_v32  ;;  %4565 = vmatprep.mubr.f32.mxu0 %v37331_v38  ;;  %v37450_v32 = vld [vmem:[#allocation62_spill] sm:$0xff] }
  0xe9   :  { %4636 = vmatprep.mubr.f32.mxu1 %v37331_v38 }
  0xea   :  { %26747 = vmatpush1.bf16.msk.msra.mxu0 %vm30729_vm2, %v31115_v46  ;;  %v37418_v46 = vld [vmem:[#allocation30_spill] sm:$0xff] }
  0xeb   :  { %26757 = vmatpush1.bf16.msk.msra.mxu1 %vm30729_vm2, %v31121_v47  ;;  %26759 = vmatprep.subr.bf16.mxu0 %v31123_v49  ;;  %v37420_v49 = vld [vmem:[#allocation32_spill] sm:$0xff]  ;;  %v37425_v47 = vld [vmem:[#allocation37_spill] sm:$0xff] }
  0xec   :  { %26769 = vmatprep.subr.bf16.mxu1 %v31138_v53  ;;  %v37419_v53 = vld [vmem:[#allocation31_spill] sm:$0xff] }
  0xed   :  { %23689 = vmatmul.mubr.msk.f32.vlgmr.msra.gmra.mrb[8].mxu0 %vm115_vm3, %v31942_v45 }
  0xee   :  { %23692 = vmatmul.mubr.msk.f32.vlgmr.msra.gmra.mrb[8].mxu1 %vm115_vm3, %v31942_v45  ;;  %26761 = vmatpush1.bf16.msra.mxu0 %v37371_v7  ;;  %v37422_v7 = vld [vmem:[#allocation34_spill] sm:$0xff] }
  0xef   :  { %26771 = vmatpush1.bf16.msra.mxu1 %v37416_v25  ;;  %26764 = vmatprep.subr.msk.bf16.mxu0 %vm30729_vm2, %v37417_v14  ;;  %v37421_v25 = vld [vmem:[#allocation33_spill] sm:$0xff]  ;;  %v37424_v14 = vld [vmem:[#allocation36_spill] sm:$0xff] }
  0xf0   :  { %26774 = vmatprep.subr.msk.bf16.mxu1 %vm30729_vm2, %v37418_v46  ;;  %4707 = vmatprep.mubr.f32.mxu0 %v37331_v38  ;;  %v37423_v46 = vld [vmem:[#allocation35_spill] sm:$0xff] }
  0xf1   :  { %4778 = vmatprep.mubr.f32.mxu1 %v37331_v38 }
  0xf2   :  { %26767 = vmatpush1.bf16.msk.msra.mxu0 %vm30729_vm2, %v37419_v53  ;;  %v37426_v53 = vld [vmem:[#allocation38_spill] sm:$0xff] }
  0xf3   :  { %26777 = vmatpush1.bf16.msk.msra.mxu1 %vm30729_vm2, %v37420_v49  ;;  %26779 = vmatprep.subr.bf16.mxu0 %v37421_v25  ;;  %v37428_v25 = vld [vmem:[#allocation40_spill] sm:$0xff]  ;;  %v37433_v49 = vld [vmem:[#allocation45_spill] sm:$0xff] }
  0xf4   :  { %26789 = vmatprep.subr.bf16.mxu1 %v37422_v7  ;;  %v37427_v7 = vld [vmem:[#allocation39_spill] sm:$0xff] }
  0xf5   :  { %23695 = vmatmul.mubr.msk.f32.vlgmr.msra.gmra.mrb[10].mxu0 %vm115_vm3, %v31942_v45 }
  0xf6   :  { %23698 = vmatmul.mubr.msk.f32.vlgmr.msra.gmra.mrb[10].mxu1 %vm115_vm3, %v31942_v45  ;;  %26781 = vmatpush1.bf16.msra.mxu0 %v37423_v46  ;;  %v37430_v46 = vld [vmem:[#allocation42_spill] sm:$0xff] }
  0xf7   :  { %26791 = vmatpush1.bf16.msra.mxu1 %v37424_v14  ;;  %26784 = vmatprep.subr.msk.bf16.mxu0 %vm30729_vm2, %v37425_v47  ;;  %v37429_v14 = vld [vmem:[#allocation41_spill] sm:$0xff]  ;;  %v37432_v47 = vld [vmem:[#allocation44_spill] sm:$0xff] }
  0xf8   :  { %26794 = vmatprep.subr.msk.bf16.mxu1 %vm30729_vm2, %v37426_v53  ;;  %4857 = vmatprep.mubr.f32.mxu0 %v37331_v38  ;;  %v37431_v53 = vld [vmem:[#allocation43_spill] sm:$0xff] }
  0xf9   :  { %4928 = vmatprep.mubr.f32.mxu1 %v37331_v38 }
  0xfa   :  { %26787 = vmatpush1.bf16.msk.msra.mxu0 %vm30729_vm2, %v37427_v7  ;;  %v37434_v7 = vld [vmem:[#allocation46_spill] sm:$0xff] }
  0xfb   :  { %26797 = vmatpush1.bf16.msk.msra.mxu1 %vm30729_vm2, %v37428_v25  ;;  %26799 = vmatprep.subr.bf16.mxu0 %v37429_v14  ;;  %v37436_v14 = vld [vmem:[#allocation48_spill] sm:$0xff]  ;;  %v37441_v25 = vld [vmem:[#allocation53_spill] sm:$0xff] }
  0xfc   :  { %26809 = vmatprep.subr.bf16.mxu1 %v37430_v46  ;;  %v37435_v46 = vld [vmem:[#allocation47_spill] sm:$0xff] }
  0xfd   :  { %23701 = vmatmul.mubr.msk.f32.vlgmr.msra.gmra.mrb[8].mxu0 %vm115_vm3, %v31991_v52 }
  0xfe   :  { %23704 = vmatmul.mubr.msk.f32.vlgmr.msra.gmra.mrb[8].mxu1 %vm115_vm3, %v31991_v52  ;;  %26801 = vmatpush1.bf16.msra.mxu0 %v37431_v53  ;;  %v37438_v53 = vld [vmem:[#allocation50_spill] sm:$0xff] }
  0xff   :  { %26811 = vmatpush1.bf16.msra.mxu1 %v37432_v47  ;;  %26804 = vmatprep.subr.msk.bf16.mxu0 %vm30729_vm2, %v37433_v49  ;;  %v37437_v47 = vld [vmem:[#allocation49_spill] sm:$0xff]  ;;  %v37440_v49 = vld [vmem:[#allocation52_spill] sm:$0xff] }
 0x100   :  { %26814 = vmatprep.subr.msk.bf16.mxu1 %vm30729_vm2, %v37434_v7  ;;  %4999 = vmatprep.mubr.f32.mxu0 %v37331_v38  ;;  %v37439_v7 = vld [vmem:[#allocation51_spill] sm:$0xff] }
 0x101   :  { %5070 = vmatprep.mubr.f32.mxu1 %v37331_v38 }
 0x102   :  { %26807 = vmatpush1.bf16.msk.msra.mxu0 %vm30729_vm2, %v37435_v46  ;;  %v37442_v46 = vld [vmem:[#allocation54_spill] sm:$0xff] }
 0x103   :  { %26817 = vmatpush1.bf16.msk.msra.mxu1 %vm30729_vm2, %v37436_v14  ;;  %26819 = vmatprep.subr.bf16.mxu0 %v37437_v47  ;;  %v37448_v47 = vld [vmem:[#allocation60_spill] sm:$0xff]  ;;  %v37449_v14 = vld [vmem:[#allocation61_spill] sm:$0xff] }
 0x104   :  { %26829 = vmatprep.subr.bf16.mxu1 %v37438_v53  ;;  %v37443_v53 = vld [vmem:[#allocation55_spill] sm:$0xff] }
 0x105   :  { %23707 = vmatmul.mubr.msk.f32.vlgmr.msra.gmra.mrb[10].mxu0 %vm115_vm3, %v31991_v52 }
 0x106   :  { %23710 = vmatmul.mubr.msk.f32.vlgmr.msra.gmra.mrb[10].mxu1 %vm115_vm3, %v31991_v52  ;;  %26821 = vmatpush1.bf16.msra.mxu0 %v37439_v7  ;;  %v37444_v7 = vld [vmem:[#allocation56_spill] sm:$0xff] }
 0x107   :  { %26831 = vmatpush1.bf16.msra.mxu1 %v37440_v49  ;;  %26824 = vmatprep.subr.msk.bf16.mxu0 %vm30729_vm2, %v37441_v25  ;;  %v32216_v49 = vld [vmem:[%s36839_s0 + $0x40] sm:$0xff]  ;;  %v37445_v25 = vld [vmem:[#allocation57_spill] sm:$0xff] }
 0x108   :  { %26834 = vmatprep.subr.msk.bf16.mxu1 %vm30729_vm2, %v37442_v46  ;;  %5154 = vmatprep.mubr.f32.mxu0 %v37331_v38  ;;  %v37446_v46 = vld [vmem:[#allocation58_spill] sm:$0xff] }
 0x109   :  { %5225 = vmatprep.mubr.f32.mxu1 %v37331_v38 }
 0x10a   :  { %26827 = vmatpush1.bf16.msk.msra.mxu0 %vm30729_vm2, %v37443_v53  ;;  %v37447_v53 = vld [vmem:[#allocation59_spill] sm:$0xff] }
 0x10b   :  { %26837 = vmatpush1.bf16.msk.msra.mxu1 %vm30729_vm2, %v37444_v7  ;;  %26839 = vmatprep.subr.bf16.mxu0 %v37445_v25 }
 0x10c   :  { %26849 = vmatprep.subr.bf16.mxu1 %v37446_v46  ;;  %v37451_v46 = vld [vmem:[#allocation63_spill] sm:$0xff] }
 0x10d   :  { %23714 = vmatmul.mubr.msk.f32.vlgmr.msra.gmra.mrb[8].mxu0 %vm115_vm3, %v32216_v49 }
 0x10e   :  { %23717 = vmatmul.mubr.msk.f32.vlgmr.msra.gmra.mrb[8].mxu1 %vm115_vm3, %v32216_v49  ;;  %26841 = vmatpush1.bf16.msra.mxu0 %v37447_v53 }
 0x10f   :  { %26851 = vmatpush1.bf16.msra.mxu1 %v37448_v47  ;;  %26844 = vmatprep.subr.msk.bf16.mxu0 %vm30729_vm2, %v37449_v14  ;;  %v37452_v47 = vld [vmem:[#allocation66_spill] sm:$0xff] }
 0x110   :  { %26854 = vmatprep.subr.msk.bf16.mxu1 %vm30729_vm2, %v37450_v32  ;;  %5296 = vmatprep.mubr.f32.mxu0 %v37331_v38  ;;  %v37453_v32 = vld [vmem:[#allocation68_spill] sm:$0xff] }
 0x111   :  { %5367 = vmatprep.mubr.f32.mxu1 %v37331_v38 }
 0x112   :  { %26847 = vmatpush1.bf16.msk.msra.mxu0 %vm30729_vm2, %v37451_v46 }
 0x113   :  { %26857 = vmatpush1.bf16.msk.msra.mxu1 %vm30729_vm2, %v37408_v6  ;;  %26859 = vmatprep.subr.bf16.mxu0 %v37409_v34 }
 0x114   :  { %26869 = vmatprep.subr.bf16.mxu1 %v37452_v47 }
 0x115   :  { %23720 = vmatmul.mubr.msk.f32.vlgmr.msra.gmra.mrb[10].mxu0 %vm115_vm3, %v32216_v49 }
 0x116   :  { %23723 = vmatmul.mubr.msk.f32.vlgmr.msra.gmra.mrb[10].mxu1 %vm115_vm3, %v32216_v49  ;;  %26861 = vmatpush1.bf16.msra.mxu0 %v37411_v10 }
 0x117   :  { %26871 = vmatpush1.bf16.msra.mxu1 %v37453_v32  ;;  %26864 = vmatprep.subr.msk.bf16.mxu0 %vm30729_vm2, %v37413_v3  ;;  %v32265_v32 = vld [vmem:[%s36839_s0 + $0x48] sm:$0xff] }
 0x118   :  { %26874 = vmatprep.subr.msk.bf16.mxu1 %vm30729_vm2, %v37414_v33  ;;  %5451 = vmatprep.mubr.f32.mxu0 %v37331_v38 }
 0x119   :  { %5522 = vmatprep.mubr.f32.mxu1 %v37331_v38 }
 0x11a   :  { %26867 = vmatpush1.bf16.msk.msra.mxu0 %vm30729_vm2, %v37415_v61 }
 0x11b   :  { %26877 = vmatpush1.bf16.msk.msra.mxu1 %vm30729_vm2, %v31652_v62  ;;  %26879 = vmatprep.subr.bf16.mxu0 %v31654_v56 }
 0x11c   :  { %26889 = vmatprep.subr.bf16.mxu1 %v31669_v63 }
 0x11d   :  { %23727 = vmatmul.mubr.msk.f32.vlgmr.msra.gmra.mrb[8].mxu0 %vm115_vm3, %v32265_v32 }
 0x11e   :  { %23730 = vmatmul.mubr.msk.f32.vlgmr.msra.gmra.mrb[8].mxu1 %vm115_vm3, %v32265_v32  ;;  %26881 = vmatpush1.bf16.msra.mxu0 %v31695_v50 }
 0x11f   :  { %26891 = vmatpush1.bf16.msra.mxu1 %v31701_v37  ;;  %26884 = vmatprep.subr.msk.bf16.mxu0 %vm30729_vm2, %v31703_v27 }
 0x120   :  { %26894 = vmatprep.subr.msk.bf16.mxu1 %vm30729_vm2, %v31712_v28  ;;  %5593 = vmatprep.mubr.f32.mxu0 %v37331_v38 }
 0x121   :  { %5664 = vmatprep.mubr.f32.mxu1 %v37331_v38 }
 0x122   :  { %26887 = vmatpush1.bf16.msk.msra.mxu0 %vm30729_vm2, %v31725_v36 }
 0x123   :  { %26897 = vmatpush1.bf16.msk.msra.mxu1 %vm30729_vm2, %v31731_v12  ;;  %26899 = vmatprep.subr.bf16.mxu0 %v30698_v4 }
 0x124   :  { %26909 = vmatprep.subr.bf16.mxu1 %v30709_v8 }
 0x125   :  { %23733 = vmatmul.mubr.msk.f32.vlgmr.msra.gmra.mrb[10].mxu0 %vm115_vm3, %v32265_v32 }
 0x126   :  { %23736 = vmatmul.mubr.msk.f32.vlgmr.msra.gmra.mrb[10].mxu1 %vm115_vm3, %v32265_v32  ;;  %26901 = vmatpush1.bf16.msra.mxu0 %v30711_v9 }
 0x127   :  { %26911 = vmatpush1.bf16.msra.mxu1 %v30723_v13  ;;  %26904 = vmatprep.subr.msk.bf16.mxu0 %vm30729_vm2, %v30738_v17 }
 0x128   :  { %26914 = vmatprep.subr.msk.bf16.mxu1 %vm30729_vm2, %v30750_v21  ;;  %5753 = vmatprep.mubr.f32.mxu0 %v37331_v38 }
 0x129   :  { %5824 = vmatprep.mubr.f32.mxu1 %v37331_v38 }
 0x12a   :  { %26907 = vmatpush1.bf16.msk.msra.mxu0 %vm30729_vm2, %v30752_v22 }
 0x12b   :  { %26917 = vmatpush1.bf16.msk.msra.mxu1 %vm30729_vm2, %v30766_v26  ;;  %26919 = vmatprep.subr.bf16.mxu0 %v30780_v30 }
 0x12c   :  { %26929 = vmatprep.subr.bf16.mxu1 %v30782_v31 }
 0x12d   :  { %23739 = vmatmul.mubr.msk.f32.vlgmr.msra.gmra.mrb[12].mxu0 %vm115_vm3, %v31991_v52 }
 0x12e   :  { %23742 = vmatmul.mubr.msk.f32.vlgmr.msra.gmra.mrb[12].mxu1 %vm115_vm3, %v31991_v52  ;;  %26921 = vmatpush1.bf16.msra.mxu0 %v30798_v35 }
 0x12f   :  { %26931 = vmatpush1.bf16.msra.mxu1 %v30813_v39  ;;  %26924 = vmatprep.subr.msk.bf16.mxu0 %vm30729_vm2, %v30825_v43 }
 0x130   :  { %v1929_v22 = vpop.f32.mrb[0].mxu0  ;;  %26934 = vmatprep.subr.msk.bf16.mxu1 %vm30729_vm2, %v30827_v44  ;;  %5895 = vmatprep.mubr.f32.mxu0 %v37331_v38 }
 0x131   :  { %v2000_v31 = vpop.f32.mrb[0].mxu1  ;;  %v1931_v30 = vpop.f32.mrb[1].mxu0  ;;  %5966 = vmatprep.mubr.f32.mxu1 %v37331_v38 }
 0x132   :  { %v2155_v26 = vmax.f32 %v1929_v22, %v2000_v31  ;;  %v2002_v21 = vpop.f32.mrb[1].mxu1  ;;  %26927 = vmatpush1.bf16.msk.msra.mxu0 %vm30729_vm2, %v30852_v51 }
 0x133   :  { %v2156_v39 = vmax.f32 %v1931_v30, %v2002_v21  ;;  %26937 = vmatpush1.bf16.msk.msra.mxu1 %vm30729_vm2, %v30864_v54  ;;  %26939 = vmatprep.subr.bf16.mxu0 %v30866_v55 }
 0x134   :  { %26949 = vmatprep.subr.bf16.mxu1 %v30881_v59 }
 0x135   :  { %23745 = vmatmul.mubr.msk.f32.vlgmr.msra.gmra.mrb[14].mxu0 %vm115_vm3, %v31991_v52 }
 0x136   :  { %23748 = vmatmul.mubr.msk.f32.vlgmr.msra.gmra.mrb[14].mxu1 %vm115_vm3, %v31991_v52  ;;  %26941 = vmatpush1.bf16.msra.mxu0 %v30902_v1 }
 0x137   :  { %26951 = vmatpush1.bf16.msra.mxu1 %v30908_v2  ;;  %26944 = vmatprep.subr.msk.bf16.mxu0 %vm30729_vm2, %v30910_v5 }
 0x138   :  { %v2071_v21 = vpop.f32.mrb[2].mxu0  ;;  %26954 = vmatprep.subr.msk.bf16.mxu1 %vm30729_vm2, %v30922_v11  ;;  %6037 = vmatprep.mubr.f32.mxu0 %v37331_v38 }
 0x139   :  { %v2142_v22 = vpop.f32.mrb[2].mxu1  ;;  %v2073_v30 = vpop.f32.mrb[3].mxu0  ;;  %6108 = vmatprep.mubr.f32.mxu1 %v37331_v38 }
 0x13a   :  { %v2157_v31 = vmax.f32 %v2071_v21, %v2142_v22  ;;  %v2144_v52 = vpop.f32.mrb[3].mxu1  ;;  %26947 = vmatpush1.bf16.msk.msra.mxu0 %vm30729_vm2, %v30944_v20  ;;  %v37460_v21 = vld [vmem:[#allocation26_spill] sm:$0xff]  ;;  %v37461_v22 = vld [vmem:[#allocation27_spill] sm:$0xff] }
 0x13b   :  { %v2158_v2 = vmax.f32 %v2073_v30, %v2144_v52  ;;  %26957 = vmatpush1.bf16.msk.msra.mxu1 %vm30729_vm2, %v30950_v23  ;;  %26959 = vmatprep.subr.bf16.mxu0 %v30952_v24  ;;  %v37462_v30 = vld [vmem:[#allocation28_spill] sm:$0xff]  ;;  %v37464_v52 = vld [vmem:[#allocation30_spill] sm:$0xff] }
 0x13c   :  { %v32359_v11 = vmax.f32 %v2155_v26, %v2157_v31  ;;  %26969 = vmatprep.subr.bf16.mxu1 %v30967_v29  ;;  %v37456_v26 = vld [vmem:[#allocation22_spill] sm:$0xff]  ;;  %v37463_v31 = vld [vmem:[#allocation29_spill] sm:$0xff] }
 0x13d   :  { %v32362_v5 = vmax.f32 %v2156_v39, %v2158_v2  ;;  %23751 = vmatmul.mubr.msk.f32.vlgmr.msra.gmra.mrb[12].mxu0 %vm115_vm3, %v31942_v45  ;;  %v37457_v39 = vld [vmem:[#allocation23_spill] sm:$0xff]  ;;  %v37458_v2 = vld [vmem:[#allocation24_spill] sm:$0xff] }
 0x13e   :  { %37454 = vst [vmem:[#allocation81_spill] sm:$0xff] %v32359_v11  ;;  %23754 = vmatmul.mubr.msk.f32.vlgmr.msra.gmra.mrb[12].mxu1 %vm115_vm3, %v31942_v45  ;;  %26961 = vmatpush1.bf16.msra.mxu0 %v30991_v40  ;;  %v37465_v11 = vld [vmem:[#allocation31_spill] sm:$0xff] }
 0x13f   :  { %37455 = vst [vmem:[#allocation82_spill] sm:$0xff] %v32362_v5  ;;  %26971 = vmatpush1.bf16.msra.mxu1 %v30997_v41  ;;  %26964 = vmatprep.subr.msk.bf16.mxu0 %vm30729_vm2, %v30999_v42  ;;  %v37466_v5 = vld [vmem:[#allocation32_spill] sm:$0xff] }
 0x140   :  { %26974 = vmatprep.subr.msk.bf16.mxu1 %vm30729_vm2, %v31011_v48  ;;  %6179 = vmatprep.mubr.f32.mxu0 %v37331_v38 }
 0x141   :  { %6250 = vmatprep.mubr.f32.mxu1 %v37331_v38 }
 0x142   :  { %26967 = vmatpush1.bf16.msk.msra.mxu0 %vm30729_vm2, %v31031_v57 }
 0x143   :  { %26977 = vmatpush1.bf16.msk.msra.mxu1 %vm30729_vm2, %v31037_v58  ;;  %26979 = vmatprep.subr.bf16.mxu0 %v31039_v60 }
 0x144   :  { %26989 = vmatprep.subr.bf16.mxu1 %v31054_v0 }
 0x145   :  { %23757 = vmatmul.mubr.msk.f32.vlgmr.msra.gmra.mrb[14].mxu0 %vm115_vm3, %v31942_v45 }
 0x146   :  { %23760 = vmatmul.mubr.msk.f32.vlgmr.msra.gmra.mrb[14].mxu1 %vm115_vm3, %v31942_v45  ;;  %26981 = vmatpush1.bf16.msra.mxu0 %v31075_v16  ;;  %v37459_v45 = vld [vmem:[#allocation25_spill] sm:$0xff] }
 0x147   :  { %26991 = vmatpush1.bf16.msra.mxu1 %v31081_v18  ;;  %26984 = vmatprep.subr.msk.bf16.mxu0 %vm30729_vm2, %v31083_v19 }
 0x148   :  { %26994 = vmatprep.subr.msk.bf16.mxu1 %vm30729_vm2, %v37456_v26  ;;  %6321 = vmatprep.mubr.f32.mxu0 %v37331_v38 }
 0x149   :  { %6392 = vmatprep.mubr.f32.mxu1 %v37331_v38 }
 0x14a   :  { %26987 = vmatpush1.bf16.msk.msra.mxu0 %vm30729_vm2, %v37457_v39 }
 0x14b   :  { %26997 = vmatpush1.bf16.msk.msra.mxu1 %vm30729_vm2, %v37458_v2  ;;  %26999 = vmatprep.subr.bf16.mxu0 %v37459_v45 }
 0x14c   :  { %27009 = vmatprep.subr.bf16.mxu1 %v37460_v21  ;;  %v37471_v21 = vld [vmem:[#allocation37_spill] sm:$0xff] }
 0x14d   :  { %23763 = vmatmul.mubr.msk.f32.vlgmr.msra.gmra.mrb[12].mxu0 %vm115_vm3, %v32216_v49 }
 0x14e   :  { %23766 = vmatmul.mubr.msk.f32.vlgmr.msra.gmra.mrb[12].mxu1 %vm115_vm3, %v32216_v49  ;;  %27001 = vmatpush1.bf16.msra.mxu0 %v37461_v22  ;;  %v37468_v22 = vld [vmem:[#allocation34_spill] sm:$0xff] }
 0x14f   :  { %27011 = vmatpush1.bf16.msra.mxu1 %v37462_v30  ;;  %27004 = vmatprep.subr.msk.bf16.mxu0 %vm30729_vm2, %v37463_v31  ;;  %v37467_v30 = vld [vmem:[#allocation33_spill] sm:$0xff]  ;;  %v37470_v31 = vld [vmem:[#allocation36_spill] sm:$0xff] }
 0x150   :  { %27014 = vmatprep.subr.msk.bf16.mxu1 %vm30729_vm2, %v37464_v52  ;;  %6463 = vmatprep.mubr.f32.mxu0 %v37331_v38  ;;  %v37469_v52 = vld [vmem:[#allocation35_spill] sm:$0xff] }
 0x151   :  { %6534 = vmatprep.mubr.f32.mxu1 %v37331_v38 }
 0x152   :  { %27007 = vmatpush1.bf16.msk.msra.mxu0 %vm30729_vm2, %v37465_v11  ;;  %v37472_v11 = vld [vmem:[#allocation38_spill] sm:$0xff] }
 0x153   :  { %27017 = vmatpush1.bf16.msk.msra.mxu1 %vm30729_vm2, %v37466_v5  ;;  %27019 = vmatprep.subr.bf16.mxu0 %v37467_v30  ;;  %v37474_v30 = vld [vmem:[#allocation40_spill] sm:$0xff]  ;;  %v37479_v5 = vld [vmem:[#allocation45_spill] sm:$0xff] }
 0x154   :  { %27029 = vmatprep.subr.bf16.mxu1 %v37468_v22  ;;  %v37473_v22 = vld [vmem:[#allocation39_spill] sm:$0xff] }
 0x155   :  { %23769 = vmatmul.mubr.msk.f32.vlgmr.msra.gmra.mrb[14].mxu0 %vm115_vm3, %v32216_v49 }
 0x156   :  { %23772 = vmatmul.mubr.msk.f32.vlgmr.msra.gmra.mrb[14].mxu1 %vm115_vm3, %v32216_v49  ;;  %27021 = vmatpush1.bf16.msra.mxu0 %v37469_v52  ;;  %v37476_v52 = vld [vmem:[#allocation42_spill] sm:$0xff] }
 0x157   :  { %27031 = vmatpush1.bf16.msra.mxu1 %v37470_v31  ;;  %27024 = vmatprep.subr.msk.bf16.mxu0 %vm30729_vm2, %v37471_v21  ;;  %v37475_v31 = vld [vmem:[#allocation41_spill] sm:$0xff]  ;;  %v37478_v21 = vld [vmem:[#allocation44_spill] sm:$0xff] }
 0x158   :  { %27034 = vmatprep.subr.msk.bf16.mxu1 %vm30729_vm2, %v37472_v11  ;;  %6613 = vmatprep.mubr.f32.mxu0 %v37331_v38  ;;  %v37477_v11 = vld [vmem:[#allocation43_spill] sm:$0xff] }
 0x159   :  { %6684 = vmatprep.mubr.f32.mxu1 %v37331_v38 }
 0x15a   :  { %27027 = vmatpush1.bf16.msk.msra.mxu0 %vm30729_vm2, %v37473_v22  ;;  %v37480_v22 = vld [vmem:[#allocation46_spill] sm:$0xff] }
 0x15b   :  { %27037 = vmatpush1.bf16.msk.msra.mxu1 %vm30729_vm2, %v37474_v30  ;;  %27039 = vmatprep.subr.bf16.mxu0 %v37475_v31  ;;  %v37482_v31 = vld [vmem:[#allocation48_spill] sm:$0xff]  ;;  %v37487_v30 = vld [vmem:[#allocation53_spill] sm:$0xff] }
 0x15c   :  { %27049 = vmatprep.subr.bf16.mxu1 %v37476_v52  ;;  %v37481_v52 = vld [vmem:[#allocation47_spill] sm:$0xff] }
 0x15d   :  { %23775 = vmatmul.mubr.msk.f32.vlgmr.msra.gmra.mrb[12].mxu0 %vm115_vm3, %v32265_v32 }
 0x15e   :  { %23778 = vmatmul.mubr.msk.f32.vlgmr.msra.gmra.mrb[12].mxu1 %vm115_vm3, %v32265_v32  ;;  %27041 = vmatpush1.bf16.msra.mxu0 %v37477_v11  ;;  %v37484_v11 = vld [vmem:[#allocation50_spill] sm:$0xff] }
 0x15f   :  { %27051 = vmatpush1.bf16.msra.mxu1 %v37478_v21  ;;  %27044 = vmatprep.subr.msk.bf16.mxu0 %vm30729_vm2, %v37479_v5  ;;  %v37483_v21 = vld [vmem:[#allocation49_spill] sm:$0xff]  ;;  %v37486_v5 = vld [vmem:[#allocation52_spill] sm:$0xff] }
 0x160   :  { %27054 = vmatprep.subr.msk.bf16.mxu1 %vm30729_vm2, %v37480_v22  ;;  %6755 = vmatprep.mubr.f32.mxu0 %v37331_v38  ;;  %v37485_v22 = vld [vmem:[#allocation51_spill] sm:$0xff] }
 0x161   :  { %6826 = vmatprep.mubr.f32.mxu1 %v37331_v38 }
 0x162   :  { %27047 = vmatpush1.bf16.msk.msra.mxu0 %vm30729_vm2, %v37481_v52  ;;  %v37488_v52 = vld [vmem:[#allocation54_spill] sm:$0xff] }
 0x163   :  { %27057 = vmatpush1.bf16.msk.msra.mxu1 %vm30729_vm2, %v37482_v31  ;;  %27059 = vmatprep.subr.bf16.mxu0 %v37483_v21 }
 0x164   :  { %27069 = vmatprep.subr.bf16.mxu1 %v37484_v11  ;;  %v37489_v11 = vld [vmem:[#allocation55_spill] sm:$0xff] }
 0x165   :  { %23781 = vmatmul.mubr.msk.f32.vlgmr.msra.gmra.mrb[14].mxu0 %vm115_vm3, %v32265_v32 }
 0x166   :  { %23784 = vmatmul.mubr.msk.f32.vlgmr.msra.gmra.mrb[14].mxu1 %vm115_vm3, %v32265_v32  ;;  %27061 = vmatpush1.bf16.msra.mxu0 %v37485_v22 }
 0x167   :  { %27071 = vmatpush1.bf16.msra.mxu1 %v37486_v5  ;;  %27064 = vmatprep.subr.msk.bf16.mxu0 %vm30729_vm2, %v37487_v30  ;;  %v32494_v5 = vld [vmem:[%s36839_s0 + $0x50] sm:$0xff]  ;;  %v37492_v30 = vld [vmem:[#allocation62_spill] sm:$0xff] }
 0x168   :  { %27074 = vmatprep.subr.msk.bf16.mxu1 %vm30729_vm2, %v37488_v52  ;;  %6910 = vmatprep.mubr.f32.mxu0 %v37331_v38  ;;  %v37490_v52 = vld [vmem:[#allocation58_spill] sm:$0xff] }
 0x169   :  { %6981 = vmatprep.mubr.f32.mxu1 %v37331_v38 }
 0x16a   :  { %27067 = vmatpush1.bf16.msk.msra.mxu0 %vm30729_vm2, %v37489_v11  ;;  %v37491_v11 = vld [vmem:[#allocation60_spill] sm:$0xff] }
 0x16b   :  { %27077 = vmatpush1.bf16.msk.msra.mxu1 %vm30729_vm2, %v37444_v7  ;;  %27079 = vmatprep.subr.bf16.mxu0 %v37445_v25 }
 0x16c   :  { %27089 = vmatprep.subr.bf16.mxu1 %v37490_v52 }
 0x16d   :  { %23788 = vmatmul.mubr.msk.f32.vlgmr.msra.gmra.mrb[12].mxu0 %vm115_vm3, %v32494_v5 }
 0x16e   :  { %23791 = vmatmul.mubr.msk.f32.vlgmr.msra.gmra.mrb[12].mxu1 %vm115_vm3, %v32494_v5  ;;  %27081 = vmatpush1.bf16.msra.mxu0 %v37447_v53 }
 0x16f   :  { %27091 = vmatpush1.bf16.msra.mxu1 %v37491_v11  ;;  %27084 = vmatprep.subr.msk.bf16.mxu0 %vm30729_vm2, %v37449_v14 }
 0x170   :  { %27094 = vmatprep.subr.msk.bf16.mxu1 %vm30729_vm2, %v37492_v30  ;;  %7052 = vmatprep.mubr.f32.mxu0 %v37331_v38  ;;  %v37493_v30 = vld [vmem:[#allocation68_spill] sm:$0xff] }
 0x171   :  { %7123 = vmatprep.mubr.f32.mxu1 %v37331_v38 }
 0x172   :  { %27087 = vmatpush1.bf16.msk.msra.mxu0 %vm30729_vm2, %v37451_v46 }
 0x173   :  { %27097 = vmatpush1.bf16.msk.msra.mxu1 %vm30729_vm2, %v37408_v6  ;;  %27099 = vmatprep.subr.bf16.mxu0 %v37409_v34 }
 0x174   :  { %27109 = vmatprep.subr.bf16.mxu1 %v37452_v47 }
 0x175   :  { %23794 = vmatmul.mubr.msk.f32.vlgmr.msra.gmra.mrb[14].mxu0 %vm115_vm3, %v32494_v5 }
 0x176   :  { %23797 = vmatmul.mubr.msk.f32.vlgmr.msra.gmra.mrb[14].mxu1 %vm115_vm3, %v32494_v5  ;;  %27101 = vmatpush1.bf16.msra.mxu0 %v37411_v10 }
 0x177   :  { %27111 = vmatpush1.bf16.msra.mxu1 %v37493_v30  ;;  %27104 = vmatprep.subr.msk.bf16.mxu0 %vm30729_vm2, %v37413_v3  ;;  %v32543_v30 = vld [vmem:[%s36839_s0 + $0x58] sm:$0xff] }
 0x178   :  { %27114 = vmatprep.subr.msk.bf16.mxu1 %vm30729_vm2, %v37414_v33  ;;  %7207 = vmatprep.mubr.f32.mxu0 %v37331_v38 }
 0x179   :  { %7278 = vmatprep.mubr.f32.mxu1 %v37331_v38 }
 0x17a   :  { %27107 = vmatpush1.bf16.msk.msra.mxu0 %vm30729_vm2, %v37415_v61 }
 0x17b   :  { %27117 = vmatpush1.bf16.msk.msra.mxu1 %vm30729_vm2, %v31652_v62  ;;  %27119 = vmatprep.subr.bf16.mxu0 %v31654_v56 }
 0x17c   :  { %27129 = vmatprep.subr.bf16.mxu1 %v31669_v63 }
 0x17d   :  { %23801 = vmatmul.mubr.msk.f32.vlgmr.msra.gmra.mrb[12].mxu0 %vm115_vm3, %v32543_v30 }
 0x17e   :  { %23804 = vmatmul.mubr.msk.f32.vlgmr.msra.gmra.mrb[12].mxu1 %vm115_vm3, %v32543_v30  ;;  %27121 = vmatpush1.bf16.msra.mxu0 %v31695_v50 }
 0x17f   :  { %27131 = vmatpush1.bf16.msra.mxu1 %v31701_v37  ;;  %27124 = vmatprep.subr.msk.bf16.mxu0 %vm30729_vm2, %v31703_v27 }
 0x180   :  { %27134 = vmatprep.subr.msk.bf16.mxu1 %vm30729_vm2, %v31712_v28  ;;  %7349 = vmatprep.mubr.f32.mxu0 %v37331_v38 }
 0x181   :  { %7420 = vmatprep.mubr.f32.mxu1 %v37331_v38 }
 0x182   :  { %27127 = vmatpush1.bf16.msk.msra.mxu0 %vm30729_vm2, %v31725_v36  ;;  %v37494_v36 = vld [vmem:[#allocation7_spill] sm:$0xff] }
 0x183   :  { %27137 = vmatpush1.bf16.msk.msra.mxu1 %vm30729_vm2, %v31731_v12  ;;  %27139 = vmatprep.subr.bf16.mxu0 %v30698_v4  ;;  %v37496_v4 = vld [vmem:[#allocation9_spill] sm:$0xff] }
 0x184   :  { %27149 = vmatprep.subr.bf16.mxu1 %v30709_v8  ;;  %v37495_v8 = vld [vmem:[#allocation8_spill] sm:$0xff] }
 0x185   :  { %23807 = vmatmul.mubr.msk.f32.vlgmr.msra.gmra.mrb[14].mxu0 %vm115_vm3, %v32543_v30 }
 0x186   :  { %23810 = vmatmul.mubr.msk.f32.vlgmr.msra.gmra.mrb[14].mxu1 %vm115_vm3, %v32543_v30  ;;  %27141 = vmatpush1.bf16.msra.mxu0 %v30711_v9  ;;  %v37498_v9 = vld [vmem:[#allocation11_spill] sm:$0xff] }
 0x187   :  { %27151 = vmatpush1.bf16.msra.mxu1 %v30723_v13  ;;  %27144 = vmatprep.subr.msk.bf16.mxu0 %vm30729_vm2, %v30738_v17  ;;  %v37497_v13 = vld [vmem:[#allocation10_spill] sm:$0xff] }
 0x188   :  { %27154 = vmatprep.subr.msk.bf16.mxu1 %vm30729_vm2, %v37494_v36  ;;  %7509 = vmatprep.mubr.f32.mxu0 %v37331_v38  ;;  %v37499_v36 = vld [vmem:[#allocation13_spill] sm:$0xff] }
 0x189   :  { %7580 = vmatprep.mubr.f32.mxu1 %v37331_v38 }
 0x18a   :  { %27147 = vmatpush1.bf16.msk.msra.mxu0 %vm30729_vm2, %v37495_v8 }
 0x18b   :  { %27157 = vmatpush1.bf16.msk.msra.mxu1 %vm30729_vm2, %v37496_v4  ;;  %27159 = vmatprep.subr.bf16.mxu0 %v37497_v13 }
 0x18c   :  { %27169 = vmatprep.subr.bf16.mxu1 %v37498_v9 }
 0x18d   :  { %23813 = vmatmul.mubr.msk.f32.vlgmr.msra.gmra.mrb[16].mxu0 %vm115_vm3, %v32265_v32 }
 0x18e   :  { %23816 = vmatmul.mubr.msk.f32.vlgmr.msra.gmra.mrb[16].mxu1 %vm115_vm3, %v32265_v32  ;;  %27161 = vmatpush1.bf16.msra.mxu0 %v30798_v35 }
 0x18f   :  { %27171 = vmatpush1.bf16.msra.mxu1 %v37499_v36  ;;  %27164 = vmatprep.subr.msk.bf16.mxu0 %vm30729_vm2, %v30825_v43 }
 0x190   :  { %v3697_v8 = vpop.f32.mrb[4].mxu0  ;;  %27174 = vmatprep.subr.msk.bf16.mxu1 %vm30729_vm2, %v30827_v44  ;;  %7651 = vmatprep.mubr.f32.mxu0 %v37331_v38 }
 0x191   :  { %v3768_v9 = vpop.f32.mrb[4].mxu1  ;;  %v3699_v13 = vpop.f32.mrb[5].mxu0  ;;  %7722 = vmatprep.mubr.f32.mxu1 %v37331_v38 }
 0x192   :  { %v3923_v4 = vmax.f32 %v3697_v8, %v3768_v9  ;;  %v3770_v17 = vpop.f32.mrb[5].mxu1  ;;  %27167 = vmatpush1.bf16.msk.msra.mxu0 %vm30729_vm2, %v30852_v51  ;;  %v37500_v8 = vld [vmem:[#allocation19_spill] sm:$0xff]  ;;  %v37501_v9 = vld [vmem:[#allocation20_spill] sm:$0xff] }
 0x193   :  { %v3924_v36 = vmax.f32 %v3699_v13, %v3770_v17  ;;  %27177 = vmatpush1.bf16.msk.msra.mxu1 %vm30729_vm2, %v30864_v54  ;;  %27179 = vmatprep.subr.bf16.mxu0 %v30866_v55  ;;  %v37502_v17 = vld [vmem:[#allocation21_spill] sm:$0xff] }
 0x194   :  { %27189 = vmatprep.subr.bf16.mxu1 %v30881_v59 }
 0x195   :  { %23819 = vmatmul.mubr.msk.f32.vlgmr.msra.gmra.mrb[18].mxu0 %vm115_vm3, %v32265_v32 }
 0x196   :  { %23822 = vmatmul.mubr.msk.f32.vlgmr.msra.gmra.mrb[18].mxu1 %vm115_vm3, %v32265_v32  ;;  %27181 = vmatpush1.bf16.msra.mxu0 %v30902_v1 }
 0x197   :  { %27191 = vmatpush1.bf16.msra.mxu1 %v37500_v8  ;;  %27184 = vmatprep.subr.msk.bf16.mxu0 %vm30729_vm2, %v37501_v9 }
 0x198   :  { %v3839_v13 = vpop.f32.mrb[6].mxu0  ;;  %27194 = vmatprep.subr.msk.bf16.mxu1 %vm30729_vm2, %v37502_v17  ;;  %7793 = vmatprep.mubr.f32.mxu0 %v37331_v38 }
 0x199   :  { %v3910_v59 = vpop.f32.mrb[6].mxu1  ;;  %v3841_v55 = vpop.f32.mrb[7].mxu0  ;;  %7864 = vmatprep.mubr.f32.mxu1 %v37331_v38 }
 0x19a   :  { %v3925_v32 = vmax.f32 %v3839_v13, %v3910_v59  ;;  %v3912_v54 = vpop.f32.mrb[7].mxu1  ;;  %27187 = vmatpush1.bf16.msk.msra.mxu0 %vm30729_vm2, %v30944_v20  ;;  %v37508_v59 = vld [vmem:[#allocation29_spill] sm:$0xff] }
 0x19b   :  { %v3926_v8 = vmax.f32 %v3841_v55, %v3912_v54  ;;  %27197 = vmatpush1.bf16.msk.msra.mxu1 %vm30729_vm2, %v30950_v23  ;;  %27199 = vmatprep.subr.bf16.mxu0 %v30952_v24  ;;  %v37506_v54 = vld [vmem:[#allocation27_spill] sm:$0xff]  ;;  %v37507_v55 = vld [vmem:[#allocation28_spill] sm:$0xff]  ;;  %v37512_v13 = vld [vmem:[#allocation33_spill] sm:$0xff] }
 0x19c   :  { %v32637_v17 = vmax.f32 %v3923_v4, %v3925_v32  ;;  %27209 = vmatprep.subr.bf16.mxu1 %v30967_v29  ;;  %v37505_v4 = vld [vmem:[#allocation26_spill] sm:$0xff] }
 0x19d   :  { %v32640_v9 = vmax.f32 %v3924_v36, %v3926_v8  ;;  %23825 = vmatmul.mubr.msk.f32.vlgmr.msra.gmra.mrb[16].mxu0 %vm115_vm3, %v32216_v49  ;;  %v37510_v36 = vld [vmem:[#allocation31_spill] sm:$0xff]  ;;  %v37511_v8 = vld [vmem:[#allocation32_spill] sm:$0xff]  ;;  %v37513_v32 = vld [vmem:[#allocation34_spill] sm:$0xff] }
 0x19e   :  { %37503 = vst [vmem:[#allocation22_spill] sm:$0xff] %v32637_v17  ;;  %23828 = vmatmul.mubr.msk.f32.vlgmr.msra.gmra.mrb[16].mxu1 %vm115_vm3, %v32216_v49  ;;  %27201 = vmatpush1.bf16.msra.mxu0 %v30991_v40  ;;  %v37514_v17 = vld [vmem:[#allocation35_spill] sm:$0xff] }
 0x19f   :  { %37504 = vst [vmem:[#allocation23_spill] sm:$0xff] %v32640_v9  ;;  %27211 = vmatpush1.bf16.msra.mxu1 %v30997_v41  ;;  %27204 = vmatprep.subr.msk.bf16.mxu0 %vm30729_vm2, %v30999_v42  ;;  %v37515_v9 = vld [vmem:[#allocation36_spill] sm:$0xff] }
 0x1a0   :  { %27214 = vmatprep.subr.msk.bf16.mxu1 %vm30729_vm2, %v31011_v48  ;;  %7935 = vmatprep.mubr.f32.mxu0 %v37331_v38 }
 0x1a1   :  { %8006 = vmatprep.mubr.f32.mxu1 %v37331_v38 }
 0x1a2   :  { %27207 = vmatpush1.bf16.msk.msra.mxu0 %vm30729_vm2, %v31031_v57 }
 0x1a3   :  { %27217 = vmatpush1.bf16.msk.msra.mxu1 %vm30729_vm2, %v31037_v58  ;;  %27219 = vmatprep.subr.bf16.mxu0 %v31039_v60 }
 0x1a4   :  { %27229 = vmatprep.subr.bf16.mxu1 %v31054_v0 }
 0x1a5   :  { %23831 = vmatmul.mubr.msk.f32.vlgmr.msra.gmra.mrb[18].mxu0 %vm115_vm3, %v32216_v49 }
 0x1a6   :  { %23834 = vmatmul.mubr.msk.f32.vlgmr.msra.gmra.mrb[18].mxu1 %vm115_vm3, %v32216_v49  ;;  %27221 = vmatpush1.bf16.msra.mxu0 %v31075_v16  ;;  %v37509_v49 = vld [vmem:[#allocation30_spill] sm:$0xff] }
 0x1a7   :  { %27231 = vmatpush1.bf16.msra.mxu1 %v31081_v18  ;;  %27224 = vmatprep.subr.msk.bf16.mxu0 %vm30729_vm2, %v31083_v19 }
 0x1a8   :  { %27234 = vmatprep.subr.msk.bf16.mxu1 %vm30729_vm2, %v37456_v26  ;;  %8077 = vmatprep.mubr.f32.mxu0 %v37331_v38 }
 0x1a9   :  { %8148 = vmatprep.mubr.f32.mxu1 %v37331_v38 }
 0x1aa   :  { %27227 = vmatpush1.bf16.msk.msra.mxu0 %vm30729_vm2, %v37457_v39 }
 0x1ab   :  { %27237 = vmatpush1.bf16.msk.msra.mxu1 %vm30729_vm2, %v37458_v2  ;;  %27239 = vmatprep.subr.bf16.mxu0 %v37459_v45 }
 0x1ac   :  { %27249 = vmatprep.subr.bf16.mxu1 %v37505_v4 }
 0x1ad   :  { %23837 = vmatmul.mubr.msk.f32.vlgmr.msra.gmra.mrb[16].mxu0 %vm115_vm3, %v32494_v5 }
 0x1ae   :  { %23840 = vmatmul.mubr.msk.f32.vlgmr.msra.gmra.mrb[16].mxu1 %vm115_vm3, %v32494_v5  ;;  %27241 = vmatpush1.bf16.msra.mxu0 %v37506_v54 }
 0x1af   :  { %27251 = vmatpush1.bf16.msra.mxu1 %v37507_v55  ;;  %27244 = vmatprep.subr.msk.bf16.mxu0 %vm30729_vm2, %v37508_v59 }
 0x1b0   :  { %27254 = vmatprep.subr.msk.bf16.mxu1 %vm30729_vm2, %v37509_v49  ;;  %8219 = vmatprep.mubr.f32.mxu0 %v37331_v38  ;;  %v37516_v49 = vld [vmem:[#allocation37_spill] sm:$0xff] }
 0x1b1   :  { %8290 = vmatprep.mubr.f32.mxu1 %v37331_v38 }
 0x1b2   :  { %27247 = vmatpush1.bf16.msk.msra.mxu0 %vm30729_vm2, %v37510_v36  ;;  %v37517_v36 = vld [vmem:[#allocation38_spill] sm:$0xff] }
 0x1b3   :  { %27257 = vmatpush1.bf16.msk.msra.mxu1 %vm30729_vm2, %v37511_v8  ;;  %27259 = vmatprep.subr.bf16.mxu0 %v37512_v13  ;;  %v37519_v13 = vld [vmem:[#allocation40_spill] sm:$0xff]  ;;  %v37524_v8 = vld [vmem:[#allocation45_spill] sm:$0xff] }
 0x1b4   :  { %27269 = vmatprep.subr.bf16.mxu1 %v37513_v32  ;;  %v37518_v32 = vld [vmem:[#allocation39_spill] sm:$0xff] }
 0x1b5   :  { %23843 = vmatmul.mubr.msk.f32.vlgmr.msra.gmra.mrb[18].mxu0 %vm115_vm3, %v32494_v5 }
 0x1b6   :  { %23846 = vmatmul.mubr.msk.f32.vlgmr.msra.gmra.mrb[18].mxu1 %vm115_vm3, %v32494_v5  ;;  %27261 = vmatpush1.bf16.msra.mxu0 %v37514_v17  ;;  %v37521_v17 = vld [vmem:[#allocation42_spill] sm:$0xff] }
 0x1b7   :  { %27271 = vmatpush1.bf16.msra.mxu1 %v37515_v9  ;;  %27264 = vmatprep.subr.msk.bf16.mxu0 %vm30729_vm2, %v37516_v49  ;;  %v37520_v9 = vld [vmem:[#allocation41_spill] sm:$0xff]  ;;  %v37523_v49 = vld [vmem:[#allocation44_spill] sm:$0xff] }
 0x1b8   :  { %27274 = vmatprep.subr.msk.bf16.mxu1 %vm30729_vm2, %v37517_v36  ;;  %8369 = vmatprep.mubr.f32.mxu0 %v37331_v38  ;;  %v37522_v36 = vld [vmem:[#allocation43_spill] sm:$0xff] }
 0x1b9   :  { %8440 = vmatprep.mubr.f32.mxu1 %v37331_v38 }
 0x1ba   :  { %27267 = vmatpush1.bf16.msk.msra.mxu0 %vm30729_vm2, %v37518_v32  ;;  %v37525_v32 = vld [vmem:[#allocation46_spill] sm:$0xff] }
 0x1bb   :  { %27277 = vmatpush1.bf16.msk.msra.mxu1 %vm30729_vm2, %v37519_v13  ;;  %27279 = vmatprep.subr.bf16.mxu0 %v37520_v9 }
 0x1bc   :  { %27289 = vmatprep.subr.bf16.mxu1 %v37521_v17  ;;  %v37526_v17 = vld [vmem:[#allocation47_spill] sm:$0xff] }
 0x1bd   :  { %23849 = vmatmul.mubr.msk.f32.vlgmr.msra.gmra.mrb[16].mxu0 %vm115_vm3, %v32543_v30 }
 0x1be   :  { %23852 = vmatmul.mubr.msk.f32.vlgmr.msra.gmra.mrb[16].mxu1 %vm115_vm3, %v32543_v30  ;;  %27281 = vmatpush1.bf16.msra.mxu0 %v37522_v36 }
 0x1bf   :  { %27291 = vmatpush1.bf16.msra.mxu1 %v37523_v49  ;;  %27284 = vmatprep.subr.msk.bf16.mxu0 %vm30729_vm2, %v37524_v8  ;;  %v37527_v49 = vld [vmem:[#allocation50_spill] sm:$0xff]  ;;  %v37529_v8 = vld [vmem:[#allocation53_spill] sm:$0xff] }
 0x1c0   :  { %27294 = vmatprep.subr.msk.bf16.mxu1 %vm30729_vm2, %v37525_v32  ;;  %8511 = vmatprep.mubr.f32.mxu0 %v37331_v38  ;;  %v37528_v32 = vld [vmem:[#allocation52_spill] sm:$0xff] }
 0x1c1   :  { %8582 = vmatprep.mubr.f32.mxu1 %v37331_v38 }
 0x1c2   :  { %27287 = vmatpush1.bf16.msk.msra.mxu0 %vm30729_vm2, %v37526_v17  ;;  %v37530_v17 = vld [vmem:[#allocation54_spill] sm:$0xff] }
 0x1c3   :  { %27297 = vmatpush1.bf16.msk.msra.mxu1 %vm30729_vm2, %v37482_v31  ;;  %27299 = vmatprep.subr.bf16.mxu0 %v37483_v21 }
 0x1c4   :  { %27309 = vmatprep.subr.bf16.mxu1 %v37527_v49  ;;  %v37531_v49 = vld [vmem:[#allocation55_spill] sm:$0xff] }
 0x1c5   :  { %23855 = vmatmul.mubr.msk.f32.vlgmr.msra.gmra.mrb[18].mxu0 %vm115_vm3, %v32543_v30 }
 0x1c6   :  { %23858 = vmatmul.mubr.msk.f32.vlgmr.msra.gmra.mrb[18].mxu1 %vm115_vm3, %v32543_v30  ;;  %27301 = vmatpush1.bf16.msra.mxu0 %v37485_v22 }
 0x1c7   :  { %27311 = vmatpush1.bf16.msra.mxu1 %v37528_v32  ;;  %27304 = vmatprep.subr.msk.bf16.mxu0 %vm30729_vm2, %v37529_v8  ;;  %v32772_v32 = vld [vmem:[%s36839_s0 + $0x60] sm:$0xff] }
 0x1c8   :  { %27314 = vmatprep.subr.msk.bf16.mxu1 %vm30729_vm2, %v37530_v17  ;;  %8666 = vmatprep.mubr.f32.mxu0 %v37331_v38 }
 0x1c9   :  { %8737 = vmatprep.mubr.f32.mxu1 %v37331_v38 }
 0x1ca   :  { %27307 = vmatpush1.bf16.msk.msra.mxu0 %vm30729_vm2, %v37531_v49  ;;  %v37532_v49 = vld [vmem:[#allocation62_spill] sm:$0xff] }
 0x1cb   :  { %27317 = vmatpush1.bf16.msk.msra.mxu1 %vm30729_vm2, %v37444_v7  ;;  %27319 = vmatprep.subr.bf16.mxu0 %v37445_v25 }
 0x1cc   :  { %27329 = vmatprep.subr.bf16.mxu1 %v37490_v52 }
 0x1cd   :  { %23862 = vmatmul.mubr.msk.f32.vlgmr.msra.gmra.mrb[16].mxu0 %vm115_vm3, %v32772_v32 }
 0x1ce   :  { %23865 = vmatmul.mubr.msk.f32.vlgmr.msra.gmra.mrb[16].mxu1 %vm115_vm3, %v32772_v32  ;;  %27321 = vmatpush1.bf16.msra.mxu0 %v37447_v53 }
 0x1cf   :  { %27331 = vmatpush1.bf16.msra.mxu1 %v37491_v11  ;;  %27324 = vmatprep.subr.msk.bf16.mxu0 %vm30729_vm2, %v37449_v14 }
 0x1d0   :  { %27334 = vmatprep.subr.msk.bf16.mxu1 %vm30729_vm2, %v37532_v49  ;;  %8808 = vmatprep.mubr.f32.mxu0 %v37331_v38  ;;  %v37533_v49 = vld [vmem:[#allocation68_spill] sm:$0xff] }
 0x1d1   :  { %8879 = vmatprep.mubr.f32.mxu1 %v37331_v38 }
 0x1d2   :  { %27327 = vmatpush1.bf16.msk.msra.mxu0 %vm30729_vm2, %v37451_v46 }
 0x1d3   :  { %27337 = vmatpush1.bf16.msk.msra.mxu1 %vm30729_vm2, %v37408_v6  ;;  %27339 = vmatprep.subr.bf16.mxu0 %v37409_v34 }
 0x1d4   :  { %27349 = vmatprep.subr.bf16.mxu1 %v37452_v47 }
 0x1d5   :  { %23868 = vmatmul.mubr.msk.f32.vlgmr.msra.gmra.mrb[18].mxu0 %vm115_vm3, %v32772_v32 }
 0x1d6   :  { %23871 = vmatmul.mubr.msk.f32.vlgmr.msra.gmra.mrb[18].mxu1 %vm115_vm3, %v32772_v32  ;;  %27341 = vmatpush1.bf16.msra.mxu0 %v37411_v10 }
 0x1d7   :  { %27351 = vmatpush1.bf16.msra.mxu1 %v37533_v49  ;;  %27344 = vmatprep.subr.msk.bf16.mxu0 %vm30729_vm2, %v37413_v3  ;;  %v32821_v49 = vld [vmem:[%s36839_s0 + $0x68] sm:$0xff] }
 0x1d8   :  { %27354 = vmatprep.subr.msk.bf16.mxu1 %vm30729_vm2, %v37414_v33  ;;  %8963 = vmatprep.mubr.f32.mxu0 %v37331_v38 }
 0x1d9   :  { %9034 = vmatprep.mubr.f32.mxu1 %v37331_v38 }
 0x1da   :  { %27347 = vmatpush1.bf16.msk.msra.mxu0 %vm30729_vm2, %v37415_v61 }
 0x1db   :  { %27357 = vmatpush1.bf16.msk.msra.mxu1 %vm30729_vm2, %v31652_v62  ;;  %27359 = vmatprep.subr.bf16.mxu0 %v31654_v56  ;;  %v37539_v56 = vld [vmem:[#allocation6_spill] sm:$0xff] }
 0x1dc   :  { %27369 = vmatprep.subr.bf16.mxu1 %v31669_v63  ;;  %v37534_v63 = vld [vmem:[#allocation79_spill] sm:$0xff] }
 0x1dd   :  { %23875 = vmatmul.mubr.msk.f32.vlgmr.msra.gmra.mrb[16].mxu0 %vm115_vm3, %v32821_v49 }
 0x1de   :  { %23878 = vmatmul.mubr.msk.f32.vlgmr.msra.gmra.mrb[16].mxu1 %vm115_vm3, %v32821_v49  ;;  %27361 = vmatpush1.bf16.msra.mxu0 %v31695_v50  ;;  %v37536_v50 = vld [vmem:[#allocation3_spill] sm:$0xff] }
 0x1df   :  { %27371 = vmatpush1.bf16.msra.mxu1 %v31701_v37  ;;  %27364 = vmatprep.subr.msk.bf16.mxu0 %vm30729_vm2, %v31703_v27  ;;  %v37535_v37 = vld [vmem:[#allocation2_spill] sm:$0xff]  ;;  %v37538_v27 = vld [vmem:[#allocation5_spill] sm:$0xff] }
 0x1e0   :  { %27374 = vmatprep.subr.msk.bf16.mxu1 %vm30729_vm2, %v31712_v28  ;;  %9105 = vmatprep.mubr.f32.mxu0 %v37331_v38  ;;  %v37537_v28 = vld [vmem:[#allocation4_spill] sm:$0xff] }
 0x1e1   :  { %9176 = vmatprep.mubr.f32.mxu1 %v37331_v38 }
 0x1e2   :  { %27367 = vmatpush1.bf16.msk.msra.mxu0 %vm30729_vm2, %v37534_v63  ;;  %v37540_v63 = vld [vmem:[#allocation7_spill] sm:$0xff] }
 0x1e3   :  { %27377 = vmatpush1.bf16.msk.msra.mxu1 %vm30729_vm2, %v31731_v12  ;;  %27379 = vmatprep.subr.bf16.mxu0 %v37535_v37  ;;  %v37542_v37 = vld [vmem:[#allocation9_spill] sm:$0xff] }
 0x1e4   :  { %27389 = vmatprep.subr.bf16.mxu1 %v37536_v50  ;;  %v37541_v50 = vld [vmem:[#allocation8_spill] sm:$0xff] }
 0x1e5   :  { %23881 = vmatmul.mubr.msk.f32.vlgmr.msra.gmra.mrb[18].mxu0 %vm115_vm3, %v32821_v49 }
 0x1e6   :  { %23884 = vmatmul.mubr.msk.f32.vlgmr.msra.gmra.mrb[18].mxu1 %vm115_vm3, %v32821_v49  ;;  %27381 = vmatpush1.bf16.msra.mxu0 %v37537_v28  ;;  %v37544_v28 = vld [vmem:[#allocation11_spill] sm:$0xff] }
 0x1e7   :  { %27391 = vmatpush1.bf16.msra.mxu1 %v37538_v27  ;;  %27384 = vmatprep.subr.msk.bf16.mxu0 %vm30729_vm2, %v37539_v56  ;;  %v37543_v27 = vld [vmem:[#allocation10_spill] sm:$0xff] }
 0x1e8   :  { %27394 = vmatprep.subr.msk.bf16.mxu1 %vm30729_vm2, %v37540_v63  ;;  %9265 = vmatprep.mubr.f32.mxu0 %v37331_v38  ;;  %v37545_v63 = vld [vmem:[#allocation13_spill] sm:$0xff] }
 0x1e9   :  { %9336 = vmatprep.mubr.f32.mxu1 %v37331_v38 }
 0x1ea   :  { %27387 = vmatpush1.bf16.msk.msra.mxu0 %vm30729_vm2, %v37541_v50 }
 0x1eb   :  { %27397 = vmatpush1.bf16.msk.msra.mxu1 %vm30729_vm2, %v37542_v37  ;;  %27399 = vmatprep.subr.bf16.mxu0 %v37543_v27 }
 0x1ec   :  { %27409 = vmatprep.subr.bf16.mxu1 %v37544_v28 }
 0x1ed   :  { %23887 = vmatmul.mubr.msk.f32.vlgmr.msra.gmra.mrb[20].mxu0 %vm115_vm3, %v32543_v30 }
 0x1ee   :  { %23890 = vmatmul.mubr.msk.f32.vlgmr.msra.gmra.mrb[20].mxu1 %vm115_vm3, %v32543_v30  ;;  %27401 = vmatpush1.bf16.msra.mxu0 %v30798_v35  ;;  %v37546_v35 = vld [vmem:[#allocation16_spill] sm:$0xff] }
 0x1ef   :  { %27411 = vmatpush1.bf16.msra.mxu1 %v37545_v63  ;;  %27404 = vmatprep.subr.msk.bf16.mxu0 %vm30729_vm2, %v30825_v43  ;;  %v37547_v43 = vld [vmem:[#allocation17_spill] sm:$0xff] }
 0x1f0   :  { %v5453_v50 = vpop.f32.mrb[8].mxu0  ;;  %27414 = vmatprep.subr.msk.bf16.mxu1 %vm30729_vm2, %v30827_v44  ;;  %9407 = vmatprep.mubr.f32.mxu0 %v37331_v38  ;;  %v37548_v44 = vld [vmem:[#allocation18_spill] sm:$0xff] }
 0x1f1   :  { %v5524_v28 = vpop.f32.mrb[8].mxu1  ;;  %v5455_v27 = vpop.f32.mrb[9].mxu0  ;;  %9478 = vmatprep.mubr.f32.mxu1 %v37331_v38 }
 0x1f2   :  { %v5679_v37 = vmax.f32 %v5453_v50, %v5524_v28  ;;  %v5526_v56 = vpop.f32.mrb[9].mxu1  ;;  %27407 = vmatpush1.bf16.msk.msra.mxu0 %vm30729_vm2, %v30852_v51  ;;  %v37549_v50 = vld [vmem:[#allocation19_spill] sm:$0xff]  ;;  %v37550_v28 = vld [vmem:[#allocation20_spill] sm:$0xff] }
 0x1f3   :  { %v5680_v63 = vmax.f32 %v5455_v27, %v5526_v56  ;;  %27417 = vmatpush1.bf16.msk.msra.mxu1 %vm30729_vm2, %v37546_v35  ;;  %27419 = vmatprep.subr.bf16.mxu0 %v37547_v43  ;;  %v37551_v27 = vld [vmem:[#allocation21_spill] sm:$0xff] }
 0x1f4   :  { %27429 = vmatprep.subr.bf16.mxu1 %v37548_v44 }
 0x1f5   :  { %23893 = vmatmul.mubr.msk.f32.vlgmr.msra.gmra.mrb[22].mxu0 %vm115_vm3, %v32543_v30 }
 0x1f6   :  { %23896 = vmatmul.mubr.msk.f32.vlgmr.msra.gmra.mrb[22].mxu1 %vm115_vm3, %v32543_v30  ;;  %27421 = vmatpush1.bf16.msra.mxu0 %v30902_v1 }
 0x1f7   :  { %27431 = vmatpush1.bf16.msra.mxu1 %v37549_v50  ;;  %27424 = vmatprep.subr.msk.bf16.mxu0 %vm30729_vm2, %v37550_v28 }
 0x1f8   :  { %v5595_v56 = vpop.f32.mrb[10].mxu0  ;;  %27434 = vmatprep.subr.msk.bf16.mxu1 %vm30729_vm2, %v37551_v27  ;;  %9549 = vmatprep.mubr.f32.mxu0 %v37331_v38 }
 0x1f9   :  { %v5666_v44 = vpop.f32.mrb[10].mxu1  ;;  %v5597_v43 = vpop.f32.mrb[11].mxu0  ;;  %9620 = vmatprep.mubr.f32.mxu1 %v37331_v38 }
 0x1fa   :  { %v5681_v30 = vmax.f32 %v5595_v56, %v5666_v44  ;;  %v5668_v35 = vpop.f32.mrb[11].mxu1  ;;  %27427 = vmatpush1.bf16.msk.msra.mxu0 %vm30729_vm2, %v30944_v20  ;;  %v37556_v44 = vld [vmem:[#allocation32_spill] sm:$0xff]  ;;  %v37561_v56 = vld [vmem:[#allocation37_spill] sm:$0xff] }
 0x1fb   :  { %v5682_v50 = vmax.f32 %v5597_v43, %v5668_v35  ;;  %27437 = vmatpush1.bf16.msk.msra.mxu1 %vm30729_vm2, %v30950_v23  ;;  %27439 = vmatprep.subr.bf16.mxu0 %v30952_v24  ;;  %v37554_v35 = vld [vmem:[#allocation30_spill] sm:$0xff]  ;;  %v37555_v43 = vld [vmem:[#allocation31_spill] sm:$0xff] }
 0x1fc   :  { %v32915_v27 = vmax.f32 %v5679_v37, %v5681_v30  ;;  %27449 = vmatprep.subr.bf16.mxu1 %v30967_v29  ;;  %v37558_v37 = vld [vmem:[#allocation34_spill] sm:$0xff] }
 0x1fd   :  { %v32918_v28 = vmax.f32 %v5680_v63, %v5682_v50  ;;  %23899 = vmatmul.mubr.msk.f32.vlgmr.msra.gmra.mrb[20].mxu0 %vm115_vm3, %v32494_v5  ;;  %v37559_v63 = vld [vmem:[#allocation35_spill] sm:$0xff]  ;;  %v37560_v50 = vld [vmem:[#allocation36_spill] sm:$0xff]  ;;  %v37562_v30 = vld [vmem:[#allocation38_spill] sm:$0xff] }
 0x1fe   :  { %37552 = vst [vmem:[#allocation24_spill] sm:$0xff] %v32915_v27  ;;  %23902 = vmatmul.mubr.msk.f32.vlgmr.msra.gmra.mrb[20].mxu1 %vm115_vm3, %v32494_v5  ;;  %27441 = vmatpush1.bf16.msra.mxu0 %v30991_v40  ;;  %v37563_v27 = vld [vmem:[#allocation39_spill] sm:$0xff] }
 0x1ff   :  { %37553 = vst [vmem:[#allocation25_spill] sm:$0xff] %v32918_v28  ;;  %27451 = vmatpush1.bf16.msra.mxu1 %v30997_v41  ;;  %27444 = vmatprep.subr.msk.bf16.mxu0 %vm30729_vm2, %v30999_v42  ;;  %v37564_v28 = vld [vmem:[#allocation42_spill] sm:$0xff] }
 0x200   :  { %27454 = vmatprep.subr.msk.bf16.mxu1 %vm30729_vm2, %v31011_v48  ;;  %9691 = vmatprep.mubr.f32.mxu0 %v37331_v38 }
 0x201   :  { %9762 = vmatprep.mubr.f32.mxu1 %v37331_v38 }
 0x202   :  { %27447 = vmatpush1.bf16.msk.msra.mxu0 %vm30729_vm2, %v31031_v57 }
 0x203   :  { %27457 = vmatpush1.bf16.msk.msra.mxu1 %vm30729_vm2, %v31037_v58  ;;  %27459 = vmatprep.subr.bf16.mxu0 %v31039_v60 }
 0x204   :  { %27469 = vmatprep.subr.bf16.mxu1 %v31054_v0 }
 0x205   :  { %23905 = vmatmul.mubr.msk.f32.vlgmr.msra.gmra.mrb[22].mxu0 %vm115_vm3, %v32494_v5 }
 0x206   :  { %23908 = vmatmul.mubr.msk.f32.vlgmr.msra.gmra.mrb[22].mxu1 %vm115_vm3, %v32494_v5  ;;  %27461 = vmatpush1.bf16.msra.mxu0 %v31075_v16  ;;  %v37557_v5 = vld [vmem:[#allocation33_spill] sm:$0xff] }
 0x207   :  { %27471 = vmatpush1.bf16.msra.mxu1 %v31081_v18  ;;  %27464 = vmatprep.subr.msk.bf16.mxu0 %vm30729_vm2, %v31083_v19 }
 0x208   :  { %27474 = vmatprep.subr.msk.bf16.mxu1 %vm30729_vm2, %v37456_v26  ;;  %9833 = vmatprep.mubr.f32.mxu0 %v37331_v38 }
 0x209   :  { %9904 = vmatprep.mubr.f32.mxu1 %v37331_v38 }
 0x20a   :  { %27467 = vmatpush1.bf16.msk.msra.mxu0 %vm30729_vm2, %v37457_v39 }
 0x20b   :  { %27477 = vmatpush1.bf16.msk.msra.mxu1 %vm30729_vm2, %v37458_v2  ;;  %27479 = vmatprep.subr.bf16.mxu0 %v37459_v45 }
 0x20c   :  { %27489 = vmatprep.subr.bf16.mxu1 %v37505_v4 }
 0x20d   :  { %23911 = vmatmul.mubr.msk.f32.vlgmr.msra.gmra.mrb[20].mxu0 %vm115_vm3, %v32772_v32 }
 0x20e   :  { %23914 = vmatmul.mubr.msk.f32.vlgmr.msra.gmra.mrb[20].mxu1 %vm115_vm3, %v32772_v32  ;;  %27481 = vmatpush1.bf16.msra.mxu0 %v37506_v54 }
 0x20f   :  { %27491 = vmatpush1.bf16.msra.mxu1 %v37507_v55  ;;  %27484 = vmatprep.subr.msk.bf16.mxu0 %vm30729_vm2, %v37508_v59 }
 0x210   :  { %27494 = vmatprep.subr.msk.bf16.mxu1 %vm30729_vm2, %v37554_v35  ;;  %9975 = vmatprep.mubr.f32.mxu0 %v37331_v38 }
 0x211   :  { %10046 = vmatprep.mubr.f32.mxu1 %v37331_v38 }
 0x212   :  { %27487 = vmatpush1.bf16.msk.msra.mxu0 %vm30729_vm2, %v37555_v43 }
 0x213   :  { %27497 = vmatpush1.bf16.msk.msra.mxu1 %vm30729_vm2, %v37556_v44  ;;  %27499 = vmatprep.subr.bf16.mxu0 %v37557_v5 }
 0x214   :  { %27509 = vmatprep.subr.bf16.mxu1 %v37558_v37 }
 0x215   :  { %23917 = vmatmul.mubr.msk.f32.vlgmr.msra.gmra.mrb[22].mxu0 %vm115_vm3, %v32772_v32 }
 0x216   :  { %23920 = vmatmul.mubr.msk.f32.vlgmr.msra.gmra.mrb[22].mxu1 %vm115_vm3, %v32772_v32  ;;  %27501 = vmatpush1.bf16.msra.mxu0 %v37559_v63 }
 0x217   :  { %27511 = vmatpush1.bf16.msra.mxu1 %v37560_v50  ;;  %27504 = vmatprep.subr.msk.bf16.mxu0 %vm30729_vm2, %v37561_v56  ;;  %v37566_v56 = vld [vmem:[#allocation45_spill] sm:$0xff] }
 0x218   :  { %27514 = vmatprep.subr.msk.bf16.mxu1 %vm30729_vm2, %v37562_v30  ;;  %10125 = vmatprep.mubr.f32.mxu0 %v37331_v38  ;;  %v37565_v30 = vld [vmem:[#allocation44_spill] sm:$0xff] }
 0x219   :  { %10196 = vmatprep.mubr.f32.mxu1 %v37331_v38 }
 0x21a   :  { %27507 = vmatpush1.bf16.msk.msra.mxu0 %vm30729_vm2, %v37563_v27  ;;  %v37567_v27 = vld [vmem:[#allocation46_spill] sm:$0xff] }
 0x21b   :  { %27517 = vmatpush1.bf16.msk.msra.mxu1 %vm30729_vm2, %v37519_v13  ;;  %27519 = vmatprep.subr.bf16.mxu0 %v37520_v9 }
 0x21c   :  { %27529 = vmatprep.subr.bf16.mxu1 %v37564_v28  ;;  %v37568_v28 = vld [vmem:[#allocation47_spill] sm:$0xff] }
 0x21d   :  { %23923 = vmatmul.mubr.msk.f32.vlgmr.msra.gmra.mrb[20].mxu0 %vm115_vm3, %v32821_v49 }
 0x21e   :  { %23926 = vmatmul.mubr.msk.f32.vlgmr.msra.gmra.mrb[20].mxu1 %vm115_vm3, %v32821_v49  ;;  %27521 = vmatpush1.bf16.msra.mxu0 %v37522_v36 }
 0x21f   :  { %27531 = vmatpush1.bf16.msra.mxu1 %v37565_v30  ;;  %27524 = vmatprep.subr.msk.bf16.mxu0 %vm30729_vm2, %v37566_v56  ;;  %v37569_v30 = vld [vmem:[#allocation50_spill] sm:$0xff] }
 0x220   :  { %27534 = vmatprep.subr.msk.bf16.mxu1 %vm30729_vm2, %v37567_v27  ;;  %10267 = vmatprep.mubr.f32.mxu0 %v37331_v38  ;;  %v37570_v27 = vld [vmem:[#allocation52_spill] sm:$0xff] }
 0x221   :  { %10338 = vmatprep.mubr.f32.mxu1 %v37331_v38 }
 0x222   :  { %27527 = vmatpush1.bf16.msk.msra.mxu0 %vm30729_vm2, %v37568_v28 }
 0x223   :  { %27537 = vmatpush1.bf16.msk.msra.mxu1 %vm30729_vm2, %v37482_v31  ;;  %27539 = vmatprep.subr.bf16.mxu0 %v37483_v21 }
 0x224   :  { %27549 = vmatprep.subr.bf16.mxu1 %v37569_v30  ;;  %v37571_v30 = vld [vmem:[#allocation55_spill] sm:$0xff] }
 0x225   :  { %23929 = vmatmul.mubr.msk.f32.vlgmr.msra.gmra.mrb[22].mxu0 %vm115_vm3, %v32821_v49 }
 0x226   :  { %23932 = vmatmul.mubr.msk.f32.vlgmr.msra.gmra.mrb[22].mxu1 %vm115_vm3, %v32821_v49  ;;  %27541 = vmatpush1.bf16.msra.mxu0 %v37485_v22 }
 0x227   :  { %27551 = vmatpush1.bf16.msra.mxu1 %v37570_v27  ;;  %27544 = vmatprep.subr.msk.bf16.mxu0 %vm30729_vm2, %v37529_v8  ;;  %v33050_v27 = vld [vmem:[%s36839_s0 + $0x70] sm:$0xff] }
 0x228   :  { %27554 = vmatprep.subr.msk.bf16.mxu1 %vm30729_vm2, %v37530_v17  ;;  %10422 = vmatprep.mubr.f32.mxu0 %v37331_v38 }
 0x229   :  { %10493 = vmatprep.mubr.f32.mxu1 %v37331_v38 }
 0x22a   :  { %27547 = vmatpush1.bf16.msk.msra.mxu0 %vm30729_vm2, %v37571_v30  ;;  %v37572_v30 = vld [vmem:[#allocation62_spill] sm:$0xff] }
 0x22b   :  { %27557 = vmatpush1.bf16.msk.msra.mxu1 %vm30729_vm2, %v37444_v7  ;;  %27559 = vmatprep.subr.bf16.mxu0 %v37445_v25 }
 0x22c   :  { %27569 = vmatprep.subr.bf16.mxu1 %v37490_v52 }
 0x22d   :  { %23936 = vmatmul.mubr.msk.f32.vlgmr.msra.gmra.mrb[20].mxu0 %vm115_vm3, %v33050_v27 }
 0x22e   :  { %23939 = vmatmul.mubr.msk.f32.vlgmr.msra.gmra.mrb[20].mxu1 %vm115_vm3, %v33050_v27  ;;  %27561 = vmatpush1.bf16.msra.mxu0 %v37447_v53 }
 0x22f   :  { %27571 = vmatpush1.bf16.msra.mxu1 %v37491_v11  ;;  %27564 = vmatprep.subr.msk.bf16.mxu0 %vm30729_vm2, %v37449_v14 }
 0x230   :  { %27574 = vmatprep.subr.msk.bf16.mxu1 %vm30729_vm2, %v37572_v30  ;;  %10564 = vmatprep.mubr.f32.mxu0 %v37331_v38  ;;  %v37573_v30 = vld [vmem:[#allocation68_spill] sm:$0xff] }
 0x231   :  { %10635 = vmatprep.mubr.f32.mxu1 %v37331_v38 }
 0x232   :  { %27567 = vmatpush1.bf16.msk.msra.mxu0 %vm30729_vm2, %v37451_v46 }
 0x233   :  { %27577 = vmatpush1.bf16.msk.msra.mxu1 %vm30729_vm2, %v37408_v6  ;;  %27579 = vmatprep.subr.bf16.mxu0 %v37409_v34  ;;  %v37579_v34 = vld [vmem:[#allocation78_spill] sm:$0xff] }
 0x234   :  { %27589 = vmatprep.subr.bf16.mxu1 %v37452_v47  ;;  %v37578_v47 = vld [vmem:[#allocation77_spill] sm:$0xff] }
 0x235   :  { %23942 = vmatmul.mubr.msk.f32.vlgmr.msra.gmra.mrb[22].mxu0 %vm115_vm3, %v33050_v27 }
 0x236   :  { %23945 = vmatmul.mubr.msk.f32.vlgmr.msra.gmra.mrb[22].mxu1 %vm115_vm3, %v33050_v27  ;;  %27581 = vmatpush1.bf16.msra.mxu0 %v37411_v10  ;;  %v37577_v10 = vld [vmem:[#allocation76_spill] sm:$0xff] }
 0x237   :  { %27591 = vmatpush1.bf16.msra.mxu1 %v37573_v30  ;;  %27584 = vmatprep.subr.msk.bf16.mxu0 %vm30729_vm2, %v37413_v3  ;;  %v33099_v30 = vld [vmem:[%s36839_s0 + $0x78] sm:$0xff] }
 0x238   :  { %27594 = vmatprep.subr.msk.bf16.mxu1 %vm30729_vm2, %v37414_v33  ;;  %10719 = vmatprep.mubr.f32.mxu0 %v37331_v38  ;;  %v37574_v3 = vld [vmem:[#allocation73_spill] sm:$0xff]  ;;  %v37575_v33 = vld [vmem:[#allocation74_spill] sm:$0xff] }
 0x239   :  { %10790 = vmatprep.mubr.f32.mxu1 %v37331_v38 }
 0x23a   :  { %27587 = vmatpush1.bf16.msk.msra.mxu0 %vm30729_vm2, %v37415_v61  ;;  %v37576_v61 = vld [vmem:[#allocation75_spill] sm:$0xff] }
 0x23b   :  { %27597 = vmatpush1.bf16.msk.msra.mxu1 %vm30729_vm2, %v31652_v62  ;;  %27599 = vmatprep.subr.bf16.mxu0 %v37574_v3  ;;  %v37585_v3 = vld [vmem:[#allocation6_spill] sm:$0xff] }
 0x23c   :  { %27609 = vmatprep.subr.bf16.mxu1 %v37575_v33  ;;  %v37580_v33 = vld [vmem:[#allocation79_spill] sm:$0xff] }
 0x23d   :  { %23949 = vmatmul.mubr.msk.f32.vlgmr.msra.gmra.mrb[20].mxu0 %vm115_vm3, %v33099_v30 }
 0x23e   :  { %23952 = vmatmul.mubr.msk.f32.vlgmr.msra.gmra.mrb[20].mxu1 %vm115_vm3, %v33099_v30  ;;  %27601 = vmatpush1.bf16.msra.mxu0 %v37576_v61  ;;  %v37582_v61 = vld [vmem:[#allocation3_spill] sm:$0xff] }
 0x23f   :  { %27611 = vmatpush1.bf16.msra.mxu1 %v37577_v10  ;;  %27604 = vmatprep.subr.msk.bf16.mxu0 %vm30729_vm2, %v37578_v47  ;;  %v37581_v10 = vld [vmem:[#allocation2_spill] sm:$0xff]  ;;  %v37584_v47 = vld [vmem:[#allocation5_spill] sm:$0xff] }
 0x240   :  { %27614 = vmatprep.subr.msk.bf16.mxu1 %vm30729_vm2, %v37579_v34  ;;  %10861 = vmatprep.mubr.f32.mxu0 %v37331_v38  ;;  %v37583_v34 = vld [vmem:[#allocation4_spill] sm:$0xff] }
 0x241   :  { %10932 = vmatprep.mubr.f32.mxu1 %v37331_v38 }
 0x242   :  { %27607 = vmatpush1.bf16.msk.msra.mxu0 %vm30729_vm2, %v37580_v33  ;;  %v37586_v33 = vld [vmem:[#allocation7_spill] sm:$0xff] }
 0x243   :  { %27617 = vmatpush1.bf16.msk.msra.mxu1 %vm30729_vm2, %v31731_v12  ;;  %27619 = vmatprep.subr.bf16.mxu0 %v37581_v10  ;;  %v37588_v10 = vld [vmem:[#allocation9_spill] sm:$0xff]  ;;  %v37593_v12 = vld [vmem:[#allocation14_spill] sm:$0xff] }
 0x244   :  { %27629 = vmatprep.subr.bf16.mxu1 %v37582_v61  ;;  %v37587_v61 = vld [vmem:[#allocation8_spill] sm:$0xff] }
 0x245   :  { %23955 = vmatmul.mubr.msk.f32.vlgmr.msra.gmra.mrb[22].mxu0 %vm115_vm3, %v33099_v30 }
 0x246   :  { %23958 = vmatmul.mubr.msk.f32.vlgmr.msra.gmra.mrb[22].mxu1 %vm115_vm3, %v33099_v30  ;;  %27621 = vmatpush1.bf16.msra.mxu0 %v37583_v34  ;;  %v37590_v34 = vld [vmem:[#allocation11_spill] sm:$0xff] }
 0x247   :  { %27631 = vmatpush1.bf16.msra.mxu1 %v37584_v47  ;;  %27624 = vmatprep.subr.msk.bf16.mxu0 %vm30729_vm2, %v37585_v3  ;;  %v37589_v47 = vld [vmem:[#allocation10_spill] sm:$0xff]  ;;  %v37592_v3 = vld [vmem:[#allocation13_spill] sm:$0xff] }
 0x248   :  { %27634 = vmatprep.subr.msk.bf16.mxu1 %vm30729_vm2, %v37586_v33  ;;  %11021 = vmatprep.mubr.f32.mxu0 %v37331_v38  ;;  %v37591_v33 = vld [vmem:[#allocation12_spill] sm:$0xff] }
 0x249   :  { %11092 = vmatprep.mubr.f32.mxu1 %v37331_v38 }
 0x24a   :  { %27627 = vmatpush1.bf16.msk.msra.mxu0 %vm30729_vm2, %v37587_v61 }
 0x24b   :  { %27637 = vmatpush1.bf16.msk.msra.mxu1 %vm30729_vm2, %v37588_v10  ;;  %27639 = vmatprep.subr.bf16.mxu0 %v37589_v47  ;;  %v37594_v10 = vld [vmem:[#allocation15_spill] sm:$0xff] }
 0x24c   :  { %27649 = vmatprep.subr.bf16.mxu1 %v37590_v34 }
 0x24d   :  { %23961 = vmatmul.mubr.msk.f32.vlgmr.msra.gmra.mrb[24].mxu0 %vm115_vm3, %v32821_v49 }
 0x24e   :  { %23964 = vmatmul.mubr.msk.f32.vlgmr.msra.gmra.mrb[24].mxu1 %vm115_vm3, %v32821_v49  ;;  %27641 = vmatpush1.bf16.msra.mxu0 %v37591_v33  ;;  %v37595_v33 = vld [vmem:[#allocation16_spill] sm:$0xff] }
 0x24f   :  { %27651 = vmatpush1.bf16.msra.mxu1 %v37592_v3  ;;  %27644 = vmatprep.subr.msk.bf16.mxu0 %vm30729_vm2, %v37593_v12  ;;  %v37596_v12 = vld [vmem:[#allocation17_spill] sm:$0xff] }
 0x250   :  { %v7209_v61 = vpop.f32.mrb[12].mxu0  ;;  %27654 = vmatprep.subr.msk.bf16.mxu1 %vm30729_vm2, %v37594_v10  ;;  %11163 = vmatprep.mubr.f32.mxu0 %v37331_v38  ;;  %v37597_v10 = vld [vmem:[#allocation18_spill] sm:$0xff] }
 0x251   :  { %v7280_v34 = vpop.f32.mrb[12].mxu1  ;;  %v7211_v47 = vpop.f32.mrb[13].mxu0  ;;  %11234 = vmatprep.mubr.f32.mxu1 %v37331_v38 }
 0x252   :  { %v7435_v62 = vmax.f32 %v7209_v61, %v7280_v34  ;;  %v7282_v6 = vpop.f32.mrb[13].mxu1  ;;  %27647 = vmatpush1.bf16.msk.msra.mxu0 %vm30729_vm2, %v30852_v51  ;;  %v37598_v34 = vld [vmem:[#allocation19_spill] sm:$0xff]  ;;  %v37599_v61 = vld [vmem:[#allocation20_spill] sm:$0xff] }
 0x253   :  { %v7436_v3 = vmax.f32 %v7211_v47, %v7282_v6  ;;  %27657 = vmatpush1.bf16.msk.msra.mxu1 %vm30729_vm2, %v37595_v33  ;;  %27659 = vmatprep.subr.bf16.mxu0 %v37596_v12  ;;  %v37600_v6 = vld [vmem:[#allocation21_spill] sm:$0xff] }
 0x254   :  { %27669 = vmatprep.subr.bf16.mxu1 %v37597_v10 }
 0x255   :  { %23967 = vmatmul.mubr.msk.f32.vlgmr.msra.gmra.mrb[26].mxu0 %vm115_vm3, %v32821_v49 }
 0x256   :  { %23970 = vmatmul.mubr.msk.f32.vlgmr.msra.gmra.mrb[26].mxu1 %vm115_vm3, %v32821_v49  ;;  %27661 = vmatpush1.bf16.msra.mxu0 %v30902_v1 }
 0x257   :  { %27671 = vmatpush1.bf16.msra.mxu1 %v37598_v34  ;;  %27664 = vmatprep.subr.msk.bf16.mxu0 %vm30729_vm2, %v37599_v61 }
 0x258   :  { %v7351_v47 = vpop.f32.mrb[14].mxu0  ;;  %27674 = vmatprep.subr.msk.bf16.mxu1 %vm30729_vm2, %v37600_v6  ;;  %11305 = vmatprep.mubr.f32.mxu0 %v37331_v38 }
 0x259   :  { %v7422_v10 = vpop.f32.mrb[14].mxu1  ;;  %v7353_v12 = vpop.f32.mrb[15].mxu0  ;;  %11376 = vmatprep.mubr.f32.mxu1 %v37331_v38 }
 0x25a   :  { %v7437_v49 = vmax.f32 %v7351_v47, %v7422_v10  ;;  %v7424_v33 = vpop.f32.mrb[15].mxu1  ;;  %27667 = vmatpush1.bf16.msk.msra.mxu0 %vm30729_vm2, %v30944_v20  ;;  %v37605_v10 = vld [vmem:[#allocation39_spill] sm:$0xff]  ;;  %v37610_v47 = vld [vmem:[#allocation52_spill] sm:$0xff] }
 0x25b   :  { %v7438_v34 = vmax.f32 %v7353_v12, %v7424_v33  ;;  %27677 = vmatpush1.bf16.msk.msra.mxu1 %vm30729_vm2, %v30950_v23  ;;  %27679 = vmatprep.subr.bf16.mxu0 %v30952_v24  ;;  %v37604_v12 = vld [vmem:[#allocation38_spill] sm:$0xff]  ;;  %v37607_v33 = vld [vmem:[#allocation44_spill] sm:$0xff] }
 0x25c   :  { %v33193_v6 = vmax.f32 %v7435_v62, %v7437_v49  ;;  %27689 = vmatprep.subr.bf16.mxu1 %v30967_v29  ;;  %v37603_v62 = vld [vmem:[#allocation37_spill] sm:$0xff]  ;;  %v37611_v49 = vld [vmem:[#allocation55_spill] sm:$0xff] }
 0x25d   :  { %v33196_v61 = vmax.f32 %v7436_v3, %v7438_v34  ;;  %23973 = vmatmul.mubr.msk.f32.vlgmr.msra.gmra.mrb[24].mxu0 %vm115_vm3, %v32772_v32  ;;  %v37606_v3 = vld [vmem:[#allocation42_spill] sm:$0xff] }
 0x25e   :  { %37601 = vst [vmem:[#allocation48_spill] sm:$0xff] %v33193_v6  ;;  %23976 = vmatmul.mubr.msk.f32.vlgmr.msra.gmra.mrb[24].mxu1 %vm115_vm3, %v32772_v32  ;;  %27681 = vmatpush1.bf16.msra.mxu0 %v30991_v40  ;;  %v37609_v34 = vld [vmem:[#allocation50_spill] sm:$0xff] }
 0x25f   :  { %37602 = vst [vmem:[#allocation49_spill] sm:$0xff] %v33196_v61  ;;  %27691 = vmatpush1.bf16.msra.mxu1 %v30997_v41  ;;  %27684 = vmatprep.subr.msk.bf16.mxu0 %vm30729_vm2, %v30999_v42  ;;  %v33328_v6 = vld [vmem:[%s36839_s0 + $0x80] sm:$0xff] }
 0x260   :  { %27694 = vmatprep.subr.msk.bf16.mxu1 %vm30729_vm2, %v31011_v48  ;;  %11447 = vmatprep.mubr.f32.mxu0 %v37331_v38  ;;  %v37612_v61 = vld [vmem:[#allocation62_spill] sm:$0xff] }
 0x261   :  { %11518 = vmatprep.mubr.f32.mxu1 %v37331_v38 }
 0x262   :  { %27687 = vmatpush1.bf16.msk.msra.mxu0 %vm30729_vm2, %v31031_v57 }
 0x263   :  { %27697 = vmatpush1.bf16.msk.msra.mxu1 %vm30729_vm2, %v31037_v58  ;;  %27699 = vmatprep.subr.bf16.mxu0 %v31039_v60 }
 0x264   :  { %27709 = vmatprep.subr.bf16.mxu1 %v31054_v0 }
 0x265   :  { %23979 = vmatmul.mubr.msk.f32.vlgmr.msra.gmra.mrb[26].mxu0 %vm115_vm3, %v32772_v32 }
 0x266   :  { %23982 = vmatmul.mubr.msk.f32.vlgmr.msra.gmra.mrb[26].mxu1 %vm115_vm3, %v32772_v32  ;;  %27701 = vmatpush1.bf16.msra.mxu0 %v31075_v16  ;;  %v37608_v32 = vld [vmem:[#allocation46_spill] sm:$0xff] }
 0x267   :  { %27711 = vmatpush1.bf16.msra.mxu1 %v31081_v18  ;;  %27704 = vmatprep.subr.msk.bf16.mxu0 %vm30729_vm2, %v31083_v19 }
 0x268   :  { %27714 = vmatprep.subr.msk.bf16.mxu1 %vm30729_vm2, %v37456_v26  ;;  %11589 = vmatprep.mubr.f32.mxu0 %v37331_v38 }
 0x269   :  { %11660 = vmatprep.mubr.f32.mxu1 %v37331_v38 }
 0x26a   :  { %27707 = vmatpush1.bf16.msk.msra.mxu0 %vm30729_vm2, %v37457_v39 }
 0x26b   :  { %27717 = vmatpush1.bf16.msk.msra.mxu1 %vm30729_vm2, %v37458_v2  ;;  %27719 = vmatprep.subr.bf16.mxu0 %v37459_v45 }
 0x26c   :  { %27729 = vmatprep.subr.bf16.mxu1 %v37505_v4 }
 0x26d   :  { %23985 = vmatmul.mubr.msk.f32.vlgmr.msra.gmra.mrb[24].mxu0 %vm115_vm3, %v33050_v27 }
 0x26e   :  { %23988 = vmatmul.mubr.msk.f32.vlgmr.msra.gmra.mrb[24].mxu1 %vm115_vm3, %v33050_v27  ;;  %27721 = vmatpush1.bf16.msra.mxu0 %v37506_v54 }
 0x26f   :  { %27731 = vmatpush1.bf16.msra.mxu1 %v37507_v55  ;;  %27724 = vmatprep.subr.msk.bf16.mxu0 %vm30729_vm2, %v37508_v59 }
 0x270   :  { %27734 = vmatprep.subr.msk.bf16.mxu1 %vm30729_vm2, %v37554_v35  ;;  %11731 = vmatprep.mubr.f32.mxu0 %v37331_v38 }
 0x271   :  { %11802 = vmatprep.mubr.f32.mxu1 %v37331_v38 }
 0x272   :  { %27727 = vmatpush1.bf16.msk.msra.mxu0 %vm30729_vm2, %v37555_v43 }
 0x273   :  { %27737 = vmatpush1.bf16.msk.msra.mxu1 %vm30729_vm2, %v37556_v44  ;;  %27739 = vmatprep.subr.bf16.mxu0 %v37557_v5 }
 0x274   :  { %27749 = vmatprep.subr.bf16.mxu1 %v37558_v37 }
 0x275   :  { %23991 = vmatmul.mubr.msk.f32.vlgmr.msra.gmra.mrb[26].mxu0 %vm115_vm3, %v33050_v27 }
 0x276   :  { %23994 = vmatmul.mubr.msk.f32.vlgmr.msra.gmra.mrb[26].mxu1 %vm115_vm3, %v33050_v27  ;;  %27741 = vmatpush1.bf16.msra.mxu0 %v37559_v63 }
 0x277   :  { %27751 = vmatpush1.bf16.msra.mxu1 %v37560_v50  ;;  %27744 = vmatprep.subr.msk.bf16.mxu0 %vm30729_vm2, %v37603_v62 }
 0x278   :  { %27754 = vmatprep.subr.msk.bf16.mxu1 %vm30729_vm2, %v37604_v12  ;;  %11881 = vmatprep.mubr.f32.mxu0 %v37331_v38 }
 0x279   :  { %11952 = vmatprep.mubr.f32.mxu1 %v37331_v38 }
 0x27a   :  { %27747 = vmatpush1.bf16.msk.msra.mxu0 %vm30729_vm2, %v37605_v10 }
 0x27b   :  { %27757 = vmatpush1.bf16.msk.msra.mxu1 %vm30729_vm2, %v37519_v13  ;;  %27759 = vmatprep.subr.bf16.mxu0 %v37520_v9 }
 0x27c   :  { %27769 = vmatprep.subr.bf16.mxu1 %v37606_v3 }
 0x27d   :  { %23997 = vmatmul.mubr.msk.f32.vlgmr.msra.gmra.mrb[24].mxu0 %vm115_vm3, %v33099_v30 }
 0x27e   :  { %24000 = vmatmul.mubr.msk.f32.vlgmr.msra.gmra.mrb[24].mxu1 %vm115_vm3, %v33099_v30  ;;  %27761 = vmatpush1.bf16.msra.mxu0 %v37522_v36 }
 0x27f   :  { %27771 = vmatpush1.bf16.msra.mxu1 %v37607_v33  ;;  %27764 = vmatprep.subr.msk.bf16.mxu0 %vm30729_vm2, %v37566_v56 }
 0x280   :  { %27774 = vmatprep.subr.msk.bf16.mxu1 %vm30729_vm2, %v37608_v32  ;;  %12023 = vmatprep.mubr.f32.mxu0 %v37331_v38 }
 0x281   :  { %12094 = vmatprep.mubr.f32.mxu1 %v37331_v38 }
 0x282   :  { %27767 = vmatpush1.bf16.msk.msra.mxu0 %vm30729_vm2, %v37568_v28 }
 0x283   :  { %27777 = vmatpush1.bf16.msk.msra.mxu1 %vm30729_vm2, %v37482_v31  ;;  %27779 = vmatprep.subr.bf16.mxu0 %v37483_v21 }
 0x284   :  { %27789 = vmatprep.subr.bf16.mxu1 %v37609_v34 }
 0x285   :  { %24003 = vmatmul.mubr.msk.f32.vlgmr.msra.gmra.mrb[26].mxu0 %vm115_vm3, %v33099_v30 }
 0x286   :  { %24006 = vmatmul.mubr.msk.f32.vlgmr.msra.gmra.mrb[26].mxu1 %vm115_vm3, %v33099_v30  ;;  %27781 = vmatpush1.bf16.msra.mxu0 %v37485_v22 }
 0x287   :  { %27791 = vmatpush1.bf16.msra.mxu1 %v37610_v47  ;;  %27784 = vmatprep.subr.msk.bf16.mxu0 %vm30729_vm2, %v37529_v8 }
 0x288   :  { %27794 = vmatprep.subr.msk.bf16.mxu1 %vm30729_vm2, %v37530_v17  ;;  %12178 = vmatprep.mubr.f32.mxu0 %v37331_v38 }
 0x289   :  { %12249 = vmatprep.mubr.f32.mxu1 %v37331_v38 }
 0x28a   :  { %27787 = vmatpush1.bf16.msk.msra.mxu0 %vm30729_vm2, %v37611_v49 }
 0x28b   :  { %27797 = vmatpush1.bf16.msk.msra.mxu1 %vm30729_vm2, %v37444_v7  ;;  %27799 = vmatprep.subr.bf16.mxu0 %v37445_v25  ;;  %v37618_v25 = vld [vmem:[#allocation69_spill] sm:$0xff]  ;;  %v37627_v7 = vld [vmem:[#allocation78_spill] sm:$0xff] }
 0x28c   :  { %27809 = vmatprep.subr.bf16.mxu1 %v37490_v52  ;;  %v37613_v52 = vld [vmem:[#allocation64_spill] sm:$0xff] }
 0x28d   :  { %24010 = vmatmul.mubr.msk.f32.vlgmr.msra.gmra.mrb[24].mxu0 %vm115_vm3, %v33328_v6 }
 0x28e   :  { %24013 = vmatmul.mubr.msk.f32.vlgmr.msra.gmra.mrb[24].mxu1 %vm115_vm3, %v33328_v6  ;;  %27801 = vmatpush1.bf16.msra.mxu0 %v37447_v53  ;;  %v37615_v53 = vld [vmem:[#allocation66_spill] sm:$0xff] }
 0x28f   :  { %27811 = vmatpush1.bf16.msra.mxu1 %v37491_v11  ;;  %27804 = vmatprep.subr.msk.bf16.mxu0 %vm30729_vm2, %v37449_v14  ;;  %v37614_v11 = vld [vmem:[#allocation65_spill] sm:$0xff]  ;;  %v37617_v14 = vld [vmem:[#allocation68_spill] sm:$0xff] }
 0x290   :  { %27814 = vmatprep.subr.msk.bf16.mxu1 %vm30729_vm2, %v37612_v61  ;;  %12320 = vmatprep.mubr.f32.mxu0 %v37331_v38  ;;  %v37616_v61 = vld [vmem:[#allocation67_spill] sm:$0xff] }
 0x291   :  { %12391 = vmatprep.mubr.f32.mxu1 %v37331_v38 }
 0x292   :  { %27807 = vmatpush1.bf16.msk.msra.mxu0 %vm30729_vm2, %v37451_v46  ;;  %v37619_v46 = vld [vmem:[#allocation70_spill] sm:$0xff] }
 0x293   :  { %27817 = vmatpush1.bf16.msk.msra.mxu1 %vm30729_vm2, %v37613_v52  ;;  %27819 = vmatprep.subr.bf16.mxu0 %v37614_v11  ;;  %v37625_v11 = vld [vmem:[#allocation76_spill] sm:$0xff]  ;;  %v37626_v52 = vld [vmem:[#allocation77_spill] sm:$0xff] }
 0x294   :  { %27829 = vmatprep.subr.bf16.mxu1 %v37615_v53  ;;  %v37620_v53 = vld [vmem:[#allocation71_spill] sm:$0xff] }
 0x295   :  { %24016 = vmatmul.mubr.msk.f32.vlgmr.msra.gmra.mrb[26].mxu0 %vm115_vm3, %v33328_v6 }
 0x296   :  { %24019 = vmatmul.mubr.msk.f32.vlgmr.msra.gmra.mrb[26].mxu1 %vm115_vm3, %v33328_v6  ;;  %27821 = vmatpush1.bf16.msra.mxu0 %v37616_v61  ;;  %v37621_v61 = vld [vmem:[#allocation72_spill] sm:$0xff] }
 0x297   :  { %27831 = vmatpush1.bf16.msra.mxu1 %v37617_v14  ;;  %27824 = vmatprep.subr.msk.bf16.mxu0 %vm30729_vm2, %v37618_v25  ;;  %v33377_v14 = vld [vmem:[%s36839_s0 + $0x88] sm:$0xff]  ;;  %v37622_v25 = vld [vmem:[#allocation73_spill] sm:$0xff] }
 0x298   :  { %27834 = vmatprep.subr.msk.bf16.mxu1 %vm30729_vm2, %v37619_v46  ;;  %12475 = vmatprep.mubr.f32.mxu0 %v37331_v38  ;;  %v37623_v46 = vld [vmem:[#allocation74_spill] sm:$0xff] }
 0x299   :  { %12546 = vmatprep.mubr.f32.mxu1 %v37331_v38 }
 0x29a   :  { %27827 = vmatpush1.bf16.msk.msra.mxu0 %vm30729_vm2, %v37620_v53  ;;  %v37624_v53 = vld [vmem:[#allocation75_spill] sm:$0xff] }
 0x29b   :  { %27837 = vmatpush1.bf16.msk.msra.mxu1 %vm30729_vm2, %v37621_v61  ;;  %27839 = vmatprep.subr.bf16.mxu0 %v37622_v25  ;;  %v37629_v25 = vld [vmem:[#allocation80_spill] sm:$0xff]  ;;  %v37634_v61 = vld [vmem:[#allocation6_spill] sm:$0xff] }
 0x29c   :  { %27849 = vmatprep.subr.bf16.mxu1 %v37623_v46  ;;  %v37628_v46 = vld [vmem:[#allocation79_spill] sm:$0xff] }
 0x29d   :  { %24023 = vmatmul.mubr.msk.f32.vlgmr.msra.gmra.mrb[24].mxu0 %vm115_vm3, %v33377_v14 }
 0x29e   :  { %24026 = vmatmul.mubr.msk.f32.vlgmr.msra.gmra.mrb[24].mxu1 %vm115_vm3, %v33377_v14  ;;  %27841 = vmatpush1.bf16.msra.mxu0 %v37624_v53  ;;  %v37631_v53 = vld [vmem:[#allocation3_spill] sm:$0xff] }
 0x29f   :  { %27851 = vmatpush1.bf16.msra.mxu1 %v37625_v11  ;;  %27844 = vmatprep.subr.msk.bf16.mxu0 %vm30729_vm2, %v37626_v52  ;;  %v37630_v11 = vld [vmem:[#allocation2_spill] sm:$0xff]  ;;  %v37633_v52 = vld [vmem:[#allocation5_spill] sm:$0xff] }
 0x2a0   :  { %27854 = vmatprep.subr.msk.bf16.mxu1 %vm30729_vm2, %v37627_v7  ;;  %12617 = vmatprep.mubr.f32.mxu0 %v37331_v38  ;;  %v37632_v7 = vld [vmem:[#allocation4_spill] sm:$0xff] }
 0x2a1   :  { %12688 = vmatprep.mubr.f32.mxu1 %v37331_v38 }
 0x2a2   :  { %27847 = vmatpush1.bf16.msk.msra.mxu0 %vm30729_vm2, %v37628_v46  ;;  %v37635_v46 = vld [vmem:[#allocation7_spill] sm:$0xff] }
 0x2a3   :  { %27857 = vmatpush1.bf16.msk.msra.mxu1 %vm30729_vm2, %v37629_v25  ;;  %27859 = vmatprep.subr.bf16.mxu0 %v37630_v11  ;;  %v37637_v11 = vld [vmem:[#allocation9_spill] sm:$0xff]  ;;  %v37642_v25 = vld [vmem:[#allocation14_spill] sm:$0xff] }
 0x2a4   :  { %27869 = vmatprep.subr.bf16.mxu1 %v37631_v53  ;;  %v37636_v53 = vld [vmem:[#allocation8_spill] sm:$0xff] }
 0x2a5   :  { %24029 = vmatmul.mubr.msk.f32.vlgmr.msra.gmra.mrb[26].mxu0 %vm115_vm3, %v33377_v14 }
 0x2a6   :  { %24032 = vmatmul.mubr.msk.f32.vlgmr.msra.gmra.mrb[26].mxu1 %vm115_vm3, %v33377_v14  ;;  %27861 = vmatpush1.bf16.msra.mxu0 %v37632_v7  ;;  %v37639_v7 = vld [vmem:[#allocation11_spill] sm:$0xff] }
 0x2a7   :  { %27871 = vmatpush1.bf16.msra.mxu1 %v37633_v52  ;;  %27864 = vmatprep.subr.msk.bf16.mxu0 %vm30729_vm2, %v37634_v61  ;;  %v37638_v52 = vld [vmem:[#allocation10_spill] sm:$0xff]  ;;  %v37641_v61 = vld [vmem:[#allocation13_spill] sm:$0xff] }
 0x2a8   :  { %27874 = vmatprep.subr.msk.bf16.mxu1 %vm30729_vm2, %v37635_v46  ;;  %12777 = vmatprep.mubr.f32.mxu0 %v37331_v38  ;;  %v37640_v46 = vld [vmem:[#allocation12_spill] sm:$0xff] }
 0x2a9   :  { %12848 = vmatprep.mubr.f32.mxu1 %v37331_v38 }
 0x2aa   :  { %27867 = vmatpush1.bf16.msk.msra.mxu0 %vm30729_vm2, %v37636_v53 }
 0x2ab   :  { %27877 = vmatpush1.bf16.msk.msra.mxu1 %vm30729_vm2, %v37637_v11  ;;  %27879 = vmatprep.subr.bf16.mxu0 %v37638_v52  ;;  %v37643_v11 = vld [vmem:[#allocation15_spill] sm:$0xff] }
 0x2ac   :  { %27889 = vmatprep.subr.bf16.mxu1 %v37639_v7 }
 0x2ad   :  { %24035 = vmatmul.mubr.msk.f32.vlgmr.msra.gmra.mrb[28].mxu0 %vm115_vm3, %v33099_v30 }
 0x2ae   :  { %24038 = vmatmul.mubr.msk.f32.vlgmr.msra.gmra.mrb[28].mxu1 %vm115_vm3, %v33099_v30  ;;  %27881 = vmatpush1.bf16.msra.mxu0 %v37640_v46  ;;  %v37644_v46 = vld [vmem:[#allocation16_spill] sm:$0xff] }
 0x2af   :  { %27891 = vmatpush1.bf16.msra.mxu1 %v37641_v61  ;;  %27884 = vmatprep.subr.msk.bf16.mxu0 %vm30729_vm2, %v37642_v25  ;;  %v37645_v25 = vld [vmem:[#allocation17_spill] sm:$0xff] }
 0x2b0   :  { %v8965_v53 = vpop.f32.mrb[16].mxu0  ;;  %27894 = vmatprep.subr.msk.bf16.mxu1 %vm30729_vm2, %v37643_v11  ;;  %12919 = vmatprep.mubr.f32.mxu0 %v37331_v38  ;;  %v37646_v11 = vld [vmem:[#allocation18_spill] sm:$0xff] }
 0x2b1   :  { %v9036_v7 = vpop.f32.mrb[16].mxu1  ;;  %v8967_v52 = vpop.f32.mrb[17].mxu0  ;;  %12990 = vmatprep.mubr.f32.mxu1 %v37331_v38 }
 0x2b2   :  { %v9191_v49 = vmax.f32 %v8965_v53, %v9036_v7  ;;  %v9038_v17 = vpop.f32.mrb[17].mxu1  ;;  %27887 = vmatpush1.bf16.msk.msra.mxu0 %vm30729_vm2, %v30852_v51  ;;  %v37647_v53 = vld [vmem:[#allocation19_spill] sm:$0xff]  ;;  %v37648_v7 = vld [vmem:[#allocation20_spill] sm:$0xff] }
 0x2b3   :  { %v9192_v61 = vmax.f32 %v8967_v52, %v9038_v17  ;;  %27897 = vmatpush1.bf16.msk.msra.mxu1 %vm30729_vm2, %v37644_v46  ;;  %27899 = vmatprep.subr.bf16.mxu0 %v37645_v25  ;;  %v37649_v17 = vld [vmem:[#allocation21_spill] sm:$0xff] }
 0x2b4   :  { %27909 = vmatprep.subr.bf16.mxu1 %v37646_v11 }
 0x2b5   :  { %24041 = vmatmul.mubr.msk.f32.vlgmr.msra.gmra.mrb[30].mxu0 %vm115_vm3, %v33099_v30 }
 0x2b6   :  { %24044 = vmatmul.mubr.msk.f32.vlgmr.msra.gmra.mrb[30].mxu1 %vm115_vm3, %v33099_v30  ;;  %27901 = vmatpush1.bf16.msra.mxu0 %v30902_v1 }
 0x2b7   :  { %27911 = vmatpush1.bf16.msra.mxu1 %v37647_v53  ;;  %27904 = vmatprep.subr.msk.bf16.mxu0 %vm30729_vm2, %v37648_v7 }
 0x2b8   :  { %v9107_v52 = vpop.f32.mrb[18].mxu0  ;;  %27914 = vmatprep.subr.msk.bf16.mxu1 %vm30729_vm2, %v37649_v17  ;;  %13061 = vmatprep.mubr.f32.mxu0 %v37331_v38 }
 0x2b9   :  { %v9178_v11 = vpop.f32.mrb[18].mxu1  ;;  %v9109_v25 = vpop.f32.mrb[19].mxu0  ;;  %13132 = vmatprep.mubr.f32.mxu1 %v37331_v38 }
 0x2ba   :  { %v9193_v30 = vmax.f32 %v9107_v52, %v9178_v11  ;;  %v9180_v46 = vpop.f32.mrb[19].mxu1  ;;  %27907 = vmatpush1.bf16.msk.msra.mxu0 %vm30729_vm2, %v30944_v20  ;;  %v37652_v11 = vld [vmem:[#allocation54_spill] sm:$0xff]  ;;  %v37658_v52 = vld [vmem:[#allocation60_spill] sm:$0xff] }
 0x2bb   :  { %v9194_v53 = vmax.f32 %v9109_v25, %v9180_v46  ;;  %27917 = vmatpush1.bf16.msk.msra.mxu1 %vm30729_vm2, %v30950_v23  ;;  %27919 = vmatprep.subr.bf16.mxu0 %v30952_v24  ;;  %v37653_v46 = vld [vmem:[#allocation55_spill] sm:$0xff]  ;;  %v33606_v25 = vld [vmem:[%s36839_s0 + $0x90] sm:$0xff] }
 0x2bc   :  { %v33471_v17 = vmax.f32 %v9191_v49, %v9193_v30  ;;  %27929 = vmatprep.subr.bf16.mxu1 %v30967_v29  ;;  %v37656_v49 = vld [vmem:[#allocation58_spill] sm:$0xff]  ;;  %v37659_v30 = vld [vmem:[#allocation61_spill] sm:$0xff] }
 0x2bd   :  { %v33474_v7 = vmax.f32 %v9192_v61, %v9194_v53  ;;  %24047 = vmatmul.mubr.msk.f32.vlgmr.msra.gmra.mrb[28].mxu0 %vm115_vm3, %v33050_v27  ;;  %v37655_v61 = vld [vmem:[#allocation57_spill] sm:$0xff]  ;;  %v37657_v53 = vld [vmem:[#allocation59_spill] sm:$0xff] }
 0x2be   :  { %37650 = vst [vmem:[#allocation51_spill] sm:$0xff] %v33471_v17  ;;  %24050 = vmatmul.mubr.msk.f32.vlgmr.msra.gmra.mrb[28].mxu1 %vm115_vm3, %v33050_v27  ;;  %27921 = vmatpush1.bf16.msra.mxu0 %v30991_v40  ;;  %v37660_v17 = vld [vmem:[#allocation62_spill] sm:$0xff] }
 0x2bf   :  { %37651 = vst [vmem:[#allocation26_spill] sm:$0xff] %v33474_v7  ;;  %27931 = vmatpush1.bf16.msra.mxu1 %v30997_v41  ;;  %27924 = vmatprep.subr.msk.bf16.mxu0 %vm30729_vm2, %v30999_v42  ;;  %v37661_v7 = vld [vmem:[#allocation63_spill] sm:$0xff] }
 0x2c0   :  { %27934 = vmatprep.subr.msk.bf16.mxu1 %vm30729_vm2, %v31011_v48  ;;  %13203 = vmatprep.mubr.f32.mxu0 %v37331_v38 }
 0x2c1   :  { %13274 = vmatprep.mubr.f32.mxu1 %v37331_v38 }
 0x2c2   :  { %27927 = vmatpush1.bf16.msk.msra.mxu0 %vm30729_vm2, %v31031_v57 }
 0x2c3   :  { %27937 = vmatpush1.bf16.msk.msra.mxu1 %vm30729_vm2, %v31037_v58  ;;  %27939 = vmatprep.subr.bf16.mxu0 %v31039_v60 }
 0x2c4   :  { %27949 = vmatprep.subr.bf16.mxu1 %v31054_v0 }
 0x2c5   :  { %24053 = vmatmul.mubr.msk.f32.vlgmr.msra.gmra.mrb[30].mxu0 %vm115_vm3, %v33050_v27 }
 0x2c6   :  { %24056 = vmatmul.mubr.msk.f32.vlgmr.msra.gmra.mrb[30].mxu1 %vm115_vm3, %v33050_v27  ;;  %27941 = vmatpush1.bf16.msra.mxu0 %v31075_v16  ;;  %v37654_v27 = vld [vmem:[#allocation56_spill] sm:$0xff] }
 0x2c7   :  { %27951 = vmatpush1.bf16.msra.mxu1 %v31081_v18  ;;  %27944 = vmatprep.subr.msk.bf16.mxu0 %vm30729_vm2, %v31083_v19 }
 0x2c8   :  { %27954 = vmatprep.subr.msk.bf16.mxu1 %vm30729_vm2, %v37456_v26  ;;  %13345 = vmatprep.mubr.f32.mxu0 %v37331_v38 }
 0x2c9   :  { %13416 = vmatprep.mubr.f32.mxu1 %v37331_v38 }
 0x2ca   :  { %27947 = vmatpush1.bf16.msk.msra.mxu0 %vm30729_vm2, %v37457_v39 }
 0x2cb   :  { %27957 = vmatpush1.bf16.msk.msra.mxu1 %vm30729_vm2, %v37458_v2  ;;  %27959 = vmatprep.subr.bf16.mxu0 %v37459_v45 }
 0x2cc   :  { %27969 = vmatprep.subr.bf16.mxu1 %v37505_v4 }
 0x2cd   :  { %24059 = vmatmul.mubr.msk.f32.vlgmr.msra.gmra.mrb[28].mxu0 %vm115_vm3, %v33328_v6 }
 0x2ce   :  { %24062 = vmatmul.mubr.msk.f32.vlgmr.msra.gmra.mrb[28].mxu1 %vm115_vm3, %v33328_v6  ;;  %27961 = vmatpush1.bf16.msra.mxu0 %v37506_v54 }
 0x2cf   :  { %27971 = vmatpush1.bf16.msra.mxu1 %v37507_v55  ;;  %27964 = vmatprep.subr.msk.bf16.mxu0 %vm30729_vm2, %v37508_v59 }
 0x2d0   :  { %27974 = vmatprep.subr.msk.bf16.mxu1 %vm30729_vm2, %v37554_v35  ;;  %13487 = vmatprep.mubr.f32.mxu0 %v37331_v38 }
 0x2d1   :  { %13558 = vmatprep.mubr.f32.mxu1 %v37331_v38 }
 0x2d2   :  { %27967 = vmatpush1.bf16.msk.msra.mxu0 %vm30729_vm2, %v37555_v43 }
 0x2d3   :  { %27977 = vmatpush1.bf16.msk.msra.mxu1 %vm30729_vm2, %v37556_v44  ;;  %27979 = vmatprep.subr.bf16.mxu0 %v37557_v5 }
 0x2d4   :  { %27989 = vmatprep.subr.bf16.mxu1 %v37558_v37 }
 0x2d5   :  { %24065 = vmatmul.mubr.msk.f32.vlgmr.msra.gmra.mrb[30].mxu0 %vm115_vm3, %v33328_v6 }
 0x2d6   :  { %24068 = vmatmul.mubr.msk.f32.vlgmr.msra.gmra.mrb[30].mxu1 %vm115_vm3, %v33328_v6  ;;  %27981 = vmatpush1.bf16.msra.mxu0 %v37559_v63 }
 0x2d7   :  { %27991 = vmatpush1.bf16.msra.mxu1 %v37560_v50  ;;  %27984 = vmatprep.subr.msk.bf16.mxu0 %vm30729_vm2, %v37603_v62 }
 0x2d8   :  { %27994 = vmatprep.subr.msk.bf16.mxu1 %vm30729_vm2, %v37604_v12  ;;  %13637 = vmatprep.mubr.f32.mxu0 %v37331_v38 }
 0x2d9   :  { %13708 = vmatprep.mubr.f32.mxu1 %v37331_v38 }
 0x2da   :  { %27987 = vmatpush1.bf16.msk.msra.mxu0 %vm30729_vm2, %v37605_v10 }
 0x2db   :  { %27997 = vmatpush1.bf16.msk.msra.mxu1 %vm30729_vm2, %v37519_v13  ;;  %27999 = vmatprep.subr.bf16.mxu0 %v37520_v9 }
 0x2dc   :  { %28009 = vmatprep.subr.bf16.mxu1 %v37606_v3 }
 0x2dd   :  { %24071 = vmatmul.mubr.msk.f32.vlgmr.msra.gmra.mrb[28].mxu0 %vm115_vm3, %v33377_v14 }
 0x2de   :  { %24074 = vmatmul.mubr.msk.f32.vlgmr.msra.gmra.mrb[28].mxu1 %vm115_vm3, %v33377_v14  ;;  %28001 = vmatpush1.bf16.msra.mxu0 %v37522_v36 }
 0x2df   :  { %28011 = vmatpush1.bf16.msra.mxu1 %v37607_v33  ;;  %28004 = vmatprep.subr.msk.bf16.mxu0 %vm30729_vm2, %v37566_v56 }
 0x2e0   :  { %28014 = vmatprep.subr.msk.bf16.mxu1 %vm30729_vm2, %v37608_v32  ;;  %13779 = vmatprep.mubr.f32.mxu0 %v37331_v38 }
 0x2e1   :  { %13850 = vmatprep.mubr.f32.mxu1 %v37331_v38 }
 0x2e2   :  { %28007 = vmatpush1.bf16.msk.msra.mxu0 %vm30729_vm2, %v37568_v28 }
 0x2e3   :  { %28017 = vmatpush1.bf16.msk.msra.mxu1 %vm30729_vm2, %v37482_v31  ;;  %28019 = vmatprep.subr.bf16.mxu0 %v37483_v21 }
 0x2e4   :  { %28029 = vmatprep.subr.bf16.mxu1 %v37609_v34 }
 0x2e5   :  { %24077 = vmatmul.mubr.msk.f32.vlgmr.msra.gmra.mrb[30].mxu0 %vm115_vm3, %v33377_v14 }
 0x2e6   :  { %24080 = vmatmul.mubr.msk.f32.vlgmr.msra.gmra.mrb[30].mxu1 %vm115_vm3, %v33377_v14  ;;  %28021 = vmatpush1.bf16.msra.mxu0 %v37485_v22 }
 0x2e7   :  { %28031 = vmatpush1.bf16.msra.mxu1 %v37610_v47  ;;  %28024 = vmatprep.subr.msk.bf16.mxu0 %vm30729_vm2, %v37529_v8 }
 0x2e8   :  { %28034 = vmatprep.subr.msk.bf16.mxu1 %vm30729_vm2, %v37652_v11  ;;  %13934 = vmatprep.mubr.f32.mxu0 %v37331_v38 }
 0x2e9   :  { %14005 = vmatprep.mubr.f32.mxu1 %v37331_v38 }
 0x2ea   :  { %28027 = vmatpush1.bf16.msk.msra.mxu0 %vm30729_vm2, %v37653_v46 }
 0x2eb   :  { %28037 = vmatpush1.bf16.msk.msra.mxu1 %vm30729_vm2, %v37654_v27  ;;  %28039 = vmatprep.subr.bf16.mxu0 %v37655_v61  ;;  %v37667_v61 = vld [vmem:[#allocation69_spill] sm:$0xff]  ;;  %v37676_v27 = vld [vmem:[#allocation78_spill] sm:$0xff] }
 0x2ec   :  { %28049 = vmatprep.subr.bf16.mxu1 %v37656_v49  ;;  %v37662_v49 = vld [vmem:[#allocation64_spill] sm:$0xff] }
 0x2ed   :  { %24084 = vmatmul.mubr.msk.f32.vlgmr.msra.gmra.mrb[28].mxu0 %vm115_vm3, %v33606_v25 }
 0x2ee   :  { %24087 = vmatmul.mubr.msk.f32.vlgmr.msra.gmra.mrb[28].mxu1 %vm115_vm3, %v33606_v25  ;;  %28041 = vmatpush1.bf16.msra.mxu0 %v37657_v53  ;;  %v37664_v53 = vld [vmem:[#allocation66_spill] sm:$0xff] }
 0x2ef   :  { %28051 = vmatpush1.bf16.msra.mxu1 %v37658_v52  ;;  %28044 = vmatprep.subr.msk.bf16.mxu0 %vm30729_vm2, %v37659_v30  ;;  %v37663_v52 = vld [vmem:[#allocation65_spill] sm:$0xff]  ;;  %v37666_v30 = vld [vmem:[#allocation68_spill] sm:$0xff] }
 0x2f0   :  { %28054 = vmatprep.subr.msk.bf16.mxu1 %vm30729_vm2, %v37660_v17  ;;  %14076 = vmatprep.mubr.f32.mxu0 %v37331_v38  ;;  %v37665_v17 = vld [vmem:[#allocation67_spill] sm:$0xff] }
 0x2f1   :  { %14147 = vmatprep.mubr.f32.mxu1 %v37331_v38 }
 0x2f2   :  { %28047 = vmatpush1.bf16.msk.msra.mxu0 %vm30729_vm2, %v37661_v7  ;;  %v37668_v7 = vld [vmem:[#allocation70_spill] sm:$0xff] }
 0x2f3   :  { %28057 = vmatpush1.bf16.msk.msra.mxu1 %vm30729_vm2, %v37662_v49  ;;  %28059 = vmatprep.subr.bf16.mxu0 %v37663_v52  ;;  %v37674_v52 = vld [vmem:[#allocation76_spill] sm:$0xff]  ;;  %v37675_v49 = vld [vmem:[#allocation77_spill] sm:$0xff] }
 0x2f4   :  { %28069 = vmatprep.subr.bf16.mxu1 %v37664_v53  ;;  %v37669_v53 = vld [vmem:[#allocation71_spill] sm:$0xff] }
 0x2f5   :  { %24090 = vmatmul.mubr.msk.f32.vlgmr.msra.gmra.mrb[30].mxu0 %vm115_vm3, %v33606_v25 }
 0x2f6   :  { %24093 = vmatmul.mubr.msk.f32.vlgmr.msra.gmra.mrb[30].mxu1 %vm115_vm3, %v33606_v25  ;;  %28061 = vmatpush1.bf16.msra.mxu0 %v37665_v17  ;;  %v37670_v17 = vld [vmem:[#allocation72_spill] sm:$0xff] }
 0x2f7   :  { %28071 = vmatpush1.bf16.msra.mxu1 %v37666_v30  ;;  %28064 = vmatprep.subr.msk.bf16.mxu0 %vm30729_vm2, %v37667_v61  ;;  %v33655_v30 = vld [vmem:[%s36839_s0 + $0x98] sm:$0xff] }
 0x2f8   :  { %28074 = vmatprep.subr.msk.bf16.mxu1 %vm30729_vm2, %v37668_v7  ;;  %14231 = vmatprep.mubr.f32.mxu0 %v37331_v38  ;;  %v37671_v61 = vld [vmem:[#allocation73_spill] sm:$0xff]  ;;  %v37672_v7 = vld [vmem:[#allocation74_spill] sm:$0xff] }
 0x2f9   :  { %14302 = vmatprep.mubr.f32.mxu1 %v37331_v38 }
 0x2fa   :  { %28067 = vmatpush1.bf16.msk.msra.mxu0 %vm30729_vm2, %v37669_v53  ;;  %v37673_v53 = vld [vmem:[#allocation75_spill] sm:$0xff] }
 0x2fb   :  { %28077 = vmatpush1.bf16.msk.msra.mxu1 %vm30729_vm2, %v37670_v17  ;;  %28079 = vmatprep.subr.bf16.mxu0 %v37671_v61  ;;  %v37678_v61 = vld [vmem:[#allocation80_spill] sm:$0xff]  ;;  %v37683_v17 = vld [vmem:[#allocation6_spill] sm:$0xff] }
 0x2fc   :  { %28089 = vmatprep.subr.bf16.mxu1 %v37672_v7  ;;  %v37677_v7 = vld [vmem:[#allocation79_spill] sm:$0xff] }
 0x2fd   :  { %24097 = vmatmul.mubr.msk.f32.vlgmr.msra.gmra.mrb[28].mxu0 %vm115_vm3, %v33655_v30 }
 0x2fe   :  { %24100 = vmatmul.mubr.msk.f32.vlgmr.msra.gmra.mrb[28].mxu1 %vm115_vm3, %v33655_v30  ;;  %28081 = vmatpush1.bf16.msra.mxu0 %v37673_v53  ;;  %v37680_v53 = vld [vmem:[#allocation3_spill] sm:$0xff] }
 0x2ff   :  { %28091 = vmatpush1.bf16.msra.mxu1 %v37674_v52  ;;  %28084 = vmatprep.subr.msk.bf16.mxu0 %vm30729_vm2, %v37675_v49  ;;  %v37679_v52 = vld [vmem:[#allocation2_spill] sm:$0xff]  ;;  %v37682_v49 = vld [vmem:[#allocation5_spill] sm:$0xff] }
 0x300   :  { %28094 = vmatprep.subr.msk.bf16.mxu1 %vm30729_vm2, %v37676_v27  ;;  %14373 = vmatprep.mubr.f32.mxu0 %v37331_v38  ;;  %v37681_v27 = vld [vmem:[#allocation4_spill] sm:$0xff] }
 0x301   :  { %14444 = vmatprep.mubr.f32.mxu1 %v37331_v38 }
 0x302   :  { %28087 = vmatpush1.bf16.msk.msra.mxu0 %vm30729_vm2, %v37677_v7  ;;  %v37684_v7 = vld [vmem:[#allocation7_spill] sm:$0xff] }
 0x303   :  { %28097 = vmatpush1.bf16.msk.msra.mxu1 %vm30729_vm2, %v37678_v61  ;;  %28099 = vmatprep.subr.bf16.mxu0 %v37679_v52  ;;  %v37686_v52 = vld [vmem:[#allocation9_spill] sm:$0xff]  ;;  %v37691_v61 = vld [vmem:[#allocation14_spill] sm:$0xff] }
 0x304   :  { %28109 = vmatprep.subr.bf16.mxu1 %v37680_v53  ;;  %v37685_v53 = vld [vmem:[#allocation8_spill] sm:$0xff] }
 0x305   :  { %24103 = vmatmul.mubr.msk.f32.vlgmr.msra.gmra.mrb[30].mxu0 %vm115_vm3, %v33655_v30 }
 0x306   :  { %24106 = vmatmul.mubr.msk.f32.vlgmr.msra.gmra.mrb[30].mxu1 %vm115_vm3, %v33655_v30  ;;  %28101 = vmatpush1.bf16.msra.mxu0 %v37681_v27  ;;  %v37688_v27 = vld [vmem:[#allocation11_spill] sm:$0xff] }
 0x307   :  { %28111 = vmatpush1.bf16.msra.mxu1 %v37682_v49  ;;  %28104 = vmatprep.subr.msk.bf16.mxu0 %vm30729_vm2, %v37683_v17  ;;  %v37687_v49 = vld [vmem:[#allocation10_spill] sm:$0xff]  ;;  %v37690_v17 = vld [vmem:[#allocation13_spill] sm:$0xff] }
 0x308   :  { %28114 = vmatprep.subr.msk.bf16.mxu1 %vm30729_vm2, %v37684_v7  ;;  %14533 = vmatprep.mubr.f32.mxu0 %v37331_v38  ;;  %v37689_v7 = vld [vmem:[#allocation12_spill] sm:$0xff] }
 0x309   :  { %14604 = vmatprep.mubr.f32.mxu1 %v37331_v38 }
 0x30a   :  { %28107 = vmatpush1.bf16.msk.msra.mxu0 %vm30729_vm2, %v37685_v53 }
 0x30b   :  { %28117 = vmatpush1.bf16.msk.msra.mxu1 %vm30729_vm2, %v37686_v52  ;;  %28119 = vmatprep.subr.bf16.mxu0 %v37687_v49  ;;  %v37692_v52 = vld [vmem:[#allocation15_spill] sm:$0xff] }
 0x30c   :  { %28129 = vmatprep.subr.bf16.mxu1 %v37688_v27 }
 0x30d   :  { %24109 = vmatmul.mubr.msk.f32.vlgmr.msra.gmra.mrb[32].mxu0 %vm115_vm3, %v33377_v14 }
 0x30e   :  { %24112 = vmatmul.mubr.msk.f32.vlgmr.msra.gmra.mrb[32].mxu1 %vm115_vm3, %v33377_v14  ;;  %28121 = vmatpush1.bf16.msra.mxu0 %v37689_v7  ;;  %v37693_v7 = vld [vmem:[#allocation16_spill] sm:$0xff] }
 0x30f   :  { %28131 = vmatpush1.bf16.msra.mxu1 %v37690_v17  ;;  %28124 = vmatprep.subr.msk.bf16.mxu0 %vm30729_vm2, %v37691_v61  ;;  %v37694_v61 = vld [vmem:[#allocation17_spill] sm:$0xff] }
 0x310   :  { %v10721_v53 = vpop.f32.mrb[20].mxu0  ;;  %28134 = vmatprep.subr.msk.bf16.mxu1 %vm30729_vm2, %v37692_v52  ;;  %14675 = vmatprep.mubr.f32.mxu0 %v37331_v38  ;;  %v37695_v52 = vld [vmem:[#allocation18_spill] sm:$0xff] }
 0x311   :  { %v10792_v27 = vpop.f32.mrb[20].mxu1  ;;  %v10723_v49 = vpop.f32.mrb[21].mxu0  ;;  %14746 = vmatprep.mubr.f32.mxu1 %v37331_v38 }
 0x312   :  { %v10947_v46 = vmax.f32 %v10721_v53, %v10792_v27  ;;  %v10794_v11 = vpop.f32.mrb[21].mxu1  ;;  %28127 = vmatpush1.bf16.msk.msra.mxu0 %vm30729_vm2, %v30852_v51  ;;  %v37696_v27 = vld [vmem:[#allocation19_spill] sm:$0xff]  ;;  %v37697_v53 = vld [vmem:[#allocation20_spill] sm:$0xff] }
 0x313   :  { %v10948_v17 = vmax.f32 %v10723_v49, %v10794_v11  ;;  %28137 = vmatpush1.bf16.msk.msra.mxu1 %vm30729_vm2, %v37693_v7  ;;  %28139 = vmatprep.subr.bf16.mxu0 %v37694_v61  ;;  %v37698_v49 = vld [vmem:[#allocation21_spill] sm:$0xff] }
 0x314   :  { %28149 = vmatprep.subr.bf16.mxu1 %v37695_v52 }
 0x315   :  { %24115 = vmatmul.mubr.msk.f32.vlgmr.msra.gmra.mrb[34].mxu0 %vm115_vm3, %v33377_v14 }
 0x316   :  { %24118 = vmatmul.mubr.msk.f32.vlgmr.msra.gmra.mrb[34].mxu1 %vm115_vm3, %v33377_v14  ;;  %28141 = vmatpush1.bf16.msra.mxu0 %v30902_v1 }
 0x317   :  { %28151 = vmatpush1.bf16.msra.mxu1 %v37696_v27  ;;  %28144 = vmatprep.subr.msk.bf16.mxu0 %vm30729_vm2, %v37697_v53 }
 0x318   :  { %v10863_v11 = vpop.f32.mrb[22].mxu0  ;;  %28154 = vmatprep.subr.msk.bf16.mxu1 %vm30729_vm2, %v37698_v49  ;;  %14817 = vmatprep.mubr.f32.mxu0 %v37331_v38 }
 0x319   :  { %v10934_v52 = vpop.f32.mrb[22].mxu1  ;;  %v10865_v61 = vpop.f32.mrb[23].mxu0  ;;  %14888 = vmatprep.mubr.f32.mxu1 %v37331_v38 }
 0x31a   :  { %v10949_v14 = vmax.f32 %v10863_v11, %v10934_v52  ;;  %v10936_v7 = vpop.f32.mrb[23].mxu1  ;;  %28147 = vmatpush1.bf16.msk.msra.mxu0 %vm30729_vm2, %v30944_v20  ;;  %v37705_v52 = vld [vmem:[#allocation58_spill] sm:$0xff]  ;;  %v37707_v11 = vld [vmem:[#allocation60_spill] sm:$0xff] }
 0x31b   :  { %v10950_v27 = vmax.f32 %v10865_v61, %v10936_v7  ;;  %28157 = vmatpush1.bf16.msk.msra.mxu1 %vm30729_vm2, %v30950_v23  ;;  %28159 = vmatprep.subr.bf16.mxu0 %v30952_v24  ;;  %v37702_v7 = vld [vmem:[#allocation55_spill] sm:$0xff]  ;;  %v37704_v61 = vld [vmem:[#allocation57_spill] sm:$0xff] }
 0x31c   :  { %v33749_v49 = vmax.f32 %v10947_v46, %v10949_v14  ;;  %28169 = vmatprep.subr.bf16.mxu1 %v30967_v29  ;;  %v37703_v46 = vld [vmem:[#allocation56_spill] sm:$0xff]  ;;  %v37708_v14 = vld [vmem:[#allocation61_spill] sm:$0xff] }
 0x31d   :  { %v33752_v53 = vmax.f32 %v10948_v17, %v10950_v27  ;;  %24121 = vmatmul.mubr.msk.f32.vlgmr.msra.gmra.mrb[32].mxu0 %vm115_vm3, %v33328_v6  ;;  %v33884_v17 = vld [vmem:[%s36839_s0 + $0xa0] sm:$0xff]  ;;  %v37706_v27 = vld [vmem:[#allocation59_spill] sm:$0xff] }
 0x31e   :  { %37699 = vst [vmem:[#allocation27_spill] sm:$0xff] %v33749_v49  ;;  %24124 = vmatmul.mubr.msk.f32.vlgmr.msra.gmra.mrb[32].mxu1 %vm115_vm3, %v33328_v6  ;;  %28161 = vmatpush1.bf16.msra.mxu0 %v30991_v40  ;;  %v37709_v49 = vld [vmem:[#allocation62_spill] sm:$0xff] }
 0x31f   :  { %37700 = vst [vmem:[#allocation28_spill] sm:$0xff] %v33752_v53  ;;  %28171 = vmatpush1.bf16.msra.mxu1 %v30997_v41  ;;  %28164 = vmatprep.subr.msk.bf16.mxu0 %vm30729_vm2, %v30999_v42  ;;  %v37710_v53 = vld [vmem:[#allocation63_spill] sm:$0xff] }
 0x320   :  { %28174 = vmatprep.subr.msk.bf16.mxu1 %vm30729_vm2, %v31011_v48  ;;  %14959 = vmatprep.mubr.f32.mxu0 %v37331_v38 }
 0x321   :  { %15030 = vmatprep.mubr.f32.mxu1 %v37331_v38 }
 0x322   :  { %28167 = vmatpush1.bf16.msk.msra.mxu0 %vm30729_vm2, %v31031_v57 }
 0x323   :  { %28177 = vmatpush1.bf16.msk.msra.mxu1 %vm30729_vm2, %v31037_v58  ;;  %28179 = vmatprep.subr.bf16.mxu0 %v31039_v60 }
 0x324   :  { %28189 = vmatprep.subr.bf16.mxu1 %v31054_v0 }
 0x325   :  { %24127 = vmatmul.mubr.msk.f32.vlgmr.msra.gmra.mrb[34].mxu0 %vm115_vm3, %v33328_v6 }
 0x326   :  { %24130 = vmatmul.mubr.msk.f32.vlgmr.msra.gmra.mrb[34].mxu1 %vm115_vm3, %v33328_v6  ;;  %28181 = vmatpush1.bf16.msra.mxu0 %v31075_v16  ;;  %v37701_v6 = vld [vmem:[#allocation54_spill] sm:$0xff] }
 0x327   :  { %28191 = vmatpush1.bf16.msra.mxu1 %v31081_v18  ;;  %28184 = vmatprep.subr.msk.bf16.mxu0 %vm30729_vm2, %v31083_v19 }
 0x328   :  { %28194 = vmatprep.subr.msk.bf16.mxu1 %vm30729_vm2, %v37456_v26  ;;  %15101 = vmatprep.mubr.f32.mxu0 %v37331_v38 }
 0x329   :  { %15172 = vmatprep.mubr.f32.mxu1 %v37331_v38 }
 0x32a   :  { %28187 = vmatpush1.bf16.msk.msra.mxu0 %vm30729_vm2, %v37457_v39 }
 0x32b   :  { %28197 = vmatpush1.bf16.msk.msra.mxu1 %vm30729_vm2, %v37458_v2  ;;  %28199 = vmatprep.subr.bf16.mxu0 %v37459_v45 }
 0x32c   :  { %28209 = vmatprep.subr.bf16.mxu1 %v37505_v4 }
 0x32d   :  { %24133 = vmatmul.mubr.msk.f32.vlgmr.msra.gmra.mrb[32].mxu0 %vm115_vm3, %v33606_v25 }
 0x32e   :  { %24136 = vmatmul.mubr.msk.f32.vlgmr.msra.gmra.mrb[32].mxu1 %vm115_vm3, %v33606_v25  ;;  %28201 = vmatpush1.bf16.msra.mxu0 %v37506_v54 }
 0x32f   :  { %28211 = vmatpush1.bf16.msra.mxu1 %v37507_v55  ;;  %28204 = vmatprep.subr.msk.bf16.mxu0 %vm30729_vm2, %v37508_v59 }
 0x330   :  { %28214 = vmatprep.subr.msk.bf16.mxu1 %vm30729_vm2, %v37554_v35  ;;  %15243 = vmatprep.mubr.f32.mxu0 %v37331_v38 }
 0x331   :  { %15314 = vmatprep.mubr.f32.mxu1 %v37331_v38 }
 0x332   :  { %28207 = vmatpush1.bf16.msk.msra.mxu0 %vm30729_vm2, %v37555_v43 }
 0x333   :  { %28217 = vmatpush1.bf16.msk.msra.mxu1 %vm30729_vm2, %v37556_v44  ;;  %28219 = vmatprep.subr.bf16.mxu0 %v37557_v5 }
 0x334   :  { %28229 = vmatprep.subr.bf16.mxu1 %v37558_v37 }
 0x335   :  { %24139 = vmatmul.mubr.msk.f32.vlgmr.msra.gmra.mrb[34].mxu0 %vm115_vm3, %v33606_v25 }
 0x336   :  { %24142 = vmatmul.mubr.msk.f32.vlgmr.msra.gmra.mrb[34].mxu1 %vm115_vm3, %v33606_v25  ;;  %28221 = vmatpush1.bf16.msra.mxu0 %v37559_v63 }
 0x337   :  { %28231 = vmatpush1.bf16.msra.mxu1 %v37560_v50  ;;  %28224 = vmatprep.subr.msk.bf16.mxu0 %vm30729_vm2, %v37603_v62 }
 0x338   :  { %28234 = vmatprep.subr.msk.bf16.mxu1 %vm30729_vm2, %v37604_v12  ;;  %15393 = vmatprep.mubr.f32.mxu0 %v37331_v38 }
 0x339   :  { %15464 = vmatprep.mubr.f32.mxu1 %v37331_v38 }
 0x33a   :  { %28227 = vmatpush1.bf16.msk.msra.mxu0 %vm30729_vm2, %v37605_v10 }
 0x33b   :  { %28237 = vmatpush1.bf16.msk.msra.mxu1 %vm30729_vm2, %v37519_v13  ;;  %28239 = vmatprep.subr.bf16.mxu0 %v37520_v9 }
 0x33c   :  { %28249 = vmatprep.subr.bf16.mxu1 %v37606_v3 }
 0x33d   :  { %24145 = vmatmul.mubr.msk.f32.vlgmr.msra.gmra.mrb[32].mxu0 %vm115_vm3, %v33655_v30 }
 0x33e   :  { %24148 = vmatmul.mubr.msk.f32.vlgmr.msra.gmra.mrb[32].mxu1 %vm115_vm3, %v33655_v30  ;;  %28241 = vmatpush1.bf16.msra.mxu0 %v37522_v36 }
 0x33f   :  { %28251 = vmatpush1.bf16.msra.mxu1 %v37607_v33  ;;  %28244 = vmatprep.subr.msk.bf16.mxu0 %vm30729_vm2, %v37566_v56 }
 0x340   :  { %28254 = vmatprep.subr.msk.bf16.mxu1 %vm30729_vm2, %v37608_v32  ;;  %15535 = vmatprep.mubr.f32.mxu0 %v37331_v38 }
 0x341   :  { %15606 = vmatprep.mubr.f32.mxu1 %v37331_v38 }
 0x342   :  { %28247 = vmatpush1.bf16.msk.msra.mxu0 %vm30729_vm2, %v37568_v28 }
 0x343   :  { %28257 = vmatpush1.bf16.msk.msra.mxu1 %vm30729_vm2, %v37482_v31  ;;  %28259 = vmatprep.subr.bf16.mxu0 %v37483_v21 }
 0x344   :  { %28269 = vmatprep.subr.bf16.mxu1 %v37609_v34 }
 0x345   :  { %24151 = vmatmul.mubr.msk.f32.vlgmr.msra.gmra.mrb[34].mxu0 %vm115_vm3, %v33655_v30 }
 0x346   :  { %24154 = vmatmul.mubr.msk.f32.vlgmr.msra.gmra.mrb[34].mxu1 %vm115_vm3, %v33655_v30  ;;  %28261 = vmatpush1.bf16.msra.mxu0 %v37485_v22 }
 0x347   :  { %28271 = vmatpush1.bf16.msra.mxu1 %v37610_v47  ;;  %28264 = vmatprep.subr.msk.bf16.mxu0 %vm30729_vm2, %v37529_v8 }
 0x348   :  { %28274 = vmatprep.subr.msk.bf16.mxu1 %vm30729_vm2, %v37701_v6  ;;  %15690 = vmatprep.mubr.f32.mxu0 %v37331_v38 }
 0x349   :  { %15761 = vmatprep.mubr.f32.mxu1 %v37331_v38 }
 0x34a   :  { %28267 = vmatpush1.bf16.msk.msra.mxu0 %vm30729_vm2, %v37702_v7 }
 0x34b   :  { %28277 = vmatpush1.bf16.msk.msra.mxu1 %vm30729_vm2, %v37703_v46  ;;  %28279 = vmatprep.subr.bf16.mxu0 %v37704_v61  ;;  %v37716_v61 = vld [vmem:[#allocation69_spill] sm:$0xff]  ;;  %v37725_v46 = vld [vmem:[#allocation78_spill] sm:$0xff] }
 0x34c   :  { %28289 = vmatprep.subr.bf16.mxu1 %v37705_v52  ;;  %v37711_v52 = vld [vmem:[#allocation64_spill] sm:$0xff] }
 0x34d   :  { %24158 = vmatmul.mubr.msk.f32.vlgmr.msra.gmra.mrb[32].mxu0 %vm115_vm3, %v33884_v17 }
 0x34e   :  { %24161 = vmatmul.mubr.msk.f32.vlgmr.msra.gmra.mrb[32].mxu1 %vm115_vm3, %v33884_v17  ;;  %28281 = vmatpush1.bf16.msra.mxu0 %v37706_v27  ;;  %v37713_v27 = vld [vmem:[#allocation66_spill] sm:$0xff] }
 0x34f   :  { %28291 = vmatpush1.bf16.msra.mxu1 %v37707_v11  ;;  %28284 = vmatprep.subr.msk.bf16.mxu0 %vm30729_vm2, %v37708_v14  ;;  %v37712_v11 = vld [vmem:[#allocation65_spill] sm:$0xff]  ;;  %v37715_v14 = vld [vmem:[#allocation68_spill] sm:$0xff] }
 0x350   :  { %28294 = vmatprep.subr.msk.bf16.mxu1 %vm30729_vm2, %v37709_v49  ;;  %15832 = vmatprep.mubr.f32.mxu0 %v37331_v38  ;;  %v37714_v49 = vld [vmem:[#allocation67_spill] sm:$0xff] }
 0x351   :  { %15903 = vmatprep.mubr.f32.mxu1 %v37331_v38 }
 0x352   :  { %28287 = vmatpush1.bf16.msk.msra.mxu0 %vm30729_vm2, %v37710_v53  ;;  %v37717_v53 = vld [vmem:[#allocation70_spill] sm:$0xff] }
 0x353   :  { %28297 = vmatpush1.bf16.msk.msra.mxu1 %vm30729_vm2, %v37711_v52  ;;  %28299 = vmatprep.subr.bf16.mxu0 %v37712_v11  ;;  %v37723_v11 = vld [vmem:[#allocation76_spill] sm:$0xff]  ;;  %v37724_v52 = vld [vmem:[#allocation77_spill] sm:$0xff] }
 0x354   :  { %28309 = vmatprep.subr.bf16.mxu1 %v37713_v27  ;;  %v37718_v27 = vld [vmem:[#allocation71_spill] sm:$0xff] }
 0x355   :  { %24164 = vmatmul.mubr.msk.f32.vlgmr.msra.gmra.mrb[34].mxu0 %vm115_vm3, %v33884_v17 }
 0x356   :  { %24167 = vmatmul.mubr.msk.f32.vlgmr.msra.gmra.mrb[34].mxu1 %vm115_vm3, %v33884_v17  ;;  %28301 = vmatpush1.bf16.msra.mxu0 %v37714_v49  ;;  %v37719_v49 = vld [vmem:[#allocation72_spill] sm:$0xff] }
 0x357   :  { %28311 = vmatpush1.bf16.msra.mxu1 %v37715_v14  ;;  %28304 = vmatprep.subr.msk.bf16.mxu0 %vm30729_vm2, %v37716_v61  ;;  %v33933_v14 = vld [vmem:[%s36839_s0 + $0xa8] sm:$0xff]  ;;  %v37720_v61 = vld [vmem:[#allocation73_spill] sm:$0xff] }
 0x358   :  { %28314 = vmatprep.subr.msk.bf16.mxu1 %vm30729_vm2, %v37717_v53  ;;  %15987 = vmatprep.mubr.f32.mxu0 %v37331_v38  ;;  %v37721_v53 = vld [vmem:[#allocation74_spill] sm:$0xff] }
 0x359   :  { %16058 = vmatprep.mubr.f32.mxu1 %v37331_v38 }
 0x35a   :  { %28307 = vmatpush1.bf16.msk.msra.mxu0 %vm30729_vm2, %v37718_v27  ;;  %v37722_v27 = vld [vmem:[#allocation75_spill] sm:$0xff] }
 0x35b   :  { %28317 = vmatpush1.bf16.msk.msra.mxu1 %vm30729_vm2, %v37719_v49  ;;  %28319 = vmatprep.subr.bf16.mxu0 %v37720_v61  ;;  %v37727_v61 = vld [vmem:[#allocation80_spill] sm:$0xff]  ;;  %v37732_v49 = vld [vmem:[#allocation6_spill] sm:$0xff] }
 0x35c   :  { %28329 = vmatprep.subr.bf16.mxu1 %v37721_v53  ;;  %v37726_v53 = vld [vmem:[#allocation79_spill] sm:$0xff] }
 0x35d   :  { %24171 = vmatmul.mubr.msk.f32.vlgmr.msra.gmra.mrb[32].mxu0 %vm115_vm3, %v33933_v14 }
 0x35e   :  { %24174 = vmatmul.mubr.msk.f32.vlgmr.msra.gmra.mrb[32].mxu1 %vm115_vm3, %v33933_v14  ;;  %28321 = vmatpush1.bf16.msra.mxu0 %v37722_v27  ;;  %v37729_v27 = vld [vmem:[#allocation3_spill] sm:$0xff] }
 0x35f   :  { %28331 = vmatpush1.bf16.msra.mxu1 %v37723_v11  ;;  %28324 = vmatprep.subr.msk.bf16.mxu0 %vm30729_vm2, %v37724_v52  ;;  %v37728_v11 = vld [vmem:[#allocation2_spill] sm:$0xff]  ;;  %v37731_v52 = vld [vmem:[#allocation5_spill] sm:$0xff] }
 0x360   :  { %28334 = vmatprep.subr.msk.bf16.mxu1 %vm30729_vm2, %v37725_v46  ;;  %16129 = vmatprep.mubr.f32.mxu0 %v37331_v38  ;;  %v37730_v46 = vld [vmem:[#allocation4_spill] sm:$0xff] }
 0x361   :  { %16200 = vmatprep.mubr.f32.mxu1 %v37331_v38 }
 0x362   :  { %28327 = vmatpush1.bf16.msk.msra.mxu0 %vm30729_vm2, %v37726_v53  ;;  %v37733_v53 = vld [vmem:[#allocation7_spill] sm:$0xff] }
 0x363   :  { %28337 = vmatpush1.bf16.msk.msra.mxu1 %vm30729_vm2, %v37727_v61  ;;  %28339 = vmatprep.subr.bf16.mxu0 %v37728_v11  ;;  %v37735_v11 = vld [vmem:[#allocation9_spill] sm:$0xff]  ;;  %v37740_v61 = vld [vmem:[#allocation14_spill] sm:$0xff] }
 0x364   :  { %28349 = vmatprep.subr.bf16.mxu1 %v37729_v27  ;;  %v37734_v27 = vld [vmem:[#allocation8_spill] sm:$0xff] }
 0x365   :  { %24177 = vmatmul.mubr.msk.f32.vlgmr.msra.gmra.mrb[34].mxu0 %vm115_vm3, %v33933_v14 }
 0x366   :  { %24180 = vmatmul.mubr.msk.f32.vlgmr.msra.gmra.mrb[34].mxu1 %vm115_vm3, %v33933_v14  ;;  %28341 = vmatpush1.bf16.msra.mxu0 %v37730_v46  ;;  %v37737_v46 = vld [vmem:[#allocation11_spill] sm:$0xff] }
 0x367   :  { %28351 = vmatpush1.bf16.msra.mxu1 %v37731_v52  ;;  %28344 = vmatprep.subr.msk.bf16.mxu0 %vm30729_vm2, %v37732_v49  ;;  %v37736_v52 = vld [vmem:[#allocation10_spill] sm:$0xff]  ;;  %v37739_v49 = vld [vmem:[#allocation13_spill] sm:$0xff] }
 0x368   :  { %28354 = vmatprep.subr.msk.bf16.mxu1 %vm30729_vm2, %v37733_v53  ;;  %16289 = vmatprep.mubr.f32.mxu0 %v37331_v38  ;;  %v37738_v53 = vld [vmem:[#allocation12_spill] sm:$0xff] }
 0x369   :  { %16360 = vmatprep.mubr.f32.mxu1 %v37331_v38 }
 0x36a   :  { %28347 = vmatpush1.bf16.msk.msra.mxu0 %vm30729_vm2, %v37734_v27 }
 0x36b   :  { %28357 = vmatpush1.bf16.msk.msra.mxu1 %vm30729_vm2, %v37735_v11  ;;  %28359 = vmatprep.subr.bf16.mxu0 %v37736_v52  ;;  %v37741_v11 = vld [vmem:[#allocation15_spill] sm:$0xff] }
 0x36c   :  { %28369 = vmatprep.subr.bf16.mxu1 %v37737_v46 }
 0x36d   :  { %24183 = vmatmul.mubr.msk.f32.vlgmr.msra.gmra.mrb[36].mxu0 %vm115_vm3, %v33655_v30 }
 0x36e   :  { %24186 = vmatmul.mubr.msk.f32.vlgmr.msra.gmra.mrb[36].mxu1 %vm115_vm3, %v33655_v30  ;;  %28361 = vmatpush1.bf16.msra.mxu0 %v37738_v53  ;;  %v37742_v53 = vld [vmem:[#allocation16_spill] sm:$0xff] }
 0x36f   :  { %28371 = vmatpush1.bf16.msra.mxu1 %v37739_v49  ;;  %28364 = vmatprep.subr.msk.bf16.mxu0 %vm30729_vm2, %v37740_v61  ;;  %v37743_v61 = vld [vmem:[#allocation17_spill] sm:$0xff] }
 0x370   :  { %v12477_v27 = vpop.f32.mrb[24].mxu0  ;;  %28374 = vmatprep.subr.msk.bf16.mxu1 %vm30729_vm2, %v37741_v11  ;;  %16431 = vmatprep.mubr.f32.mxu0 %v37331_v38  ;;  %v37744_v11 = vld [vmem:[#allocation18_spill] sm:$0xff] }
 0x371   :  { %v12548_v46 = vpop.f32.mrb[24].mxu1  ;;  %v12479_v52 = vpop.f32.mrb[25].mxu0  ;;  %16502 = vmatprep.mubr.f32.mxu1 %v37331_v38 }
 0x372   :  { %v12703_v7 = vmax.f32 %v12477_v27, %v12548_v46  ;;  %v12550_v6 = vpop.f32.mrb[25].mxu1  ;;  %28367 = vmatpush1.bf16.msk.msra.mxu0 %vm30729_vm2, %v30852_v51  ;;  %v37745_v46 = vld [vmem:[#allocation19_spill] sm:$0xff]  ;;  %v37746_v27 = vld [vmem:[#allocation20_spill] sm:$0xff] }
 0x373   :  { %v12704_v49 = vmax.f32 %v12479_v52, %v12550_v6  ;;  %28377 = vmatpush1.bf16.msk.msra.mxu1 %vm30729_vm2, %v37742_v53  ;;  %28379 = vmatprep.subr.bf16.mxu0 %v37743_v61  ;;  %v37747_v52 = vld [vmem:[#allocation21_spill] sm:$0xff] }
 0x374   :  { %28389 = vmatprep.subr.bf16.mxu1 %v37744_v11 }
 0x375   :  { %24189 = vmatmul.mubr.msk.f32.vlgmr.msra.gmra.mrb[38].mxu0 %vm115_vm3, %v33655_v30 }
 0x376   :  { %24192 = vmatmul.mubr.msk.f32.vlgmr.msra.gmra.mrb[38].mxu1 %vm115_vm3, %v33655_v30  ;;  %28381 = vmatpush1.bf16.msra.mxu0 %v30902_v1 }
 0x377   :  { %28391 = vmatpush1.bf16.msra.mxu1 %v37745_v46  ;;  %28384 = vmatprep.subr.msk.bf16.mxu0 %vm30729_vm2, %v37746_v27 }
 0x378   :  { %v12619_v6 = vpop.f32.mrb[26].mxu0  ;;  %28394 = vmatprep.subr.msk.bf16.mxu1 %vm30729_vm2, %v37747_v52  ;;  %16573 = vmatprep.mubr.f32.mxu0 %v37331_v38 }
 0x379   :  { %v12690_v11 = vpop.f32.mrb[26].mxu1  ;;  %v12621_v61 = vpop.f32.mrb[27].mxu0  ;;  %16644 = vmatprep.mubr.f32.mxu1 %v37331_v38 }
 0x37a   :  { %v12705_v30 = vmax.f32 %v12619_v6, %v12690_v11  ;;  %v12692_v53 = vpop.f32.mrb[27].mxu1  ;;  %28387 = vmatpush1.bf16.msk.msra.mxu0 %vm30729_vm2, %v30944_v20  ;;  %v37754_v11 = vld [vmem:[#allocation58_spill] sm:$0xff]  ;;  %v37756_v6 = vld [vmem:[#allocation60_spill] sm:$0xff] }
 0x37b   :  { %v12706_v46 = vmax.f32 %v12621_v61, %v12692_v53  ;;  %28397 = vmatpush1.bf16.msk.msra.mxu1 %vm30729_vm2, %v30950_v23  ;;  %28399 = vmatprep.subr.bf16.mxu0 %v30952_v24  ;;  %v37751_v53 = vld [vmem:[#allocation55_spill] sm:$0xff]  ;;  %v37753_v61 = vld [vmem:[#allocation57_spill] sm:$0xff] }
 0x37c   :  { %v34027_v52 = vmax.f32 %v12703_v7, %v12705_v30  ;;  %28409 = vmatprep.subr.bf16.mxu1 %v30967_v29  ;;  %v37752_v7 = vld [vmem:[#allocation56_spill] sm:$0xff]  ;;  %v37757_v30 = vld [vmem:[#allocation61_spill] sm:$0xff] }
 0x37d   :  { %v34030_v27 = vmax.f32 %v12704_v49, %v12706_v46  ;;  %24195 = vmatmul.mubr.msk.f32.vlgmr.msra.gmra.mrb[36].mxu0 %vm115_vm3, %v33606_v25  ;;  %v34162_v49 = vld [vmem:[%s36839_s0 + $0xb0] sm:$0xff]  ;;  %v37755_v46 = vld [vmem:[#allocation59_spill] sm:$0xff] }
 0x37e   :  { %37748 = vst [vmem:[#allocation29_spill] sm:$0xff] %v34027_v52  ;;  %24198 = vmatmul.mubr.msk.f32.vlgmr.msra.gmra.mrb[36].mxu1 %vm115_vm3, %v33606_v25  ;;  %28401 = vmatpush1.bf16.msra.mxu0 %v30991_v40  ;;  %v37758_v52 = vld [vmem:[#allocation62_spill] sm:$0xff] }
 0x37f   :  { %37749 = vst [vmem:[#allocation40_spill] sm:$0xff] %v34030_v27  ;;  %28411 = vmatpush1.bf16.msra.mxu1 %v30997_v41  ;;  %28404 = vmatprep.subr.msk.bf16.mxu0 %vm30729_vm2, %v30999_v42  ;;  %v37759_v27 = vld [vmem:[#allocation63_spill] sm:$0xff] }
 0x380   :  { %28414 = vmatprep.subr.msk.bf16.mxu1 %vm30729_vm2, %v31011_v48  ;;  %16715 = vmatprep.mubr.f32.mxu0 %v37331_v38 }
 0x381   :  { %16786 = vmatprep.mubr.f32.mxu1 %v37331_v38 }
 0x382   :  { %28407 = vmatpush1.bf16.msk.msra.mxu0 %vm30729_vm2, %v31031_v57 }
 0x383   :  { %28417 = vmatpush1.bf16.msk.msra.mxu1 %vm30729_vm2, %v31037_v58  ;;  %28419 = vmatprep.subr.bf16.mxu0 %v31039_v60 }
 0x384   :  { %28429 = vmatprep.subr.bf16.mxu1 %v31054_v0 }
 0x385   :  { %24201 = vmatmul.mubr.msk.f32.vlgmr.msra.gmra.mrb[38].mxu0 %vm115_vm3, %v33606_v25 }
 0x386   :  { %24204 = vmatmul.mubr.msk.f32.vlgmr.msra.gmra.mrb[38].mxu1 %vm115_vm3, %v33606_v25  ;;  %28421 = vmatpush1.bf16.msra.mxu0 %v31075_v16  ;;  %v37750_v25 = vld [vmem:[#allocation54_spill] sm:$0xff] }
 0x387   :  { %28431 = vmatpush1.bf16.msra.mxu1 %v31081_v18  ;;  %28424 = vmatprep.subr.msk.bf16.mxu0 %vm30729_vm2, %v31083_v19 }
 0x388   :  { %28434 = vmatprep.subr.msk.bf16.mxu1 %vm30729_vm2, %v37456_v26  ;;  %16857 = vmatprep.mubr.f32.mxu0 %v37331_v38 }
 0x389   :  { %16928 = vmatprep.mubr.f32.mxu1 %v37331_v38 }
 0x38a   :  { %28427 = vmatpush1.bf16.msk.msra.mxu0 %vm30729_vm2, %v37457_v39 }
 0x38b   :  { %28437 = vmatpush1.bf16.msk.msra.mxu1 %vm30729_vm2, %v37458_v2  ;;  %28439 = vmatprep.subr.bf16.mxu0 %v37459_v45 }
 0x38c   :  { %28449 = vmatprep.subr.bf16.mxu1 %v37505_v4 }
 0x38d   :  { %24207 = vmatmul.mubr.msk.f32.vlgmr.msra.gmra.mrb[36].mxu0 %vm115_vm3, %v33884_v17 }
 0x38e   :  { %24210 = vmatmul.mubr.msk.f32.vlgmr.msra.gmra.mrb[36].mxu1 %vm115_vm3, %v33884_v17  ;;  %28441 = vmatpush1.bf16.msra.mxu0 %v37506_v54 }
 0x38f   :  { %28451 = vmatpush1.bf16.msra.mxu1 %v37507_v55  ;;  %28444 = vmatprep.subr.msk.bf16.mxu0 %vm30729_vm2, %v37508_v59 }
 0x390   :  { %28454 = vmatprep.subr.msk.bf16.mxu1 %vm30729_vm2, %v37554_v35  ;;  %16999 = vmatprep.mubr.f32.mxu0 %v37331_v38 }
 0x391   :  { %17070 = vmatprep.mubr.f32.mxu1 %v37331_v38 }
 0x392   :  { %28447 = vmatpush1.bf16.msk.msra.mxu0 %vm30729_vm2, %v37555_v43 }
 0x393   :  { %28457 = vmatpush1.bf16.msk.msra.mxu1 %vm30729_vm2, %v37556_v44  ;;  %28459 = vmatprep.subr.bf16.mxu0 %v37557_v5 }
 0x394   :  { %28469 = vmatprep.subr.bf16.mxu1 %v37558_v37 }
 0x395   :  { %24213 = vmatmul.mubr.msk.f32.vlgmr.msra.gmra.mrb[38].mxu0 %vm115_vm3, %v33884_v17 }
 0x396   :  { %24216 = vmatmul.mubr.msk.f32.vlgmr.msra.gmra.mrb[38].mxu1 %vm115_vm3, %v33884_v17  ;;  %28461 = vmatpush1.bf16.msra.mxu0 %v37559_v63 }
 0x397   :  { %28471 = vmatpush1.bf16.msra.mxu1 %v37560_v50  ;;  %28464 = vmatprep.subr.msk.bf16.mxu0 %vm30729_vm2, %v37603_v62 }
 0x398   :  { %28474 = vmatprep.subr.msk.bf16.mxu1 %vm30729_vm2, %v37604_v12  ;;  %17149 = vmatprep.mubr.f32.mxu0 %v37331_v38 }
 0x399   :  { %17220 = vmatprep.mubr.f32.mxu1 %v37331_v38 }
 0x39a   :  { %28467 = vmatpush1.bf16.msk.msra.mxu0 %vm30729_vm2, %v37605_v10 }
 0x39b   :  { %28477 = vmatpush1.bf16.msk.msra.mxu1 %vm30729_vm2, %v37519_v13  ;;  %28479 = vmatprep.subr.bf16.mxu0 %v37520_v9 }
 0x39c   :  { %28489 = vmatprep.subr.bf16.mxu1 %v37606_v3 }
 0x39d   :  { %24219 = vmatmul.mubr.msk.f32.vlgmr.msra.gmra.mrb[36].mxu0 %vm115_vm3, %v33933_v14 }
 0x39e   :  { %24222 = vmatmul.mubr.msk.f32.vlgmr.msra.gmra.mrb[36].mxu1 %vm115_vm3, %v33933_v14  ;;  %28481 = vmatpush1.bf16.msra.mxu0 %v37522_v36 }
 0x39f   :  { %28491 = vmatpush1.bf16.msra.mxu1 %v37607_v33  ;;  %28484 = vmatprep.subr.msk.bf16.mxu0 %vm30729_vm2, %v37566_v56 }
 0x3a0   :  { %28494 = vmatprep.subr.msk.bf16.mxu1 %vm30729_vm2, %v37608_v32  ;;  %17291 = vmatprep.mubr.f32.mxu0 %v37331_v38 }
 0x3a1   :  { %17362 = vmatprep.mubr.f32.mxu1 %v37331_v38 }
 0x3a2   :  { %28487 = vmatpush1.bf16.msk.msra.mxu0 %vm30729_vm2, %v37568_v28 }
 0x3a3   :  { %28497 = vmatpush1.bf16.msk.msra.mxu1 %vm30729_vm2, %v37482_v31  ;;  %28499 = vmatprep.subr.bf16.mxu0 %v37483_v21 }
 0x3a4   :  { %28509 = vmatprep.subr.bf16.mxu1 %v37609_v34 }
 0x3a5   :  { %24225 = vmatmul.mubr.msk.f32.vlgmr.msra.gmra.mrb[38].mxu0 %vm115_vm3, %v33933_v14 }
 0x3a6   :  { %24228 = vmatmul.mubr.msk.f32.vlgmr.msra.gmra.mrb[38].mxu1 %vm115_vm3, %v33933_v14  ;;  %28501 = vmatpush1.bf16.msra.mxu0 %v37485_v22 }
 0x3a7   :  { %28511 = vmatpush1.bf16.msra.mxu1 %v37610_v47  ;;  %28504 = vmatprep.subr.msk.bf16.mxu0 %vm30729_vm2, %v37529_v8 }
 0x3a8   :  { %28514 = vmatprep.subr.msk.bf16.mxu1 %vm30729_vm2, %v37750_v25  ;;  %17446 = vmatprep.mubr.f32.mxu0 %v37331_v38 }
 0x3a9   :  { %17517 = vmatprep.mubr.f32.mxu1 %v37331_v38 }
 0x3aa   :  { %28507 = vmatpush1.bf16.msk.msra.mxu0 %vm30729_vm2, %v37751_v53 }
 0x3ab   :  { %28517 = vmatpush1.bf16.msk.msra.mxu1 %vm30729_vm2, %v37752_v7  ;;  %28519 = vmatprep.subr.bf16.mxu0 %v37753_v61  ;;  %v37765_v61 = vld [vmem:[#allocation69_spill] sm:$0xff]  ;;  %v37774_v7 = vld [vmem:[#allocation78_spill] sm:$0xff] }
 0x3ac   :  { %28529 = vmatprep.subr.bf16.mxu1 %v37754_v11  ;;  %v37760_v11 = vld [vmem:[#allocation64_spill] sm:$0xff] }
 0x3ad   :  { %24232 = vmatmul.mubr.msk.f32.vlgmr.msra.gmra.mrb[36].mxu0 %vm115_vm3, %v34162_v49 }
 0x3ae   :  { %24235 = vmatmul.mubr.msk.f32.vlgmr.msra.gmra.mrb[36].mxu1 %vm115_vm3, %v34162_v49  ;;  %28521 = vmatpush1.bf16.msra.mxu0 %v37755_v46  ;;  %v37762_v46 = vld [vmem:[#allocation66_spill] sm:$0xff] }
 0x3af   :  { %28531 = vmatpush1.bf16.msra.mxu1 %v37756_v6  ;;  %28524 = vmatprep.subr.msk.bf16.mxu0 %vm30729_vm2, %v37757_v30  ;;  %v37761_v6 = vld [vmem:[#allocation65_spill] sm:$0xff]  ;;  %v37764_v30 = vld [vmem:[#allocation68_spill] sm:$0xff] }
 0x3b0   :  { %28534 = vmatprep.subr.msk.bf16.mxu1 %vm30729_vm2, %v37758_v52  ;;  %17588 = vmatprep.mubr.f32.mxu0 %v37331_v38  ;;  %v37763_v52 = vld [vmem:[#allocation67_spill] sm:$0xff] }
 0x3b1   :  { %17659 = vmatprep.mubr.f32.mxu1 %v37331_v38 }
 0x3b2   :  { %28527 = vmatpush1.bf16.msk.msra.mxu0 %vm30729_vm2, %v37759_v27  ;;  %v37766_v27 = vld [vmem:[#allocation70_spill] sm:$0xff] }
 0x3b3   :  { %28537 = vmatpush1.bf16.msk.msra.mxu1 %vm30729_vm2, %v37760_v11  ;;  %28539 = vmatprep.subr.bf16.mxu0 %v37761_v6  ;;  %v37772_v6 = vld [vmem:[#allocation76_spill] sm:$0xff]  ;;  %v37773_v11 = vld [vmem:[#allocation77_spill] sm:$0xff] }
 0x3b4   :  { %28549 = vmatprep.subr.bf16.mxu1 %v37762_v46  ;;  %v37767_v46 = vld [vmem:[#allocation71_spill] sm:$0xff] }
 0x3b5   :  { %24238 = vmatmul.mubr.msk.f32.vlgmr.msra.gmra.mrb[38].mxu0 %vm115_vm3, %v34162_v49 }
 0x3b6   :  { %24241 = vmatmul.mubr.msk.f32.vlgmr.msra.gmra.mrb[38].mxu1 %vm115_vm3, %v34162_v49  ;;  %28541 = vmatpush1.bf16.msra.mxu0 %v37763_v52  ;;  %v37768_v52 = vld [vmem:[#allocation72_spill] sm:$0xff] }
 0x3b7   :  { %28551 = vmatpush1.bf16.msra.mxu1 %v37764_v30  ;;  %28544 = vmatprep.subr.msk.bf16.mxu0 %vm30729_vm2, %v37765_v61  ;;  %v34211_v30 = vld [vmem:[%s36839_s0 + $0xb8] sm:$0xff] }
 0x3b8   :  { %28554 = vmatprep.subr.msk.bf16.mxu1 %vm30729_vm2, %v37766_v27  ;;  %17743 = vmatprep.mubr.f32.mxu0 %v37331_v38  ;;  %v37769_v61 = vld [vmem:[#allocation73_spill] sm:$0xff]  ;;  %v37770_v27 = vld [vmem:[#allocation74_spill] sm:$0xff] }
 0x3b9   :  { %17814 = vmatprep.mubr.f32.mxu1 %v37331_v38 }
 0x3ba   :  { %28547 = vmatpush1.bf16.msk.msra.mxu0 %vm30729_vm2, %v37767_v46  ;;  %v37771_v46 = vld [vmem:[#allocation75_spill] sm:$0xff] }
 0x3bb   :  { %28557 = vmatpush1.bf16.msk.msra.mxu1 %vm30729_vm2, %v37768_v52  ;;  %28559 = vmatprep.subr.bf16.mxu0 %v37769_v61  ;;  %v37776_v61 = vld [vmem:[#allocation80_spill] sm:$0xff]  ;;  %v37781_v52 = vld [vmem:[#allocation6_spill] sm:$0xff] }
 0x3bc   :  { %28569 = vmatprep.subr.bf16.mxu1 %v37770_v27  ;;  %v37775_v27 = vld [vmem:[#allocation79_spill] sm:$0xff] }
 0x3bd   :  { %24245 = vmatmul.mubr.msk.f32.vlgmr.msra.gmra.mrb[36].mxu0 %vm115_vm3, %v34211_v30 }
 0x3be   :  { %24248 = vmatmul.mubr.msk.f32.vlgmr.msra.gmra.mrb[36].mxu1 %vm115_vm3, %v34211_v30  ;;  %28561 = vmatpush1.bf16.msra.mxu0 %v37771_v46  ;;  %v37778_v46 = vld [vmem:[#allocation3_spill] sm:$0xff] }
 0x3bf   :  { %28571 = vmatpush1.bf16.msra.mxu1 %v37772_v6  ;;  %28564 = vmatprep.subr.msk.bf16.mxu0 %vm30729_vm2, %v37773_v11  ;;  %v37777_v6 = vld [vmem:[#allocation2_spill] sm:$0xff]  ;;  %v37780_v11 = vld [vmem:[#allocation5_spill] sm:$0xff] }
 0x3c0   :  { %28574 = vmatprep.subr.msk.bf16.mxu1 %vm30729_vm2, %v37774_v7  ;;  %17885 = vmatprep.mubr.f32.mxu0 %v37331_v38  ;;  %v37779_v7 = vld [vmem:[#allocation4_spill] sm:$0xff] }
 0x3c1   :  { %17956 = vmatprep.mubr.f32.mxu1 %v37331_v38 }
 0x3c2   :  { %28567 = vmatpush1.bf16.msk.msra.mxu0 %vm30729_vm2, %v37775_v27  ;;  %v37782_v27 = vld [vmem:[#allocation7_spill] sm:$0xff] }
 0x3c3   :  { %28577 = vmatpush1.bf16.msk.msra.mxu1 %vm30729_vm2, %v37776_v61  ;;  %28579 = vmatprep.subr.bf16.mxu0 %v37777_v6  ;;  %v37784_v6 = vld [vmem:[#allocation9_spill] sm:$0xff]  ;;  %v37789_v61 = vld [vmem:[#allocation14_spill] sm:$0xff] }
 0x3c4   :  { %28589 = vmatprep.subr.bf16.mxu1 %v37778_v46  ;;  %v37783_v46 = vld [vmem:[#allocation8_spill] sm:$0xff] }
 0x3c5   :  { %24251 = vmatmul.mubr.msk.f32.vlgmr.msra.gmra.mrb[38].mxu0 %vm115_vm3, %v34211_v30 }
 0x3c6   :  { %24254 = vmatmul.mubr.msk.f32.vlgmr.msra.gmra.mrb[38].mxu1 %vm115_vm3, %v34211_v30  ;;  %28581 = vmatpush1.bf16.msra.mxu0 %v37779_v7  ;;  %v37785_v7 = vld [vmem:[#allocation10_spill] sm:$0xff] }
 0x3c7   :  { %28591 = vmatpush1.bf16.msra.mxu1 %v37780_v11  ;;  %28584 = vmatprep.subr.msk.bf16.mxu0 %vm30729_vm2, %v37781_v52  ;;  %v37786_v11 = vld [vmem:[#allocation11_spill] sm:$0xff]  ;;  %v37788_v52 = vld [vmem:[#allocation13_spill] sm:$0xff] }
 0x3c8   :  { %28594 = vmatprep.subr.msk.bf16.mxu1 %vm30729_vm2, %v37782_v27  ;;  %18045 = vmatprep.mubr.f32.mxu0 %v37331_v38  ;;  %v37787_v27 = vld [vmem:[#allocation12_spill] sm:$0xff] }
 0x3c9   :  { %18116 = vmatprep.mubr.f32.mxu1 %v37331_v38 }
 0x3ca   :  { %28587 = vmatpush1.bf16.msk.msra.mxu0 %vm30729_vm2, %v37783_v46 }
 0x3cb   :  { %28597 = vmatpush1.bf16.msk.msra.mxu1 %vm30729_vm2, %v37784_v6  ;;  %28599 = vmatprep.subr.bf16.mxu0 %v37785_v7  ;;  %v37790_v6 = vld [vmem:[#allocation15_spill] sm:$0xff] }
 0x3cc   :  { %28609 = vmatprep.subr.bf16.mxu1 %v37786_v11 }
 0x3cd   :  { %24257 = vmatmul.mubr.msk.f32.vlgmr.msra.gmra.mrb[40].mxu0 %vm115_vm3, %v33933_v14 }
 0x3ce   :  { %24260 = vmatmul.mubr.msk.f32.vlgmr.msra.gmra.mrb[40].mxu1 %vm115_vm3, %v33933_v14  ;;  %28601 = vmatpush1.bf16.msra.mxu0 %v37787_v27 }
 0x3cf   :  { %28611 = vmatpush1.bf16.msra.mxu1 %v37788_v52  ;;  %28604 = vmatprep.subr.msk.bf16.mxu0 %vm30729_vm2, %v37789_v61  ;;  %v37791_v52 = vld [vmem:[#allocation16_spill] sm:$0xff]  ;;  %v37792_v61 = vld [vmem:[#allocation17_spill] sm:$0xff] }
 0x3d0   :  { %v14233_v46 = vpop.f32.mrb[28].mxu0  ;;  %28614 = vmatprep.subr.msk.bf16.mxu1 %vm30729_vm2, %v37790_v6  ;;  %18187 = vmatprep.mubr.f32.mxu0 %v37331_v38  ;;  %v37793_v6 = vld [vmem:[#allocation18_spill] sm:$0xff] }
 0x3d1   :  { %v14304_v7 = vpop.f32.mrb[28].mxu1  ;;  %v14235_v11 = vpop.f32.mrb[29].mxu0  ;;  %18258 = vmatprep.mubr.f32.mxu1 %v37331_v38 }
 0x3d2   :  { %v14459_v53 = vmax.f32 %v14233_v46, %v14304_v7  ;;  %v14306_v25 = vpop.f32.mrb[29].mxu1  ;;  %28607 = vmatpush1.bf16.msk.msra.mxu0 %vm30729_vm2, %v30852_v51  ;;  %v37794_v46 = vld [vmem:[#allocation19_spill] sm:$0xff]  ;;  %v37795_v51 = vld [vmem:[#allocation20_spill] sm:$0xff]  ;;  %v37796_v7 = vld [vmem:[#allocation21_spill] sm:$0xff] }
 0x3d3   :  { %v14460_v27 = vmax.f32 %v14235_v11, %v14306_v25  ;;  %28617 = vmatpush1.bf16.msk.msra.mxu1 %vm30729_vm2, %v37791_v52  ;;  %28619 = vmatprep.subr.bf16.mxu0 %v37792_v61 }
 0x3d4   :  { %28629 = vmatprep.subr.bf16.mxu1 %v37793_v6 }
 0x3d5   :  { %24263 = vmatmul.mubr.msk.f32.vlgmr.msra.gmra.mrb[42].mxu0 %vm115_vm3, %v33933_v14 }
 0x3d6   :  { %24266 = vmatmul.mubr.msk.f32.vlgmr.msra.gmra.mrb[42].mxu1 %vm115_vm3, %v33933_v14  ;;  %28621 = vmatpush1.bf16.msra.mxu0 %v30902_v1 }
 0x3d7   :  { %28631 = vmatpush1.bf16.msra.mxu1 %v37794_v46  ;;  %28624 = vmatprep.subr.msk.bf16.mxu0 %vm30729_vm2, %v37795_v51  ;;  %v37827_v51 = vld [vmem:[#allocation80_spill] sm:$0xff] }
 0x3d8   :  { %v14375_v25 = vpop.f32.mrb[30].mxu0  ;;  %28634 = vmatprep.subr.msk.bf16.mxu1 %vm30729_vm2, %v37796_v7  ;;  %18329 = vmatprep.mubr.f32.mxu0 %v37331_v38  ;;  %v24363_v7 = vld [vmem:[%s36841_s2 + $0x110] sm:$0xff] }
 0x3d9   :  { %v14446_v11 = vpop.f32.mrb[30].mxu1  ;;  %v14377_v52 = vpop.f32.mrb[31].mxu0  ;;  %18400 = vmatprep.mubr.f32.mxu1 %v37331_v38 }
 0x3da   :  { %v14461_v14 = vmax.f32 %v14375_v25, %v14446_v11  ;;  %v14448_v61 = vpop.f32.mrb[31].mxu1  ;;  %28627 = vmatpush1.bf16.msk.msra.mxu0 %vm30729_vm2, %v30944_v20  ;;  %v37799_v20 = vld [vmem:[#allocation54_spill] sm:$0xff]  ;;  %v24364_v11 = vld [vmem:[%s36841_s2 + $0x118] sm:$0xff] }
 0x3db   :  { %v14462_v1 = vmax.f32 %v14377_v52, %v14448_v61  ;;  %28637 = vmatpush1.bf16.msk.msra.mxu1 %vm30729_vm2, %v30950_v23  ;;  %28639 = vmatprep.subr.bf16.mxu0 %v30952_v24  ;;  %v37800_v23 = vld [vmem:[#allocation55_spill] sm:$0xff]  ;;  %v24303_v24 = vld [vmem:[%s36839_s0 + $0xc0] sm:$0xff]  ;;  %v19739_v52 = vld [vmem:[%s36841_s2 + $0x10] sm:$0xff] }
 0x3dc   :  { %v34305_v6 = vmax.f32 %v14459_v53, %v14461_v14  ;;  %28649 = vmatprep.subr.bf16.mxu1 %v30967_v29  ;;  %v37801_v29 = vld [vmem:[#allocation56_spill] sm:$0xff]  ;;  %v37826_v53 = vld [vmem:[#allocation82_spill] sm:$0xff]  ;;  %v19740_v14 = vld [vmem:[%s36841_s2 + $0x18] sm:$0xff] }
 0x3dd   :  { %v34308_v46 = vmax.f32 %v14460_v27, %v14462_v1  ;;  %24269 = vmatmul.mubr.msk.f32.vlgmr.msra.gmra.mrb[40].mxu0 %vm115_vm3, %v33884_v17  ;;  %v19756_v27 = vld [vmem:[%s36841_s2 + $0x98] sm:$0xff]  ;;  %v24381_v61 = vld [vmem:[%s36841_s2 + $0x1a0] sm:$0xff]  ;;  %v24382_v1 = vld [vmem:[%s36841_s2 + $0x1a8] sm:$0xff] }
 0x3de   :  { %37797 = vst [vmem:[#allocation41_spill] sm:$0xff] %v34305_v6  ;;  %24272 = vmatmul.mubr.msk.f32.vlgmr.msra.gmra.mrb[40].mxu1 %vm115_vm3, %v33884_v17  ;;  %28641 = vmatpush1.bf16.msra.mxu0 %v30991_v40  ;;  %v37802_v40 = vld [vmem:[#allocation57_spill] sm:$0xff]  ;;  %v24402_v6 = vld [vmem:[%s36841_s2 + $0x648] sm:$0xff] }
 0x3df   :  { %37798 = vst [vmem:[#allocation43_spill] sm:$0xff] %v34308_v46  ;;  %28651 = vmatpush1.bf16.msra.mxu1 %v30997_v41  ;;  %28644 = vmatprep.subr.msk.bf16.mxu0 %vm30729_vm2, %v30999_v42  ;;  %v37803_v41 = vld [vmem:[#allocation58_spill] sm:$0xff]  ;;  %v37804_v42 = vld [vmem:[#allocation59_spill] sm:$0xff] }
 0x3e0   :  { %28654 = vmatprep.subr.msk.bf16.mxu1 %vm30729_vm2, %v31011_v48  ;;  %18471 = vmatprep.mubr.f32.mxu0 %v37331_v38  ;;  %v37805_v48 = vld [vmem:[#allocation60_spill] sm:$0xff] }
 0x3e1   :  { %18542 = vmatprep.mubr.f32.mxu1 %v37331_v38 }
 0x3e2   :  { %28647 = vmatpush1.bf16.msk.msra.mxu0 %vm30729_vm2, %v31031_v57  ;;  %v37806_v57 = vld [vmem:[#allocation61_spill] sm:$0xff] }
 0x3e3   :  { %28657 = vmatpush1.bf16.msk.msra.mxu1 %vm30729_vm2, %v31037_v58  ;;  %28659 = vmatprep.subr.bf16.mxu0 %v31039_v60  ;;  %v37807_v58 = vld [vmem:[#allocation62_spill] sm:$0xff]  ;;  %v2163_v60 = vlaneseq }
 0x3e4   :  { %28669 = vmatprep.subr.bf16.mxu1 %v31054_v0  ;;  %v37808_v0 = vld [vmem:[#allocation63_spill] sm:$0xff] }
 0x3e5   :  { %24275 = vmatmul.mubr.msk.f32.vlgmr.msra.gmra.mrb[42].mxu0 %vm115_vm3, %v33884_v17 }
 0x3e6   :  { %24278 = vmatmul.mubr.msk.f32.vlgmr.msra.gmra.mrb[42].mxu1 %vm115_vm3, %v33884_v17  ;;  %28661 = vmatpush1.bf16.msra.mxu0 %v31075_v16  ;;  %v37809_v16 = vld [vmem:[#allocation64_spill] sm:$0xff] }
 0x3e7   :  { %28671 = vmatpush1.bf16.msra.mxu1 %v31081_v18  ;;  %28664 = vmatprep.subr.msk.bf16.mxu0 %vm30729_vm2, %v31083_v19  ;;  %v37810_v18 = vld [vmem:[#allocation65_spill] sm:$0xff]  ;;  %v37811_v19 = vld [vmem:[#allocation66_spill] sm:$0xff] }
 0x3e8   :  { %28674 = vmatprep.subr.msk.bf16.mxu1 %vm30729_vm2, %v37456_v26  ;;  %18613 = vmatprep.mubr.f32.mxu0 %v37331_v38  ;;  %v34466_v26 = vshrl.u32 %v2163_v60, 7  ;;  %v19741_v60 = vld [vmem:[%s36841_s2 + $0x20] sm:$0xff] }
 0x3e9   :  { %18684 = vmatprep.mubr.f32.mxu1 %v37331_v38 }
 0x3ea   :  { %28667 = vmatpush1.bf16.msk.msra.mxu0 %vm30729_vm2, %v37457_v39  ;;  %v37812_v39 = vld [vmem:[#allocation67_spill] sm:$0xff] }
 0x3eb   :  { %28677 = vmatpush1.bf16.msk.msra.mxu1 %vm30729_vm2, %v37458_v2  ;;  %28679 = vmatprep.subr.bf16.mxu0 %v37459_v45  ;;  %v37813_v2 = vld [vmem:[#allocation68_spill] sm:$0xff]  ;;  %v37814_v45 = vld [vmem:[#allocation69_spill] sm:$0xff] }
 0x3ec   :  { %28689 = vmatprep.subr.bf16.mxu1 %v37505_v4  ;;  %v34489_v4 = vld [vmem:[%s36840_s3] sm:$0x3] }
 0x3ed   :  { %24281 = vmatmul.mubr.msk.f32.vlgmr.msra.gmra.mrb[40].mxu0 %vm115_vm3, %v34162_v49 }
 0x3ee   :  { %24284 = vmatmul.mubr.msk.f32.vlgmr.msra.gmra.mrb[40].mxu1 %vm115_vm3, %v34162_v49  ;;  %28681 = vmatpush1.bf16.msra.mxu0 %v37506_v54  ;;  %v37817_v54 = vld [vmem:[#allocation72_spill] sm:$0xff] }
 0x3ef   :  { %28691 = vmatpush1.bf16.msra.mxu1 %v37507_v55  ;;  %28684 = vmatprep.subr.msk.bf16.mxu0 %vm30729_vm2, %v37508_v59  ;;  %v37818_v55 = vld [vmem:[#allocation73_spill] sm:$0xff]  ;;  %v37819_v59 = vld [vmem:[#allocation74_spill] sm:$0xff] }
 0x3f0   :  { %28694 = vmatprep.subr.msk.bf16.mxu1 %vm30729_vm2, %v37554_v35  ;;  %18755 = vmatprep.mubr.f32.mxu0 %v37331_v38 }
 0x3f1   :  { %18826 = vmatprep.mubr.f32.mxu1 %v37331_v38 }
 0x3f2   :  { %28687 = vmatpush1.bf16.msk.msra.mxu0 %vm30729_vm2, %v37555_v43  ;;  %v37820_v43 = vld [vmem:[#allocation75_spill] sm:$0xff] }
 0x3f3   :  { %28697 = vmatpush1.bf16.msk.msra.mxu1 %vm30729_vm2, %v37556_v44  ;;  %28699 = vmatprep.subr.bf16.mxu0 %v37557_v5  ;;  %v37821_v44 = vld [vmem:[#allocation76_spill] sm:$0xff]  ;;  %v37822_v5 = vld [vmem:[#allocation77_spill] sm:$0xff] }
 0x3f4   :  { %28709 = vmatprep.subr.bf16.mxu1 %v37558_v37 }
 0x3f5   :  { %24287 = vmatmul.mubr.msk.f32.vlgmr.msra.gmra.mrb[42].mxu0 %vm115_vm3, %v34162_v49 }
 0x3f6   :  { %24290 = vmatmul.mubr.msk.f32.vlgmr.msra.gmra.mrb[42].mxu1 %vm115_vm3, %v34162_v49  ;;  %28701 = vmatpush1.bf16.msra.mxu0 %v37559_v63  ;;  %v24361_v63 = vld [vmem:[%s36841_s2 + $0x100] sm:$0xff] }
 0x3f7   :  { %28711 = vmatpush1.bf16.msra.mxu1 %v37560_v50  ;;  %28704 = vmatprep.subr.msk.bf16.mxu0 %vm30729_vm2, %v37603_v62  ;;  %v24362_v50 = vld [vmem:[%s36841_s2 + $0x108] sm:$0xff] }
 0x3f8   :  { %28714 = vmatprep.subr.msk.bf16.mxu1 %vm30729_vm2, %v37604_v12  ;;  %18905 = vmatprep.mubr.f32.mxu0 %v37331_v38  ;;  %v19737_v12 = vld [vmem:[%s36841_s2] sm:$0xff]  ;;  %v34552_v17 = vpack.c.bf16 %v24362_v50, %v24361_v63  ;;  %v24370_v50 = vld [vmem:[%s36841_s2 + $0x148] sm:$0xff] }
 0x3f9   :  { %18976 = vmatprep.mubr.f32.mxu1 %v37331_v38  ;;  %v24369_v63 = vld [vmem:[%s36841_s2 + $0x140] sm:$0xff] }
 0x3fa   :  { %28707 = vmatpush1.bf16.msk.msra.mxu0 %vm30729_vm2, %v37605_v10  ;;  %v19738_v10 = vld [vmem:[%s36841_s2 + $0x8] sm:$0xff] }
 0x3fb   :  { %28717 = vmatpush1.bf16.msk.msra.mxu1 %vm30729_vm2, %v37519_v13  ;;  %28719 = vmatprep.subr.bf16.mxu0 %v37520_v9  ;;  %v24316_v9 = vld [vmem:[%s36839_s0 + $0xc8] sm:$0xff]  ;;  %v19753_v13 = vld [vmem:[%s36841_s2 + $0x80] sm:$0xff]  ;;  %v34568_v25 = vpack.c.bf16 %v19738_v10, %v19737_v12 }
 0x3fc   :  { %28729 = vmatprep.subr.bf16.mxu1 %v37606_v3  ;;  %v37824_v3 = vld [vmem:[#allocation23_spill] sm:$0xff] }
 0x3fd   :  { %24293 = vmatmul.mubr.msk.f32.vlgmr.msra.gmra.mrb[40].mxu0 %vm115_vm3, %v34211_v30 }
 0x3fe   :  { %24296 = vmatmul.mubr.msk.f32.vlgmr.msra.gmra.mrb[40].mxu1 %vm115_vm3, %v34211_v30  ;;  %28721 = vmatpush1.bf16.msra.mxu0 %v37522_v36  ;;  %v24377_v36 = vld [vmem:[%s36841_s2 + $0x180] sm:$0xff] }
 0x3ff   :  { %28731 = vmatpush1.bf16.msra.mxu1 %v37607_v33  ;;  %28724 = vmatprep.subr.msk.bf16.mxu0 %vm30729_vm2, %v37566_v56  ;;  %v37823_v56 = vld [vmem:[#allocation78_spill] sm:$0xff] }
 0x400   :  { %28734 = vmatprep.subr.msk.bf16.mxu1 %vm30729_vm2, %v37608_v32  ;;  %19047 = vmatprep.mubr.f32.mxu0 %v37331_v38  ;;  %v24379_v32 = vld [vmem:[%s36841_s2 + $0x190] sm:$0xff] }
 0x401   :  { %19118 = vmatprep.mubr.f32.mxu1 %v37331_v38 }
 0x402   :  { %28727 = vmatpush1.bf16.msk.msra.mxu0 %vm30729_vm2, %v37568_v28  ;;  %v19754_v28 = vld [vmem:[%s36841_s2 + $0x88] sm:$0xff] }
 0x403   :  { %28737 = vmatpush1.bf16.msk.msra.mxu1 %vm30729_vm2, %v37482_v31  ;;  %28739 = vmatprep.subr.bf16.mxu0 %v37483_v21  ;;  %v37815_v21 = vld [vmem:[#allocation70_spill] sm:$0xff]  ;;  %v37816_v31 = vld [vmem:[#allocation71_spill] sm:$0xff]  ;;  %v34530_v62 = vpack.c.bf16 %v19754_v28, %v19753_v13 }
 0x404   :  { %28749 = vmatprep.subr.bf16.mxu1 %v37609_v34  ;;  %v24380_v34 = vld [vmem:[%s36841_s2 + $0x198] sm:$0xff]  ;;  %v19761_v13 = vld [vmem:[%s36841_s2 + $0xc0] sm:$0xff]  ;;  %v19762_v28 = vld [vmem:[%s36841_s2 + $0xc8] sm:$0xff] }
 0x405   :  { %24299 = vmatmul.mubr.msk.f32.vlgmr.msra.gmra.mrb[42].mxu0 %vm115_vm3, %v34211_v30  ;;  %v34580_v15 = vpack.c.bf16 %v24380_v34, %v24379_v32  ;;  %v34700_v10 = vpack.c.bf16 %v19762_v28, %v19761_v13  ;;  %v24387_v32 = vld [vmem:[%s36841_s2 + $0x1d0] sm:$0xff]  ;;  %v24388_v34 = vld [vmem:[%s36841_s2 + $0x1d8] sm:$0xff]  ;;  %v19750_v28 = vld [vmem:[%s36841_s2 + $0x68] sm:$0xff] }
 0x406   :  { %24302 = vmatmul.mubr.msk.f32.vlgmr.msra.gmra.mrb[42].mxu1 %vm115_vm3, %v34211_v30  ;;  %28741 = vmatpush1.bf16.msra.mxu0 %v37485_v22  ;;  %v2169_v22 = vsub.s32 1, %v34466_v26  ;;  %v19755_v30 = vld [vmem:[%s36841_s2 + $0x90] sm:$0xff] }
 0x407   :  { %28751 = vmatpush1.bf16.msra.mxu1 %v37610_v47  ;;  %28744 = vmatprep.subr.msk.bf16.mxu0 %vm30729_vm2, %v37529_v8  ;;  %v24378_v8 = vld [vmem:[%s36841_s2 + $0x188] sm:$0xff] }
 0x408   :  { %28754 = vmatprep.subr.msk.bf16.mxu1 %vm30729_vm2, %v37799_v20  ;;  %19202 = vmatprep.mubr.f32.mxu0 %v37331_v38  ;;  %v34510_v35 = vrot.slane %v34489_v4, %v2169_v22  ;;  %v34518_v37 = vpack.c.bf16 %v24378_v8, %v24377_v36  ;;  %v37825_v47 = vld [vmem:[#allocation79_spill] sm:$0xff]  ;;  %v24385_v36 = vld [vmem:[%s36841_s2 + $0x1c0] sm:$0xff] }
 0x409   :  { %19273 = vmatprep.mubr.f32.mxu1 %v37331_v38  ;;  %v24386_v8 = vld [vmem:[%s36841_s2 + $0x1c8] sm:$0xff] }
 0x40a   :  { %28747 = vmatpush1.bf16.msk.msra.mxu0 %vm30729_vm2, %v37800_v23  ;;  %v34541_v33 = vadd.f32 %v37824_v3, %v34510_v35  ;;  %v34556_v49 = vadd.f32 %v34510_v35, %v37826_v53  ;;  %v34593_v23 = vpack.c.bf16 %v19756_v27, %v19755_v30  ;;  %v19746_v3 = vld [vmem:[%s36841_s2 + $0x48] sm:$0xff]  ;;  %v19763_v30 = vld [vmem:[%s36841_s2 + $0xd0] sm:$0xff]  ;;  %v19764_v27 = vld [vmem:[%s36841_s2 + $0xd8] sm:$0xff] }
 0x40b   :  { %28757 = vmatpush1.bf16.msk.msra.mxu1 %vm30729_vm2, %v37801_v29  ;;  %28759 = vmatprep.subr.bf16.mxu0 %v37802_v40  ;;  %v19758_v29 = vld [vmem:[%s36841_s2 + $0xa8] sm:$0xff] }
 0x40c   :  { %28769 = vmatprep.subr.bf16.mxu1 %v37803_v41  ;;  %v3932_v20 = vmax.f32 %v34541_v33, 0.0  ;;  %v2176_v40 = vmax.f32 %v34556_v49, 0.0  ;;  %v34604_v41 = vpack.c.bf16 %v24364_v11, %v24363_v7  ;;  %v34719_v11 = vpack.c.bf16 %v24370_v50, %v24369_v63  ;;  %v24391_v63 = vld [vmem:[%s36841_s2 + $0x1f0] sm:$0xff]  ;;  %v24392_v50 = vld [vmem:[%s36841_s2 + $0x1f8] sm:$0xff] }
 0x40d   :  { %24306 = vmatmul.mubr.msk.f32.vlgmr.msra.gmra.mrb[40].mxu0 %vm115_vm3, %v24303_v24  ;;  %v24351_v49 = vld [vmem:[%s36841_s2 + $0x5b0] sm:$0xff] }
 0x40e   :  { %24309 = vmatmul.mubr.msk.f32.vlgmr.msra.gmra.mrb[40].mxu1 %vm115_vm3, %v24303_v24  ;;  %28761 = vmatpush1.bf16.msra.mxu0 %v37804_v42  ;;  %v34609_v42 = vpack.c.bf16 %v19740_v14, %v19739_v52 }
 0x40f   :  { %28771 = vmatpush1.bf16.msra.mxu1 %v37805_v48  ;;  %28764 = vmatprep.subr.msk.bf16.mxu0 %vm30729_vm2, %v37806_v57  ;;  %v34611_v48 = vpack.c.bf16 %v24382_v1, %v24381_v61  ;;  %v24365_v57 = vld [vmem:[%s36841_s2 + $0x120] sm:$0xff]  ;;  %v34725_v61 = vpack.c.bf16 %v24388_v34, %v24387_v32  ;;  %v24371_v1 = vld [vmem:[%s36841_s2 + $0x150] sm:$0xff] }
 0x410   :  { %28774 = vmatprep.subr.msk.bf16.mxu1 %vm30729_vm2, %v37807_v58  ;;  %19344 = vmatprep.mubr.f32.mxu0 %v37331_v38  ;;  %v24366_v58 = vld [vmem:[%s36841_s2 + $0x128] sm:$0xff] }
 0x411   :  { %19415 = vmatprep.mubr.f32.mxu1 %v37331_v38  ;;  %37829 = vst [vmem:[#allocation30_spill] sm:$0xff] %v34725_v61 }
 0x412   :  { %28767 = vmatpush1.bf16.msk.msra.mxu0 %vm30729_vm2, %v37808_v0 }
 0x413   :  { %28777 = vmatpush1.bf16.msk.msra.mxu1 %vm30729_vm2, %v37809_v16  ;;  %28779 = vmatprep.subr.bf16.mxu0 %v37810_v18  ;;  %v19742_v16 = vld [vmem:[%s36841_s2 + $0x28] sm:$0xff]  ;;  %v24383_v18 = vld [vmem:[%s36841_s2 + $0x1b0] sm:$0xff] }
 0x414   :  { %28789 = vmatprep.subr.bf16.mxu1 %v37811_v19  ;;  %v24384_v19 = vld [vmem:[%s36841_s2 + $0x1b8] sm:$0xff] }
 0x415   :  { %24312 = vmatmul.mubr.msk.f32.vlgmr.msra.gmra.mrb[42].mxu0 %vm115_vm3, %v24303_v24  ;;  %v34650_v22 = vpack.c.bf16 %v24384_v19, %v24383_v18  ;;  %v19765_v18 = vld [vmem:[%s36841_s2 + $0xe0] sm:$0xff]  ;;  %v19766_v19 = vld [vmem:[%s36841_s2 + $0xe8] sm:$0xff] }
 0x416   :  { %24315 = vmatmul.mubr.msk.f32.vlgmr.msra.gmra.mrb[42].mxu1 %vm115_vm3, %v24303_v24  ;;  %28781 = vmatpush1.bf16.msra.mxu0 %v37812_v39  ;;  %v19757_v24 = vld [vmem:[%s36841_s2 + $0xa0] sm:$0xff]  ;;  %v19759_v39 = vld [vmem:[%s36841_s2 + $0xb0] sm:$0xff]  ;;  %v34774_v13 = vpack.c.bf16 %v19766_v19, %v19765_v18  ;;  %v24410_v19 = vld [vmem:[%s36841_s2 + $0x688] sm:$0xff] }
 0x417   :  { %28791 = vmatpush1.bf16.msra.mxu1 %v37813_v2  ;;  %28784 = vmatprep.subr.msk.bf16.mxu0 %vm30729_vm2, %v37814_v45  ;;  %v34625_v0 = vpack.c.bf16 %v19758_v29, %v19757_v24  ;;  %v19760_v2 = vld [vmem:[%s36841_s2 + $0xb8] sm:$0xff]  ;;  %v34644_v45 = vpack.c.bf16 %v24366_v58, %v24365_v57  ;;  %v19747_v29 = vld [vmem:[%s36841_s2 + $0x50] sm:$0xff]  ;;  %v34737_v57 = vpack.c.bf16 %v19764_v27, %v19763_v30  ;;  %v24409_v18 = vld [vmem:[%s36841_s2 + $0x680] sm:$0xff] }
 0x418   :  { %28794 = vmatprep.subr.msk.bf16.mxu1 %vm30729_vm2, %v37815_v21  ;;  %19499 = vmatprep.mubr.f32.mxu0 %v37331_v38  ;;  %v34648_v21 = vpack.c.bf16 %v19742_v16, %v19741_v60  ;;  %v24372_v24 = vld [vmem:[%s36841_s2 + $0x158] sm:$0xff]  ;;  %v24389_v60 = vld [vmem:[%s36841_s2 + $0x1e0] sm:$0xff]  ;;  %v24390_v16 = vld [vmem:[%s36841_s2 + $0x1e8] sm:$0xff]  ;;  %v34798_v27 = vpack.c.bf16 %v24392_v50, %v24391_v63 }
 0x419   :  { %19570 = vmatprep.mubr.f32.mxu1 %v37331_v38  ;;  %37830 = vst [vmem:[#allocation31_spill] sm:$0xff] %v34737_v57  ;;  %v19748_v58 = vld [vmem:[%s36841_s2 + $0x58] sm:$0xff]  ;;  %v24394_v63 = vld [vmem:[%s36841_s2 + $0x608] sm:$0xff] }
 0x41a   :  { %28787 = vmatpush1.bf16.msk.msra.mxu0 %vm30729_vm2, %v37816_v31  ;;  %v24367_v31 = vld [vmem:[%s36841_s2 + $0x130] sm:$0xff]  ;;  %37833 = vst [vmem:[#allocation34_spill] sm:$0xff] %v34798_v27  ;;  %v37841_v50 = vld [vmem:[#allocation81_spill] sm:$0xff] }
 0x41b   :  { %28797 = vmatpush1.bf16.msk.msra.mxu1 %vm30729_vm2, %v37817_v54  ;;  %28799 = vmatprep.subr.bf16.mxu0 %v37818_v55  ;;  %v19743_v54 = vld [vmem:[%s36841_s2 + $0x30] sm:$0xff]  ;;  %v34662_v55 = vpack.c.bf16 %v19760_v2, %v19759_v39  ;;  %v34755_v39 = vpack.c.bf16 %v24372_v24, %v24371_v1  ;;  %v34759_v2 = vpack.c.bf16 %v19748_v58, %v19747_v29  ;;  %v24376_v1 = vld [vmem:[%s36841_s2 + $0x178] sm:$0xff] }
 0x41c   :  { %28809 = vmatprep.subr.bf16.mxu1 %v37819_v59  ;;  %v19744_v59 = vld [vmem:[%s36841_s2 + $0x38] sm:$0xff]  ;;  %v19751_v24 = vld [vmem:[%s36841_s2 + $0x70] sm:$0xff] }
 0x41d   :  { %24319 = vmatmul.mubr.msk.f32.vlgmr.msra.gmra.mrb[40].mxu0 %vm115_vm3, %v24316_v9 }
 0x41e   :  { %24322 = vmatmul.mubr.msk.f32.vlgmr.msra.gmra.mrb[40].mxu1 %vm115_vm3, %v24316_v9  ;;  %28801 = vmatpush1.bf16.msra.mxu0 %v37820_v43 }
 0x41f   :  { %28811 = vmatpush1.bf16.msra.mxu1 %v37821_v44  ;;  %28804 = vmatprep.subr.msk.bf16.mxu0 %vm30729_vm2, %v37822_v5  ;;  %v34684_v44 = vpack.c.bf16 %v19744_v59, %v19743_v54  ;;  %v34686_v5 = vpack.c.bf16 %v24386_v8, %v24385_v36  ;;  %v24374_v54 = vld [vmem:[%s36841_s2 + $0x168] sm:$0xff]  ;;  %v19749_v59 = vld [vmem:[%s36841_s2 + $0x60] sm:$0xff]  ;;  %v2165_v36 = vsub.s32 0, %v34466_v26  ;;  %v19767_v26 = vld [vmem:[%s36841_s2 + $0xf0] sm:$0xff] }
 0x420   :  { %28814 = vmatprep.subr.msk.bf16.mxu1 %vm30729_vm2, %v37823_v56  ;;  %19641 = vmatprep.mubr.f32.mxu0 %v37331_v38  ;;  %v19745_v56 = vld [vmem:[%s36841_s2 + $0x40] sm:$0xff]  ;;  %v34796_v30 = vpack.c.bf16 %v19750_v28, %v19749_v59 }
 0x421   :  { %19712 = vmatprep.mubr.f32.mxu1 %v37331_v38  ;;  %v34723_v14 = vpack.c.bf16 %v19746_v3, %v19745_v56  ;;  %v19768_v3 = vld [vmem:[%s36841_s2 + $0xf8] sm:$0xff]  ;;  %v34810_v29 = vrot.slane %v34489_v4, %v2165_v36  ;;  %v37838_v59 = vld [vmem:[#allocation22_spill] sm:$0xff] }
 0x422   :  { %28807 = vmatpush1.bf16.msk.msra.mxu0 %vm30729_vm2, %v37825_v47  ;;  %37832 = vst [vmem:[#allocation33_spill] sm:$0xff] %v34796_v30  ;;  %v24393_v28 = vld [vmem:[%s36841_s2 + $0x600] sm:$0xff] }
 0x423   :  { %28817 = vmatpush1.bf16.msk.msra.mxu1 %vm30729_vm2, %v37827_v51  ;;  %28819 = vmatprep.subr.bf16.mxu0 %v34518_v37  ;;  %37828 = vst [vmem:[#allocation53_spill] sm:$0xff] %v34723_v14  ;;  %v34839_v36 = vadd.f32 %v37838_v59, %v34810_v29 }
 0x424   :  { %28851 = vmatprep.subr.bf16.mxu1 %v34530_v62 }
 0x425   :  { %24325 = vmatmul.mubr.msk.f32.vlgmr.msra.gmra.mrb[42].mxu0 %vm115_vm3, %v24316_v9 }
 0x426   :  { %24328 = vmatmul.mubr.msk.f32.vlgmr.msra.gmra.mrb[42].mxu1 %vm115_vm3, %v24316_v9  ;;  %28821 = vmatpush3.bf16.msra.mxu0 %v34552_v17  ;;  %v24368_v9 = vld [vmem:[%s36841_s2 + $0x138] sm:$0xff] }
 0x427   :  { %19899 = vmatprep.mubr.f32.mxu0 %v3932_v20  ;;  %28853 = vmatpush3.bf16.msra.mxu1 %v34568_v25  ;;  %v34680_v43 = vpack.c.bf16 %v24368_v9, %v24367_v31  ;;  %v34761_v31 = vpack.c.bf16 %v24390_v16, %v24389_v60  ;;  %v24373_v9 = vld [vmem:[%s36841_s2 + $0x160] sm:$0xff]  ;;  %v34815_v60 = vpack.c.bf16 %v19768_v3, %v19767_v26  ;;  %v19752_v16 = vld [vmem:[%s36841_s2 + $0x78] sm:$0xff]  ;;  %v24330_v3 = vld [vmem:[%s36841_s2 + $0x508] sm:$0xff] }
 0x428   :  { %19969 = vmatprep.mubr.f32.mxu1 %v2176_v40  ;;  %28823 = vmatprep.subr.bf16.mxu0 %v34580_v15  ;;  %v24329_v26 = vld [vmem:[%s36841_s2 + $0x500] sm:$0xff] }
 0x429   :  { %28855 = vmatprep.subr.bf16.mxu1 %v34593_v23  ;;  %37835 = vst [vmem:[#allocation36_spill] sm:$0xff] %v34815_v60 }
 0x42a   :  { %28825 = vmatpush3.bf16.msra.mxu0 %v34604_v41 }
 0x42b   :  { %28857 = vmatpush3.bf16.msra.mxu1 %v34609_v42  ;;  %28827 = vmatprep.subr.bf16.mxu0 %v34611_v48 }
 0x42c   :  { %28859 = vmatprep.subr.bf16.mxu1 %v34625_v0 }
 0x42e   :  { %28829 = vmatpush3.bf16.msra.mxu0 %v34644_v45 }
 0x42f   :  { %28861 = vmatpush3.bf16.msra.mxu1 %v34648_v21  ;;  %28831 = vmatprep.subr.bf16.mxu0 %v34650_v22 }
 0x430   :  { %v34697_v12 = vpop.f32.mrb[32].mxu0  ;;  %28863 = vmatprep.subr.bf16.mxu1 %v34662_v55 }
 0x431   :  { %v16060_v47 = vpop.f32.mrb[32].mxu1  ;;  %v15991_v53 = vpop.f32.mrb[33].mxu0 }
 0x432   :  { %v16215_v51 = vmax.f32 %v34697_v12, %v16060_v47  ;;  %v16062_v7 = vpop.f32.mrb[33].mxu1  ;;  %28833 = vmatpush3.bf16.msra.mxu0 %v34680_v43  ;;  %v34792_v47 = vpack.c.bf16 %v24374_v54, %v24373_v9  ;;  %v24346_v9 = vld [vmem:[%s36841_s2 + $0x588] sm:$0xff] }
 0x433   :  { %v16216_v52 = vmax.f32 %v15991_v53, %v16062_v7  ;;  %28865 = vmatpush3.bf16.msra.mxu1 %v34684_v44  ;;  %28835 = vmatprep.subr.bf16.mxu0 %v34686_v5  ;;  %v24375_v7 = vld [vmem:[%s36841_s2 + $0x170] sm:$0xff] }
 0x434   :  { %28867 = vmatprep.subr.bf16.mxu1 %v34700_v10  ;;  %37831 = vst [vmem:[#allocation32_spill] sm:$0xff] %v34792_v47  ;;  %v34835_v54 = vpack.c.bf16 %v24376_v1, %v24375_v7  ;;  %v24347_v7 = vld [vmem:[%s36841_s2 + $0x590] sm:$0xff]  ;;  %v24348_v1 = vld [vmem:[%s36841_s2 + $0x598] sm:$0xff] }
 0x436   :  { %28837 = vmatpush3.bf16.msra.mxu0 %v34719_v11  ;;  %37837 = vst [vmem:[#allocation47_spill] sm:$0xff] %v34835_v54 }
 0x437   :  { %28869 = vmatpush3.bf16.msra.mxu1 %v34723_v14  ;;  %28839 = vmatprep.subr.bf16.mxu0 %v34725_v61 }
 0x438   :  { %v16131_v8 = vpop.f32.mrb[34].mxu0  ;;  %28871 = vmatprep.subr.bf16.mxu1 %v34737_v57 }
 0x439   :  { %v16202_v56 = vpop.f32.mrb[34].mxu1  ;;  %v16133_v12 = vpop.f32.mrb[35].mxu0 }
 0x43a   :  { %v16217_v32 = vmax.f32 %v16131_v8, %v16202_v56  ;;  %v16204_v34 = vpop.f32.mrb[35].mxu1  ;;  %28841 = vmatpush3.bf16.msra.mxu0 %v34755_v39  ;;  %v34845_v8 = vpack.c.bf16 %v24410_v19, %v24409_v18  ;;  %v34855_v56 = vadd.f32 %v34810_v29, %v37841_v50  ;;  %v24395_v18 = vld [vmem:[%s36841_s2 + $0x610] sm:$0xff]  ;;  %v24396_v19 = vld [vmem:[%s36841_s2 + $0x618] sm:$0xff]  ;;  %v24414_v50 = vld [vmem:[%s36841_s2 + $0x6a8] sm:$0xff] }
 0x43b   :  { %v16218_v53 = vmax.f32 %v16133_v12, %v16204_v34  ;;  %28873 = vmatpush3.bf16.msra.mxu1 %v34759_v2  ;;  %28843 = vmatprep.subr.bf16.mxu0 %v34761_v31  ;;  %v24412_v34 = vld [vmem:[%s36841_s2 + $0x698] sm:$0xff] }
 0x43c   :  { %v34812_v58 = vmax.f32 %v16215_v51, %v16217_v32  ;;  %28875 = vmatprep.subr.bf16.mxu1 %v34774_v13  ;;  %v24345_v51 = vld [vmem:[%s36841_s2 + $0x580] sm:$0xff]  ;;  %37840 = vst [vmem:[#allocation38_spill] sm:$0xff] %v34845_v8  ;;  %v24411_v32 = vld [vmem:[%s36841_s2 + $0x690] sm:$0xff] }
 0x43d   :  { %v34826_v4 = vmax.f32 %v16216_v52, %v16218_v53  ;;  %v34843_v52 = vpack.c.bf16 %v19752_v16, %v19751_v24  ;;  %v34858_v12 = vpack.c.bf16 %v24346_v9, %v24345_v51  ;;  %v34873_v53 = vpack.c.bf16 %v24394_v63, %v24393_v28  ;;  %v24331_v51 = vld [vmem:[%s36841_s2 + $0x510] sm:$0xff]  ;;  %v24332_v28 = vld [vmem:[%s36841_s2 + $0x518] sm:$0xff]  ;;  %v24413_v63 = vld [vmem:[%s36841_s2 + $0x6a0] sm:$0xff] }
 0x43e   :  { %37834 = vst [vmem:[#allocation35_spill] sm:$0xff] %v34812_v58  ;;  %28845 = vmatpush3.bf16.msra.mxu0 %v34792_v47  ;;  %v37029_v24 = vmax.f32 %v34839_v36, 0.0  ;;  %v34884_v16 = vpack.c.bf16 %v24330_v3, %v24329_v26  ;;  %v37030_v9 = vmax.f32 %v34855_v56, 0.0  ;;  %v34897_v59 = vpack.c.bf16 %v24412_v34, %v24411_v32  ;;  %v24349_v3 = vld [vmem:[%s36841_s2 + $0x5a0] sm:$0xff]  ;;  %v24350_v32 = vld [vmem:[%s36841_s2 + $0x5a8] sm:$0xff] }
 0x43f   :  { %37836 = vst [vmem:[#allocation45_spill] sm:$0xff] %v34826_v4  ;;  %28877 = vmatpush3.bf16.msra.mxu1 %v34796_v30  ;;  %28847 = vmatprep.subr.bf16.mxu0 %v34798_v27  ;;  %37839 = vst [vmem:[#allocation37_spill] sm:$0xff] %v34843_v52  ;;  %v34910_v26 = vpack.c.bf16 %v24348_v1, %v24347_v7  ;;  %v34921_v34 = vpack.c.bf16 %v24396_v19, %v24395_v18  ;;  %v24333_v18 = vld [vmem:[%s36841_s2 + $0x520] sm:$0xff]  ;;  %v24415_v19 = vld [vmem:[%s36841_s2 + $0x6b0] sm:$0xff] }
 0x440   :  { %28879 = vmatprep.subr.bf16.mxu1 %v34815_v60  ;;  %37842 = vst [vmem:[#allocation39_spill] sm:$0xff] %v34858_v12  ;;  %37843 = vst [vmem:[#allocation42_spill] sm:$0xff] %v34873_v53  ;;  %v34926_v7 = vpack.c.bf16 %v24332_v28, %v24331_v51  ;;  %v34928_v1 = vpack.c.bf16 %v24414_v50, %v24413_v63  ;;  %v34942_v33 = vpack.c.bf16 %v24350_v32, %v24349_v3  ;;  %v24416_v51 = vld [vmem:[%s36841_s2 + $0x6b8] sm:$0xff]  ;;  %v24399_v3 = vld [vmem:[%s36841_s2 + $0x630] sm:$0xff] }
 0x441   :  { %37844 = vst [vmem:[#allocation44_spill] sm:$0xff] %v34884_v16  ;;  %37845 = vst [vmem:[#allocation46_spill] sm:$0xff] %v34897_v59  ;;  %v34967_v50 = vpack.c.bf16 %v24416_v51, %v24415_v19  ;;  %v24400_v32 = vld [vmem:[%s36841_s2 + $0x638] sm:$0xff]  ;;  %v24418_v19 = vld [vmem:[%s36841_s2 + $0x6c8] sm:$0xff] }
 0x442   :  { %28849 = vmatpush3.bf16.msra.mxu0 %v34835_v54  ;;  %37846 = vst [vmem:[#allocation50_spill] sm:$0xff] %v34910_v26  ;;  %37847 = vst [vmem:[#allocation52_spill] sm:$0xff] %v34921_v34  ;;  %v24353_v51 = vld [vmem:[%s36841_s2 + $0x5c0] sm:$0xff] }
 0x443   :  { %28881 = vmatpush3.bf16.msra.mxu1 %v34843_v52  ;;  %28883 = vmatprep.subr.bf16.mxu0 %v34845_v8  ;;  %37848 = vst [vmem:[#allocation2_spill] sm:$0xff] %v34926_v7  ;;  %37849 = vst [vmem:[#allocation3_spill] sm:$0xff] %v34928_v1  ;;  %v24401_v4 = vld [vmem:[%s36841_s2 + $0x640] sm:$0xff] }
 0x444   :  { %28915 = vmatprep.subr.bf16.mxu1 %v34858_v12  ;;  %37850 = vst [vmem:[#allocation4_spill] sm:$0xff] %v34942_v33  ;;  %37853 = vst [vmem:[#allocation7_spill] sm:$0xff] %v34967_v50 }
 0x445   :  { %19900 = vmatmul.mubr.f32.vlgmr.msra.gmra.mrb[44].mxu0 %v37029_v24  ;;  %v24397_v24 = vld [vmem:[%s36841_s2 + $0x620] sm:$0xff] }
 0x446   :  { %19970 = vmatmul.mubr.f32.vlgmr.msra.gmra.mrb[44].mxu1 %v37030_v9  ;;  %28885 = vmatpush3.bf16.msra.mxu0 %v34873_v53  ;;  %v24398_v9 = vld [vmem:[%s36841_s2 + $0x628] sm:$0xff] }
 0x447   :  { %20072 = vmatprep.mubr.f32.mxu0 %v3932_v20  ;;  %28917 = vmatpush3.bf16.msra.mxu1 %v34884_v16  ;;  %v24334_v20 = vld [vmem:[%s36841_s2 + $0x528] sm:$0xff]  ;;  %v34961_v28 = vpack.c.bf16 %v24398_v9, %v24397_v24  ;;  %v24335_v24 = vld [vmem:[%s36841_s2 + $0x530] sm:$0xff] }
 0x448   :  { %20142 = vmatprep.mubr.f32.mxu1 %v2176_v40  ;;  %28887 = vmatprep.subr.bf16.mxu0 %v34897_v59  ;;  %v24352_v40 = vld [vmem:[%s36841_s2 + $0x5b8] sm:$0xff]  ;;  %v34965_v63 = vpack.c.bf16 %v24334_v20, %v24333_v18  ;;  %v24417_v20 = vld [vmem:[%s36841_s2 + $0x6c0] sm:$0xff]  ;;  %v24503_v16 = vld [vmem:[%s36841_s2 + $0x370] sm:$0xff] }
 0x449   :  { %28919 = vmatprep.subr.bf16.mxu1 %v34910_v26  ;;  %37851 = vst [vmem:[#allocation5_spill] sm:$0xff] %v34961_v28  ;;  %v34979_v9 = vpack.c.bf16 %v24352_v40, %v24351_v49  ;;  %v24336_v18 = vld [vmem:[%s36841_s2 + $0x538] sm:$0xff]  ;;  %v24354_v49 = vld [vmem:[%s36841_s2 + $0x5c8] sm:$0xff]  ;;  %v34997_v40 = vpack.c.bf16 %v24400_v32, %v24399_v3  ;;  %v35003_v58 = vpack.c.bf16 %v24418_v19, %v24417_v20  ;;  %v24337_v3 = vld [vmem:[%s36841_s2 + $0x540] sm:$0xff] }
 0x44a   :  { %28889 = vmatpush3.bf16.msra.mxu0 %v34921_v34  ;;  %37852 = vst [vmem:[#allocation6_spill] sm:$0xff] %v34965_v63  ;;  %v35001_v38 = vpack.c.bf16 %v24336_v18, %v24335_v24  ;;  %v35015_v32 = vpack.c.bf16 %v24354_v49, %v24353_v51  ;;  %v24338_v24 = vld [vmem:[%s36841_s2 + $0x548] sm:$0xff]  ;;  %v24419_v18 = vld [vmem:[%s36841_s2 + $0x6d0] sm:$0xff]  ;;  %v24420_v20 = vld [vmem:[%s36841_s2 + $0x6d8] sm:$0xff]  ;;  %v35033_v49 = vpack.c.bf16 %v24402_v6, %v24401_v4 }
 0x44b   :  { %28921 = vmatpush3.bf16.msra.mxu1 %v34926_v7  ;;  %28891 = vmatprep.subr.bf16.mxu0 %v34928_v1  ;;  %37854 = vst [vmem:[#allocation8_spill] sm:$0xff] %v34979_v9  ;;  %37855 = vst [vmem:[#allocation9_spill] sm:$0xff] %v34997_v40  ;;  %v24355_v19 = vld [vmem:[%s36841_s2 + $0x5d0] sm:$0xff]  ;;  %v24356_v51 = vld [vmem:[%s36841_s2 + $0x5d8] sm:$0xff]  ;;  %v35037_v46 = vpack.c.bf16 %v24338_v24, %v24337_v3 }
 0x44c   :  { %28923 = vmatprep.subr.bf16.mxu1 %v34942_v33  ;;  %37856 = vst [vmem:[#allocation10_spill] sm:$0xff] %v35001_v38  ;;  %37857 = vst [vmem:[#allocation11_spill] sm:$0xff] %v35003_v58  ;;  %v24339_v6 = vld [vmem:[%s36841_s2 + $0x550] sm:$0xff]  ;;  %v35051_v4 = vpack.c.bf16 %v24356_v51, %v24355_v19  ;;  %v24340_v3 = vld [vmem:[%s36841_s2 + $0x558] sm:$0xff] }
 0x44d   :  { %37858 = vst [vmem:[#allocation12_spill] sm:$0xff] %v35015_v32  ;;  %37859 = vst [vmem:[#allocation13_spill] sm:$0xff] %v35033_v49  ;;  %v24421_v24 = vld [vmem:[%s36841_s2 + $0x6e0] sm:$0xff]  ;;  %v24358_v19 = vld [vmem:[%s36841_s2 + $0x5e8] sm:$0xff] }
 0x44e   :  { %28893 = vmatpush3.bf16.msra.mxu0 %v34961_v28  ;;  %37860 = vst [vmem:[#allocation14_spill] sm:$0xff] %v35037_v46  ;;  %37862 = vst [vmem:[#allocation16_spill] sm:$0xff] %v35051_v4  ;;  %v37881_v28 = vmax.f32 %v34855_v56, 0.0  ;;  %v24430_v56 = vld [vmem:[%s36841_s2 + $0x228] sm:$0xff]  ;;  %v24499_v26 = vld [vmem:[%s36841_s2 + $0x350] sm:$0xff] }
 0x44f   :  { %28925 = vmatpush3.bf16.msra.mxu1 %v34965_v63  ;;  %28895 = vmatprep.subr.bf16.mxu0 %v34967_v50  ;;  %v24403_v50 = vld [vmem:[%s36841_s2 + $0x650] sm:$0xff]  ;;  %v24404_v63 = vld [vmem:[%s36841_s2 + $0x658] sm:$0xff] }
 0x450   :  { %28927 = vmatprep.subr.bf16.mxu1 %v34979_v9  ;;  %v35039_v9 = vpack.c.bf16 %v24420_v20, %v24419_v18  ;;  %v24422_v18 = vld [vmem:[%s36841_s2 + $0x6e8] sm:$0xff]  ;;  %v24357_v20 = vld [vmem:[%s36841_s2 + $0x5e0] sm:$0xff]  ;;  %v35069_v51 = vpack.c.bf16 %v24404_v63, %v24403_v50 }
 0x451   :  { %v24341_v63 = vld [vmem:[%s36841_s2 + $0x560] sm:$0xff]  ;;  %v35087_v50 = vpack.c.bf16 %v24358_v19, %v24357_v20  ;;  %v24360_v20 = vld [vmem:[%s36841_s2 + $0x5f8] sm:$0xff] }
 0x452   :  { %28897 = vmatpush3.bf16.msra.mxu0 %v34997_v40  ;;  %37861 = vst [vmem:[#allocation15_spill] sm:$0xff] %v35039_v9  ;;  %37863 = vst [vmem:[#allocation17_spill] sm:$0xff] %v35069_v51  ;;  %v24406_v40 = vld [vmem:[%s36841_s2 + $0x668] sm:$0xff] }
 0x453   :  { %28929 = vmatpush3.bf16.msra.mxu1 %v35001_v38  ;;  %28899 = vmatprep.subr.bf16.mxu0 %v35003_v58  ;;  %v35075_v58 = vpack.c.bf16 %v24422_v18, %v24421_v24  ;;  %v24405_v38 = vld [vmem:[%s36841_s2 + $0x660] sm:$0xff]  ;;  %37866 = vst [vmem:[#allocation20_spill] sm:$0xff] %v35087_v50  ;;  %v24424_v24 = vld [vmem:[%s36841_s2 + $0x6f8] sm:$0xff]  ;;  %v24359_v18 = vld [vmem:[%s36841_s2 + $0x5f0] sm:$0xff] }
 0x454   :  { %28931 = vmatprep.subr.bf16.mxu1 %v35015_v32  ;;  %v35073_v32 = vpack.c.bf16 %v24340_v3, %v24339_v6  ;;  %v24342_v6 = vld [vmem:[%s36841_s2 + $0x568] sm:$0xff]  ;;  %v24423_v3 = vld [vmem:[%s36841_s2 + $0x6f0] sm:$0xff]  ;;  %v35105_v19 = vpack.c.bf16 %v24406_v40, %v24405_v38  ;;  %v35123_v40 = vpack.c.bf16 %v24360_v20, %v24359_v18 }
 0x455   :  { %37865 = vst [vmem:[#allocation19_spill] sm:$0xff] %v35075_v58  ;;  %v24343_v38 = vld [vmem:[%s36841_s2 + $0x570] sm:$0xff]  ;;  %v24474_v18 = vld [vmem:[%s36841_s2 + $0x788] sm:$0xff] }
 0x456   :  { %28901 = vmatpush3.bf16.msra.mxu0 %v35033_v49  ;;  %37864 = vst [vmem:[#allocation18_spill] sm:$0xff] %v35073_v32  ;;  %37867 = vst [vmem:[#allocation21_spill] sm:$0xff] %v35105_v19  ;;  %v24408_v49 = vld [vmem:[%s36841_s2 + $0x678] sm:$0xff] }
 0x457   :  { %28933 = vmatpush3.bf16.msra.mxu1 %v35037_v46  ;;  %28903 = vmatprep.subr.bf16.mxu0 %v35039_v9  ;;  %v35111_v9 = vpack.c.bf16 %v24424_v24, %v24423_v3  ;;  %v24407_v46 = vld [vmem:[%s36841_s2 + $0x670] sm:$0xff]  ;;  %37870 = vst [vmem:[#allocation56_spill] sm:$0xff] %v35123_v40  ;;  %v24442_v3 = vld [vmem:[%s36841_s2 + $0x288] sm:$0xff]  ;;  %v24473_v24 = vld [vmem:[%s36841_s2 + $0x780] sm:$0xff] }
 0x458   :  { %28935 = vmatprep.subr.bf16.mxu1 %v35051_v4  ;;  %v35109_v4 = vpack.c.bf16 %v24342_v6, %v24341_v63  ;;  %v24344_v63 = vld [vmem:[%s36841_s2 + $0x578] sm:$0xff]  ;;  %v24441_v6 = vld [vmem:[%s36841_s2 + $0x280] sm:$0xff]  ;;  %v35141_v20 = vpack.c.bf16 %v24408_v49, %v24407_v46  ;;  %v35156_v46 = vpack.c.bf16 %v24474_v18, %v24473_v24 }
 0x459   :  { %37869 = vst [vmem:[#allocation55_spill] sm:$0xff] %v35111_v9  ;;  %v24457_v49 = vld [vmem:[%s36841_s2 + $0x700] sm:$0xff]  ;;  %v24444_v24 = vld [vmem:[%s36841_s2 + $0x298] sm:$0xff] }
 0x45a   :  { %28905 = vmatpush3.bf16.msra.mxu0 %v35069_v51  ;;  %37868 = vst [vmem:[#allocation54_spill] sm:$0xff] %v35109_v4  ;;  %37871 = vst [vmem:[#allocation57_spill] sm:$0xff] %v35141_v20  ;;  %v24426_v51 = vld [vmem:[%s36841_s2 + $0x208] sm:$0xff] }
 0x45b   :  { %28937 = vmatpush3.bf16.msra.mxu1 %v35073_v32  ;;  %28907 = vmatprep.subr.bf16.mxu0 %v35075_v58  ;;  %v35147_v58 = vpack.c.bf16 %v24442_v3, %v24441_v6  ;;  %v24425_v32 = vld [vmem:[%s36841_s2 + $0x200] sm:$0xff]  ;;  %37874 = vst [vmem:[#allocation60_spill] sm:$0xff] %v35156_v46  ;;  %v24443_v3 = vld [vmem:[%s36841_s2 + $0x290] sm:$0xff] }
 0x45c   :  { %28939 = vmatprep.subr.bf16.mxu1 %v35087_v50  ;;  %v35145_v50 = vpack.c.bf16 %v24344_v63, %v24343_v38  ;;  %v24458_v38 = vld [vmem:[%s36841_s2 + $0x708] sm:$0xff]  ;;  %v37875_v63 = vld [vmem:[#allocation25_spill] sm:$0xff]  ;;  %v35173_v18 = vpack.c.bf16 %v24426_v51, %v24425_v32  ;;  %v24459_v51 = vld [vmem:[%s36841_s2 + $0x710] sm:$0xff] }
 0x45d   :  { %37873 = vst [vmem:[#allocation59_spill] sm:$0xff] %v35147_v58  ;;  %v5686_v6 = vadd.f32 %v37875_v63, %v34510_v35  ;;  %v24476_v63 = vld [vmem:[%s36841_s2 + $0x798] sm:$0xff] }
 0x45e   :  { %28909 = vmatpush3.bf16.msra.mxu0 %v35105_v19  ;;  %37872 = vst [vmem:[#allocation58_spill] sm:$0xff] %v35145_v50  ;;  %37876 = vst [vmem:[#allocation61_spill] sm:$0xff] %v35173_v18  ;;  %v24428_v32 = vld [vmem:[%s36841_s2 + $0x218] sm:$0xff]  ;;  %v37879_v19 = vmax.f32 %v34839_v36, 0.0 }
 0x45f   :  { %28941 = vmatpush3.bf16.msra.mxu1 %v35109_v4  ;;  %28911 = vmatprep.subr.bf16.mxu0 %v35111_v9  ;;  %v35183_v9 = vpack.c.bf16 %v24458_v38, %v24457_v49  ;;  %v35195_v4 = vpack.c.bf16 %v24444_v24, %v24443_v3  ;;  %v24460_v49 = vld [vmem:[%s36841_s2 + $0x718] sm:$0xff]  ;;  %v24445_v38 = vld [vmem:[%s36841_s2 + $0x2a0] sm:$0xff]  ;;  %v24478_v24 = vld [vmem:[%s36841_s2 + $0x7a8] sm:$0xff] }
 0x460   :  { %28943 = vmatprep.subr.bf16.mxu1 %v35123_v40  ;;  %v24475_v40 = vld [vmem:[%s36841_s2 + $0x790] sm:$0xff]  ;;  %v24477_v3 = vld [vmem:[%s36841_s2 + $0x7a0] sm:$0xff]  ;;  %v35225_v36 = vpack.c.bf16 %v24460_v49, %v24459_v51  ;;  %v24480_v49 = vld [vmem:[%s36841_s2 + $0x7b8] sm:$0xff] }
 0x461   :  { %37877 = vst [vmem:[#allocation62_spill] sm:$0xff] %v35183_v9  ;;  %37878 = vst [vmem:[#allocation63_spill] sm:$0xff] %v35195_v4  ;;  %v24479_v51 = vld [vmem:[%s36841_s2 + $0x7b0] sm:$0xff] }
 0x462   :  { %28913 = vmatpush3.bf16.msra.mxu0 %v35141_v20  ;;  %v24427_v20 = vld [vmem:[%s36841_s2 + $0x210] sm:$0xff]  ;;  %37883 = vst [vmem:[#allocation66_spill] sm:$0xff] %v35225_v36 }
 0x463   :  { %28945 = vmatpush3.bf16.msra.mxu1 %v35145_v50  ;;  %28947 = vmatprep.subr.bf16.mxu0 %v35147_v58  ;;  %v24446_v58 = vld [vmem:[%s36841_s2 + $0x2a8] sm:$0xff]  ;;  %v35206_v50 = vmax.f32 %v5686_v6, 0.0  ;;  %v35221_v6 = vpack.c.bf16 %v24428_v32, %v24427_v20  ;;  %v35240_v20 = vpack.c.bf16 %v24478_v24, %v24477_v3  ;;  %v24448_v32 = vld [vmem:[%s36841_s2 + $0x2b8] sm:$0xff] }
 0x464   :  { %28979 = vmatprep.subr.bf16.mxu1 %v35156_v46  ;;  %v35210_v46 = vpack.c.bf16 %v24476_v63, %v24475_v40  ;;  %v24429_v40 = vld [vmem:[%s36841_s2 + $0x220] sm:$0xff]  ;;  %v24447_v63 = vld [vmem:[%s36841_s2 + $0x2b0] sm:$0xff] }
 0x465   :  { %20073 = vmatmul.mubr.f32.vlgmr.msra.gmra.mrb[46].mxu0 %v37879_v19  ;;  %37882 = vst [vmem:[#allocation65_spill] sm:$0xff] %v35221_v6  ;;  %v35227_v19 = vpack.c.bf16 %v24446_v58, %v24445_v38  ;;  %37885 = vst [vmem:[#allocation68_spill] sm:$0xff] %v35240_v20  ;;  %v24462_v58 = vld [vmem:[%s36841_s2 + $0x728] sm:$0xff]  ;;  %v35259_v38 = vpack.c.bf16 %v24430_v56, %v24429_v40  ;;  %v35265_v24 = vpack.c.bf16 %v24448_v32, %v24447_v63  ;;  %v24463_v40 = vld [vmem:[%s36841_s2 + $0x730] sm:$0xff] }
 0x466   :  { %37880 = vst [vmem:[#allocation64_spill] sm:$0xff] %v35210_v46  ;;  %20143 = vmatmul.mubr.f32.vlgmr.msra.gmra.mrb[46].mxu1 %v37881_v28  ;;  %28949 = vmatpush3.bf16.msra.mxu0 %v35173_v18  ;;  %v24461_v28 = vld [vmem:[%s36841_s2 + $0x720] sm:$0xff]  ;;  %v35277_v56 = vpack.c.bf16 %v24480_v49, %v24479_v51  ;;  %v24450_v63 = vld [vmem:[%s36841_s2 + $0x2c8] sm:$0xff] }
 0x467   :  { %20245 = vmatprep.mubr.f32.mxu0 %v35206_v50  ;;  %28981 = vmatpush3.bf16.msra.mxu1 %v35183_v9  ;;  %37884 = vst [vmem:[#allocation67_spill] sm:$0xff] %v35227_v19  ;;  %37886 = vst [vmem:[#allocation69_spill] sm:$0xff] %v35259_v38  ;;  %v35263_v3 = vpack.c.bf16 %v24462_v58, %v24461_v28  ;;  %v24464_v28 = vld [vmem:[%s36841_s2 + $0x738] sm:$0xff]  ;;  %v24449_v58 = vld [vmem:[%s36841_s2 + $0x2c0] sm:$0xff] }
 0x468   :  { %20349 = vmatprep.mubr.f32.mxu1 %v35206_v50  ;;  %28951 = vmatprep.subr.bf16.mxu0 %v35195_v4  ;;  %37888 = vst [vmem:[#allocation71_spill] sm:$0xff] %v35265_v24  ;;  %v24432_v4 = vld [vmem:[%s36841_s2 + $0x238] sm:$0xff]  ;;  %37889 = vst [vmem:[#allocation72_spill] sm:$0xff] %v35277_v56  ;;  %v24481_v32 = vld [vmem:[%s36841_s2 + $0x7c0] sm:$0xff] }
 0x469   :  { %28983 = vmatprep.subr.bf16.mxu1 %v35210_v46  ;;  %37887 = vst [vmem:[#allocation70_spill] sm:$0xff] %v35263_v3  ;;  %v24431_v46 = vld [vmem:[%s36841_s2 + $0x230] sm:$0xff]  ;;  %v24482_v51 = vld [vmem:[%s36841_s2 + $0x7c8] sm:$0xff]  ;;  %v24489_v9 = vld [vmem:[%s36841_s2 + $0x300] sm:$0xff] }
 0x46a   :  { %28953 = vmatpush3.bf16.msra.mxu0 %v35221_v6  ;;  %v35295_v49 = vpack.c.bf16 %v24432_v4, %v24431_v46  ;;  %v24434_v6 = vld [vmem:[%s36841_s2 + $0x248] sm:$0xff]  ;;  %v24465_v4 = vld [vmem:[%s36841_s2 + $0x740] sm:$0xff]  ;;  %v35313_v46 = vpack.c.bf16 %v24482_v51, %v24481_v32  ;;  %v24484_v32 = vld [vmem:[%s36841_s2 + $0x7d8] sm:$0xff] }
 0x46b   :  { %28985 = vmatpush3.bf16.msra.mxu1 %v35225_v36  ;;  %28955 = vmatprep.subr.bf16.mxu0 %v35227_v19  ;;  %v35301_v19 = vpack.c.bf16 %v24450_v63, %v24449_v58  ;;  %v24433_v36 = vld [vmem:[%s36841_s2 + $0x240] sm:$0xff]  ;;  %v24452_v58 = vld [vmem:[%s36841_s2 + $0x2d8] sm:$0xff]  ;;  %v24483_v63 = vld [vmem:[%s36841_s2 + $0x7d0] sm:$0xff] }
 0x46c   :  { %28987 = vmatprep.subr.bf16.mxu1 %v35240_v20  ;;  %37890 = vst [vmem:[#allocation73_spill] sm:$0xff] %v35295_v49  ;;  %v35299_v20 = vpack.c.bf16 %v24464_v28, %v24463_v40  ;;  %37893 = vst [vmem:[#allocation76_spill] sm:$0xff] %v35313_v46  ;;  %v24466_v40 = vld [vmem:[%s36841_s2 + $0x748] sm:$0xff]  ;;  %v24451_v28 = vld [vmem:[%s36841_s2 + $0x2d0] sm:$0xff]  ;;  %v35331_v51 = vpack.c.bf16 %v24434_v6, %v24433_v36  ;;  %v35349_v36 = vpack.c.bf16 %v24484_v32, %v24483_v63 }
 0x46d   :  { %37892 = vst [vmem:[#allocation75_spill] sm:$0xff] %v35301_v19  ;;  %v24467_v6 = vld [vmem:[%s36841_s2 + $0x750] sm:$0xff]  ;;  %v24486_v63 = vld [vmem:[%s36841_s2 + $0x7e8] sm:$0xff] }
 0x46e   :  { %28957 = vmatpush3.bf16.msra.mxu0 %v35259_v38  ;;  %37891 = vst [vmem:[#allocation74_spill] sm:$0xff] %v35299_v20  ;;  %37894 = vst [vmem:[#allocation77_spill] sm:$0xff] %v35331_v51  ;;  %v24436_v38 = vld [vmem:[%s36841_s2 + $0x258] sm:$0xff]  ;;  %v24494_v18 = vld [vmem:[%s36841_s2 + $0x328] sm:$0xff] }
 0x46f   :  { %28989 = vmatpush3.bf16.msra.mxu1 %v35263_v3  ;;  %28959 = vmatprep.subr.bf16.mxu0 %v35265_v24  ;;  %v35337_v24 = vpack.c.bf16 %v24452_v58, %v24451_v28  ;;  %v24435_v3 = vld [vmem:[%s36841_s2 + $0x250] sm:$0xff]  ;;  %37897 = vst [vmem:[#allocation79_spill] sm:$0xff] %v35349_v36  ;;  %v24454_v28 = vld [vmem:[%s36841_s2 + $0x2e8] sm:$0xff]  ;;  %v24485_v58 = vld [vmem:[%s36841_s2 + $0x7e0] sm:$0xff] }
 0x470   :  { %28991 = vmatprep.subr.bf16.mxu1 %v35277_v56  ;;  %v35335_v56 = vpack.c.bf16 %v24466_v40, %v24465_v4  ;;  %v24468_v4 = vld [vmem:[%s36841_s2 + $0x758] sm:$0xff]  ;;  %v24453_v40 = vld [vmem:[%s36841_s2 + $0x2e0] sm:$0xff]  ;;  %v35367_v32 = vpack.c.bf16 %v24436_v38, %v24435_v3  ;;  %v35385_v3 = vpack.c.bf16 %v24486_v63, %v24485_v58 }
 0x471   :  { %37896 = vst [vmem:[#allocation23_spill] sm:$0xff] %v35337_v24  ;;  %v24469_v38 = vld [vmem:[%s36841_s2 + $0x760] sm:$0xff]  ;;  %v24488_v58 = vld [vmem:[%s36841_s2 + $0x7f8] sm:$0xff] }
 0x472   :  { %28961 = vmatpush3.bf16.msra.mxu0 %v35295_v49  ;;  %37895 = vst [vmem:[#allocation78_spill] sm:$0xff] %v35335_v56  ;;  %37898 = vst [vmem:[#allocation82_spill] sm:$0xff] %v35367_v32  ;;  %v24438_v49 = vld [vmem:[%s36841_s2 + $0x268] sm:$0xff] }
 0x473   :  { %28993 = vmatpush3.bf16.msra.mxu1 %v35299_v20  ;;  %28963 = vmatprep.subr.bf16.mxu0 %v35301_v19  ;;  %v35373_v19 = vpack.c.bf16 %v24454_v28, %v24453_v40  ;;  %v24437_v20 = vld [vmem:[%s36841_s2 + $0x260] sm:$0xff]  ;;  %37901 = vst [vmem:[#allocation81_spill] sm:$0xff] %v35385_v3  ;;  %v24456_v40 = vld [vmem:[%s36841_s2 + $0x2f8] sm:$0xff]  ;;  %v24487_v28 = vld [vmem:[%s36841_s2 + $0x7f0] sm:$0xff] }
 0x474   :  { %28995 = vmatprep.subr.bf16.mxu1 %v35313_v46  ;;  %v35371_v46 = vpack.c.bf16 %v24468_v4, %v24467_v6  ;;  %v24470_v6 = vld [vmem:[%s36841_s2 + $0x768] sm:$0xff]  ;;  %v24455_v4 = vld [vmem:[%s36841_s2 + $0x2f0] sm:$0xff]  ;;  %v35403_v63 = vpack.c.bf16 %v24438_v49, %v24437_v20  ;;  %v35421_v49 = vpack.c.bf16 %v24488_v58, %v24487_v28 }
 0x475   :  { %37900 = vst [vmem:[#allocation22_spill] sm:$0xff] %v35373_v19  ;;  %v24471_v20 = vld [vmem:[%s36841_s2 + $0x770] sm:$0xff]  ;;  %v24538_v28 = vld [vmem:[%s36841_s2 + $0x888] sm:$0xff] }
 0x476   :  { %28965 = vmatpush3.bf16.msra.mxu0 %v35331_v51  ;;  %37899 = vst [vmem:[#allocation80_spill] sm:$0xff] %v35371_v46  ;;  %37902 = vst [vmem:[#allocation25_spill] sm:$0xff] %v35403_v63  ;;  %v24440_v51 = vld [vmem:[%s36841_s2 + $0x278] sm:$0xff] }
 0x477   :  { %28997 = vmatpush3.bf16.msra.mxu1 %v35335_v56  ;;  %28967 = vmatprep.subr.bf16.mxu0 %v35337_v24  ;;  %v35409_v24 = vpack.c.bf16 %v24456_v40, %v24455_v4  ;;  %v24439_v56 = vld [vmem:[%s36841_s2 + $0x270] sm:$0xff]  ;;  %37905 = vst [vmem:[#allocation85_spill] sm:$0xff] %v35421_v49  ;;  %v24506_v4 = vld [vmem:[%s36841_s2 + $0x388] sm:$0xff]  ;;  %v24537_v40 = vld [vmem:[%s36841_s2 + $0x880] sm:$0xff] }
 0x478   :  { %28999 = vmatprep.subr.bf16.mxu1 %v35349_v36  ;;  %v35407_v36 = vpack.c.bf16 %v24470_v6, %v24469_v38  ;;  %v24472_v38 = vld [vmem:[%s36841_s2 + $0x778] sm:$0xff]  ;;  %v24505_v6 = vld [vmem:[%s36841_s2 + $0x380] sm:$0xff]  ;;  %v35439_v58 = vpack.c.bf16 %v24440_v51, %v24439_v56  ;;  %v24490_v56 = vld [vmem:[%s36841_s2 + $0x308] sm:$0xff]  ;;  %v35456_v51 = vpack.c.bf16 %v24538_v28, %v24537_v40 }
 0x479   :  { %37904 = vst [vmem:[#allocation84_spill] sm:$0xff] %v35409_v24  ;;  %v24508_v40 = vld [vmem:[%s36841_s2 + $0x398] sm:$0xff]  ;;  %v35473_v28 = vpack.c.bf16 %v24490_v56, %v24489_v9  ;;  %v24491_v9 = vld [vmem:[%s36841_s2 + $0x310] sm:$0xff] }
 0x47a   :  { %28969 = vmatpush3.bf16.msra.mxu0 %v35367_v32  ;;  %37903 = vst [vmem:[#allocation83_spill] sm:$0xff] %v35407_v36  ;;  %37906 = vst [vmem:[#allocation86_spill] sm:$0xff] %v35439_v58  ;;  %v35447_v32 = vpack.c.bf16 %v24506_v4, %v24505_v6  ;;  %v24507_v4 = vld [vmem:[%s36841_s2 + $0x390] sm:$0xff]  ;;  %v24492_v56 = vld [vmem:[%s36841_s2 + $0x318] sm:$0xff] }
 0x47b   :  { %29001 = vmatpush3.bf16.msra.mxu1 %v35371_v46  ;;  %28971 = vmatprep.subr.bf16.mxu0 %v35373_v19  ;;  %v35445_v46 = vpack.c.bf16 %v24472_v38, %v24471_v20  ;;  %37910 = vst [vmem:[#allocation88_spill] sm:$0xff] %v35456_v51  ;;  %v24522_v20 = vld [vmem:[%s36841_s2 + $0x808] sm:$0xff]  ;;  %v37911_v38 = vld [vmem:[#allocation49_spill] sm:$0xff] }
 0x47c   :  { %29003 = vmatprep.subr.bf16.mxu1 %v35385_v3  ;;  %v37907_v3 = vld [vmem:[#allocation24_spill] sm:$0xff]  ;;  %37909 = vst [vmem:[#allocation87_spill] sm:$0xff] %v35447_v32  ;;  %v7442_v6 = vadd.f32 %v37911_v38, %v34510_v35  ;;  %37912 = vst [vmem:[#allocation49_spill] sm:$0xff] %v35473_v28  ;;  %v24540_v38 = vld [vmem:[%s36841_s2 + $0x898] sm:$0xff] }
 0x47d   :  { %v5685_v19 = vadd.f32 %v37907_v3, %v34810_v29  ;;  %37908 = vst [vmem:[#allocation24_spill] sm:$0xff] %v35445_v46  ;;  %v24521_v3 = vld [vmem:[%s36841_s2 + $0x800] sm:$0xff] }
 0x47e   :  { %28973 = vmatpush3.bf16.msra.mxu0 %v35403_v63 }
 0x47f   :  { %29005 = vmatpush3.bf16.msra.mxu1 %v35407_v36  ;;  %28975 = vmatprep.subr.bf16.mxu0 %v35409_v24  ;;  %v35481_v24 = vmax.f32 %v5685_v19, 0.0  ;;  %v35485_v36 = vpack.c.bf16 %v24522_v20, %v24521_v3  ;;  %v35497_v19 = vpack.c.bf16 %v24508_v40, %v24507_v4  ;;  %v24524_v3 = vld [vmem:[%s36841_s2 + $0x818] sm:$0xff]  ;;  %v24509_v20 = vld [vmem:[%s36841_s2 + $0x3a0] sm:$0xff]  ;;  %v24542_v40 = vld [vmem:[%s36841_s2 + $0x8a8] sm:$0xff] }
 0x480   :  { %29007 = vmatprep.subr.bf16.mxu1 %v35421_v49  ;;  %v24539_v49 = vld [vmem:[%s36841_s2 + $0x890] sm:$0xff]  ;;  %v24541_v4 = vld [vmem:[%s36841_s2 + $0x8a0] sm:$0xff] }
 0x481   :  { %37913 = vst [vmem:[#allocation89_spill] sm:$0xff] %v35485_v36  ;;  %37914 = vst [vmem:[#allocation90_spill] sm:$0xff] %v35497_v19  ;;  %v35511_v63 = vpack.c.bf16 %v24540_v38, %v24539_v49  ;;  %v24493_v38 = vld [vmem:[%s36841_s2 + $0x320] sm:$0xff] }
 0x482   :  { %28977 = vmatpush3.bf16.msra.mxu0 %v35439_v58  ;;  %v24523_v58 = vld [vmem:[%s36841_s2 + $0x810] sm:$0xff] }
 0x483   :  { %29009 = vmatpush3.bf16.msra.mxu1 %v35445_v46  ;;  %29011 = vmatprep.subr.bf16.mxu0 %v35447_v32  ;;  %v24510_v32 = vld [vmem:[%s36841_s2 + $0x3a8] sm:$0xff]  ;;  %v35508_v46 = vmax.f32 %v7442_v6, 0.0  ;;  %37915 = vst [vmem:[#allocation91_spill] sm:$0xff] %v35511_v63  ;;  %v35525_v49 = vpack.c.bf16 %v24524_v3, %v24523_v58  ;;  %v35540_v58 = vpack.c.bf16 %v24542_v40, %v24541_v4  ;;  %v24512_v3 = vld [vmem:[%s36841_s2 + $0x3b8] sm:$0xff] }
 0x484   :  { %29043 = vmatprep.subr.bf16.mxu1 %v35456_v51  ;;  %v35521_v51 = vpack.c.bf16 %v24492_v56, %v24491_v9  ;;  %v35527_v6 = vpack.c.bf16 %v24510_v32, %v24509_v20  ;;  %v24525_v9 = vld [vmem:[%s36841_s2 + $0x820] sm:$0xff]  ;;  %v24526_v32 = vld [vmem:[%s36841_s2 + $0x828] sm:$0xff]  ;;  %v24511_v56 = vld [vmem:[%s36841_s2 + $0x3b0] sm:$0xff]  ;;  %v35559_v40 = vpack.c.bf16 %v24494_v18, %v24493_v38 }
 0x485   :  { %20246 = vmatmul.mubr.f32.vlgmr.msra.gmra.mrb[48].mxu0 %v35481_v24  ;;  %37917 = vst [vmem:[#allocation93_spill] sm:$0xff] %v35525_v49  ;;  %37919 = vst [vmem:[#allocation95_spill] sm:$0xff] %v35540_v58  ;;  %v24543_v20 = vld [vmem:[%s36841_s2 + $0x8b0] sm:$0xff]  ;;  %v24544_v4 = vld [vmem:[%s36841_s2 + $0x8b8] sm:$0xff] }
 0x486   :  { %20350 = vmatmul.mubr.f32.vlgmr.msra.gmra.mrb[48].mxu1 %v35481_v24  ;;  %29013 = vmatpush3.bf16.msra.mxu0 %v35473_v28  ;;  %37916 = vst [vmem:[#allocation92_spill] sm:$0xff] %v35521_v51  ;;  %37918 = vst [vmem:[#allocation94_spill] sm:$0xff] %v35527_v6  ;;  %v24496_v28 = vld [vmem:[%s36841_s2 + $0x338] sm:$0xff]  ;;  %v24527_v18 = vld [vmem:[%s36841_s2 + $0x830] sm:$0xff]  ;;  %v35577_v38 = vpack.c.bf16 %v24544_v4, %v24543_v20 }
 0x487   :  { %20453 = vmatprep.mubr.f32.mxu0 %v35508_v46  ;;  %29045 = vmatpush3.bf16.msra.mxu1 %v35485_v36  ;;  %37920 = vst [vmem:[#allocation96_spill] sm:$0xff] %v35559_v40  ;;  %v35565_v36 = vpack.c.bf16 %v24512_v3, %v24511_v56  ;;  %v24514_v56 = vld [vmem:[%s36841_s2 + $0x3c8] sm:$0xff]  ;;  %v24545_v3 = vld [vmem:[%s36841_s2 + $0x8c0] sm:$0xff] }
 0x488   :  { %20557 = vmatprep.mubr.f32.mxu1 %v35508_v46  ;;  %29015 = vmatprep.subr.bf16.mxu0 %v35497_v19  ;;  %v35563_v19 = vpack.c.bf16 %v24526_v32, %v24525_v9  ;;  %37923 = vst [vmem:[#allocation99_spill] sm:$0xff] %v35577_v38  ;;  %v24528_v9 = vld [vmem:[%s36841_s2 + $0x838] sm:$0xff]  ;;  %v24513_v32 = vld [vmem:[%s36841_s2 + $0x3c0] sm:$0xff]  ;;  %v24546_v20 = vld [vmem:[%s36841_s2 + $0x8c8] sm:$0xff] }
 0x489   :  { %29047 = vmatprep.subr.bf16.mxu1 %v35511_v63  ;;  %37922 = vst [vmem:[#allocation98_spill] sm:$0xff] %v35565_v36  ;;  %v24495_v63 = vld [vmem:[%s36841_s2 + $0x330] sm:$0xff] }
 0x48a   :  { %29017 = vmatpush3.bf16.msra.mxu0 %v35521_v51  ;;  %37921 = vst [vmem:[#allocation97_spill] sm:$0xff] %v35563_v19  ;;  %v35595_v4 = vpack.c.bf16 %v24496_v28, %v24495_v63  ;;  %v24498_v51 = vld [vmem:[%s36841_s2 + $0x348] sm:$0xff]  ;;  %v24529_v63 = vld [vmem:[%s36841_s2 + $0x840] sm:$0xff] }
 0x48b   :  { %29049 = vmatpush3.bf16.msra.mxu1 %v35525_v49  ;;  %29019 = vmatprep.subr.bf16.mxu0 %v35527_v6  ;;  %v35601_v6 = vpack.c.bf16 %v24514_v56, %v24513_v32  ;;  %v24497_v49 = vld [vmem:[%s36841_s2 + $0x340] sm:$0xff]  ;;  %v24516_v32 = vld [vmem:[%s36841_s2 + $0x3d8] sm:$0xff] }
 0x48c   :  { %29051 = vmatprep.subr.bf16.mxu1 %v35540_v58  ;;  %37924 = vst [vmem:[#allocation100_spill] sm:$0xff] %v35595_v4  ;;  %v35599_v58 = vpack.c.bf16 %v24528_v9, %v24527_v18  ;;  %v24530_v18 = vld [vmem:[%s36841_s2 + $0x848] sm:$0xff]  ;;  %v24515_v9 = vld [vmem:[%s36841_s2 + $0x3d0] sm:$0xff]  ;;  %v35631_v33 = vpack.c.bf16 %v24498_v51, %v24497_v49  ;;  %v24532_v49 = vld [vmem:[%s36841_s2 + $0x858] sm:$0xff] }
 0x48d   :  { %37926 = vst [vmem:[#allocation102_spill] sm:$0xff] %v35601_v6  ;;  %v35635_v7 = vpack.c.bf16 %v24530_v18, %v24529_v63  ;;  %v35637_v34 = vpack.c.bf16 %v24516_v32, %v24515_v9  ;;  %v24531_v51 = vld [vmem:[%s36841_s2 + $0x850] sm:$0xff]  ;;  %v24518_v63 = vld [vmem:[%s36841_s2 + $0x3e8] sm:$0xff]  ;;  %v24549_v18 = vld [vmem:[%s36841_s2 + $0x8e0] sm:$0xff] }
 0x48e   :  { %29021 = vmatpush3.bf16.msra.mxu0 %v35559_v40  ;;  %37925 = vst [vmem:[#allocation101_spill] sm:$0xff] %v35599_v58  ;;  %37928 = vst [vmem:[#allocation104_spill] sm:$0xff] %v35631_v33  ;;  %v35671_v32 = vpack.c.bf16 %v24532_v49, %v24531_v51  ;;  %v24534_v51 = vld [vmem:[%s36841_s2 + $0x868] sm:$0xff]  ;;  %v24519_v49 = vld [vmem:[%s36841_s2 + $0x3f0] sm:$0xff] }
 0x48f   :  { %29053 = vmatpush3.bf16.msra.mxu1 %v35563_v19  ;;  %29023 = vmatprep.subr.bf16.mxu0 %v35565_v36  ;;  %v35613_v36 = vpack.c.bf16 %v24546_v20, %v24545_v3  ;;  %v24548_v3 = vld [vmem:[%s36841_s2 + $0x8d8] sm:$0xff]  ;;  %37929 = vst [vmem:[#allocation105_spill] sm:$0xff] %v35635_v7  ;;  %37930 = vst [vmem:[#allocation106_spill] sm:$0xff] %v35637_v34 }
 0x490   :  { %v17745_v28 = vpop.f32.mrb[36].mxu0  ;;  %29055 = vmatprep.subr.bf16.mxu1 %v35577_v38  ;;  %v24547_v38 = vld [vmem:[%s36841_s2 + $0x8d0] sm:$0xff]  ;;  %37933 = vst [vmem:[#allocation109_spill] sm:$0xff] %v35671_v32 }
 0x491   :  { %37927 = vst [vmem:[#allocation103_spill] sm:$0xff] %v35613_v36  ;;  %v17816_v56 = vpop.f32.mrb[36].mxu1  ;;  %v17747_v19 = vpop.f32.mrb[37].mxu0 }
 0x492   :  { %v17971_v20 = vmax.f32 %v17745_v28, %v17816_v56  ;;  %v17818_v40 = vpop.f32.mrb[37].mxu1  ;;  %29025 = vmatpush3.bf16.msra.mxu0 %v35595_v4  ;;  %v24500_v28 = vld [vmem:[%s36841_s2 + $0x358] sm:$0xff] }
 0x493   :  { %v17972_v1 = vmax.f32 %v17747_v19, %v17818_v40  ;;  %29057 = vmatpush3.bf16.msra.mxu1 %v35599_v58  ;;  %29027 = vmatprep.subr.bf16.mxu0 %v35601_v6  ;;  %v35649_v19 = vpack.c.bf16 %v24548_v3, %v24547_v38  ;;  %v24517_v40 = vld [vmem:[%s36841_s2 + $0x3e0] sm:$0xff]  ;;  %v24550_v38 = vld [vmem:[%s36841_s2 + $0x8e8] sm:$0xff]  ;;  %v35667_v9 = vpack.c.bf16 %v24500_v28, %v24499_v26 }
 0x494   :  { %29059 = vmatprep.subr.bf16.mxu1 %v35613_v36  ;;  %v35673_v56 = vpack.c.bf16 %v24518_v63, %v24517_v40  ;;  %v24501_v3 = vld [vmem:[%s36841_s2 + $0x360] sm:$0xff]  ;;  %v24502_v36 = vld [vmem:[%s36841_s2 + $0x368] sm:$0xff]  ;;  %v24520_v40 = vld [vmem:[%s36841_s2 + $0x3f8] sm:$0xff] }
 0x495   :  { %37931 = vst [vmem:[#allocation107_spill] sm:$0xff] %v35649_v19  ;;  %37932 = vst [vmem:[#allocation108_spill] sm:$0xff] %v35667_v9  ;;  %v24533_v26 = vld [vmem:[%s36841_s2 + $0x860] sm:$0xff]  ;;  %v35703_v6 = vpack.c.bf16 %v24502_v36, %v24501_v3  ;;  %v35709_v59 = vpack.c.bf16 %v24520_v40, %v24519_v49  ;;  %v24536_v3 = vld [vmem:[%s36841_s2 + $0x878] sm:$0xff] }
 0x496   :  { %29029 = vmatpush3.bf16.msra.mxu0 %v35631_v33  ;;  %37934 = vst [vmem:[#allocation110_spill] sm:$0xff] %v35673_v56  ;;  %v35707_v4 = vpack.c.bf16 %v24534_v51, %v24533_v26  ;;  %v24569_v26 = vld [vmem:[%s36841_s2 + $0x480] sm:$0xff]  ;;  %v24570_v51 = vld [vmem:[%s36841_s2 + $0x488] sm:$0xff] }
 0x497   :  { %29061 = vmatpush3.bf16.msra.mxu1 %v35635_v7  ;;  %29031 = vmatprep.subr.bf16.mxu0 %v35637_v34  ;;  %v35685_v34 = vpack.c.bf16 %v24550_v38, %v24549_v18  ;;  %v24552_v18 = vld [vmem:[%s36841_s2 + $0x8f8] sm:$0xff]  ;;  %37936 = vst [vmem:[#allocation112_spill] sm:$0xff] %v35703_v6  ;;  %37938 = vst [vmem:[#allocation114_spill] sm:$0xff] %v35709_v59 }
 0x498   :  { %v17887_v28 = vpop.f32.mrb[38].mxu0  ;;  %29063 = vmatprep.subr.bf16.mxu1 %v35649_v19  ;;  %v24551_v19 = vld [vmem:[%s36841_s2 + $0x8f0] sm:$0xff]  ;;  %37937 = vst [vmem:[#allocation113_spill] sm:$0xff] %v35707_v4 }
 0x499   :  { %37935 = vst [vmem:[#allocation111_spill] sm:$0xff] %v35685_v34  ;;  %v17958_v63 = vpop.f32.mrb[38].mxu1  ;;  %v17889_v7 = vpop.f32.mrb[39].mxu0  ;;  %v35723_v36 = vpack.c.bf16 %v24552_v18, %v24551_v19  ;;  %v24602_v19 = vld [vmem:[%s36841_s2 + $0x988] sm:$0xff] }
 0x49a   :  { %v17973_v38 = vmax.f32 %v17887_v28, %v17958_v63  ;;  %v17960_v33 = vpop.f32.mrb[39].mxu1  ;;  %29033 = vmatpush3.bf16.msra.mxu0 %v35667_v9  ;;  %v24504_v28 = vld [vmem:[%s36841_s2 + $0x378] sm:$0xff]  ;;  %v37943_v63 = vld [vmem:[#allocation48_spill] sm:$0xff] }
 0x49b   :  { %v17974_v58 = vmax.f32 %v17889_v7, %v17960_v33  ;;  %29065 = vmatpush3.bf16.msra.mxu1 %v35671_v32  ;;  %29035 = vmatprep.subr.bf16.mxu0 %v35673_v56  ;;  %v24535_v7 = vld [vmem:[%s36841_s2 + $0x870] sm:$0xff]  ;;  %37940 = vst [vmem:[#allocation116_spill] sm:$0xff] %v35723_v36  ;;  %v35743_v40 = vpack.c.bf16 %v24504_v28, %v24503_v16  ;;  %v24554_v16 = vld [vmem:[%s36841_s2 + $0x408] sm:$0xff] }
 0x49c   :  { %v35720_v33 = vmax.f32 %v17971_v20, %v17973_v38  ;;  %29067 = vmatprep.subr.bf16.mxu1 %v35685_v34  ;;  %v24601_v20 = vld [vmem:[%s36841_s2 + $0x980] sm:$0xff]  ;;  %v7441_v18 = vadd.f32 %v37943_v63, %v34810_v29 }
 0x49d   :  { %v35734_v49 = vmax.f32 %v17972_v1, %v17974_v58  ;;  %37942 = vst [vmem:[#allocation118_spill] sm:$0xff] %v35743_v40  ;;  %v35749_v1 = vpack.c.bf16 %v24536_v3, %v24535_v7  ;;  %v35751_v58 = vpack.c.bf16 %v24570_v51, %v24569_v26  ;;  %v24553_v38 = vld [vmem:[%s36841_s2 + $0x400] sm:$0xff]  ;;  %v35760_v28 = vpack.c.bf16 %v24602_v19, %v24601_v20  ;;  %v24586_v7 = vld [vmem:[%s36841_s2 + $0x908] sm:$0xff]  ;;  %v24571_v51 = vld [vmem:[%s36841_s2 + $0x490] sm:$0xff] }
 0x49e   :  { %37939 = vst [vmem:[#allocation115_spill] sm:$0xff] %v35720_v33  ;;  %29037 = vmatpush3.bf16.msra.mxu0 %v35703_v6  ;;  %v24585_v63 = vld [vmem:[%s36841_s2 + $0x900] sm:$0xff]  ;;  %v24572_v20 = vld [vmem:[%s36841_s2 + $0x498] sm:$0xff]  ;;  %v35777_v19 = vpack.c.bf16 %v24554_v16, %v24553_v38  ;;  %v24603_v33 = vld [vmem:[%s36841_s2 + $0x990] sm:$0xff] }
 0x49f   :  { %37941 = vst [vmem:[#allocation117_spill] sm:$0xff] %v35734_v49  ;;  %29069 = vmatpush3.bf16.msra.mxu1 %v35707_v4  ;;  %29039 = vmatprep.subr.bf16.mxu0 %v35709_v59  ;;  %37944 = vst [vmem:[#allocation48_spill] sm:$0xff] %v35749_v1  ;;  %v37947_v3 = vld [vmem:[#allocation26_spill] sm:$0xff]  ;;  %v35785_v49 = vmax.f32 %v7441_v18, 0.0  ;;  %v24555_v38 = vld [vmem:[%s36841_s2 + $0x410] sm:$0xff]  ;;  %v35801_v18 = vpack.c.bf16 %v24572_v20, %v24571_v51 }
 0x4a0   :  { %37945 = vst [vmem:[#allocation119_spill] sm:$0xff] %v35751_v58  ;;  %29071 = vmatprep.subr.bf16.mxu1 %v35723_v36  ;;  %37946 = vst [vmem:[#allocation120_spill] sm:$0xff] %v35760_v28  ;;  %v9198_v26 = vadd.f32 %v37947_v3, %v34510_v35  ;;  %v24604_v3 = vld [vmem:[%s36841_s2 + $0x998] sm:$0xff]  ;;  %v35789_v36 = vpack.c.bf16 %v24586_v7, %v24585_v63  ;;  %v24573_v7 = vld [vmem:[%s36841_s2 + $0x4a0] sm:$0xff] }
 0x4a1   :  { %37948 = vst [vmem:[#allocation26_spill] sm:$0xff] %v35777_v19  ;;  %v24556_v16 = vld [vmem:[%s36841_s2 + $0x418] sm:$0xff]  ;;  %37950 = vst [vmem:[#allocation122_spill] sm:$0xff] %v35801_v18  ;;  %v35815_v59 = vpack.c.bf16 %v24604_v3, %v24603_v33  ;;  %v24605_v51 = vld [vmem:[%s36841_s2 + $0x9a0] sm:$0xff] }
 0x4a2   :  { %29041 = vmatpush3.bf16.msra.mxu0 %v35743_v40  ;;  %37949 = vst [vmem:[#allocation121_spill] sm:$0xff] %v35789_v36  ;;  %v24587_v40 = vld [vmem:[%s36841_s2 + $0x910] sm:$0xff]  ;;  %v24588_v63 = vld [vmem:[%s36841_s2 + $0x918] sm:$0xff]  ;;  %v24606_v20 = vld [vmem:[%s36841_s2 + $0x9a8] sm:$0xff] }
 0x4a3   :  { %29073 = vmatpush3.bf16.msra.mxu1 %v35749_v1  ;;  %29075 = vmatprep.subr.bf16.mxu0 %v35751_v58  ;;  %v24574_v58 = vld [vmem:[%s36841_s2 + $0x4a8] sm:$0xff]  ;;  %v35812_v1 = vmax.f32 %v9198_v26, 0.0  ;;  %37951 = vst [vmem:[#allocation123_spill] sm:$0xff] %v35815_v59  ;;  %v35829_v33 = vpack.c.bf16 %v24588_v63, %v24587_v40  ;;  %v24557_v3 = vld [vmem:[%s36841_s2 + $0x420] sm:$0xff]  ;;  %v35844_v40 = vpack.c.bf16 %v24606_v20, %v24605_v51  ;;  %v24576_v63 = vld [vmem:[%s36841_s2 + $0x4b8] sm:$0xff] }
 0x4a4   :  { %29107 = vmatprep.subr.bf16.mxu1 %v35760_v28  ;;  %v35825_v28 = vpack.c.bf16 %v24556_v16, %v24555_v38  ;;  %v35831_v26 = vpack.c.bf16 %v24574_v58, %v24573_v7  ;;  %v24558_v4 = vld [vmem:[%s36841_s2 + $0x428] sm:$0xff]  ;;  %v24589_v38 = vld [vmem:[%s36841_s2 + $0x920] sm:$0xff]  ;;  %v24575_v16 = vld [vmem:[%s36841_s2 + $0x4b0] sm:$0xff] }
 0x4a5   :  { %20454 = vmatmul.mubr.f32.vlgmr.msra.gmra.mrb[50].mxu0 %v35785_v49  ;;  %37953 = vst [vmem:[#allocation125_spill] sm:$0xff] %v35829_v33  ;;  %37955 = vst [vmem:[#allocation127_spill] sm:$0xff] %v35844_v40  ;;  %v24590_v58 = vld [vmem:[%s36841_s2 + $0x928] sm:$0xff]  ;;  %v24607_v7 = vld [vmem:[%s36841_s2 + $0x9b0] sm:$0xff]  ;;  %v35863_v20 = vpack.c.bf16 %v24558_v4, %v24557_v3 }
 0x4a6   :  { %20558 = vmatmul.mubr.f32.vlgmr.msra.gmra.mrb[50].mxu1 %v35785_v49  ;;  %29077 = vmatpush3.bf16.msra.mxu0 %v35777_v19  ;;  %37952 = vst [vmem:[#allocation124_spill] sm:$0xff] %v35825_v28  ;;  %37954 = vst [vmem:[#allocation126_spill] sm:$0xff] %v35831_v26  ;;  %v24608_v51 = vld [vmem:[%s36841_s2 + $0x9b8] sm:$0xff]  ;;  %v24591_v4 = vld [vmem:[%s36841_s2 + $0x930] sm:$0xff] }
 0x4a7   :  { %20661 = vmatprep.mubr.f32.mxu0 %v35812_v1  ;;  %29109 = vmatpush3.bf16.msra.mxu1 %v35789_v36  ;;  %37956 = vst [vmem:[#allocation128_spill] sm:$0xff] %v35863_v20  ;;  %v35869_v36 = vpack.c.bf16 %v24576_v63, %v24575_v16  ;;  %v24560_v19 = vld [vmem:[%s36841_s2 + $0x438] sm:$0xff]  ;;  %v35881_v3 = vpack.c.bf16 %v24608_v51, %v24607_v7  ;;  %v24578_v16 = vld [vmem:[%s36841_s2 + $0x4c8] sm:$0xff]  ;;  %v24609_v63 = vld [vmem:[%s36841_s2 + $0x9c0] sm:$0xff] }
 0x4a8   :  { %20765 = vmatprep.mubr.f32.mxu1 %v35812_v1  ;;  %29079 = vmatprep.subr.bf16.mxu0 %v35801_v18  ;;  %v35867_v18 = vpack.c.bf16 %v24590_v58, %v24589_v38  ;;  %v24592_v38 = vld [vmem:[%s36841_s2 + $0x938] sm:$0xff]  ;;  %v24577_v58 = vld [vmem:[%s36841_s2 + $0x4c0] sm:$0xff]  ;;  %v24610_v7 = vld [vmem:[%s36841_s2 + $0x9c8] sm:$0xff] }
 0x4a9   :  { %29111 = vmatprep.subr.bf16.mxu1 %v35815_v59  ;;  %37958 = vst [vmem:[#allocation130_spill] sm:$0xff] %v35869_v36  ;;  %v24559_v59 = vld [vmem:[%s36841_s2 + $0x430] sm:$0xff]  ;;  %37959 = vst [vmem:[#allocation131_spill] sm:$0xff] %v35881_v3 }
 0x4aa   :  { %29081 = vmatpush3.bf16.msra.mxu0 %v35825_v28  ;;  %37957 = vst [vmem:[#allocation129_spill] sm:$0xff] %v35867_v18  ;;  %v35899_v51 = vpack.c.bf16 %v24560_v19, %v24559_v59  ;;  %v24562_v28 = vld [vmem:[%s36841_s2 + $0x448] sm:$0xff]  ;;  %v24593_v59 = vld [vmem:[%s36841_s2 + $0x940] sm:$0xff]  ;;  %v35917_v19 = vpack.c.bf16 %v24610_v7, %v24609_v63  ;;  %v24612_v63 = vld [vmem:[%s36841_s2 + $0x9d8] sm:$0xff] }
 0x4ab   :  { %29113 = vmatpush3.bf16.msra.mxu1 %v35829_v33  ;;  %29083 = vmatprep.subr.bf16.mxu0 %v35831_v26  ;;  %v35905_v26 = vpack.c.bf16 %v24578_v16, %v24577_v58  ;;  %v24561_v33 = vld [vmem:[%s36841_s2 + $0x440] sm:$0xff]  ;;  %v24580_v58 = vld [vmem:[%s36841_s2 + $0x4d8] sm:$0xff]  ;;  %v24611_v16 = vld [vmem:[%s36841_s2 + $0x9d0] sm:$0xff] }
 0x4ac   :  { %29115 = vmatprep.subr.bf16.mxu1 %v35844_v40  ;;  %37960 = vst [vmem:[#allocation132_spill] sm:$0xff] %v35899_v51  ;;  %v35903_v40 = vpack.c.bf16 %v24592_v38, %v24591_v4  ;;  %37963 = vst [vmem:[#allocation135_spill] sm:$0xff] %v35917_v19  ;;  %v24594_v4 = vld [vmem:[%s36841_s2 + $0x948] sm:$0xff]  ;;  %v24579_v38 = vld [vmem:[%s36841_s2 + $0x4d0] sm:$0xff]  ;;  %v35935_v7 = vpack.c.bf16 %v24562_v28, %v24561_v33  ;;  %v35953_v33 = vpack.c.bf16 %v24612_v63, %v24611_v16 }
 0x4ad   :  { %37962 = vst [vmem:[#allocation134_spill] sm:$0xff] %v35905_v26  ;;  %v24595_v28 = vld [vmem:[%s36841_s2 + $0x950] sm:$0xff]  ;;  %v24614_v16 = vld [vmem:[%s36841_s2 + $0x9e8] sm:$0xff] }
 0x4ae   :  { %29085 = vmatpush3.bf16.msra.mxu0 %v35863_v20  ;;  %37961 = vst [vmem:[#allocation133_spill] sm:$0xff] %v35903_v40  ;;  %37964 = vst [vmem:[#allocation136_spill] sm:$0xff] %v35935_v7  ;;  %v24564_v20 = vld [vmem:[%s36841_s2 + $0x458] sm:$0xff] }
 0x4af   :  { %29117 = vmatpush3.bf16.msra.mxu1 %v35867_v18  ;;  %29087 = vmatprep.subr.bf16.mxu0 %v35869_v36  ;;  %v35941_v36 = vpack.c.bf16 %v24580_v58, %v24579_v38  ;;  %v24563_v18 = vld [vmem:[%s36841_s2 + $0x450] sm:$0xff]  ;;  %37967 = vst [vmem:[#allocation139_spill] sm:$0xff] %v35953_v33  ;;  %v24582_v38 = vld [vmem:[%s36841_s2 + $0x4e8] sm:$0xff]  ;;  %v24613_v58 = vld [vmem:[%s36841_s2 + $0x9e0] sm:$0xff] }
 0x4b0   :  { %29119 = vmatprep.subr.bf16.mxu1 %v35881_v3  ;;  %v35939_v3 = vpack.c.bf16 %v24594_v4, %v24593_v59  ;;  %v24596_v59 = vld [vmem:[%s36841_s2 + $0x958] sm:$0xff]  ;;  %v24581_v4 = vld [vmem:[%s36841_s2 + $0x4e0] sm:$0xff]  ;;  %v35971_v63 = vpack.c.bf16 %v24564_v20, %v24563_v18  ;;  %v35989_v20 = vpack.c.bf16 %v24614_v16, %v24613_v58 }
 0x4b1   :  { %37966 = vst [vmem:[#allocation138_spill] sm:$0xff] %v35941_v36  ;;  %v24597_v18 = vld [vmem:[%s36841_s2 + $0x960] sm:$0xff]  ;;  %v24616_v58 = vld [vmem:[%s36841_s2 + $0x9f8] sm:$0xff] }
 0x4b2   :  { %29089 = vmatpush3.bf16.msra.mxu0 %v35899_v51  ;;  %37965 = vst [vmem:[#allocation137_spill] sm:$0xff] %v35939_v3  ;;  %v24566_v51 = vld [vmem:[%s36841_s2 + $0x468] sm:$0xff] }
 0x4b3   :  { %29121 = vmatpush3.bf16.msra.mxu1 %v35903_v40  ;;  %29091 = vmatprep.subr.bf16.mxu0 %v35905_v26  ;;  %v35977_v26 = vpack.c.bf16 %v24582_v38, %v24581_v4  ;;  %v24565_v40 = vld [vmem:[%s36841_s2 + $0x460] sm:$0xff]  ;;  %v24584_v4 = vld [vmem:[%s36841_s2 + $0x4f8] sm:$0xff]  ;;  %v24615_v38 = vld [vmem:[%s36841_s2 + $0x9f0] sm:$0xff] }
 0x4b4   :  { %29123 = vmatprep.subr.bf16.mxu1 %v35917_v19  ;;  %v35975_v19 = vpack.c.bf16 %v24596_v59, %v24595_v28  ;;  %v24598_v28 = vld [vmem:[%s36841_s2 + $0x968] sm:$0xff]  ;;  %v24583_v59 = vld [vmem:[%s36841_s2 + $0x4f0] sm:$0xff]  ;;  %v36007_v16 = vpack.c.bf16 %v24566_v51, %v24565_v40  ;;  %v36022_v40 = vpack.c.bf16 %v24616_v58, %v24615_v38 }
 0x4b5   :  { %v24599_v51 = vld [vmem:[%s36841_s2 + $0x970] sm:$0xff] }
 0x4b6   :  { %29093 = vmatpush3.bf16.msra.mxu0 %v35935_v7  ;;  %v24568_v7 = vld [vmem:[%s36841_s2 + $0x478] sm:$0xff] }
 0x4b7   :  { %29125 = vmatpush3.bf16.msra.mxu1 %v35939_v3  ;;  %29095 = vmatprep.subr.bf16.mxu0 %v35941_v36  ;;  %v36013_v36 = vpack.c.bf16 %v24584_v4, %v24583_v59  ;;  %v24567_v3 = vld [vmem:[%s36841_s2 + $0x470] sm:$0xff]  ;;  %v37968_v59 = vld [vmem:[#allocation51_spill] sm:$0xff] }
 0x4b8   :  { %29127 = vmatprep.subr.bf16.mxu1 %v35953_v33  ;;  %v36011_v33 = vpack.c.bf16 %v24598_v28, %v24597_v18  ;;  %v24600_v18 = vld [vmem:[%s36841_s2 + $0x978] sm:$0xff]  ;;  %v36031_v28 = vpack.c.bf16 %v24568_v7, %v24567_v3  ;;  %v9197_v4 = vadd.f32 %v37968_v59, %v34810_v29  ;;  %v37969_v3 = vld [vmem:[#allocation44_spill] sm:$0xff]  ;;  %v37970_v7 = vld [vmem:[#allocation46_spill] sm:$0xff] }
 0x4b9   :  { %v36037_v38 = vpack.c.bf16 %v24600_v18, %v24599_v51  ;;  %v37971_v51 = vld [vmem:[#allocation50_spill] sm:$0xff]  ;;  %v37972_v18 = vld [vmem:[#allocation52_spill] sm:$0xff] }
 0x4ba   :  { %29097 = vmatpush3.bf16.msra.mxu0 %v35971_v63  ;;  %v36041_v58 = vmax.f32 %v9197_v4, 0.0  ;;  %v37973_v59 = vld [vmem:[#allocation2_spill] sm:$0xff]  ;;  %v37974_v4 = vld [vmem:[#allocation3_spill] sm:$0xff] }
 0x4bb   :  { %29129 = vmatpush3.bf16.msra.mxu1 %v35975_v19  ;;  %29099 = vmatprep.subr.bf16.mxu0 %v35977_v26 }
 0x4bc   :  { %29131 = vmatprep.subr.bf16.mxu1 %v35989_v20 }
 0x4be   :  { %29101 = vmatpush3.bf16.msra.mxu0 %v36007_v16 }
 0x4bf   :  { %29133 = vmatpush3.bf16.msra.mxu1 %v36011_v33  ;;  %29103 = vmatprep.subr.bf16.mxu0 %v36013_v36 }
 0x4c0   :  { %29135 = vmatprep.subr.bf16.mxu1 %v36022_v40 }
 0x4c2   :  { %29105 = vmatpush3.bf16.msra.mxu0 %v36031_v28 }
 0x4c3   :  { %29137 = vmatpush3.bf16.msra.mxu1 %v36037_v38  ;;  %29139 = vmatprep.subr.bf16.mxu0 %v34518_v37 }
 0x4c4   :  { %29171 = vmatprep.subr.bf16.mxu1 %v34530_v62 }
 0x4c5   :  { %20662 = vmatmul.mubr.f32.vlgmr.msra.gmra.mrb[52].mxu0 %v36041_v58 }
 0x4c6   :  { %20766 = vmatmul.mubr.f32.vlgmr.msra.gmra.mrb[52].mxu1 %v36041_v58  ;;  %29141 = vmatpush3.bf16.msra.mxu0 %v34552_v17 }
 0x4c7   :  { %20837 = vmatprep.mubr.f32.mxu0 %v35508_v46  ;;  %29173 = vmatpush3.bf16.msra.mxu1 %v34568_v25 }
 0x4c8   :  { %20907 = vmatprep.mubr.f32.mxu1 %v35206_v50  ;;  %29143 = vmatprep.subr.bf16.mxu0 %v34580_v15 }
 0x4c9   :  { %29175 = vmatprep.subr.bf16.mxu1 %v34593_v23 }
 0x4ca   :  { %29145 = vmatpush3.bf16.msra.mxu0 %v34604_v41 }
 0x4cb   :  { %29177 = vmatpush3.bf16.msra.mxu1 %v34609_v42  ;;  %29147 = vmatprep.subr.bf16.mxu0 %v34611_v48 }
 0x4cc   :  { %29179 = vmatprep.subr.bf16.mxu1 %v34625_v0 }
 0x4ce   :  { %29149 = vmatpush3.bf16.msra.mxu0 %v34644_v45 }
 0x4cf   :  { %29181 = vmatpush3.bf16.msra.mxu1 %v34648_v21  ;;  %29151 = vmatprep.subr.bf16.mxu0 %v34650_v22 }
 0x4d0   :  { %29183 = vmatprep.subr.bf16.mxu1 %v34662_v55 }
 0x4d2   :  { %29153 = vmatpush3.bf16.msra.mxu0 %v34680_v43 }
 0x4d3   :  { %29185 = vmatpush3.bf16.msra.mxu1 %v34684_v44  ;;  %29155 = vmatprep.subr.bf16.mxu0 %v34686_v5 }
 0x4d4   :  { %29187 = vmatprep.subr.bf16.mxu1 %v34700_v10 }
 0x4d6   :  { %29157 = vmatpush3.bf16.msra.mxu0 %v34719_v11 }
 0x4d7   :  { %29189 = vmatpush3.bf16.msra.mxu1 %v34723_v14  ;;  %29159 = vmatprep.subr.bf16.mxu0 %v34725_v61 }
 0x4d8   :  { %29191 = vmatprep.subr.bf16.mxu1 %v34737_v57 }
 0x4da   :  { %29161 = vmatpush3.bf16.msra.mxu0 %v34755_v39 }
 0x4db   :  { %29193 = vmatpush3.bf16.msra.mxu1 %v34759_v2  ;;  %29163 = vmatprep.subr.bf16.mxu0 %v34761_v31 }
 0x4dc   :  { %29195 = vmatprep.subr.bf16.mxu1 %v34774_v13 }
 0x4de   :  { %29165 = vmatpush3.bf16.msra.mxu0 %v34792_v47  ;;  %v37996_v47 = vld [vmem:[#allocation55_spill] sm:$0xff] }
 0x4df   :  { %29197 = vmatpush3.bf16.msra.mxu1 %v34796_v30  ;;  %29167 = vmatprep.subr.bf16.mxu0 %v34798_v27  ;;  %v37987_v27 = vld [vmem:[#allocation16_spill] sm:$0xff] }
 0x4e0   :  { %29199 = vmatprep.subr.bf16.mxu1 %v34815_v60  ;;  %v37981_v60 = vld [vmem:[#allocation10_spill] sm:$0xff] }
 0x4e2   :  { %29169 = vmatpush3.bf16.msra.mxu0 %v34835_v54 }
 0x4e3   :  { %29201 = vmatpush3.bf16.msra.mxu1 %v34843_v52  ;;  %29203 = vmatprep.subr.bf16.mxu0 %v34845_v8  ;;  %v37976_v8 = vld [vmem:[#allocation5_spill] sm:$0xff] }
 0x4e4   :  { %29235 = vmatprep.subr.bf16.mxu1 %v34858_v12  ;;  %v37975_v12 = vld [vmem:[#allocation4_spill] sm:$0xff] }
 0x4e5   :  { %20838 = vmatmul.mubr.f32.vlgmr.msra.gmra.mrb[54].mxu0 %v35785_v49 }
 0x4e6   :  { %20908 = vmatmul.mubr.f32.vlgmr.msra.gmra.mrb[54].mxu1 %v35481_v24  ;;  %29205 = vmatpush3.bf16.msra.mxu0 %v34873_v53  ;;  %v37977_v53 = vld [vmem:[#allocation6_spill] sm:$0xff] }
 0x4e7   :  { %20977 = vmatprep.mubr.f32.mxu0 %v35508_v46  ;;  %29237 = vmatpush3.bf16.msra.mxu1 %v37969_v3  ;;  %v37978_v46 = vld [vmem:[#allocation7_spill] sm:$0xff] }
 0x4e8   :  { %21047 = vmatprep.mubr.f32.mxu1 %v35206_v50  ;;  %29207 = vmatprep.subr.bf16.mxu0 %v37970_v7  ;;  %v37979_v50 = vld [vmem:[#allocation8_spill] sm:$0xff] }
 0x4e9   :  { %29239 = vmatprep.subr.bf16.mxu1 %v37971_v51 }
 0x4ea   :  { %29209 = vmatpush3.bf16.msra.mxu0 %v37972_v18  ;;  %v37980_v18 = vld [vmem:[#allocation9_spill] sm:$0xff] }
 0x4eb   :  { %29241 = vmatpush3.bf16.msra.mxu1 %v37973_v59  ;;  %29211 = vmatprep.subr.bf16.mxu0 %v37974_v4  ;;  %v37982_v4 = vld [vmem:[#allocation11_spill] sm:$0xff] }
 0x4ec   :  { %29243 = vmatprep.subr.bf16.mxu1 %v37975_v12  ;;  %v37983_v12 = vld [vmem:[#allocation12_spill] sm:$0xff] }
 0x4ee   :  { %29213 = vmatpush3.bf16.msra.mxu0 %v37976_v8  ;;  %v37984_v8 = vld [vmem:[#allocation13_spill] sm:$0xff] }
 0x4ef   :  { %29245 = vmatpush3.bf16.msra.mxu1 %v37977_v53  ;;  %29215 = vmatprep.subr.bf16.mxu0 %v37978_v46  ;;  %v37985_v53 = vld [vmem:[#allocation14_spill] sm:$0xff]  ;;  %v37986_v46 = vld [vmem:[#allocation15_spill] sm:$0xff] }
 0x4f0   :  { %v19501_v3 = vpop.f32.mrb[40].mxu0  ;;  %29247 = vmatprep.subr.bf16.mxu1 %v37979_v50 }
 0x4f1   :  { %v19572_v7 = vpop.f32.mrb[40].mxu1  ;;  %v19503_v52 = vpop.f32.mrb[41].mxu0 }
 0x4f2   :  { %v19727_v51 = vmax.f32 %v19501_v3, %v19572_v7  ;;  %v19574_v54 = vpop.f32.mrb[41].mxu1  ;;  %29217 = vmatpush3.bf16.msra.mxu0 %v37980_v18 }
 0x4f3   :  { %v19728_v59 = vmax.f32 %v19503_v52, %v19574_v54  ;;  %29249 = vmatpush3.bf16.msra.mxu1 %v37981_v60  ;;  %29219 = vmatprep.subr.bf16.mxu0 %v37982_v4  ;;  %v37988_v54 = vld [vmem:[#allocation17_spill] sm:$0xff]  ;;  %v37989_v60 = vld [vmem:[#allocation18_spill] sm:$0xff]  ;;  %v37990_v4 = vld [vmem:[#allocation19_spill] sm:$0xff] }
 0x4f4   :  { %29251 = vmatprep.subr.bf16.mxu1 %v37983_v12 }
 0x4f6   :  { %29221 = vmatpush3.bf16.msra.mxu0 %v37984_v8  ;;  %v37992_v8 = vld [vmem:[#allocation20_spill] sm:$0xff] }
 0x4f7   :  { %29253 = vmatpush3.bf16.msra.mxu1 %v37985_v53  ;;  %29223 = vmatprep.subr.bf16.mxu0 %v37986_v46  ;;  %v37994_v46 = vld [vmem:[#allocation21_spill] sm:$0xff] }
 0x4f8   :  { %v19643_v50 = vpop.f32.mrb[42].mxu0  ;;  %29255 = vmatprep.subr.bf16.mxu1 %v37987_v27  ;;  %v37995_v27 = vld [vmem:[#allocation54_spill] sm:$0xff] }
 0x4f9   :  { %v19714_v3 = vpop.f32.mrb[42].mxu1  ;;  %v19645_v7 = vpop.f32.mrb[43].mxu0 }
 0x4fa   :  { %v19729_v30 = vmax.f32 %v19643_v50, %v19714_v3  ;;  %v19716_v18 = vpop.f32.mrb[43].mxu1  ;;  %29225 = vmatpush3.bf16.msra.mxu0 %v37988_v54  ;;  %v37997_v50 = vld [vmem:[#allocation56_spill] sm:$0xff]  ;;  %v37998_v3 = vld [vmem:[#allocation57_spill] sm:$0xff] }
 0x4fb   :  { %v19730_v52 = vmax.f32 %v19645_v7, %v19716_v18  ;;  %29257 = vmatpush3.bf16.msra.mxu1 %v37989_v60  ;;  %29227 = vmatprep.subr.bf16.mxu0 %v37990_v4  ;;  %v37999_v18 = vld [vmem:[#allocation58_spill] sm:$0xff]  ;;  %v38000_v7 = vld [vmem:[#allocation59_spill] sm:$0xff] }
 0x4fc   :  { %v36109_v12 = vmax.f32 %v19727_v51, %v19729_v30  ;;  %29259 = vmatprep.subr.bf16.mxu1 %v37992_v8  ;;  %v38001_v30 = vld [vmem:[#allocation60_spill] sm:$0xff]  ;;  %v38002_v51 = vld [vmem:[#allocation61_spill] sm:$0xff] }
 0x4fd   :  { %v36112_v53 = vmax.f32 %v19728_v59, %v19730_v52  ;;  %v38003_v59 = vld [vmem:[#allocation62_spill] sm:$0xff]  ;;  %v38004_v52 = vld [vmem:[#allocation63_spill] sm:$0xff] }
 0x4fe   :  { %37991 = vst [vmem:[#allocation51_spill] sm:$0xff] %v36109_v12  ;;  %29229 = vmatpush3.bf16.msra.mxu0 %v37994_v46  ;;  %v38005_v12 = vld [vmem:[#allocation64_spill] sm:$0xff]  ;;  %v38029_v46 = vld [vmem:[#allocation85_spill] sm:$0xff] }
 0x4ff   :  { %37993 = vst [vmem:[#allocation17_spill] sm:$0xff] %v36112_v53  ;;  %29261 = vmatpush3.bf16.msra.mxu1 %v37995_v27  ;;  %29231 = vmatprep.subr.bf16.mxu0 %v37996_v47  ;;  %v38006_v53 = vld [vmem:[#allocation65_spill] sm:$0xff]  ;;  %v38023_v27 = vld [vmem:[#allocation80_spill] sm:$0xff] }
 0x500   :  { %29263 = vmatprep.subr.bf16.mxu1 %v37997_v50 }
 0x502   :  { %29233 = vmatpush3.bf16.msra.mxu0 %v37998_v3  ;;  %v38014_v3 = vld [vmem:[#allocation73_spill] sm:$0xff] }
 0x503   :  { %29265 = vmatpush3.bf16.msra.mxu1 %v37999_v18  ;;  %29267 = vmatprep.subr.bf16.mxu0 %v38000_v7  ;;  %v38007_v7 = vld [vmem:[#allocation66_spill] sm:$0xff]  ;;  %v38012_v18 = vld [vmem:[#allocation71_spill] sm:$0xff] }
 0x504   :  { %29299 = vmatprep.subr.bf16.mxu1 %v38001_v30  ;;  %v38008_v30 = vld [vmem:[#allocation67_spill] sm:$0xff] }
 0x505   :  { %20978 = vmatmul.mubr.f32.vlgmr.msra.gmra.mrb[56].mxu0 %v35785_v49  ;;  %v38009_v49 = vld [vmem:[#allocation68_spill] sm:$0xff] }
 0x506   :  { %21048 = vmatmul.mubr.f32.vlgmr.msra.gmra.mrb[56].mxu1 %v35481_v24  ;;  %29269 = vmatpush3.bf16.msra.mxu0 %v38002_v51  ;;  %v38010_v24 = vld [vmem:[#allocation69_spill] sm:$0xff]  ;;  %v38011_v51 = vld [vmem:[#allocation70_spill] sm:$0xff] }
 0x507   :  { %21117 = vmatprep.mubr.f32.mxu0 %v35812_v1  ;;  %29301 = vmatpush3.bf16.msra.mxu1 %v38003_v59  ;;  %v38013_v59 = vld [vmem:[#allocation72_spill] sm:$0xff] }
 0x508   :  { %21188 = vmatprep.mubr.f32.mxu1 %v35812_v1  ;;  %29271 = vmatprep.subr.bf16.mxu0 %v38004_v52  ;;  %v38015_v52 = vld [vmem:[#allocation74_spill] sm:$0xff] }
 0x509   :  { %29303 = vmatprep.subr.bf16.mxu1 %v38005_v12  ;;  %v38016_v12 = vld [vmem:[#allocation75_spill] sm:$0xff] }
 0x50a   :  { %29273 = vmatpush3.bf16.msra.mxu0 %v38006_v53  ;;  %v38017_v53 = vld [vmem:[#allocation76_spill] sm:$0xff] }
 0x50b   :  { %29305 = vmatpush3.bf16.msra.mxu1 %v38007_v7  ;;  %29275 = vmatprep.subr.bf16.mxu0 %v38008_v30  ;;  %v38018_v7 = vld [vmem:[#allocation77_spill] sm:$0xff]  ;;  %v38019_v30 = vld [vmem:[#allocation78_spill] sm:$0xff] }
 0x50c   :  { %29307 = vmatprep.subr.bf16.mxu1 %v38009_v49  ;;  %v38020_v49 = vld [vmem:[#allocation23_spill] sm:$0xff] }
 0x50e   :  { %29277 = vmatpush3.bf16.msra.mxu0 %v38010_v24 }
 0x50f   :  { %29309 = vmatpush3.bf16.msra.mxu1 %v38011_v51  ;;  %29279 = vmatprep.subr.bf16.mxu0 %v38012_v18  ;;  %v38021_v51 = vld [vmem:[#allocation79_spill] sm:$0xff] }
 0x510   :  { %29311 = vmatprep.subr.bf16.mxu1 %v38013_v59 }
 0x512   :  { %29281 = vmatpush3.bf16.msra.mxu0 %v38014_v3  ;;  %v38022_v3 = vld [vmem:[#allocation82_spill] sm:$0xff] }
 0x513   :  { %29313 = vmatpush3.bf16.msra.mxu1 %v38015_v52  ;;  %29283 = vmatprep.subr.bf16.mxu0 %v38016_v12  ;;  %v38024_v12 = vld [vmem:[#allocation22_spill] sm:$0xff] }
 0x514   :  { %29315 = vmatprep.subr.bf16.mxu1 %v38017_v53  ;;  %v38025_v53 = vld [vmem:[#allocation81_spill] sm:$0xff] }
 0x516   :  { %29285 = vmatpush3.bf16.msra.mxu0 %v38018_v7 }
 0x517   :  { %29317 = vmatpush3.bf16.msra.mxu1 %v38019_v30  ;;  %29287 = vmatprep.subr.bf16.mxu0 %v38020_v49  ;;  %v38026_v30 = vld [vmem:[#allocation25_spill] sm:$0xff]  ;;  %v38027_v49 = vld [vmem:[#allocation83_spill] sm:$0xff] }
 0x518   :  { %v24658_v24 = vpop.f32.mrb[44].mxu0  ;;  %29319 = vmatprep.subr.bf16.mxu1 %v38021_v51  ;;  %v38028_v51 = vld [vmem:[#allocation84_spill] sm:$0xff] }
 0x519   :  { %v24693_v18 = vpop.f32.mrb[44].mxu1  ;;  %v24659_v50 = vpop.f32.mrb[45].mxu0 }
 0x51a   :  { %v24660_v59 = vadd.f32 %v24659_v50, %v24658_v24  ;;  %v24694_v47 = vpop.f32.mrb[45].mxu1  ;;  %29289 = vmatpush3.bf16.msra.mxu0 %v38022_v3  ;;  %v38030_v50 = vld [vmem:[#allocation28_spill] sm:$0xff] }
 0x51b   :  { %v24695_v52 = vadd.f32 %v24694_v47, %v24693_v18  ;;  %29321 = vmatpush3.bf16.msra.mxu1 %v38023_v27  ;;  %29291 = vmatprep.subr.bf16.mxu0 %v38024_v12  ;;  %v10954_v24 = vadd.f32 %v38030_v50, %v34510_v35  ;;  %v38031_v47 = vld [vmem:[#allocation86_spill] sm:$0xff]  ;;  %v38032_v18 = vld [vmem:[#allocation24_spill] sm:$0xff]  ;;  %v38033_v12 = vld [vmem:[#allocation87_spill] sm:$0xff] }
 0x51c   :  { %29323 = vmatprep.subr.bf16.mxu1 %v38025_v53  ;;  %v38034_v53 = vld [vmem:[#allocation88_spill] sm:$0xff]  ;;  %v38037_v50 = vld [vmem:[#allocation90_spill] sm:$0xff] }
 0x51d   :  { %v36150_v7 = vadd.f32 %v24695_v52, %v24660_v59  ;;  %v36162_v59 = vmax.f32 %v10954_v24, 0.0  ;;  %v38035_v52 = vld [vmem:[#allocation49_spill] sm:$0xff] }
 0x51e   :  { %29293 = vmatpush3.bf16.msra.mxu0 %v38026_v30  ;;  %v38040_v24 = vld [vmem:[#allocation93_spill] sm:$0xff]  ;;  %v38047_v30 = vld [vmem:[#allocation100_spill] sm:$0xff] }
 0x51f   :  { %29325 = vmatpush3.bf16.msra.mxu1 %v38027_v49  ;;  %29295 = vmatprep.subr.bf16.mxu0 %v38028_v51  ;;  %v38043_v51 = vld [vmem:[#allocation96_spill] sm:$0xff]  ;;  %v38045_v49 = vld [vmem:[#allocation98_spill] sm:$0xff] }
 0x520   :  { %29327 = vmatprep.subr.bf16.mxu1 %v38029_v46  ;;  %v38036_v46 = vld [vmem:[#allocation89_spill] sm:$0xff] }
 0x522   :  { %29297 = vmatpush3.bf16.msra.mxu0 %v38031_v47  ;;  %v38042_v47 = vld [vmem:[#allocation95_spill] sm:$0xff] }
 0x523   :  { %29329 = vmatpush3.bf16.msra.mxu1 %v38032_v18  ;;  %29331 = vmatprep.subr.bf16.mxu0 %v38033_v12  ;;  %v38038_v18 = vld [vmem:[#allocation91_spill] sm:$0xff]  ;;  %v38039_v12 = vld [vmem:[#allocation92_spill] sm:$0xff] }
 0x524   :  { %29363 = vmatprep.subr.bf16.mxu1 %v38034_v53  ;;  %v38041_v53 = vld [vmem:[#allocation94_spill] sm:$0xff] }
 0x525   :  { %21118 = vmatmul.mubr.f32.vlgmr.msra.gmra.mrb[58].mxu0 %v36041_v58 }
 0x526   :  { %21189 = vmatmul.mubr.f32.vlgmr.msra.gmra.mrb[58].mxu1 %v36041_v58  ;;  %29333 = vmatpush3.bf16.msra.mxu0 %v38035_v52  ;;  %v38044_v52 = vld [vmem:[#allocation97_spill] sm:$0xff] }
 0x527   :  { %21259 = vmatprep.mubr.f32.mxu0 %v36162_v59  ;;  %29365 = vmatpush3.bf16.msra.mxu1 %v38036_v46  ;;  %v38046_v46 = vld [vmem:[#allocation99_spill] sm:$0xff] }
 0x528   :  { %21330 = vmatprep.mubr.f32.mxu1 %v36162_v59  ;;  %29335 = vmatprep.subr.bf16.mxu0 %v38037_v50  ;;  %v38048_v50 = vld [vmem:[#allocation101_spill] sm:$0xff] }
 0x529   :  { %29367 = vmatprep.subr.bf16.mxu1 %v38038_v18  ;;  %v38049_v18 = vld [vmem:[#allocation102_spill] sm:$0xff] }
 0x52a   :  { %29337 = vmatpush3.bf16.msra.mxu0 %v38039_v12  ;;  %v38050_v12 = vld [vmem:[#allocation103_spill] sm:$0xff] }
 0x52b   :  { %29369 = vmatpush3.bf16.msra.mxu1 %v38040_v24  ;;  %29339 = vmatprep.subr.bf16.mxu0 %v38041_v53  ;;  %v38051_v24 = vld [vmem:[#allocation104_spill] sm:$0xff]  ;;  %v38052_v53 = vld [vmem:[#allocation105_spill] sm:$0xff] }
 0x52c   :  { %29371 = vmatprep.subr.bf16.mxu1 %v38042_v47  ;;  %v38053_v47 = vld [vmem:[#allocation106_spill] sm:$0xff] }
 0x52e   :  { %29341 = vmatpush3.bf16.msra.mxu0 %v38043_v51 }
 0x52f   :  { %29373 = vmatpush3.bf16.msra.mxu1 %v38044_v52  ;;  %29343 = vmatprep.subr.bf16.mxu0 %v38045_v49  ;;  %v38054_v52 = vld [vmem:[#allocation107_spill] sm:$0xff] }
 0x530   :  { %29375 = vmatprep.subr.bf16.mxu1 %v38046_v46 }
 0x532   :  { %29345 = vmatpush3.bf16.msra.mxu0 %v38047_v30 }
 0x533   :  { %29377 = vmatpush3.bf16.msra.mxu1 %v38048_v50  ;;  %29347 = vmatprep.subr.bf16.mxu0 %v38049_v18 }
 0x534   :  { %29379 = vmatprep.subr.bf16.mxu1 %v38050_v12  ;;  %v38057_v12 = vld [vmem:[#allocation114_spill] sm:$0xff] }
 0x536   :  { %29349 = vmatpush3.bf16.msra.mxu0 %v38051_v24 }
 0x537   :  { %29381 = vmatpush3.bf16.msra.mxu1 %v38052_v53  ;;  %29351 = vmatprep.subr.bf16.mxu0 %v38053_v47  ;;  %v38055_v47 = vld [vmem:[#allocation27_spill] sm:$0xff] }
 0x538   :  { %v24728_v51 = vpop.f32.mrb[46].mxu0  ;;  %29383 = vmatprep.subr.bf16.mxu1 %v38054_v52  ;;  %v10953_v53 = vadd.f32 %v38055_v47, %v34810_v29  ;;  %v38056_v52 = vld [vmem:[#allocation113_spill] sm:$0xff] }
 0x539   :  { %v24763_v49 = vpop.f32.mrb[46].mxu1  ;;  %v24729_v27 = vpop.f32.mrb[47].mxu0 }
 0x53a   :  { %v24730_v46 = vadd.f32 %v24729_v27, %v24728_v51  ;;  %v24764_v3 = vpop.f32.mrb[47].mxu1  ;;  %29353 = vmatpush3.bf16.msra.mxu0 %v35667_v9  ;;  %v38058_v27 = vld [vmem:[#allocation116_spill] sm:$0xff] }
 0x53b   :  { %v24765_v50 = vadd.f32 %v24764_v3, %v24763_v49  ;;  %29385 = vmatpush3.bf16.msra.mxu1 %v35671_v32  ;;  %29355 = vmatprep.subr.bf16.mxu0 %v35673_v56  ;;  %v38059_v3 = vld [vmem:[#allocation40_spill] sm:$0xff]  ;;  %v38060_v49 = vld [vmem:[#allocation118_spill] sm:$0xff]  ;;  %v36201_v56 = vmax.f32 %v10953_v53, 0.0 }
 0x53c   :  { %29387 = vmatprep.subr.bf16.mxu1 %v35685_v34  ;;  %v12710_v51 = vadd.f32 %v38059_v3, %v34510_v35  ;;  %v38061_v34 = vld [vmem:[#allocation48_spill] sm:$0xff]  ;;  %v38065_v3 = vld [vmem:[#allocation121_spill] sm:$0xff]  ;;  %v38066_v53 = vld [vmem:[#allocation122_spill] sm:$0xff] }
 0x53d   :  { %v20145_v24 = vadd.f32 %v24765_v50, %v24730_v46  ;;  %v38062_v46 = vld [vmem:[#allocation119_spill] sm:$0xff]  ;;  %v38063_v50 = vld [vmem:[#allocation120_spill] sm:$0xff] }
 0x53e   :  { %29357 = vmatpush3.bf16.msra.mxu0 %v35703_v6  ;;  %v36206_v47 = vmax.f32 %v12710_v51, 0.0  ;;  %v38069_v51 = vld [vmem:[#allocation125_spill] sm:$0xff]  ;;  %v38076_v6 = vld [vmem:[#allocation132_spill] sm:$0xff] }
 0x53f   :  { %29389 = vmatpush3.bf16.msra.mxu1 %v38056_v52  ;;  %29359 = vmatprep.subr.bf16.mxu0 %v38057_v12  ;;  %v38072_v12 = vld [vmem:[#allocation128_spill] sm:$0xff]  ;;  %v38074_v52 = vld [vmem:[#allocation130_spill] sm:$0xff] }
 0x540   :  { %29391 = vmatprep.subr.bf16.mxu1 %v38058_v27  ;;  %v38064_v27 = vld [vmem:[#allocation26_spill] sm:$0xff] }
 0x542   :  { %29361 = vmatpush3.bf16.msra.mxu0 %v38060_v49  ;;  %v38071_v49 = vld [vmem:[#allocation127_spill] sm:$0xff] }
 0x543   :  { %29393 = vmatpush3.bf16.msra.mxu1 %v38061_v34  ;;  %29395 = vmatprep.subr.bf16.mxu0 %v38062_v46  ;;  %v38067_v34 = vld [vmem:[#allocation123_spill] sm:$0xff]  ;;  %v38068_v46 = vld [vmem:[#allocation124_spill] sm:$0xff] }
 0x544   :  { %29427 = vmatprep.subr.bf16.mxu1 %v38063_v50  ;;  %v38070_v50 = vld [vmem:[#allocation126_spill] sm:$0xff] }
 0x545   :  { %21260 = vmatmul.mubr.f32.vlgmr.msra.gmra.mrb[60].mxu0 %v36201_v56 }
 0x546   :  { %21331 = vmatmul.mubr.f32.vlgmr.msra.gmra.mrb[60].mxu1 %v36201_v56  ;;  %29397 = vmatpush3.bf16.msra.mxu0 %v38064_v27  ;;  %v38073_v27 = vld [vmem:[#allocation129_spill] sm:$0xff] }
 0x547   :  { %21401 = vmatprep.mubr.f32.mxu0 %v36206_v47  ;;  %29429 = vmatpush3.bf16.msra.mxu1 %v38065_v3  ;;  %v38075_v3 = vld [vmem:[#allocation131_spill] sm:$0xff] }
 0x548   :  { %21472 = vmatprep.mubr.f32.mxu1 %v36206_v47  ;;  %29399 = vmatprep.subr.bf16.mxu0 %v38066_v53  ;;  %v38077_v53 = vld [vmem:[#allocation133_spill] sm:$0xff] }
 0x549   :  { %29431 = vmatprep.subr.bf16.mxu1 %v38067_v34  ;;  %v38078_v34 = vld [vmem:[#allocation134_spill] sm:$0xff] }
 0x54a   :  { %29401 = vmatpush3.bf16.msra.mxu0 %v38068_v46  ;;  %v38079_v46 = vld [vmem:[#allocation135_spill] sm:$0xff] }
 0x54b   :  { %29433 = vmatpush3.bf16.msra.mxu1 %v38069_v51  ;;  %29403 = vmatprep.subr.bf16.mxu0 %v38070_v50  ;;  %v38080_v51 = vld [vmem:[#allocation136_spill] sm:$0xff]  ;;  %v38081_v50 = vld [vmem:[#allocation137_spill] sm:$0xff] }
 0x54c   :  { %29435 = vmatprep.subr.bf16.mxu1 %v38071_v49  ;;  %v38082_v49 = vld [vmem:[#allocation138_spill] sm:$0xff] }
 0x54e   :  { %29405 = vmatpush3.bf16.msra.mxu0 %v38072_v12 }
 0x54f   :  { %29437 = vmatpush3.bf16.msra.mxu1 %v38073_v27  ;;  %29407 = vmatprep.subr.bf16.mxu0 %v38074_v52  ;;  %v38083_v27 = vld [vmem:[#allocation139_spill] sm:$0xff] }
 0x550   :  { %29439 = vmatprep.subr.bf16.mxu1 %v38075_v3 }
 0x552   :  { %29409 = vmatpush3.bf16.msra.mxu0 %v38076_v6 }
 0x553   :  { %29441 = vmatpush3.bf16.msra.mxu1 %v38077_v53  ;;  %29411 = vmatprep.subr.bf16.mxu0 %v38078_v34 }
 0x554   :  { %29443 = vmatprep.subr.bf16.mxu1 %v38079_v46 }
 0x556   :  { %29413 = vmatpush3.bf16.msra.mxu0 %v38080_v51 }
 0x557   :  { %29445 = vmatpush3.bf16.msra.mxu1 %v38081_v50  ;;  %29415 = vmatprep.subr.bf16.mxu0 %v38082_v49 }
 0x558   :  { %v24798_v12 = vpop.f32.mrb[48].mxu0  ;;  %29447 = vmatprep.subr.bf16.mxu1 %v38083_v27  ;;  %v38084_v27 = vld [vmem:[#allocation29_spill] sm:$0xff] }
 0x559   :  { %v24833_v52 = vpop.f32.mrb[48].mxu1  ;;  %v24799_v32 = vpop.f32.mrb[49].mxu0  ;;  %v12709_v49 = vadd.f32 %v38084_v27, %v34810_v29 }
 0x55a   :  { %v24800_v3 = vadd.f32 %v24799_v32, %v24798_v12  ;;  %v24834_v9 = vpop.f32.mrb[49].mxu1  ;;  %29417 = vmatpush3.bf16.msra.mxu0 %v35971_v63 }
 0x55b   :  { %v24835_v53 = vadd.f32 %v24834_v9, %v24833_v52  ;;  %29449 = vmatpush3.bf16.msra.mxu1 %v35975_v19  ;;  %29419 = vmatprep.subr.bf16.mxu0 %v35977_v26  ;;  %v36244_v12 = vmax.f32 %v12709_v49, 0.0 }
 0x55c   :  { %v20251_v51 = vadd.f32 %v24800_v3, %v36150_v7  ;;  %29451 = vmatprep.subr.bf16.mxu1 %v35989_v20 }
 0x55d   :  { %v20355_v50 = vadd.f32 %v24835_v53, %v20145_v24  ;;  %v38085_v53 = vld [vmem:[#allocation32_spill] sm:$0xff] }
 0x55e   :  { %29421 = vmatpush3.bf16.msra.mxu0 %v36007_v16 }
 0x55f   :  { %29453 = vmatpush3.bf16.msra.mxu1 %v36011_v33  ;;  %29423 = vmatprep.subr.bf16.mxu0 %v36013_v36 }
 0x560   :  { %29455 = vmatprep.subr.bf16.mxu1 %v36022_v40 }
 0x562   :  { %29425 = vmatpush3.bf16.msra.mxu0 %v36031_v28 }
 0x563   :  { %29457 = vmatpush3.bf16.msra.mxu1 %v36037_v38  ;;  %29459 = vmatprep.subr.bf16.mxu0 %v34518_v37 }
 0x564   :  { %29491 = vmatprep.subr.bf16.mxu1 %v34530_v62 }
 0x565   :  { %21402 = vmatmul.mubr.f32.vlgmr.msra.gmra.mrb[62].mxu0 %v36244_v12 }
 0x566   :  { %21473 = vmatmul.mubr.f32.vlgmr.msra.gmra.mrb[62].mxu1 %v36244_v12  ;;  %29461 = vmatpush3.bf16.msra.mxu0 %v34552_v17 }
 0x567   :  { %21544 = vmatprep.mubr.f32.mxu0 %v36162_v59  ;;  %29493 = vmatpush3.bf16.msra.mxu1 %v34568_v25 }
 0x568   :  { %21614 = vmatprep.mubr.f32.mxu1 %v35812_v1  ;;  %29463 = vmatprep.subr.bf16.mxu0 %v34580_v15 }
 0x569   :  { %29495 = vmatprep.subr.bf16.mxu1 %v34593_v23 }
 0x56a   :  { %29465 = vmatpush3.bf16.msra.mxu0 %v34604_v41 }
 0x56b   :  { %29497 = vmatpush3.bf16.msra.mxu1 %v34609_v42  ;;  %29467 = vmatprep.subr.bf16.mxu0 %v34611_v48 }
 0x56c   :  { %29499 = vmatprep.subr.bf16.mxu1 %v34625_v0 }
 0x56e   :  { %29469 = vmatpush3.bf16.msra.mxu0 %v34644_v45 }
 0x56f   :  { %29501 = vmatpush3.bf16.msra.mxu1 %v34648_v21  ;;  %29471 = vmatprep.subr.bf16.mxu0 %v34650_v22 }
 0x570   :  { %29503 = vmatprep.subr.bf16.mxu1 %v34662_v55 }
 0x572   :  { %29473 = vmatpush3.bf16.msra.mxu0 %v34680_v43 }
 0x573   :  { %29505 = vmatpush3.bf16.msra.mxu1 %v34684_v44  ;;  %29475 = vmatprep.subr.bf16.mxu0 %v34686_v5 }
 0x574   :  { %29507 = vmatprep.subr.bf16.mxu1 %v34700_v10 }
 0x576   :  { %29477 = vmatpush3.bf16.msra.mxu0 %v34719_v11 }
 0x577   :  { %29509 = vmatpush3.bf16.msra.mxu1 %v34723_v14  ;;  %29479 = vmatprep.subr.bf16.mxu0 %v34725_v61  ;;  %v38086_v61 = vld [vmem:[#allocation33_spill] sm:$0xff]  ;;  %v38088_v14 = vld [vmem:[#allocation36_spill] sm:$0xff] }
 0x578   :  { %v24868_v9 = vpop.f32.mrb[50].mxu0  ;;  %29511 = vmatprep.subr.bf16.mxu1 %v34737_v57  ;;  %v38087_v57 = vld [vmem:[#allocation34_spill] sm:$0xff] }
 0x579   :  { %v24903_v32 = vpop.f32.mrb[50].mxu1  ;;  %v24869_v7 = vpop.f32.mrb[51].mxu0 }
 0x57a   :  { %v24870_v52 = vadd.f32 %v24869_v7, %v24868_v9  ;;  %v24904_v24 = vpop.f32.mrb[51].mxu1  ;;  %29481 = vmatpush3.bf16.msra.mxu0 %v34755_v39  ;;  %v38089_v9 = vld [vmem:[#allocation47_spill] sm:$0xff]  ;;  %v38090_v7 = vld [vmem:[#allocation37_spill] sm:$0xff] }
 0x57b   :  { %v24905_v27 = vadd.f32 %v24904_v24, %v24903_v32  ;;  %29513 = vmatpush3.bf16.msra.mxu1 %v34759_v2  ;;  %29483 = vmatprep.subr.bf16.mxu0 %v34761_v31  ;;  %v38091_v32 = vld [vmem:[#allocation38_spill] sm:$0xff]  ;;  %v38092_v24 = vld [vmem:[#allocation39_spill] sm:$0xff] }
 0x57c   :  { %v20459_v49 = vadd.f32 %v24870_v52, %v20251_v51  ;;  %29515 = vmatprep.subr.bf16.mxu1 %v34774_v13  ;;  %v38094_v51 = vld [vmem:[#allocation44_spill] sm:$0xff]  ;;  %v38095_v52 = vld [vmem:[#allocation46_spill] sm:$0xff] }
 0x57d   :  { %v20563_v3 = vadd.f32 %v24905_v27, %v20355_v50  ;;  %v38093_v50 = vld [vmem:[#allocation42_spill] sm:$0xff] }
 0x57e   :  { %29485 = vmatpush3.bf16.msra.mxu0 %v38085_v53  ;;  %v38096_v27 = vld [vmem:[#allocation50_spill] sm:$0xff] }
 0x57f   :  { %29517 = vmatpush3.bf16.msra.mxu1 %v38086_v61  ;;  %29487 = vmatprep.subr.bf16.mxu0 %v38087_v57 }
 0x580   :  { %29519 = vmatprep.subr.bf16.mxu1 %v38088_v14  ;;  %v38101_v14 = vld [vmem:[#allocation5_spill] sm:$0xff] }
 0x582   :  { %29489 = vmatpush3.bf16.msra.mxu0 %v38089_v9  ;;  %v38100_v9 = vld [vmem:[#allocation4_spill] sm:$0xff] }
 0x583   :  { %29521 = vmatpush3.bf16.msra.mxu1 %v38090_v7  ;;  %29523 = vmatprep.subr.bf16.mxu0 %v38091_v32  ;;  %v38097_v7 = vld [vmem:[#allocation52_spill] sm:$0xff]  ;;  %v38098_v32 = vld [vmem:[#allocation2_spill] sm:$0xff] }
 0x584   :  { %29555 = vmatprep.subr.bf16.mxu1 %v38092_v24  ;;  %v38099_v24 = vld [vmem:[#allocation3_spill] sm:$0xff] }
 0x585   :  { %21545 = vmatmul.mubr.f32.vlgmr.msra.gmra.mrb[64].mxu0 %v36201_v56 }
 0x586   :  { %21615 = vmatmul.mubr.f32.vlgmr.msra.gmra.mrb[64].mxu1 %v36041_v58  ;;  %29525 = vmatpush3.bf16.msra.mxu0 %v38093_v50  ;;  %v38102_v50 = vld [vmem:[#allocation6_spill] sm:$0xff] }
 0x587   :  { %21684 = vmatprep.mubr.f32.mxu0 %v36162_v59  ;;  %29557 = vmatpush3.bf16.msra.mxu1 %v38094_v51  ;;  %v38103_v59 = vld [vmem:[#allocation7_spill] sm:$0xff]  ;;  %v38104_v51 = vld [vmem:[#allocation8_spill] sm:$0xff] }
 0x588   :  { %21754 = vmatprep.mubr.f32.mxu1 %v35812_v1  ;;  %29527 = vmatprep.subr.bf16.mxu0 %v38095_v52  ;;  %v38105_v1 = vld [vmem:[#allocation9_spill] sm:$0xff]  ;;  %v38106_v52 = vld [vmem:[#allocation10_spill] sm:$0xff] }
 0x589   :  { %29559 = vmatprep.subr.bf16.mxu1 %v38096_v27  ;;  %v38107_v27 = vld [vmem:[#allocation11_spill] sm:$0xff] }
 0x58a   :  { %29529 = vmatpush3.bf16.msra.mxu0 %v38097_v7  ;;  %v38108_v7 = vld [vmem:[#allocation12_spill] sm:$0xff] }
 0x58b   :  { %29561 = vmatpush3.bf16.msra.mxu1 %v38098_v32  ;;  %29531 = vmatprep.subr.bf16.mxu0 %v38099_v24  ;;  %v38109_v32 = vld [vmem:[#allocation13_spill] sm:$0xff]  ;;  %v38110_v24 = vld [vmem:[#allocation14_spill] sm:$0xff] }
 0x58c   :  { %29563 = vmatprep.subr.bf16.mxu1 %v38100_v9  ;;  %v38111_v9 = vld [vmem:[#allocation15_spill] sm:$0xff] }
 0x58e   :  { %29533 = vmatpush3.bf16.msra.mxu0 %v38101_v14 }
 0x58f   :  { %29565 = vmatpush3.bf16.msra.mxu1 %v38102_v50  ;;  %29535 = vmatprep.subr.bf16.mxu0 %v38103_v59  ;;  %v38112_v50 = vld [vmem:[#allocation16_spill] sm:$0xff] }
 0x590   :  { %29567 = vmatprep.subr.bf16.mxu1 %v38104_v51 }
 0x592   :  { %29537 = vmatpush3.bf16.msra.mxu0 %v38105_v1 }
 0x593   :  { %29569 = vmatpush3.bf16.msra.mxu1 %v38106_v52  ;;  %29539 = vmatprep.subr.bf16.mxu0 %v38107_v27 }
 0x594   :  { %29571 = vmatprep.subr.bf16.mxu1 %v38108_v7 }
 0x596   :  { %29541 = vmatpush3.bf16.msra.mxu0 %v38109_v32 }
 0x597   :  { %29573 = vmatpush3.bf16.msra.mxu1 %v38110_v24  ;;  %29543 = vmatprep.subr.bf16.mxu0 %v38111_v9  ;;  %v38115_v9 = vld [vmem:[#allocation21_spill] sm:$0xff] }
 0x598   :  { %v24938_v14 = vpop.f32.mrb[52].mxu0  ;;  %29575 = vmatprep.subr.bf16.mxu1 %v38112_v50  ;;  %v38125_v50 = vld [vmem:[#allocation63_spill] sm:$0xff] }
 0x599   :  { %v24973_v59 = vpop.f32.mrb[52].mxu1  ;;  %v24939_v57 = vpop.f32.mrb[53].mxu0 }
 0x59a   :  { %v24940_v51 = vadd.f32 %v24939_v57, %v24938_v14  ;;  %v24974_v61 = vpop.f32.mrb[53].mxu1  ;;  %29545 = vmatpush3.bf16.msra.mxu0 %v37988_v54  ;;  %v38116_v14 = vld [vmem:[#allocation54_spill] sm:$0xff]  ;;  %v38117_v57 = vld [vmem:[#allocation55_spill] sm:$0xff] }
 0x59b   :  { %v24975_v52 = vadd.f32 %v24974_v61, %v24973_v59  ;;  %29577 = vmatpush3.bf16.msra.mxu1 %v37989_v60  ;;  %29547 = vmatprep.subr.bf16.mxu0 %v37990_v4  ;;  %v38118_v61 = vld [vmem:[#allocation56_spill] sm:$0xff]  ;;  %v38119_v59 = vld [vmem:[#allocation57_spill] sm:$0xff]  ;;  %v38120_v4 = vld [vmem:[#allocation58_spill] sm:$0xff] }
 0x59c   :  { %v36312_v7 = vadd.f32 %v24940_v51, %v20459_v49  ;;  %29579 = vmatprep.subr.bf16.mxu1 %v37992_v8  ;;  %v38121_v49 = vld [vmem:[#allocation59_spill] sm:$0xff]  ;;  %v38122_v51 = vld [vmem:[#allocation60_spill] sm:$0xff]  ;;  %v38181_v8 = vld [vmem:[#allocation114_spill] sm:$0xff] }
 0x59d   :  { %v36315_v24 = vadd.f32 %v24975_v52, %v20563_v3  ;;  %v38123_v3 = vld [vmem:[#allocation61_spill] sm:$0xff]  ;;  %v38124_v52 = vld [vmem:[#allocation62_spill] sm:$0xff] }
 0x59e   :  { %38113 = vst [vmem:[#allocation18_spill] sm:$0xff] %v36312_v7  ;;  %29549 = vmatpush3.bf16.msra.mxu0 %v38115_v9  ;;  %v38135_v7 = vld [vmem:[#allocation73_spill] sm:$0xff] }
 0x59f   :  { %38114 = vst [vmem:[#allocation28_spill] sm:$0xff] %v36315_v24  ;;  %29581 = vmatpush3.bf16.msra.mxu1 %v38116_v14  ;;  %29551 = vmatprep.subr.bf16.mxu0 %v38117_v57  ;;  %v38133_v24 = vld [vmem:[#allocation71_spill] sm:$0xff]  ;;  %v38144_v14 = vld [vmem:[#allocation80_spill] sm:$0xff]  ;;  %v38150_v9 = vld [vmem:[#allocation85_spill] sm:$0xff] }
 0x5a0   :  { %29583 = vmatprep.subr.bf16.mxu1 %v38118_v61 }
 0x5a2   :  { %29553 = vmatpush3.bf16.msra.mxu0 %v38119_v59  ;;  %v38126_v59 = vld [vmem:[#allocation64_spill] sm:$0xff] }
 0x5a3   :  { %29585 = vmatpush3.bf16.msra.mxu1 %v38120_v4  ;;  %29587 = vmatprep.subr.bf16.mxu0 %v38121_v49  ;;  %v38127_v4 = vld [vmem:[#allocation65_spill] sm:$0xff]  ;;  %v38128_v49 = vld [vmem:[#allocation66_spill] sm:$0xff] }
 0x5a4   :  { %29619 = vmatprep.subr.bf16.mxu1 %v38122_v51  ;;  %v38129_v51 = vld [vmem:[#allocation67_spill] sm:$0xff] }
 0x5a5   :  { %21685 = vmatmul.mubr.f32.vlgmr.msra.gmra.mrb[66].mxu0 %v36201_v56  ;;  %v38130_v56 = vld [vmem:[#allocation68_spill] sm:$0xff] }
 0x5a6   :  { %21755 = vmatmul.mubr.f32.vlgmr.msra.gmra.mrb[66].mxu1 %v36041_v58  ;;  %29589 = vmatpush3.bf16.msra.mxu0 %v38123_v3  ;;  %v38131_v58 = vld [vmem:[#allocation69_spill] sm:$0xff]  ;;  %v38132_v3 = vld [vmem:[#allocation70_spill] sm:$0xff] }
 0x5a7   :  { %21824 = vmatprep.mubr.f32.mxu0 %v36206_v47  ;;  %29621 = vmatpush3.bf16.msra.mxu1 %v38124_v52  ;;  %v38134_v52 = vld [vmem:[#allocation72_spill] sm:$0xff] }
 0x5a8   :  { %21895 = vmatprep.mubr.f32.mxu1 %v36206_v47  ;;  %29591 = vmatprep.subr.bf16.mxu0 %v38125_v50  ;;  %v38136_v50 = vld [vmem:[#allocation74_spill] sm:$0xff] }
 0x5a9   :  { %29623 = vmatprep.subr.bf16.mxu1 %v38126_v59  ;;  %v38137_v59 = vld [vmem:[#allocation75_spill] sm:$0xff] }
 0x5aa   :  { %29593 = vmatpush3.bf16.msra.mxu0 %v38127_v4  ;;  %v38138_v4 = vld [vmem:[#allocation76_spill] sm:$0xff] }
 0x5ab   :  { %29625 = vmatpush3.bf16.msra.mxu1 %v38128_v49  ;;  %29595 = vmatprep.subr.bf16.mxu0 %v38129_v51  ;;  %v38139_v49 = vld [vmem:[#allocation77_spill] sm:$0xff]  ;;  %v38140_v51 = vld [vmem:[#allocation78_spill] sm:$0xff] }
 0x5ac   :  { %29627 = vmatprep.subr.bf16.mxu1 %v38130_v56  ;;  %v38141_v56 = vld [vmem:[#allocation23_spill] sm:$0xff] }
 0x5ae   :  { %29597 = vmatpush3.bf16.msra.mxu0 %v38131_v58 }
 0x5af   :  { %29629 = vmatpush3.bf16.msra.mxu1 %v38132_v3  ;;  %29599 = vmatprep.subr.bf16.mxu0 %v38133_v24  ;;  %v38142_v3 = vld [vmem:[#allocation79_spill] sm:$0xff] }
 0x5b0   :  { %29631 = vmatprep.subr.bf16.mxu1 %v38134_v52 }
 0x5b2   :  { %29601 = vmatpush3.bf16.msra.mxu0 %v38135_v7  ;;  %v38143_v7 = vld [vmem:[#allocation82_spill] sm:$0xff] }
 0x5b3   :  { %29633 = vmatpush3.bf16.msra.mxu1 %v38136_v50  ;;  %29603 = vmatprep.subr.bf16.mxu0 %v38137_v59  ;;  %v38145_v59 = vld [vmem:[#allocation22_spill] sm:$0xff] }
 0x5b4   :  { %29635 = vmatprep.subr.bf16.mxu1 %v38138_v4  ;;  %v38146_v4 = vld [vmem:[#allocation81_spill] sm:$0xff] }
 0x5b6   :  { %29605 = vmatpush3.bf16.msra.mxu0 %v38139_v49 }
 0x5b7   :  { %29637 = vmatpush3.bf16.msra.mxu1 %v38140_v51  ;;  %29607 = vmatprep.subr.bf16.mxu0 %v38141_v56  ;;  %v38147_v51 = vld [vmem:[#allocation25_spill] sm:$0xff]  ;;  %v38148_v56 = vld [vmem:[#allocation83_spill] sm:$0xff] }
 0x5b8   :  { %v25008_v58 = vpop.f32.mrb[54].mxu0  ;;  %29639 = vmatprep.subr.bf16.mxu1 %v38142_v3  ;;  %v38149_v3 = vld [vmem:[#allocation84_spill] sm:$0xff] }
 0x5b9   :  { %v25043_v24 = vpop.f32.mrb[54].mxu1  ;;  %v25009_v61 = vpop.f32.mrb[55].mxu0 }
 0x5ba   :  { %v25010_v52 = vadd.f32 %v25009_v61, %v25008_v58  ;;  %v25044_v57 = vpop.f32.mrb[55].mxu1  ;;  %29609 = vmatpush3.bf16.msra.mxu0 %v38143_v7  ;;  %v38151_v61 = vld [vmem:[#allocation43_spill] sm:$0xff] }
 0x5bb   :  { %v25045_v50 = vadd.f32 %v25044_v57, %v25043_v24  ;;  %29641 = vmatpush3.bf16.msra.mxu1 %v38144_v14  ;;  %29611 = vmatprep.subr.bf16.mxu0 %v38145_v59  ;;  %v14466_v58 = vadd.f32 %v38151_v61, %v34510_v35  ;;  %v38152_v24 = vld [vmem:[#allocation86_spill] sm:$0xff]  ;;  %v38153_v57 = vld [vmem:[#allocation24_spill] sm:$0xff]  ;;  %v38154_v59 = vld [vmem:[#allocation87_spill] sm:$0xff] }
 0x5bc   :  { %29643 = vmatprep.subr.bf16.mxu1 %v38146_v4  ;;  %v38155_v4 = vld [vmem:[#allocation88_spill] sm:$0xff]  ;;  %v38158_v61 = vld [vmem:[#allocation90_spill] sm:$0xff]  ;;  %v38175_v14 = vld [vmem:[#allocation109_spill] sm:$0xff] }
 0x5bd   :  { %v36355_v49 = vadd.f32 %v25045_v50, %v25010_v52  ;;  %v36367_v50 = vmax.f32 %v14466_v58, 0.0  ;;  %v38156_v52 = vld [vmem:[#allocation49_spill] sm:$0xff] }
 0x5be   :  { %29613 = vmatpush3.bf16.msra.mxu0 %v38147_v51  ;;  %v38161_v58 = vld [vmem:[#allocation93_spill] sm:$0xff] }
 0x5bf   :  { %29645 = vmatpush3.bf16.msra.mxu1 %v38148_v56  ;;  %29615 = vmatprep.subr.bf16.mxu0 %v38149_v3  ;;  %v38164_v3 = vld [vmem:[#allocation96_spill] sm:$0xff]  ;;  %v38166_v56 = vld [vmem:[#allocation98_spill] sm:$0xff] }
 0x5c0   :  { %29647 = vmatprep.subr.bf16.mxu1 %v38150_v9  ;;  %v38157_v9 = vld [vmem:[#allocation89_spill] sm:$0xff] }
 0x5c2   :  { %29617 = vmatpush3.bf16.msra.mxu0 %v38152_v24  ;;  %v38163_v24 = vld [vmem:[#allocation95_spill] sm:$0xff] }
 0x5c3   :  { %29649 = vmatpush3.bf16.msra.mxu1 %v38153_v57  ;;  %29651 = vmatprep.subr.bf16.mxu0 %v38154_v59  ;;  %v38159_v57 = vld [vmem:[#allocation91_spill] sm:$0xff]  ;;  %v38160_v59 = vld [vmem:[#allocation92_spill] sm:$0xff] }
 0x5c4   :  { %29683 = vmatprep.subr.bf16.mxu1 %v38155_v4  ;;  %v38162_v4 = vld [vmem:[#allocation94_spill] sm:$0xff] }
 0x5c5   :  { %21825 = vmatmul.mubr.f32.vlgmr.msra.gmra.mrb[68].mxu0 %v36244_v12 }
 0x5c6   :  { %21896 = vmatmul.mubr.f32.vlgmr.msra.gmra.mrb[68].mxu1 %v36244_v12  ;;  %29653 = vmatpush3.bf16.msra.mxu0 %v38156_v52  ;;  %v38165_v52 = vld [vmem:[#allocation97_spill] sm:$0xff] }
 0x5c7   :  { %21966 = vmatprep.mubr.f32.mxu0 %v36367_v50  ;;  %29685 = vmatpush3.bf16.msra.mxu1 %v38157_v9  ;;  %v38167_v9 = vld [vmem:[#allocation99_spill] sm:$0xff] }
 0x5c8   :  { %22037 = vmatprep.mubr.f32.mxu1 %v36367_v50  ;;  %29655 = vmatprep.subr.bf16.mxu0 %v38158_v61  ;;  %v38168_v61 = vld [vmem:[#allocation101_spill] sm:$0xff] }
 0x5c9   :  { %29687 = vmatprep.subr.bf16.mxu1 %v38159_v57 }
 0x5ca   :  { %29657 = vmatpush3.bf16.msra.mxu0 %v38160_v59  ;;  %v38169_v59 = vld [vmem:[#allocation103_spill] sm:$0xff] }
 0x5cb   :  { %29689 = vmatpush3.bf16.msra.mxu1 %v38161_v58  ;;  %29659 = vmatprep.subr.bf16.mxu0 %v38162_v4  ;;  %v38170_v58 = vld [vmem:[#allocation104_spill] sm:$0xff]  ;;  %v38171_v4 = vld [vmem:[#allocation105_spill] sm:$0xff] }
 0x5cc   :  { %29691 = vmatprep.subr.bf16.mxu1 %v38163_v24  ;;  %v38172_v24 = vld [vmem:[#allocation106_spill] sm:$0xff] }
 0x5ce   :  { %29661 = vmatpush3.bf16.msra.mxu0 %v38164_v3 }
 0x5cf   :  { %29693 = vmatpush3.bf16.msra.mxu1 %v38165_v52  ;;  %29663 = vmatprep.subr.bf16.mxu0 %v38166_v56  ;;  %v38173_v52 = vld [vmem:[#allocation107_spill] sm:$0xff] }
 0x5d0   :  { %29695 = vmatprep.subr.bf16.mxu1 %v38167_v9 }
 0x5d2   :  { %29665 = vmatpush3.bf16.msra.mxu0 %v38047_v30  ;;  %v38174_v30 = vld [vmem:[#allocation108_spill] sm:$0xff] }
 0x5d3   :  { %29697 = vmatpush3.bf16.msra.mxu1 %v38168_v61  ;;  %29667 = vmatprep.subr.bf16.mxu0 %v38049_v18  ;;  %v38176_v18 = vld [vmem:[#allocation110_spill] sm:$0xff] }
 0x5d4   :  { %29699 = vmatprep.subr.bf16.mxu1 %v38169_v59  ;;  %v38177_v59 = vld [vmem:[#allocation111_spill] sm:$0xff] }
 0x5d6   :  { %29669 = vmatpush3.bf16.msra.mxu0 %v38170_v58 }
 0x5d7   :  { %29701 = vmatpush3.bf16.msra.mxu1 %v38171_v4  ;;  %29671 = vmatprep.subr.bf16.mxu0 %v38172_v24  ;;  %v38178_v4 = vld [vmem:[#allocation112_spill] sm:$0xff]  ;;  %v38179_v24 = vld [vmem:[#allocation41_spill] sm:$0xff] }
 0x5d8   :  { %v25078_v3 = vpop.f32.mrb[56].mxu0  ;;  %29703 = vmatprep.subr.bf16.mxu1 %v38173_v52  ;;  %v14465_v7 = vadd.f32 %v38179_v24, %v34810_v29  ;;  %v38180_v52 = vld [vmem:[#allocation113_spill] sm:$0xff] }
 0x5d9   :  { %v25113_v56 = vpop.f32.mrb[56].mxu1  ;;  %v25079_v57 = vpop.f32.mrb[57].mxu0 }
 0x5da   :  { %v25080_v9 = vadd.f32 %v25079_v57, %v25078_v3  ;;  %v25114_v51 = vpop.f32.mrb[57].mxu1  ;;  %29673 = vmatpush3.bf16.msra.mxu0 %v38174_v30  ;;  %v38182_v3 = vld [vmem:[#allocation116_spill] sm:$0xff]  ;;  %v38184_v57 = vld [vmem:[#allocation118_spill] sm:$0xff] }
 0x5db   :  { %v25115_v61 = vadd.f32 %v25114_v51, %v25113_v56  ;;  %29705 = vmatpush3.bf16.msra.mxu1 %v38175_v14  ;;  %29675 = vmatprep.subr.bf16.mxu0 %v38176_v18  ;;  %v38183_v51 = vld [vmem:[#allocation45_spill] sm:$0xff]  ;;  %v36406_v18 = vmax.f32 %v14465_v7, 0.0  ;;  %v38190_v7 = vld [vmem:[#allocation122_spill] sm:$0xff] }
 0x5dc   :  { %29707 = vmatprep.subr.bf16.mxu1 %v38177_v59  ;;  %v16222_v56 = vadd.f32 %v38183_v51, %v34510_v35  ;;  %v38185_v59 = vld [vmem:[#allocation48_spill] sm:$0xff]  ;;  %v38189_v51 = vld [vmem:[#allocation121_spill] sm:$0xff] }
 0x5dd   :  { %v21050_v58 = vadd.f32 %v25115_v61, %v25080_v9  ;;  %v38186_v9 = vld [vmem:[#allocation119_spill] sm:$0xff]  ;;  %v38187_v61 = vld [vmem:[#allocation120_spill] sm:$0xff] }
 0x5de   :  { %29677 = vmatpush3.bf16.msra.mxu0 %v38178_v4  ;;  %v36411_v24 = vmax.f32 %v16222_v56, 0.0  ;;  %v38193_v56 = vld [vmem:[#allocation125_spill] sm:$0xff] }
 0x5df   :  { %29709 = vmatpush3.bf16.msra.mxu1 %v38180_v52  ;;  %29679 = vmatprep.subr.bf16.mxu0 %v38181_v8  ;;  %v38196_v8 = vld [vmem:[#allocation128_spill] sm:$0xff]  ;;  %v38198_v52 = vld [vmem:[#allocation130_spill] sm:$0xff] }
 0x5e0   :  { %29711 = vmatprep.subr.bf16.mxu1 %v38182_v3  ;;  %v38188_v3 = vld [vmem:[#allocation26_spill] sm:$0xff] }
 0x5e2   :  { %29681 = vmatpush3.bf16.msra.mxu0 %v38184_v57  ;;  %v38195_v57 = vld [vmem:[#allocation127_spill] sm:$0xff] }
 0x5e3   :  { %29713 = vmatpush3.bf16.msra.mxu1 %v38185_v59  ;;  %29715 = vmatprep.subr.bf16.mxu0 %v38186_v9  ;;  %v38191_v59 = vld [vmem:[#allocation123_spill] sm:$0xff]  ;;  %v38192_v9 = vld [vmem:[#allocation124_spill] sm:$0xff] }
 0x5e4   :  { %29747 = vmatprep.subr.bf16.mxu1 %v38187_v61  ;;  %v38194_v61 = vld [vmem:[#allocation126_spill] sm:$0xff] }
 0x5e5   :  { %21967 = vmatmul.mubr.f32.vlgmr.msra.gmra.mrb[70].mxu0 %v36406_v18 }
 0x5e6   :  { %22038 = vmatmul.mubr.f32.vlgmr.msra.gmra.mrb[70].mxu1 %v36406_v18  ;;  %29717 = vmatpush3.bf16.msra.mxu0 %v38188_v3  ;;  %v38197_v3 = vld [vmem:[#allocation129_spill] sm:$0xff] }
 0x5e7   :  { %22108 = vmatprep.mubr.f32.mxu0 %v36411_v24  ;;  %29749 = vmatpush3.bf16.msra.mxu1 %v38189_v51  ;;  %v38199_v51 = vld [vmem:[#allocation131_spill] sm:$0xff] }
 0x5e8   :  { %22179 = vmatprep.mubr.f32.mxu1 %v36411_v24  ;;  %29719 = vmatprep.subr.bf16.mxu0 %v38190_v7  ;;  %v38200_v7 = vld [vmem:[#allocation133_spill] sm:$0xff] }
 0x5e9   :  { %29751 = vmatprep.subr.bf16.mxu1 %v38191_v59 }
 0x5ea   :  { %29721 = vmatpush3.bf16.msra.mxu0 %v38192_v9 }
 0x5eb   :  { %29753 = vmatpush3.bf16.msra.mxu1 %v38193_v56  ;;  %29723 = vmatprep.subr.bf16.mxu0 %v38194_v61  ;;  %v38201_v56 = vld [vmem:[#allocation136_spill] sm:$0xff]  ;;  %v38202_v61 = vld [vmem:[#allocation137_spill] sm:$0xff] }
 0x5ec   :  { %29755 = vmatprep.subr.bf16.mxu1 %v38195_v57  ;;  %v38203_v57 = vld [vmem:[#allocation138_spill] sm:$0xff] }
 0x5ee   :  { %29725 = vmatpush3.bf16.msra.mxu0 %v38196_v8 }
 0x5ef   :  { %29757 = vmatpush3.bf16.msra.mxu1 %v38197_v3  ;;  %29727 = vmatprep.subr.bf16.mxu0 %v38198_v52  ;;  %v38204_v3 = vld [vmem:[#allocation139_spill] sm:$0xff] }
 0x5f0   :  { %29759 = vmatprep.subr.bf16.mxu1 %v38199_v51 }
 0x5f2   :  { %29729 = vmatpush3.bf16.msra.mxu0 %v38076_v6 }
 0x5f3   :  { %29761 = vmatpush3.bf16.msra.mxu1 %v38200_v7  ;;  %29731 = vmatprep.subr.bf16.mxu0 %v38078_v34 }
 0x5f4   :  { %29763 = vmatprep.subr.bf16.mxu1 %v38079_v46 }
 0x5f6   :  { %29733 = vmatpush3.bf16.msra.mxu0 %v38201_v56 }
 0x5f7   :  { %29765 = vmatpush3.bf16.msra.mxu1 %v38202_v61  ;;  %29735 = vmatprep.subr.bf16.mxu0 %v38203_v57 }
 0x5f8   :  { %v25148_v8 = vpop.f32.mrb[58].mxu0  ;;  %29767 = vmatprep.subr.bf16.mxu1 %v38204_v3  ;;  %v38205_v3 = vld [vmem:[#allocation35_spill] sm:$0xff] }
 0x5f9   :  { %v25183_v52 = vpop.f32.mrb[58].mxu1  ;;  %v25149_v9 = vpop.f32.mrb[59].mxu0  ;;  %v16221_v57 = vadd.f32 %v38205_v3, %v34810_v29  ;;  %v38227_v3 = vld [vmem:[#allocation8_spill] sm:$0xff] }
 0x5fa   :  { %v25150_v51 = vadd.f32 %v25149_v9, %v25148_v8  ;;  %v25184_v59 = vpop.f32.mrb[59].mxu1  ;;  %29737 = vmatpush3.bf16.msra.mxu0 %v35971_v63  ;;  %v38230_v9 = vld [vmem:[#allocation14_spill] sm:$0xff] }
 0x5fb   :  { %v25185_v7 = vadd.f32 %v25184_v59, %v25183_v52  ;;  %29769 = vmatpush3.bf16.msra.mxu1 %v35975_v19  ;;  %29739 = vmatprep.subr.bf16.mxu0 %v35977_v26  ;;  %v36449_v8 = vmax.f32 %v16221_v57, 0.0  ;;  %v38222_v59 = vld [vmem:[#allocation3_spill] sm:$0xff]  ;;  %v38224_v52 = vld [vmem:[#allocation5_spill] sm:$0xff]  ;;  %v38229_v57 = vld [vmem:[#allocation12_spill] sm:$0xff] }
 0x5fc   :  { %v21123_v56 = vadd.f32 %v25150_v51, %v36355_v49  ;;  %29771 = vmatprep.subr.bf16.mxu1 %v35989_v20  ;;  %v38223_v49 = vld [vmem:[#allocation4_spill] sm:$0xff] }
 0x5fd   :  { %v21194_v61 = vadd.f32 %v25185_v7, %v21050_v58  ;;  %v38225_v58 = vld [vmem:[#allocation6_spill] sm:$0xff]  ;;  %v38232_v7 = vld [vmem:[#allocation16_spill] sm:$0xff] }
 0x5fe   :  { %29741 = vmatpush3.bf16.msra.mxu0 %v36007_v16 }
 0x5ff   :  { %29773 = vmatpush3.bf16.msra.mxu1 %v36011_v33  ;;  %29743 = vmatprep.subr.bf16.mxu0 %v36013_v36 }
 0x600   :  { %29775 = vmatprep.subr.bf16.mxu1 %v36022_v40 }
 0x602   :  { %29745 = vmatpush3.bf16.msra.mxu0 %v36031_v28 }
 0x603   :  { %29777 = vmatpush3.bf16.msra.mxu1 %v36037_v38  ;;  %29779 = vmatprep.subr.bf16.mxu0 %v34518_v37  ;;  %v38206_v37 = vld [vmem:[#allocation53_spill] sm:$0xff] }
 0x604   :  { %29811 = vmatprep.subr.bf16.mxu1 %v34530_v62  ;;  %v38207_v62 = vld [vmem:[#allocation30_spill] sm:$0xff] }
 0x605   :  { %22109 = vmatmul.mubr.f32.vlgmr.msra.gmra.mrb[72].mxu0 %v36449_v8 }
 0x606   :  { %22180 = vmatmul.mubr.f32.vlgmr.msra.gmra.mrb[72].mxu1 %v36449_v8  ;;  %29781 = vmatpush3.bf16.msra.mxu0 %v34552_v17 }
 0x607   :  { %22251 = vmatprep.mubr.f32.mxu0 %v36367_v50  ;;  %29813 = vmatpush3.bf16.msra.mxu1 %v34568_v25  ;;  %v38208_v25 = vld [vmem:[#allocation31_spill] sm:$0xff] }
 0x608   :  { %22321 = vmatprep.mubr.f32.mxu1 %v36206_v47  ;;  %29783 = vmatprep.subr.bf16.mxu0 %v34580_v15 }
 0x609   :  { %29815 = vmatprep.subr.bf16.mxu1 %v34593_v23 }
 0x60a   :  { %29785 = vmatpush3.bf16.msra.mxu0 %v34604_v41 }
 0x60b   :  { %29817 = vmatpush3.bf16.msra.mxu1 %v34609_v42  ;;  %29787 = vmatprep.subr.bf16.mxu0 %v34611_v48 }
 0x60c   :  { %29819 = vmatprep.subr.bf16.mxu1 %v34625_v0 }
 0x60e   :  { %29789 = vmatpush3.bf16.msra.mxu0 %v34644_v45 }
 0x60f   :  { %29821 = vmatpush3.bf16.msra.mxu1 %v34648_v21  ;;  %29791 = vmatprep.subr.bf16.mxu0 %v34650_v22  ;;  %v38209_v21 = vld [vmem:[#allocation33_spill] sm:$0xff]  ;;  %v38210_v22 = vld [vmem:[#allocation34_spill] sm:$0xff] }
 0x610   :  { %29823 = vmatprep.subr.bf16.mxu1 %v34662_v55  ;;  %v38211_v55 = vld [vmem:[#allocation36_spill] sm:$0xff] }
 0x612   :  { %29793 = vmatpush3.bf16.msra.mxu0 %v34680_v43  ;;  %v38212_v43 = vld [vmem:[#allocation47_spill] sm:$0xff] }
 0x613   :  { %29825 = vmatpush3.bf16.msra.mxu1 %v34684_v44  ;;  %29795 = vmatprep.subr.bf16.mxu0 %v34686_v5  ;;  %v38213_v44 = vld [vmem:[#allocation37_spill] sm:$0xff]  ;;  %v38214_v5 = vld [vmem:[#allocation38_spill] sm:$0xff] }
 0x614   :  { %29827 = vmatprep.subr.bf16.mxu1 %v34700_v10  ;;  %v38215_v10 = vld [vmem:[#allocation39_spill] sm:$0xff] }
 0x616   :  { %29797 = vmatpush3.bf16.msra.mxu0 %v34719_v11  ;;  %v38216_v11 = vld [vmem:[#allocation42_spill] sm:$0xff] }
 0x617   :  { %29829 = vmatpush3.bf16.msra.mxu1 %v38206_v37  ;;  %29799 = vmatprep.subr.bf16.mxu0 %v38207_v62 }
 0x618   :  { %v25218_v17 = vpop.f32.mrb[60].mxu0  ;;  %29831 = vmatprep.subr.bf16.mxu1 %v38208_v25 }
 0x619   :  { %v25253_v15 = vpop.f32.mrb[60].mxu1  ;;  %v25219_v23 = vpop.f32.mrb[61].mxu0 }
 0x61a   :  { %v25220_v41 = vadd.f32 %v25219_v23, %v25218_v17  ;;  %v25254_v42 = vpop.f32.mrb[61].mxu1  ;;  %29801 = vmatpush3.bf16.msra.mxu0 %v34755_v39  ;;  %v38217_v39 = vld [vmem:[#allocation44_spill] sm:$0xff]  ;;  %v38235_v23 = vld [vmem:[#allocation21_spill] sm:$0xff] }
 0x61b   :  { %v25255_v48 = vadd.f32 %v25254_v42, %v25253_v15  ;;  %29833 = vmatpush3.bf16.msra.mxu1 %v34759_v2  ;;  %29803 = vmatprep.subr.bf16.mxu0 %v34761_v31  ;;  %v38218_v2 = vld [vmem:[#allocation46_spill] sm:$0xff] }
 0x61c   :  { %v21265_v0 = vadd.f32 %v25220_v41, %v21123_v56  ;;  %29835 = vmatprep.subr.bf16.mxu1 %v34774_v13  ;;  %v38219_v31 = vld [vmem:[#allocation50_spill] sm:$0xff]  ;;  %v38220_v13 = vld [vmem:[#allocation52_spill] sm:$0xff] }
 0x61d   :  { %v21336_v45 = vadd.f32 %v25255_v48, %v21194_v61  ;;  %v38231_v61 = vld [vmem:[#allocation15_spill] sm:$0xff]  ;;  %v38236_v42 = vld [vmem:[#allocation54_spill] sm:$0xff] }
 0x61e   :  { %29805 = vmatpush3.bf16.msra.mxu0 %v38085_v53  ;;  %v38221_v53 = vld [vmem:[#allocation2_spill] sm:$0xff]  ;;  %v38237_v48 = vld [vmem:[#allocation55_spill] sm:$0xff] }
 0x61f   :  { %29837 = vmatpush3.bf16.msra.mxu1 %v38209_v21  ;;  %29807 = vmatprep.subr.bf16.mxu0 %v38210_v22  ;;  %v38238_v21 = vld [vmem:[#allocation56_spill] sm:$0xff]  ;;  %v38239_v22 = vld [vmem:[#allocation18_spill] sm:$0xff] }
 0x620   :  { %29839 = vmatprep.subr.bf16.mxu1 %v38211_v55 }
 0x622   :  { %29809 = vmatpush3.bf16.msra.mxu0 %v38212_v43 }
 0x623   :  { %29841 = vmatpush3.bf16.msra.mxu1 %v38213_v44  ;;  %29843 = vmatprep.subr.bf16.mxu0 %v38214_v5  ;;  %v38244_v44 = vld [vmem:[#allocation59_spill] sm:$0xff]  ;;  %v38246_v5 = vld [vmem:[#allocation61_spill] sm:$0xff] }
 0x624   :  { %29875 = vmatprep.subr.bf16.mxu1 %v38215_v10  ;;  %v38247_v10 = vld [vmem:[#allocation62_spill] sm:$0xff] }
 0x625   :  { %22252 = vmatmul.mubr.f32.vlgmr.msra.gmra.mrb[74].mxu0 %v36406_v18 }
 0x626   :  { %22322 = vmatmul.mubr.f32.vlgmr.msra.gmra.mrb[74].mxu1 %v36244_v12  ;;  %29845 = vmatpush3.bf16.msra.mxu0 %v38216_v11  ;;  %v38248_v11 = vld [vmem:[#allocation63_spill] sm:$0xff] }
 0x627   :  { %22391 = vmatprep.mubr.f32.mxu0 %v36367_v50  ;;  %29877 = vmatpush3.bf16.msra.mxu1 %v38217_v39  ;;  %v38226_v50 = vld [vmem:[#allocation7_spill] sm:$0xff]  ;;  %v38249_v39 = vld [vmem:[#allocation64_spill] sm:$0xff] }
 0x628   :  { %22461 = vmatprep.mubr.f32.mxu1 %v36206_v47  ;;  %29847 = vmatprep.subr.bf16.mxu0 %v38218_v2  ;;  %v38228_v47 = vld [vmem:[#allocation10_spill] sm:$0xff]  ;;  %v38250_v2 = vld [vmem:[#allocation65_spill] sm:$0xff] }
 0x629   :  { %29879 = vmatprep.subr.bf16.mxu1 %v38219_v31  ;;  %v38251_v31 = vld [vmem:[#allocation66_spill] sm:$0xff] }
 0x62a   :  { %29849 = vmatpush3.bf16.msra.mxu0 %v38220_v13  ;;  %v38252_v13 = vld [vmem:[#allocation67_spill] sm:$0xff] }
 0x62b   :  { %29881 = vmatpush3.bf16.msra.mxu1 %v38221_v53  ;;  %29851 = vmatprep.subr.bf16.mxu0 %v38222_v59  ;;  %v38255_v53 = vld [vmem:[#allocation70_spill] sm:$0xff]  ;;  %v38256_v59 = vld [vmem:[#allocation71_spill] sm:$0xff] }
 0x62c   :  { %29883 = vmatprep.subr.bf16.mxu1 %v38223_v49  ;;  %v38257_v49 = vld [vmem:[#allocation72_spill] sm:$0xff] }
 0x62e   :  { %29853 = vmatpush3.bf16.msra.mxu0 %v38224_v52  ;;  %v38259_v52 = vld [vmem:[#allocation74_spill] sm:$0xff] }
 0x62f   :  { %29885 = vmatpush3.bf16.msra.mxu1 %v38225_v58  ;;  %29855 = vmatprep.subr.bf16.mxu0 %v38226_v50  ;;  %v38260_v58 = vld [vmem:[#allocation75_spill] sm:$0xff]  ;;  %v38261_v50 = vld [vmem:[#allocation76_spill] sm:$0xff] }
 0x630   :  { %29887 = vmatprep.subr.bf16.mxu1 %v38227_v3  ;;  %v38262_v3 = vld [vmem:[#allocation77_spill] sm:$0xff] }
 0x632   :  { %29857 = vmatpush3.bf16.msra.mxu0 %v38105_v1 }
 0x633   :  { %29889 = vmatpush3.bf16.msra.mxu1 %v38228_v47  ;;  %29859 = vmatprep.subr.bf16.mxu0 %v38107_v27  ;;  %v38233_v27 = vld [vmem:[#allocation19_spill] sm:$0xff]  ;;  %v38263_v47 = vld [vmem:[#allocation78_spill] sm:$0xff] }
 0x634   :  { %29891 = vmatprep.subr.bf16.mxu1 %v38229_v57  ;;  %v38264_v57 = vld [vmem:[#allocation23_spill] sm:$0xff] }
 0x636   :  { %29861 = vmatpush3.bf16.msra.mxu0 %v38109_v32  ;;  %v38234_v32 = vld [vmem:[#allocation20_spill] sm:$0xff] }
 0x637   :  { %29893 = vmatpush3.bf16.msra.mxu1 %v38230_v9  ;;  %29863 = vmatprep.subr.bf16.mxu0 %v38231_v61  ;;  %v38265_v61 = vld [vmem:[#allocation79_spill] sm:$0xff] }
 0x638   :  { %v25288_v51 = vpop.f32.mrb[62].mxu0  ;;  %29895 = vmatprep.subr.bf16.mxu1 %v38232_v7 }
 0x639   :  { %v25323_v56 = vpop.f32.mrb[62].mxu1  ;;  %v25289_v37 = vpop.f32.mrb[63].mxu0 }
 0x63a   :  { %v25290_v62 = vadd.f32 %v25289_v37, %v25288_v51  ;;  %v25324_v17 = vpop.f32.mrb[63].mxu1  ;;  %29865 = vmatpush3.bf16.msra.mxu0 %v37988_v54  ;;  %v38240_v54 = vld [vmem:[#allocation28_spill] sm:$0xff] }
 0x63b   :  { %v25325_v1 = vadd.f32 %v25324_v17, %v25323_v56  ;;  %29897 = vmatpush3.bf16.msra.mxu1 %v37989_v60  ;;  %29867 = vmatprep.subr.bf16.mxu0 %v38233_v27  ;;  %v38241_v55 = vmax.f32 %v38239_v22, %v38240_v54  ;;  %v38242_v60 = vld [vmem:[#allocation57_spill] sm:$0xff]  ;;  %v38268_v27 = vld [vmem:[#allocation22_spill] sm:$0xff]  ;;  %v38276_v54 = vld [vmem:[#allocation24_spill] sm:$0xff] }
 0x63c   :  { %v21407_v25 = vadd.f32 %v25290_v62, %v21265_v0  ;;  %29899 = vmatprep.subr.bf16.mxu1 %v38234_v32  ;;  %v38243_v0 = vld [vmem:[#allocation58_spill] sm:$0xff] }
 0x63d   :  { %v21478_v15 = vadd.f32 %v25325_v1, %v21336_v45  ;;  %v38245_v45 = vld [vmem:[#allocation60_spill] sm:$0xff]  ;;  %v38266_v62 = vld [vmem:[#allocation82_spill] sm:$0xff] }
 0x63e   :  { %29869 = vmatpush3.bf16.msra.mxu0 %v38235_v23  ;;  %v38267_v1 = vld [vmem:[#allocation80_spill] sm:$0xff]  ;;  %v38271_v23 = vld [vmem:[#allocation83_spill] sm:$0xff]  ;;  %v38275_v22 = vld [vmem:[#allocation86_spill] sm:$0xff] }
 0x63f   :  { %v21479_v41 = vmax.f32 %v21407_v25, %v21478_v15  ;;  %29901 = vmatpush3.bf16.msra.mxu1 %v38236_v42  ;;  %29871 = vmatprep.subr.bf16.mxu0 %v38237_v48  ;;  %v38269_v25 = vld [vmem:[#allocation81_spill] sm:$0xff] }
 0x640   :  { %29903 = vmatprep.subr.bf16.mxu1 %v38238_v21  ;;  %v38270_v15 = vld [vmem:[#allocation25_spill] sm:$0xff] }
 0x641   :  { %v36525_v43 = vmax.f32 %v38241_v55, %v21479_v41  ;;  %v38272_v41 = vld [vmem:[#allocation84_spill] sm:$0xff]  ;;  %v38273_v42 = vld [vmem:[#allocation85_spill] sm:$0xff]  ;;  %v38277_v55 = vld [vmem:[#allocation87_spill] sm:$0xff] }
 0x642   :  { %29873 = vmatpush3.bf16.msra.mxu0 %v38242_v60  ;;  %v38274_v48 = vld [vmem:[#allocation117_spill] sm:$0xff]  ;;  %v38278_v60 = vld [vmem:[#allocation88_spill] sm:$0xff] }
 0x643   :  { %29905 = vmatpush3.bf16.msra.mxu1 %v38243_v0  ;;  %29907 = vmatprep.subr.bf16.mxu0 %v38244_v44  ;;  %v17978_v21 = vadd.f32 %v38274_v48, %v34510_v35  ;;  %v38279_v44 = vld [vmem:[#allocation49_spill] sm:$0xff]  ;;  %v38308_v48 = vld [vmem:[#allocation119_spill] sm:$0xff] }
 0x644   :  { %29939 = vmatprep.subr.bf16.mxu1 %v38245_v45  ;;  %v38280_v45 = vld [vmem:[#allocation89_spill] sm:$0xff] }
 0x645   :  { %22392 = vmatmul.mubr.f32.vlgmr.msra.gmra.mrb[76].mxu0 %v36406_v18  ;;  %v38253_v18 = vld [vmem:[#allocation68_spill] sm:$0xff]  ;;  %v17980_v0 = vmax.f32 %v17978_v21, 0.0 }
 0x646   :  { %22462 = vmatmul.mubr.f32.vlgmr.msra.gmra.mrb[76].mxu1 %v36244_v12  ;;  %29909 = vmatpush3.bf16.msra.mxu0 %v38246_v5  ;;  %v38254_v12 = vld [vmem:[#allocation69_spill] sm:$0xff]  ;;  %v38281_v5 = vld [vmem:[#allocation90_spill] sm:$0xff] }
 0x647   :  { %22531 = vmatprep.mubr.f32.mxu0 %v36411_v24  ;;  %29941 = vmatpush3.bf16.msra.mxu1 %v38247_v10  ;;  %v38282_v10 = vld [vmem:[#allocation91_spill] sm:$0xff] }
 0x648   :  { %22602 = vmatprep.mubr.f32.mxu1 %v36411_v24  ;;  %29911 = vmatprep.subr.bf16.mxu0 %v38248_v11  ;;  %v38258_v24 = vld [vmem:[#allocation73_spill] sm:$0xff]  ;;  %v38283_v11 = vld [vmem:[#allocation92_spill] sm:$0xff] }
 0x649   :  { %29943 = vmatprep.subr.bf16.mxu1 %v38249_v39  ;;  %v38284_v39 = vld [vmem:[#allocation93_spill] sm:$0xff] }
 0x64a   :  { %29913 = vmatpush3.bf16.msra.mxu0 %v38250_v2  ;;  %v38285_v2 = vld [vmem:[#allocation94_spill] sm:$0xff] }
 0x64b   :  { %29945 = vmatpush3.bf16.msra.mxu1 %v38251_v31  ;;  %29915 = vmatprep.subr.bf16.mxu0 %v38252_v13  ;;  %v38286_v31 = vld [vmem:[#allocation95_spill] sm:$0xff]  ;;  %v38287_v13 = vld [vmem:[#allocation96_spill] sm:$0xff] }
 0x64c   :  { %29947 = vmatprep.subr.bf16.mxu1 %v38253_v18  ;;  %v38289_v18 = vld [vmem:[#allocation98_spill] sm:$0xff] }
 0x64e   :  { %29917 = vmatpush3.bf16.msra.mxu0 %v38254_v12  ;;  %v38290_v12 = vld [vmem:[#allocation99_spill] sm:$0xff] }
 0x64f   :  { %29949 = vmatpush3.bf16.msra.mxu1 %v38255_v53  ;;  %29919 = vmatprep.subr.bf16.mxu0 %v38256_v59  ;;  %v38291_v53 = vld [vmem:[#allocation100_spill] sm:$0xff]  ;;  %v38292_v59 = vld [vmem:[#allocation101_spill] sm:$0xff] }
 0x650   :  { %29951 = vmatprep.subr.bf16.mxu1 %v38257_v49  ;;  %v38293_v49 = vld [vmem:[#allocation102_spill] sm:$0xff] }
 0x652   :  { %29921 = vmatpush3.bf16.msra.mxu0 %v38258_v24  ;;  %v38294_v24 = vld [vmem:[#allocation103_spill] sm:$0xff] }
 0x653   :  { %29953 = vmatpush3.bf16.msra.mxu1 %v38259_v52  ;;  %29923 = vmatprep.subr.bf16.mxu0 %v38260_v58  ;;  %v38295_v52 = vld [vmem:[#allocation104_spill] sm:$0xff]  ;;  %v38296_v58 = vld [vmem:[#allocation105_spill] sm:$0xff] }
 0x654   :  { %29955 = vmatprep.subr.bf16.mxu1 %v38261_v50  ;;  %v38297_v50 = vld [vmem:[#allocation106_spill] sm:$0xff] }
 0x656   :  { %29925 = vmatpush3.bf16.msra.mxu0 %v38262_v3 }
 0x657   :  { %29957 = vmatpush3.bf16.msra.mxu1 %v38263_v47  ;;  %29927 = vmatprep.subr.bf16.mxu0 %v38264_v57  ;;  %v38298_v47 = vld [vmem:[#allocation107_spill] sm:$0xff] }
 0x658   :  { %v25358_v9 = vpop.f32.mrb[64].mxu0  ;;  %29959 = vmatprep.subr.bf16.mxu1 %v38265_v61 }
 0x659   :  { %v25393_v51 = vpop.f32.mrb[64].mxu1  ;;  %v25359_v7 = vpop.f32.mrb[65].mxu0 }
 0x65a   :  { %v25360_v56 = vadd.f32 %v25359_v7, %v25358_v9  ;;  %v25394_v37 = vpop.f32.mrb[65].mxu1  ;;  %29929 = vmatpush3.bf16.msra.mxu0 %v38266_v62 }
 0x65b   :  { %v25395_v17 = vadd.f32 %v25394_v37, %v25393_v51  ;;  %29961 = vmatpush3.bf16.msra.mxu1 %v38267_v1  ;;  %29931 = vmatprep.subr.bf16.mxu0 %v38268_v27  ;;  %v38300_v37 = vld [vmem:[#allocation111_spill] sm:$0xff]  ;;  %v38302_v27 = vld [vmem:[#allocation113_spill] sm:$0xff] }
 0x65c   :  { %29963 = vmatprep.subr.bf16.mxu1 %v38269_v25  ;;  %v38303_v25 = vld [vmem:[#allocation114_spill] sm:$0xff] }
 0x65d   :  { %v36559_v32 = vadd.f32 %v25395_v17, %v25360_v56  ;;  %v38299_v56 = vld [vmem:[#allocation110_spill] sm:$0xff]  ;;  %v38301_v17 = vld [vmem:[#allocation115_spill] sm:$0xff] }
 0x65e   :  { %29933 = vmatpush3.bf16.msra.mxu0 %v38270_v15  ;;  %v17977_v1 = vadd.f32 %v38301_v17, %v34810_v29  ;;  %v38304_v15 = vld [vmem:[#allocation116_spill] sm:$0xff] }
 0x65f   :  { %29965 = vmatpush3.bf16.msra.mxu1 %v38271_v23  ;;  %29935 = vmatprep.subr.bf16.mxu0 %v38272_v41 }
 0x660   :  { %29967 = vmatprep.subr.bf16.mxu1 %v38273_v42  ;;  %v17979_v41 = vmax.f32 %v17977_v1, 0.0  ;;  %v38307_v42 = vld [vmem:[#allocation48_spill] sm:$0xff] }
 0x662   :  { %29937 = vmatpush3.bf16.msra.mxu0 %v38275_v22  ;;  %v38310_v22 = vld [vmem:[#allocation26_spill] sm:$0xff] }
 0x663   :  { %29969 = vmatpush3.bf16.msra.mxu1 %v38276_v54  ;;  %29971 = vmatprep.subr.bf16.mxu0 %v38277_v55  ;;  %v38311_v54 = vld [vmem:[#allocation121_spill] sm:$0xff]  ;;  %v38312_v55 = vld [vmem:[#allocation122_spill] sm:$0xff] }
 0x664   :  { %30003 = vmatprep.subr.bf16.mxu1 %v38278_v60  ;;  %v38314_v60 = vld [vmem:[#allocation124_spill] sm:$0xff] }
 0x665   :  { %22532 = vmatmul.mubr.f32.vlgmr.msra.gmra.mrb[78].mxu0 %v36449_v8 }
 0x666   :  { %22603 = vmatmul.mubr.f32.vlgmr.msra.gmra.mrb[78].mxu1 %v36449_v8  ;;  %29973 = vmatpush3.bf16.msra.mxu0 %v38279_v44  ;;  %v38288_v8 = vld [vmem:[#allocation97_spill] sm:$0xff]  ;;  %v38316_v44 = vld [vmem:[#allocation126_spill] sm:$0xff] }
 0x667   :  { %22673 = vmatprep.mubr.f32.mxu0 %v17980_v0  ;;  %30005 = vmatpush3.bf16.msra.mxu1 %v38280_v45  ;;  %v38317_v45 = vld [vmem:[#allocation127_spill] sm:$0xff] }
 0x668   :  { %22744 = vmatprep.mubr.f32.mxu1 %v17980_v0  ;;  %29975 = vmatprep.subr.bf16.mxu0 %v38281_v5  ;;  %v38315_v0 = vld [vmem:[#allocation125_spill] sm:$0xff]  ;;  %v38318_v5 = vld [vmem:[#allocation128_spill] sm:$0xff] }
 0x669   :  { %30007 = vmatprep.subr.bf16.mxu1 %v38282_v10  ;;  %v38319_v10 = vld [vmem:[#allocation129_spill] sm:$0xff] }
 0x66a   :  { %29977 = vmatpush3.bf16.msra.mxu0 %v38283_v11  ;;  %v38320_v11 = vld [vmem:[#allocation130_spill] sm:$0xff] }
 0x66b   :  { %30009 = vmatpush3.bf16.msra.mxu1 %v38284_v39  ;;  %29979 = vmatprep.subr.bf16.mxu0 %v38285_v2  ;;  %v38321_v39 = vld [vmem:[#allocation131_spill] sm:$0xff]  ;;  %v38322_v2 = vld [vmem:[#allocation133_spill] sm:$0xff] }
 0x66c   :  { %30011 = vmatprep.subr.bf16.mxu1 %v38286_v31  ;;  %v38323_v31 = vld [vmem:[#allocation136_spill] sm:$0xff] }
 0x66e   :  { %29981 = vmatpush3.bf16.msra.mxu0 %v38287_v13  ;;  %v38324_v13 = vld [vmem:[#allocation137_spill] sm:$0xff] }
 0x66f   :  { %30013 = vmatpush3.bf16.msra.mxu1 %v38288_v8  ;;  %29983 = vmatprep.subr.bf16.mxu0 %v38289_v18  ;;  %v38325_v8 = vld [vmem:[#allocation138_spill] sm:$0xff] }
 0x670   :  { %30015 = vmatprep.subr.bf16.mxu1 %v38290_v12  ;;  %v38326_v12 = vld [vmem:[#allocation139_spill] sm:$0xff] }
 0x672   :  { %29985 = vmatpush3.bf16.msra.mxu0 %v38291_v53 }
 0x673   :  { %30017 = vmatpush3.bf16.msra.mxu1 %v38292_v59  ;;  %29987 = vmatprep.subr.bf16.mxu0 %v38293_v49 }
 0x674   :  { %30019 = vmatprep.subr.bf16.mxu1 %v38294_v24 }
 0x676   :  { %29989 = vmatpush3.bf16.msra.mxu0 %v38295_v52  ;;  %v38327_v52 = vld [vmem:[#allocation51_spill] sm:$0xff] }
 0x677   :  { %30021 = vmatpush3.bf16.msra.mxu1 %v38296_v58  ;;  %29991 = vmatprep.subr.bf16.mxu0 %v38297_v50  ;;  %v19733_v58 = vadd.f32 %v38327_v52, %v34810_v29  ;;  %v22913_v50 = vld [vmem:[%s36842_s5 + $0x30] sm:$0xff] }
 0x678   :  { %v25428_v3 = vpop.f32.mrb[66].mxu0  ;;  %30023 = vmatprep.subr.bf16.mxu1 %v38298_v47  ;;  %v36677_v47 = vld [vmem:[%s36843_s4] ss:$0 sm:$0xff] }
 0x679   :  { %v25463_v57 = vpop.f32.mrb[66].mxu1  ;;  %v25429_v9 = vpop.f32.mrb[67].mxu0 }
 0x67a   :  { %v25430_v61 = vadd.f32 %v25429_v9, %v25428_v3  ;;  %v25464_v51 = vpop.f32.mrb[67].mxu1  ;;  %29993 = vmatpush3.bf16.msra.mxu0 %v38174_v30  ;;  %v38305_v30 = vld [vmem:[#allocation17_spill] sm:$0xff]  ;;  %v22902_v9 = vadd.f32 %v36677_v47, %v36525_v43 }
 0x67b   :  { %v25465_v7 = vadd.f32 %v25464_v51, %v25463_v57  ;;  %30025 = vmatpush3.bf16.msra.mxu1 %v38175_v14  ;;  %29995 = vmatprep.subr.bf16.mxu0 %v38299_v56  ;;  %v19734_v23 = vadd.f32 %v38305_v30, %v34510_v35  ;;  %v38306_v14 = vld [vmem:[#allocation118_spill] sm:$0xff]  ;;  %v38313_v35 = vld [vmem:[#allocation123_spill] sm:$0xff]  ;;  %v22914_v3 = vld [vmem:[%s36842_s5 + $0x38] sm:$0xff] }
 0x67c   :  { %30027 = vmatprep.subr.bf16.mxu1 %v38300_v37  ;;  %v30120_v57 = vpack.c.bf16 %v22914_v3, %v22913_v50 }
 0x67d   :  { %v21757_v62 = vadd.f32 %v25465_v7, %v25430_v61  ;;  %v19736_v21 = vmax.f32 %v19734_v23, 0.0  ;;  %v22903_v61 = vmax.f32 %v22902_v9, 0.0 }
 0x67e   :  { %29997 = vmatpush3.bf16.msra.mxu0 %v38178_v4  ;;  %v38309_v4 = vld [vmem:[#allocation120_spill] sm:$0xff] }
 0x67f   :  { %30029 = vmatpush3.bf16.msra.mxu1 %v38302_v27  ;;  %29999 = vmatprep.subr.bf16.mxu0 %v38303_v25 }
 0x680   :  { %30031 = vmatprep.subr.bf16.mxu1 %v38304_v15 }
 0x682   :  { %30001 = vmatpush3.bf16.msra.mxu0 %v38306_v14 }
 0x683   :  { %30033 = vmatpush3.bf16.msra.mxu1 %v38307_v42  ;;  %30035 = vmatprep.subr.bf16.mxu0 %v38308_v48  ;;  %v22915_v48 = vld [vmem:[%s36844_s6] sm:$0xff] }
 0x684   :  { %30067 = vmatprep.subr.bf16.mxu1 %v38309_v4  ;;  %v22916_v4 = vld [vmem:[%s36844_s6 + $0x8] sm:$0xff] }
 0x685   :  { %22674 = vmatmul.mubr.f32.vlgmr.msra.gmra.mrb[80].mxu0 %v17979_v41 }
 0x686   :  { %22745 = vmatmul.mubr.f32.vlgmr.msra.gmra.mrb[80].mxu1 %v17979_v41  ;;  %30037 = vmatpush3.bf16.msra.mxu0 %v38310_v22  ;;  %v30099_v22 = vpack.c.bf16 %v22916_v4, %v22915_v48  ;;  %v23084_v4 = vld [vmem:[%s36845_s8 + $0x28] sm:$0xff] }
 0x687   :  { %22815 = vmatprep.mubr.f32.mxu0 %v19736_v21  ;;  %30069 = vmatpush3.bf16.msra.mxu1 %v38311_v54 }
 0x688   :  { %22886 = vmatprep.mubr.f32.mxu1 %v19736_v21  ;;  %30039 = vmatprep.subr.bf16.mxu0 %v38312_v55 }
 0x689   :  { %30071 = vmatprep.subr.bf16.mxu1 %v38313_v35 }
 0x68a   :  { %30041 = vmatpush3.bf16.msra.mxu0 %v38314_v60 }
 0x68b   :  { %30073 = vmatpush3.bf16.msra.mxu1 %v38315_v0  ;;  %30043 = vmatprep.subr.bf16.mxu0 %v38316_v44  ;;  %v22917_v44 = vld [vmem:[%s36844_s6 + $0x10] sm:$0xff] }
 0x68c   :  { %30075 = vmatprep.subr.bf16.mxu1 %v38317_v45  ;;  %v22918_v45 = vld [vmem:[%s36844_s6 + $0x18] sm:$0xff] }
 0x68e   :  { %30045 = vmatpush3.bf16.msra.mxu0 %v38318_v5 }
 0x68f   :  { %30077 = vmatpush3.bf16.msra.mxu1 %v38319_v10  ;;  %30047 = vmatprep.subr.bf16.mxu0 %v38320_v11  ;;  %v30102_v10 = vpack.c.bf16 %v22918_v45, %v22917_v44  ;;  %v23089_v45 = vld [vmem:[%s36845_s8 + $0x50] sm:$0xff] }
 0x690   :  { %30079 = vmatprep.subr.bf16.mxu1 %v38321_v39  ;;  %v22919_v39 = vld [vmem:[%s36844_s6 + $0x20] sm:$0xff] }
 0x692   :  { %30049 = vmatpush3.bf16.msra.mxu0 %v38076_v6 }
 0x693   :  { %30081 = vmatpush3.bf16.msra.mxu1 %v38322_v2  ;;  %30051 = vmatprep.subr.bf16.mxu0 %v38078_v34  ;;  %v22920_v2 = vld [vmem:[%s36844_s6 + $0x28] sm:$0xff] }
 0x694   :  { %30083 = vmatprep.subr.bf16.mxu1 %v38079_v46 }
 0x696   :  { %30053 = vmatpush3.bf16.msra.mxu0 %v38323_v31  ;;  %v30105_v31 = vpack.c.bf16 %v22920_v2, %v22919_v39  ;;  %v23092_v39 = vld [vmem:[%s36845_s8 + $0x68] sm:$0xff] }
 0x697   :  { %30085 = vmatpush3.bf16.msra.mxu1 %v38324_v13  ;;  %30055 = vmatprep.subr.bf16.mxu0 %v38325_v8  ;;  %v22921_v13 = vld [vmem:[%s36844_s6 + $0x30] sm:$0xff]  ;;  %v22922_v8 = vld [vmem:[%s36844_s6 + $0x38] sm:$0xff] }
 0x698   :  { %v25498_v18 = vpop.f32.mrb[68].mxu0  ;;  %30087 = vmatprep.subr.bf16.mxu1 %v38326_v12 }
 0x699   :  { %v25533_v53 = vpop.f32.mrb[68].mxu1  ;;  %v25499_v59 = vpop.f32.mrb[69].mxu0 }
 0x69a   :  { %v25500_v49 = vadd.f32 %v25499_v59, %v25498_v18  ;;  %v25534_v24 = vpop.f32.mrb[69].mxu1  ;;  %30057 = vmatpush3.bf16.msra.mxu0 %v35971_v63  ;;  %v19735_v63 = vmax.f32 %v19733_v58, 0.0  ;;  %v30108_v18 = vpack.c.bf16 %v22922_v8, %v22921_v13  ;;  %v23094_v13 = vld [vmem:[%s36845_s8 + $0x78] sm:$0xff] }
 0x69b   :  { %v25535_v6 = vadd.f32 %v25534_v24, %v25533_v53  ;;  %30089 = vmatpush3.bf16.msra.mxu1 %v35975_v19  ;;  %30059 = vmatprep.subr.bf16.mxu0 %v35977_v26  ;;  %v22907_v26 = vld [vmem:[%s36842_s5] sm:$0xff]  ;;  %v22908_v19 = vld [vmem:[%s36842_s5 + $0x8] sm:$0xff] }
 0x69c   :  { %v21830_v34 = vadd.f32 %v25500_v49, %v36559_v32  ;;  %30091 = vmatprep.subr.bf16.mxu1 %v35989_v20  ;;  %v30111_v29 = vpack.c.bf16 %v22908_v19, %v22907_v26  ;;  %v30610_v20 = vmov 0.0|0.0  }
 0x69d   :  { %v21901_v46 = vadd.f32 %v25535_v6, %v21757_v62 }
 0x69e   :  { %30061 = vmatpush3.bf16.msra.mxu0 %v36007_v16  ;;  %v38328_v16 = vmov 0.0  }
 0x69f   :  { %30093 = vmatpush3.bf16.msra.mxu1 %v36011_v33  ;;  %30063 = vmatprep.subr.bf16.mxu0 %v36013_v36  ;;  %v22909_v36 = vld [vmem:[%s36842_s5 + $0x10] sm:$0xff]  ;;  %v22910_v33 = vld [vmem:[%s36842_s5 + $0x18] sm:$0xff] }
 0x6a0   :  { %30095 = vmatprep.subr.bf16.mxu1 %v36022_v40  ;;  %v30114_v40 = vpack.c.bf16 %v22910_v33, %v22909_v36 }
 0x6a2   :  { %30065 = vmatpush3.bf16.msra.mxu0 %v36031_v28  ;;  %v22911_v28 = vld [vmem:[%s36842_s5 + $0x20] sm:$0xff] }
 0x6a3   :  { %30097 = vmatpush3.bf16.msra.mxu1 %v36037_v38  ;;  %30098 = vmatprep.subr.bf16.mxu0 %v30610_v20  ;;  %v22912_v38 = vld [vmem:[%s36842_s5 + $0x28] sm:$0xff] }
 0x6a4   :  { %30110 = vmatprep.subr.bf16.mxu1 %v30610_v20  ;;  %v30117_v32 = vpack.c.bf16 %v22912_v38, %v22911_v28 }
 0x6a5   :  { %22816 = vmatmul.mubr.f32.vlgmr.msra.gmra.mrb[82].mxu0 %v19735_v63 }
 0x6a6   :  { %22887 = vmatmul.mubr.f32.vlgmr.msra.gmra.mrb[82].mxu1 %v19735_v63  ;;  %26091 = vmatprep.mubr.msk.f32.mxu0 %vm30611_vm4, %v38328_v16 }
 0x6a7   :  { %30112 = vmatpush3.bf16.msra.mxu1 %v30111_v29  ;;  %26110 = vmatprep.mubr.msk.f32.mxu1 %vm30611_vm4, %v38328_v16 }
 0x6a8   :  { %30113 = vmatprep.subr.bf16.mxu1 %v30610_v20  ;;  %30100 = vmatpush3.bf16.msra.mxu0 %v30099_v22 }
 0x6a9   :  { %30101 = vmatprep.subr.bf16.mxu0 %v30610_v20 }
 0x6ab   :  { %30115 = vmatpush3.bf16.msra.mxu1 %v30114_v40 }
 0x6ac   :  { %30116 = vmatprep.subr.bf16.mxu1 %v30610_v20  ;;  %30103 = vmatpush3.bf16.msra.mxu0 %v30102_v10 }
 0x6ad   :  { %30104 = vmatprep.subr.bf16.mxu0 %v30610_v20 }
 0x6af   :  { %30118 = vmatpush3.bf16.msra.mxu1 %v30117_v32 }
 0x6b0   :  { %30119 = vmatprep.subr.bf16.mxu1 %v30610_v20  ;;  %30106 = vmatpush3.bf16.msra.mxu0 %v30105_v31  ;;  %v23093_v31 = vld [vmem:[%s36845_s8 + $0x70] sm:$0xff] }
 0x6b1   :  { %30107 = vmatprep.subr.bf16.mxu0 %v30610_v20  ;;  %v30144_v8 = vpack.c.bf16 %v23094_v13, %v23093_v31 }
 0x6b3   :  { %30121 = vmatpush3.bf16.msra.mxu1 %v30120_v57 }
 0x6b4   :  { %30146 = vmatprep.subr.bf16.mxu1 %v30610_v20  ;;  %30109 = vmatpush3.bf16.msra.mxu0 %v30108_v18  ;;  %v23173_v18 = vld [vmem:[%s36846_s10] sm:$0xff] }
 0x6b5   :  { %30122 = vmatprep.subr.bf16.mxu0 %v30610_v20 }
 0x6b6   :  { %26111 = vmatmul.mubr.msk.f32.vlgmr.msra.gmra.mrb[84].mxu1 %vm22923_vm5, %v22903_v61 }
 0x6b7   :  { %26164 = vmatprep.mubr.msk.f32.mxu1 %vm30611_vm4, %v38328_v16 }
 0x6b8   :  { %v25568_v51 = vpop.f32.mrb[70].mxu0 }
 0x6b9   :  { %v25603_v7 = vpop.f32.mrb[70].mxu1  ;;  %v25569_v56 = vpop.f32.mrb[71].mxu0 }
 0x6ba   :  { %v25570_v37 = vadd.f32 %v25569_v56, %v25568_v51  ;;  %v25604_v62 = vpop.f32.mrb[71].mxu1 }
 0x6bb   :  { %v25605_v17 = vadd.f32 %v25604_v62, %v25603_v7 }
 0x6bc   :  { %v21972_v1 = vadd.f32 %v25570_v37, %v21830_v34 }
 0x6bd   :  { %v22043_v43 = vadd.f32 %v25605_v17, %v21901_v46 }
 0x6d8   :  { %v25638_v27 = vpop.f32.mrb[72].mxu0 }
 0x6d9   :  { %v25673_v25 = vpop.f32.mrb[72].mxu1  ;;  %v25639_v15 = vpop.f32.mrb[73].mxu0 }
 0x6da   :  { %v25640_v30 = vadd.f32 %v25639_v15, %v25638_v27  ;;  %v25674_v23 = vpop.f32.mrb[73].mxu1  ;;  %v23079_v27 = vld [vmem:[%s36845_s8] sm:$0xff] }
 0x6db   :  { %v25675_v14 = vadd.f32 %v25674_v23, %v25673_v25  ;;  %v23080_v25 = vld [vmem:[%s36845_s8 + $0x8] sm:$0xff] }
 0x6dc   :  { %v36686_v41 = vadd.f32 %v25640_v30, %v21972_v1  ;;  %v30123_v30 = vpack.c.bf16 %v23080_v25, %v23079_v27 }
 0x6dd   :  { %v36688_v42 = vadd.f32 %v25675_v14, %v22043_v43  ;;  %v23081_v14 = vld [vmem:[%s36845_s8 + $0x10] sm:$0xff] }
 0x6df   :  { %v22186_v21 = vmax.f32 %v36686_v41, %v36688_v42  ;;  %v23082_v41 = vld [vmem:[%s36845_s8 + $0x18] sm:$0xff] }
 0x6e0   :  { %v30126_v42 = vpack.c.bf16 %v23082_v41, %v23081_v14 }
 0x6f8   :  { %v25708_v54 = vpop.f32.mrb[74].mxu0 }
 0x6f9   :  { %v25743_v55 = vpop.f32.mrb[74].mxu1  ;;  %v25709_v35 = vpop.f32.mrb[75].mxu0 }
 0x6fa   :  { %v25710_v60 = vadd.f32 %v25709_v35, %v25708_v54  ;;  %v25744_v0 = vpop.f32.mrb[75].mxu1  ;;  %v23085_v54 = vld [vmem:[%s36845_s8 + $0x30] sm:$0xff] }
 0x6fb   :  { %v25745_v5 = vadd.f32 %v25744_v0, %v25743_v55  ;;  %v23086_v55 = vld [vmem:[%s36845_s8 + $0x38] sm:$0xff]  ;;  %v23088_v0 = vld [vmem:[%s36845_s8 + $0x48] sm:$0xff] }
 0x6fc   :  { %v30132_v35 = vpack.c.bf16 %v23086_v55, %v23085_v54 }
 0x6fd   :  { %v22324_v11 = vadd.f32 %v25745_v5, %v25710_v60  ;;  %v23087_v60 = vld [vmem:[%s36845_s8 + $0x40] sm:$0xff]  ;;  %v23090_v5 = vld [vmem:[%s36845_s8 + $0x58] sm:$0xff] }
 0x6fe   :  { %v30135_v44 = vpack.c.bf16 %v23088_v0, %v23087_v60  ;;  %v30138_v10 = vpack.c.bf16 %v23090_v5, %v23089_v45 }
 0x718   :  { %v25778_v12 = vpop.f32.mrb[76].mxu0 }
 0x719   :  { %v25813_v53 = vpop.f32.mrb[76].mxu1  ;;  %v25779_v59 = vpop.f32.mrb[77].mxu0 }
 0x71a   :  { %v25780_v49 = vadd.f32 %v25779_v59, %v25778_v12  ;;  %v25814_v24 = vpop.f32.mrb[77].mxu1  ;;  %v23174_v12 = vld [vmem:[%s36846_s10 + $0x8] sm:$0xff] }
 0x71b   :  { %v25815_v6 = vadd.f32 %v25814_v24, %v25813_v53  ;;  %v23175_v53 = vld [vmem:[%s36846_s10 + $0x10] sm:$0xff]  ;;  %v30147_v59 = vpack.c.bf16 %v23174_v12, %v23173_v18 }
 0x71d   :  { %v22464_v34 = vadd.f32 %v25815_v6, %v25780_v49  ;;  %v23176_v49 = vld [vmem:[%s36846_s10 + $0x18] sm:$0xff]  ;;  %30148 = vmatpush3.bf16.msra.mxu1 %v30147_v59  ;;  %v23177_v6 = vld [vmem:[%s36846_s10 + $0x20] sm:$0xff] }
 0x71e   :  { %v30150_v24 = vpack.c.bf16 %v23176_v49, %v23175_v53  ;;  %30149 = vmatprep.subr.bf16.mxu1 %v30610_v20 }
 0x721   :  { %30151 = vmatpush3.bf16.msra.mxu1 %v30150_v24 }
 0x722   :  { %30152 = vmatprep.subr.bf16.mxu1 %v30610_v20 }
 0x738   :  { %v25848_v46 = vpop.f32.mrb[78].mxu0 }
 0x739   :  { %v25883_v52 = vpop.f32.mrb[78].mxu1  ;;  %v25849_v58 = vpop.f32.mrb[79].mxu0 }
 0x73a   :  { %v25850_v26 = vadd.f32 %v25849_v58, %v25848_v46  ;;  %v25884_v19 = vpop.f32.mrb[79].mxu1  ;;  %v24620_v58 = vld [vmem:[%s36847_s7] ss:$0 sm:$0xff] }
 0x73b   :  { %v25885_v63 = vadd.f32 %v25884_v19, %v25883_v52 }
 0x73c   :  { %v22537_v29 = vadd.f32 %v25850_v26, %v22324_v11  ;;  %v23091_v11 = vld [vmem:[%s36845_s8 + $0x60] sm:$0xff] }
 0x73d   :  { %v22608_v36 = vadd.f32 %v25885_v63, %v22464_v34  ;;  %v30141_v2 = vpack.c.bf16 %v23092_v39, %v23091_v11  ;;  %v23178_v34 = vld [vmem:[%s36846_s10 + $0x28] sm:$0xff] }
 0x73e   :  { %v30153_v46 = vpack.c.bf16 %v23178_v34, %v23177_v6 }
 0x740   :  { %30154 = vmatpush3.bf16.msra.mxu1 %v30153_v46 }
 0x741   :  { %30155 = vmatprep.subr.bf16.mxu1 %v30610_v20 }
 0x758   :  { %v25918_v33 = vpop.f32.mrb[80].mxu0 }
 0x759   :  { %v25953_v40 = vpop.f32.mrb[80].mxu1  ;;  %v25919_v28 = vpop.f32.mrb[81].mxu0 }
 0x75a   :  { %v25920_v38 = vadd.f32 %v25919_v28, %v25918_v33  ;;  %v25954_v32 = vpop.f32.mrb[81].mxu1  ;;  %v23180_v33 = vld [vmem:[%s36846_s10 + $0x38] sm:$0xff]  ;;  %v24621_v28 = vld [vmem:[%s36848_s9] ss:$0 sm:$0xff] }
 0x75b   :  { %v25955_v50 = vadd.f32 %v25954_v32, %v25953_v40  ;;  %v23263_v32 = vld [vmem:[%s36849_s12 + $0x8] sm:$0xff] }
 0x75c   :  { %v22679_v3 = vadd.f32 %v25920_v38, %v22537_v29  ;;  %v23262_v38 = vld [vmem:[%s36849_s12] sm:$0xff] }
 0x75d   :  { %v22750_v57 = vadd.f32 %v25955_v50, %v22608_v36  ;;  %v23179_v36 = vld [vmem:[%s36846_s10 + $0x30] sm:$0xff] }
 0x75e   :  { %v30156_v40 = vpack.c.bf16 %v23180_v33, %v23179_v36 }
 0x760   :  { %30157 = vmatpush3.bf16.msra.mxu1 %v30156_v40 }
 0x761   :  { %30158 = vmatprep.subr.bf16.mxu1 %v30610_v20 }
 0x778   :  { %v25988_v9 = vpop.f32.mrb[82].mxu0 }
 0x779   :  { %v26023_v61 = vpop.f32.mrb[82].mxu1  ;;  %v25989_v51 = vpop.f32.mrb[83].mxu0 }
 0x77a   :  { %v25990_v7 = vadd.f32 %v25989_v51, %v25988_v9  ;;  %v26024_v56 = vpop.f32.mrb[83].mxu1  ;;  %v30159_v9 = vpack.c.bf16 %v23263_v32, %v23262_v38  ;;  %v23264_v51 = vld [vmem:[%s36849_s12 + $0x10] sm:$0xff] }
 0x77b   :  { %v26025_v37 = vadd.f32 %v26024_v56, %v26023_v61 }
 0x77c   :  { %v22821_v62 = vadd.f32 %v25990_v7, %v22679_v3  ;;  %v23265_v7 = vld [vmem:[%s36849_s12 + $0x18] sm:$0xff] }
 0x77d   :  { %v22892_v17 = vadd.f32 %v26025_v37, %v22750_v57  ;;  %v30162_v56 = vpack.c.bf16 %v23265_v7, %v23264_v51  ;;  %v24622_v37 = vld [vmem:[%s36850_s11] ss:$0 sm:$0xff] }
 0x77f   :  { %v22893_v1 = vmax.f32 %v22821_v62, %v22892_v17 }
 0x781   :  { %v22904_v43 = vmax.f32 %v22186_v21, %v22893_v1 }
 0x783   :  { %v22905_v15 = vadd.f32 %v36677_v47, %v22904_v43  ;;  %v23083_v47 = vld [vmem:[%s36845_s8 + $0x20] sm:$0xff] }
 0x784   :  { %v30129_v22 = vpack.c.bf16 %v23084_v4, %v23083_v47 }
 0x785   :  { %v22906_v23 = vmax.f32 %v22905_v15, 0.0 }
 0x787   :  { %26092 = vmatmul.mubr.msk.f32.vlgmr.msra.gmra.mrb[84].mxu0 %vm22923_vm5, %v22906_v23 }
 0x788   :  { %30124 = vmatpush3.bf16.msra.mxu0 %v30123_v30  ;;  %26145 = vmatprep.mubr.msk.f32.mxu0 %vm30611_vm4, %v38328_v16 }
 0x789   :  { %v23066_v48 = vpop.f32.mrb[84].mxu1  ;;  %30125 = vmatprep.subr.bf16.mxu0 %v30610_v20 }
 0x78a   :  { %v26112_v21 = vpop.f32.mrb[85].mxu1 }
 0x78c   :  { %30127 = vmatpush3.bf16.msra.mxu0 %v30126_v42 }
 0x78d   :  { %30128 = vmatprep.subr.bf16.mxu0 %v30610_v20 }
 0x790   :  { %30130 = vmatpush3.bf16.msra.mxu0 %v30129_v22 }
 0x791   :  { %30131 = vmatprep.subr.bf16.mxu0 %v30610_v20 }
 0x794   :  { %30133 = vmatpush3.bf16.msra.mxu0 %v30132_v35 }
 0x795   :  { %30134 = vmatprep.subr.bf16.mxu0 %v30610_v20 }
 0x798   :  { %30136 = vmatpush3.bf16.msra.mxu0 %v30135_v44 }
 0x799   :  { %30137 = vmatprep.subr.bf16.mxu0 %v30610_v20 }
 0x79c   :  { %30139 = vmatpush3.bf16.msra.mxu0 %v30138_v10 }
 0x79d   :  { %30140 = vmatprep.subr.bf16.mxu0 %v30610_v20 }
 0x7a0   :  { %30142 = vmatpush3.bf16.msra.mxu0 %v30141_v2 }
 0x7a1   :  { %30143 = vmatprep.subr.bf16.mxu0 %v30610_v20 }
 0x7a4   :  { %30145 = vmatpush3.bf16.msra.mxu0 %v30144_v8 }
 0x85a   :  { %v22993_v52 = vpop.f32.mrb[84].mxu0 }
 0x85b   :  { %v23067_v26 = vadd.f32 %v23066_v48, %v22993_v52  ;;  %v26093_v19 = vpop.f32.mrb[85].mxu0 }
 0x85d   :  { %v23077_v63 = vadd.f32 %v24620_v58, %v23067_v26 }
 0x85f   :  { %v23078_v29 = vmax.f32 %v23077_v63, 0.0 }
 0x861   :  { %26146 = vmatmul.mubr.f32.vlgmr.msra.gmra.mrb[86].mxu0 %v23078_v29 }
 0x934   :  { %v23168_v50 = vpop.f32.mrb[86].mxu0 }
 0x935   :  { %v23169_v3 = vadd.f32 %v24621_v28, %v23168_v50  ;;  %v26147_v57 = vpop.f32.mrb[87].mxu0 }
 0x937   :  { %v23172_v61 = vmax.f32 %v23169_v3, 0.0 }
 0x939   :  { %26165 = vmatmul.mubr.msk.f32.vlgmr.msra.gmra.mrb[86].mxu1 %vm22923_vm5, %v23172_v61 }
 0x93a   :  { %30160 = vmatpush3.bf16.msra.mxu1 %v30159_v9  ;;  %26175 = vmatprep.mubr.msk.f32.mxu1 %vm30611_vm4, %v38328_v16 }
 0x93b   :  { %30161 = vmatprep.subr.bf16.mxu1 %v30610_v20  ;;  %v24624_v20 = vld [vmem:[%s36851_s13] ss:$0 sm:$0xff] }
 0x93e   :  { %30163 = vmatpush3.bf16.msra.mxu1 %v30162_v56 }
 0xa0c   :  { %v23257_v62 = vpop.f32.mrb[86].mxu1 }
 0xa0d   :  { %v23258_v17 = vadd.f32 %v24622_v37, %v23257_v62  ;;  %v26166_v1 = vpop.f32.mrb[87].mxu1 }
 0xa0f   :  { %v23261_v16 = vmax.f32 %v23258_v17, 0.0 }
 0xa11   :  { %26176 = vmatmul.mubr.msk.f32.vlgmr.msra.gmra.mrb[88].mxu1 %vm23273_vm6, %v23261_v16 }
 0xae4   :  { %v23343_v43 = vpop.f32.mrb[88].mxu1 }
 0xae5   :  { %v23344_v27 = vadd.f32 %v24624_v20, %v23343_v43  ;;  %v26177_v25 = vpop.f32.mrb[89].mxu1 }
 0xae7   :  { %23347 = vst [vmem:[%s36852_s14] sm:$0xff] %v23344_v27 }

</bundles_post_ra>
